<compile_context>
chip_gen: v7x
topology: tpu7x:2x2x1
jax: 0.10.0
libtpu: 0.0.40
codegen_flags: <defaults>
</compile_context>

<pallas_src>
import functools
import math

import jax
import jax.numpy as jnp
from jax import lax
from jax.experimental import pallas as pl
from jax.experimental.pallas import tpu as pltpu


# ----------------------------- kernel helpers -----------------------------

def _layer_norm(x, w, b, eps=1e-5):
    mu = jnp.mean(x, axis=-1, keepdims=True)
    xc = x - mu
    var = jnp.mean(xc * xc, axis=-1, keepdims=True)
    return xc * lax.rsqrt(var + eps) * w + b


# --------------------------- fused decoder stack ---------------------------

PARAM_NAMES = (
    "w_sa_qkv", "b_sa_qkv", "w_sa_o", "b_sa_o",
    "w_ca_q", "b_ca_q", "w_ca_kv", "b_ca_kv", "w_ca_o", "b_ca_o",
    "w_ff1", "b_ff1", "w_ff2", "b_ff2",
    "ln1_w", "ln1_b", "ln2_w", "ln2_b", "ln3_w", "ln3_b",
)


def decoder_stack_kernel(
        x_ref, mem_ref,
        w_sa_qkv, b_sa_qkv, w_sa_o, b_sa_o,
        w_ca_q, b_ca_q, w_ca_kv, b_ca_kv, w_ca_o, b_ca_o,
        w_ff1, b_ff1, w_ff2, b_ff2,
        ln1_w, ln1_b, ln2_w, ln2_b, ln3_w, ln3_b,
        o_ref, ctx_ref, *, num_heads):
    layer = pl.program_id(1)

    # At layer 0, load the embedded captions into the resident activation.
    @pl.when(layer == 0)
    def _():
        o_ref[...] = x_ref[...]

    sb, t, e = o_ref.shape             # (S_block, attn_seq = B, d_model)
    m1 = mem_ref.shape[0] // sb        # memory sequence length per attn-batch
    dh = e // num_heads
    rows = sb * t

    x2 = o_ref[...].reshape(rows, e)   # (rows, E) f32, VMEM-resident

    def attend(q3, k3, v3, wo, bo):
        # q3: (sb, n_q, E) bf16 (1/sqrt(dh) already folded into the Q weights)
        # k3/v3: (sb, n_kv, E) bf16.  Each head's context is written to the
        # f32 VMEM scratch at its static lane offset (no concatenate), then a
        # single (rows, E) x (E, E) output projection is applied.
        n_q = q3.shape[1]
        for h in range(num_heads):     # static, tiny per-head core
            hs = slice(h * dh, (h + 1) * dh)
            s = jnp.einsum('sqd,skd->sqk', q3[..., hs], k3[..., hs],
                           preferred_element_type=jnp.float32)
            s = s - jnp.max(s, axis=-1, keepdims=True)
            p = jnp.exp(s)
            p = p * pl.reciprocal(jnp.sum(p, axis=-1, keepdims=True),
                                  approx=True)
            ctx = jnp.einsum('sqk,skd->sqd', p.astype(jnp.bfloat16),
                             v3[..., hs], preferred_element_type=jnp.float32)
            ctx_ref[:, hs] = ctx.reshape(sb * n_q, dh)
        return jnp.dot(ctx_ref[...].astype(jnp.bfloat16), wo,
                       preferred_element_type=jnp.float32) + bo

    # ---------------- self-attention + add & norm ----------------
    qkv = jnp.dot(x2.astype(jnp.bfloat16), w_sa_qkv[0],
                  preferred_element_type=jnp.float32) + b_sa_qkv[0]
    q3 = qkv[:, :e].reshape(sb, t, e).astype(jnp.bfloat16)
    k3 = qkv[:, e:2 * e].reshape(sb, t, e).astype(jnp.bfloat16)
    v3 = qkv[:, 2 * e:].reshape(sb, t, e).astype(jnp.bfloat16)
    sa = attend(q3, k3, v3, w_sa_o[0], b_sa_o[0])
    x2 = _layer_norm(x2 + sa, ln1_w[0], ln1_b[0])

    # ---------------- cross-attention + add & norm ----------------
    # mem_ref is already bf16 and already flattened to (sb*m1, E): no per-layer
    # cast / reshape of the memory block (it is resident across the layer axis).
    kv = jnp.dot(mem_ref[...], w_ca_kv[0],
                 preferred_element_type=jnp.float32) + b_ca_kv[0]
    qc = jnp.dot(x2.astype(jnp.bfloat16), w_ca_q[0],
                 preferred_element_type=jnp.float32) + b_ca_q[0]
    q3c = qc.reshape(sb, t, e).astype(jnp.bfloat16)
    k3c = kv[:, :e].reshape(sb, m1, e).astype(jnp.bfloat16)
    v3c = kv[:, e:].reshape(sb, m1, e).astype(jnp.bfloat16)
    ca = attend(q3c, k3c, v3c, w_ca_o[0], b_ca_o[0])
    x2 = _layer_norm(x2 + ca, ln2_w[0], ln2_b[0])

    # ---------------- feed-forward (relu) + add & norm ----------------
    h1 = jnp.dot(x2.astype(jnp.bfloat16), w_ff1[0],
                 preferred_element_type=jnp.float32) + b_ff1[0]
    h1 = jnp.maximum(h1, 0.0)
    ff = jnp.dot(h1.astype(jnp.bfloat16), w_ff2[0],
                 preferred_element_type=jnp.float32) + b_ff2[0]
    x2 = _layer_norm(x2 + ff, ln3_w[0], ln3_b[0])

    o_ref[...] = x2.reshape(sb, t, e)


def decoder_stack(x0, memory, stack_params, num_heads, s_block=None):
    """x0: (S, B, E) f32 embedded captions; memory: (M0, M1, E) bf16, M0 >= S."""
    s, b, e = x0.shape
    m0, m1, _ = memory.shape
    num_layers = stack_params["w_sa_qkv"].shape[0]
    assert e % num_heads == 0

    # Default: no S split.  Single-TC chips (v5e/v6e) gain nothing from a
    # split — it halves the matmul M dim and re-streams every layer's weights
    # per S-block.  On v7x (2 TCs) benchmark s_block = s // 2 explicitly; for
    # production shapes pick s_block so s_block * B >= 128 (v5e) / 256 (v6e/v7x).
    if s_block is None:
        s_block = s
    assert s % s_block == 0
    num_sb = s // s_block

    mem2 = memory.reshape(m0 * m1, e)          # row s*m1 + m == memory[s, m, :]

    weights = [stack_params[n] for n in PARAM_NAMES]
    weight_specs = [pl.BlockSpec((1,) + w.shape[1:], lambda sbi, l: (l, 0, 0))
                    for w in weights]

    return pl.pallas_call(
        functools.partial(decoder_stack_kernel, num_heads=num_heads),
        grid=(num_sb, num_layers),
        in_specs=[pl.BlockSpec((s_block, b, e), lambda sbi, l: (sbi, 0, 0)),
                  pl.BlockSpec((s_block * m1, e), lambda sbi, l: (sbi, 0))]
                 + weight_specs,
        out_specs=pl.BlockSpec((s_block, b, e), lambda sbi, l: (sbi, 0, 0)),
        out_shape=jax.ShapeDtypeStruct((s, b, e), jnp.float32),
        scratch_shapes=[pltpu.VMEM((s_block * b, e), jnp.float32)],
        compiler_params=pltpu.CompilerParams(
            dimension_semantics=("parallel", "arbitrary"),
            # Explicit scoped-VMEM budget; kept under v7x's 64 MiB physical
            # VMEM.  Re-derive (and split w_ff1/w_ff2 along F) if d_model /
            # mlp_dim scale up.
            vmem_limit_bytes=48 * 1024 * 1024),
    )(x0, mem2, *weights)


# --------------------------- output projection -----------------------------

def out_proj_kernel(x_ref, w_ref, b_ref, o_ref):
    xb = x_ref[...].astype(jnp.bfloat16)
    o_ref[...] = (jnp.dot(xb, w_ref[...],
                          preferred_element_type=jnp.float32) + b_ref[...])


def output_projection(x2, w, b, tile_v=2048):
    rows, e = x2.shape
    v = w.shape[1]
    tile_v = min(tile_v, v)
    assert v % tile_v == 0
    # TODO(synk): for realistic vocab sizes store w as int8 (v6e) / fp8 (v7x)
    # with per-column scales to halve the weight-streaming HBM traffic.
    return pl.pallas_call(
        out_proj_kernel,
        grid=(v // tile_v,),
        in_specs=[pl.BlockSpec((rows, e), lambda j: (0, 0)),
                  pl.BlockSpec((e, tile_v), lambda j: (0, j)),
                  pl.BlockSpec((1, tile_v), lambda j: (0, j))],
        out_specs=pl.BlockSpec((rows, tile_v), lambda j: (0, j)),
        out_shape=jax.ShapeDtypeStruct((rows, v), jnp.float32),
        compiler_params=pltpu.CompilerParams(dimension_semantics=("parallel",)),
    )(x2, w, b)


# ------------------------------ glue (JAX) ---------------------------------

def positional_encoding(seq_len, d_model):
    assert d_model % 2 == 0
    pos = jnp.arange(seq_len, dtype=jnp.float32)[:, None]
    div = jnp.exp(jnp.arange(0, d_model, 2, dtype=jnp.float32)
                  * (-math.log(10000.0) / d_model))
    enc = jnp.zeros((seq_len, d_model), jnp.float32)
    enc = enc.at[:, 0::2].set(jnp.sin(pos * div))
    enc = enc.at[:, 1::2].set(jnp.cos(pos * div))
    return enc                                              # (S, E)


def transformer_caption_decoder(captions, memory, params, num_heads):
    b, s = captions.shape
    e = params["embedding"].shape[1]
    m0 = memory.shape[0]
    assert s <= m0

    # Embedding gather directly in attention-batch-first (S, B, E) layout
    # (no HBM transpose of activations) + positional encoding per caption
    # position (PE[s] added to every batch element, matching the reference).
    x0 = params["embedding"][captions.T] + positional_encoding(s, e)[:, None, :]

    # Fused decoder stack; memory is used in its ORIGINAL (M0, M1, E) layout
    # (memory.transpose(0,1)[:, :S, :][:, s, :] == memory[s, :, :]) and cast
    # to bf16 ONCE here (halves its DMA, no per-layer cast in the kernel).
    y = decoder_stack(x0, memory.astype(jnp.bfloat16), params["stack"],
                      num_heads)                                    # (S, B, E)

    # Small final re-layout of the activations (much smaller than the logits),
    # then the vocab projection.
    x_bse = jnp.transpose(y, (1, 0, 2)).reshape(b * s, e)
    logits2 = output_projection(x_bse, params["out_w"], params["out_b"])
    return logits2.reshape(b, s, -1)                                # (B, S, V)


def init_params(key, d_model, num_layers, num_heads, mlp_dim, vocab_size):
    keys = iter(jax.random.split(key, 64))
    wdt = jnp.bfloat16                      # MXU-native weight storage

    def nrm(shape, scale=0.05):
        return jax.random.normal(next(keys), shape, jnp.float32) * scale

    e, f, L = d_model, mlp_dim, num_layers
    qscale = 1.0 / math.sqrt(d_model // num_heads)

    # Fold the 1/sqrt(d_head) attention scale into the Q projection weights
    # AND bias (equivalent reparameterization) so the kernel never scales q.
    w_sa_qkv = nrm((L, e, 3 * e)).at[:, :, :e].multiply(qscale)
    b_sa_qkv = nrm((L, 1, 3 * e), 0.01).at[:, :, :e].multiply(qscale)
    w_ca_q = nrm((L, e, e)) * qscale
    b_ca_q = nrm((L, 1, e), 0.01) * qscale

    stack = {
        "w_sa_qkv": w_sa_qkv.astype(wdt),
        "b_sa_qkv": b_sa_qkv,
        "w_sa_o":   nrm((L, e, e)).astype(wdt),
        "b_sa_o":   nrm((L, 1, e), 0.01),
        "w_ca_q":   w_ca_q.astype(wdt),
        "b_ca_q":   b_ca_q,
        "w_ca_kv":  nrm((L, e, 2 * e)).astype(wdt),
        "b_ca_kv":  nrm((L, 1, 2 * e), 0.01),
        "w_ca_o":   nrm((L, e, e)).astype(wdt),
        "b_ca_o":   nrm((L, 1, e), 0.01),
        "w_ff1":    nrm((L, e, f)).astype(wdt),
        "b_ff1":    nrm((L, 1, f), 0.01),
        "w_ff2":    nrm((L, f, e)).astype(wdt),
        "b_ff2":    nrm((L, 1, e), 0.01),
        "ln1_w": jnp.ones((L, 1, e), jnp.float32),
        "ln1_b": jnp.zeros((L, 1, e), jnp.float32),
        "ln2_w": jnp.ones((L, 1, e), jnp.float32),
        "ln2_b": jnp.zeros((L, 1, e), jnp.float32),
        "ln3_w": jnp.ones((L, 1, e), jnp.float32),
        "ln3_b": jnp.zeros((L, 1, e), jnp.float32),
    }
    # TODO(synk): pretrained DistilBERT input embeddings are replaced by a
    # deterministic synthetic embedding table (no checkpoint loading here).
    params = {"embedding": nrm((vocab_size, d_model), 0.02), "stack": stack}

    limit = math.sqrt(6.0 / (d_model + vocab_size))        # xavier_uniform_
    params["out_w"] = jax.random.uniform(next(keys), (d_model, vocab_size),
                                         jnp.float32, -limit, limit).astype(wdt)
    params["out_b"] = jnp.zeros((1, vocab_size), jnp.float32)
    return params


if __name__ == "__main__":
    B, S = 8, 8                 # caption batch (= attn sequence), caption length
    M0, M1 = 16, 8              # memory dims (M0 >= S so the slice is valid)
    D_MODEL, HEADS, MLP = 128, 4, 256
    LAYERS, VOCAB = 2, 512

    key = jax.random.PRNGKey(0)
    k_cap, k_mem, k_par = jax.random.split(key, 3)
    captions = jax.random.randint(k_cap, (B, S), 0, VOCAB, dtype=jnp.int32)
    memory = jax.random.normal(k_mem, (M0, M1, D_MODEL), jnp.float32)
    params = init_params(k_par, D_MODEL, LAYERS, HEADS, MLP, VOCAB)

    fwd = jax.jit(lambda c, m: transformer_caption_decoder(c, m, params, HEADS))
    logits = fwd(captions, memory)
    jax.block_until_ready(logits)

    assert logits.shape == (B, S, VOCAB), logits.shape
    assert bool(jnp.all(jnp.isfinite(logits)))
    print("KERNEL_OK")
</pallas_src>

<mosaic_0001>
module attributes {stable_mosaic.version = 11 : i64} {
  func.func @out_proj_kernel(%arg0: i32, %arg1: memref<64x128xf32, #tpu.memory_space<vmem>>, %arg2: memref<128x512xbf16, #tpu.memory_space<vmem>>, %arg3: memref<1x512xf32, #tpu.memory_space<vmem>>, %arg4: memref<64x512xf32, #tpu.memory_space<vmem>>) attributes {dimension_semantics = [#tpu.dimension_semantics<parallel>], iteration_bounds = array<i64: 1>, scalar_prefetch = 0 : i64, scratch_operands = 0 : i64, tpu.core_type = #tpu.core_type<tc>, window_params = [{pipeline_mode = #tpu.pipeline_mode<synchronous>, transform_indices = @transform_0, window_bounds = array<i64: 64, 128>}, {transform_indices = @transform_1, window_bounds = array<i64: 128, 512>}, {transform_indices = @transform_2, window_bounds = array<i64: 1, 512>}, {transform_indices = @transform_3, window_bounds = array<i64: 64, 512>}]} {
    %c0 = arith.constant 0 : index
    %c0_0 = arith.constant 0 : index
    %0 = vector.load %arg1[%c0, %c0_0] : memref<64x128xf32, #tpu.memory_space<vmem>>, vector<64x128xf32>
    %1 = arith.truncf %0 : vector<64x128xf32> to vector<64x128xbf16>
    %c0_1 = arith.constant 0 : index
    %c0_2 = arith.constant 0 : index
    %2 = vector.load %arg2[%c0_1, %c0_2] : memref<128x512xbf16, #tpu.memory_space<vmem>>, vector<128x512xbf16>
    %cst = arith.constant dense<0.000000e+00> : vector<64x512xf32>
    %3 = tpu.matmul %1, %2, %cst {dimension_numbers = #tpu.dot_dimension_numbers<[1], [0], [0], [1], [0, 0, 1, 1], [], []>} : vector<64x128xbf16>, vector<128x512xbf16>, vector<64x512xf32> -> vector<64x512xf32>
    %c0_3 = arith.constant 0 : index
    %c0_4 = arith.constant 0 : index
    %4 = vector.load %arg3[%c0_3, %c0_4] : memref<1x512xf32, #tpu.memory_space<vmem>>, vector<1x512xf32>
    %5 = vector.broadcast %4 : vector<1x512xf32> to vector<64x512xf32>
    %6 = arith.addf %3, %5 : vector<64x512xf32>
    %c0_5 = arith.constant 0 : index
    %c0_6 = arith.constant 0 : index
    %7 = vector.load %arg4[%c0_5, %c0_6] : memref<64x512xf32, #tpu.memory_space<vmem>>, vector<64x512xf32>
    tpu.vector_store %arg4[%c0_5, %c0_6], %6 {strides = array<i32>} : memref<64x512xf32, #tpu.memory_space<vmem>>, vector<64x512xf32>,
    return
  }
  func.func @transform_0(%arg0: i32) -> (i32, i32) {
    %c0_i32 = arith.constant 0 : i32
    %c0_i32_0 = arith.constant 0 : i32
    %c0_i32_1 = arith.constant 0 : i32
    return %c0_i32, %c0_i32_0 : i32, i32
  }
  func.func @transform_1(%arg0: i32) -> (i32, i32) {
    %c0_i32 = arith.constant 0 : i32
    %c0_i32_0 = arith.constant 0 : i32
    return %c0_i32, %arg0 : i32, i32
  }
  func.func @transform_2(%arg0: i32) -> (i32, i32) {
    %c0_i32 = arith.constant 0 : i32
    %c0_i32_0 = arith.constant 0 : i32
    return %c0_i32, %arg0 : i32, i32
  }
  func.func @transform_3(%arg0: i32) -> (i32, i32) {
    %c0_i32 = arith.constant 0 : i32
    %c0_i32_0 = arith.constant 0 : i32
    return %c0_i32, %arg0 : i32, i32
  }
}

module attributes {stable_mosaic.version = 11 : i64} {
  func.func @decoder_stack_kernel(%arg0: i32, %arg1: i32, %arg2: memref<8x8x128xf32, #tpu.memory_space<vmem>>, %arg3: memref<64x128xbf16, #tpu.memory_space<vmem>>, %arg4: memref<1x128x384xbf16, #tpu.memory_space<vmem>>, %arg5: memref<1x1x384xf32, #tpu.memory_space<vmem>>, %arg6: memref<1x128x128xbf16, #tpu.memory_space<vmem>>, %arg7: memref<1x1x128xf32, #tpu.memory_space<vmem>>, %arg8: memref<1x128x128xbf16, #tpu.memory_space<vmem>>, %arg9: memref<1x1x128xf32, #tpu.memory_space<vmem>>, %arg10: memref<1x128x256xbf16, #tpu.memory_space<vmem>>, %arg11: memref<1x1x256xf32, #tpu.memory_space<vmem>>, %arg12: memref<1x128x128xbf16, #tpu.memory_space<vmem>>, %arg13: memref<1x1x128xf32, #tpu.memory_space<vmem>>, %arg14: memref<1x128x256xbf16, #tpu.memory_space<vmem>>, %arg15: memref<1x1x256xf32, #tpu.memory_space<vmem>>, %arg16: memref<1x256x128xbf16, #tpu.memory_space<vmem>>, %arg17: memref<1x1x128xf32, #tpu.memory_space<vmem>>, %arg18: memref<1x1x128xf32, #tpu.memory_space<vmem>>, %arg19: memref<1x1x128xf32, #tpu.memory_space<vmem>>, %arg20: memref<1x1x128xf32, #tpu.memory_space<vmem>>, %arg21: memref<1x1x128xf32, #tpu.memory_space<vmem>>, %arg22: memref<1x1x128xf32, #tpu.memory_space<vmem>>, %arg23: memref<1x1x128xf32, #tpu.memory_space<vmem>>, %arg24: memref<8x8x128xf32, #tpu.memory_space<vmem>>, %arg25: memref<64x128xf32, #tpu.memory_space<vmem>>) attributes {dimension_semantics = [#tpu.dimension_semantics<parallel>, #tpu.dimension_semantics<arbitrary>], iteration_bounds = array<i64: 1, 2>, scalar_prefetch = 0 : i64, scratch_operands = 1 : i64, tpu.core_type = #tpu.core_type<tc>, window_params = [{transform_indices = @transform_0, window_bounds = array<i64: 8, 8, 128>}, {transform_indices = @transform_1, window_bounds = array<i64: 64, 128>}, {transform_indices = @transform_2, window_bounds = array<i64: 1, 128, 384>}, {transform_indices = @transform_3, window_bounds = array<i64: 1, 1, 384>}, {transform_indices = @transform_4, window_bounds = array<i64: 1, 128, 128>}, {transform_indices = @transform_5, window_bounds = array<i64: 1, 1, 128>}, {transform_indices = @transform_6, window_bounds = array<i64: 1, 128, 128>}, {transform_indices = @transform_7, window_bounds = array<i64: 1, 1, 128>}, {transform_indices = @transform_8, window_bounds = array<i64: 1, 128, 256>}, {transform_indices = @transform_9, window_bounds = array<i64: 1, 1, 256>}, {transform_indices = @transform_10, window_bounds = array<i64: 1, 128, 128>}, {transform_indices = @transform_11, window_bounds = array<i64: 1, 1, 128>}, {transform_indices = @transform_12, window_bounds = array<i64: 1, 128, 256>}, {transform_indices = @transform_13, window_bounds = array<i64: 1, 1, 256>}, {transform_indices = @transform_14, window_bounds = array<i64: 1, 256, 128>}, {transform_indices = @transform_15, window_bounds = array<i64: 1, 1, 128>}, {transform_indices = @transform_16, window_bounds = array<i64: 1, 1, 128>}, {transform_indices = @transform_17, window_bounds = array<i64: 1, 1, 128>}, {transform_indices = @transform_18, window_bounds = array<i64: 1, 1, 128>}, {transform_indices = @transform_19, window_bounds = array<i64: 1, 1, 128>}, {transform_indices = @transform_20, window_bounds = array<i64: 1, 1, 128>}, {transform_indices = @transform_21, window_bounds = array<i64: 1, 1, 128>}, {transform_indices = @transform_22, window_bounds = array<i64: 8, 8, 128>}]} {
    %c0_i32 = arith.constant 0 : i32
    %0 = arith.cmpi eq, %arg1, %c0_i32 : i32
    %1 = arith.extui %0 : i1 to i32
    %c0_i32_0 = arith.constant 0 : i32
    %2 = arith.cmpi ne, %1, %c0_i32_0 : i32
    scf.if %2 {
      %c0_139 = arith.constant 0 : index
      %c0_140 = arith.constant 0 : index
      %c0_141 = arith.constant 0 : index
      %303 = vector.load %arg2[%c0_139, %c0_140, %c0_141] : memref<8x8x128xf32, #tpu.memory_space<vmem>>, vector<8x8x128xf32>
      %c0_142 = arith.constant 0 : index
      %c0_143 = arith.constant 0 : index
      %c0_144 = arith.constant 0 : index
      %304 = vector.load %arg24[%c0_142, %c0_143, %c0_144] : memref<8x8x128xf32, #tpu.memory_space<vmem>>, vector<8x8x128xf32>
      tpu.vector_store %arg24[%c0_142, %c0_143, %c0_144], %303 {strides = array<i32>} : memref<8x8x128xf32, #tpu.memory_space<vmem>>, vector<8x8x128xf32>,
    } else {
    }
    %c0 = arith.constant 0 : index
    %c0_1 = arith.constant 0 : index
    %c0_2 = arith.constant 0 : index
    %3 = vector.load %arg24[%c0, %c0_1, %c0_2] : memref<8x8x128xf32, #tpu.memory_space<vmem>>, vector<8x8x128xf32>
    %4 = vector.shape_cast %3 : vector<8x8x128xf32> to vector<64x128xf32>
    %5 = arith.truncf %4 : vector<64x128xf32> to vector<64x128xbf16>
    %c0_3 = arith.constant 0 : index
    %c0_4 = arith.constant 0 : index
    %c0_5 = arith.constant 0 : index
    %6 = vector.load %arg4[%c0_3, %c0_4, %c0_5] : memref<1x128x384xbf16, #tpu.memory_space<vmem>>, vector<1x128x384xbf16>
    %7 = vector.shape_cast %6 : vector<1x128x384xbf16> to vector<128x384xbf16>
    %cst = arith.constant dense<0.000000e+00> : vector<64x384xf32>
    %8 = tpu.matmul %5, %7, %cst {dimension_numbers = #tpu.dot_dimension_numbers<[1], [0], [0], [1], [0, 0, 1, 1], [], []>} : vector<64x128xbf16>, vector<128x384xbf16>, vector<64x384xf32> -> vector<64x384xf32>
    %c0_6 = arith.constant 0 : index
    %c0_7 = arith.constant 0 : index
    %c0_8 = arith.constant 0 : index
    %9 = vector.load %arg5[%c0_6, %c0_7, %c0_8] : memref<1x1x384xf32, #tpu.memory_space<vmem>>, vector<1x1x384xf32>
    %10 = vector.shape_cast %9 : vector<1x1x384xf32> to vector<1x384xf32>
    %11 = vector.broadcast %10 : vector<1x384xf32> to vector<64x384xf32>
    %12 = arith.addf %8, %11 : vector<64x384xf32>
    %13 = vector.extract_strided_slice %12 {offsets = [0, 0], sizes = [64, 128], strides = [1, 1]} : vector<64x384xf32> to vector<64x128xf32>
    %14 = vector.shape_cast %13 : vector<64x128xf32> to vector<8x8x128xf32>
    %15 = arith.truncf %14 : vector<8x8x128xf32> to vector<8x8x128xbf16>
    %16 = vector.extract_strided_slice %12 {offsets = [0, 128], sizes = [64, 128], strides = [1, 1]} : vector<64x384xf32> to vector<64x128xf32>
    %17 = vector.shape_cast %16 : vector<64x128xf32> to vector<8x8x128xf32>
    %18 = arith.truncf %17 : vector<8x8x128xf32> to vector<8x8x128xbf16>
    %19 = vector.extract_strided_slice %12 {offsets = [0, 256], sizes = [64, 128], strides = [1, 1]} : vector<64x384xf32> to vector<64x128xf32>
    %20 = vector.shape_cast %19 : vector<64x128xf32> to vector<8x8x128xf32>
    %21 = arith.truncf %20 : vector<8x8x128xf32> to vector<8x8x128xbf16>
    %c0_9 = arith.constant 0 : index
    %c0_10 = arith.constant 0 : index
    %c0_11 = arith.constant 0 : index
    %22 = vector.load %arg6[%c0_9, %c0_10, %c0_11] : memref<1x128x128xbf16, #tpu.memory_space<vmem>>, vector<1x128x128xbf16>
    %23 = vector.shape_cast %22 : vector<1x128x128xbf16> to vector<128x128xbf16>
    %c0_12 = arith.constant 0 : index
    %c0_13 = arith.constant 0 : index
    %c0_14 = arith.constant 0 : index
    %24 = vector.load %arg7[%c0_12, %c0_13, %c0_14] : memref<1x1x128xf32, #tpu.memory_space<vmem>>, vector<1x1x128xf32>
    %25 = vector.shape_cast %24 : vector<1x1x128xf32> to vector<1x128xf32>
    %26 = vector.extract_strided_slice %15 {offsets = [0, 0, 0], sizes = [8, 8, 32], strides = [1, 1, 1]} : vector<8x8x128xbf16> to vector<8x8x32xbf16>
    %27 = vector.extract_strided_slice %18 {offsets = [0, 0, 0], sizes = [8, 8, 32], strides = [1, 1, 1]} : vector<8x8x128xbf16> to vector<8x8x32xbf16>
    "tpu.trace_start"() <{level = 10 : i32, message = "sqd,skd->sqk"}> : () -> ()
    %cst_15 = arith.constant dense<0.000000e+00> : vector<8x8x8xf32>
    %28 = tpu.matmul %26, %27, %cst_15 {dimension_numbers = #tpu.dot_dimension_numbers<[2], [2], [1], [1], [0, 0, 0, 1, 1, 1], [0], [0]>} : vector<8x8x32xbf16>, vector<8x8x32xbf16>, vector<8x8x8xf32> -> vector<8x8x8xf32>
    "tpu.trace_stop"() : () -> ()
    %cst_16 = arith.constant dense<0xFF800000> : vector<8x8xf32>
    %29 = vector.multi_reduction <maximumf>, %28, %cst_16 [2] : vector<8x8x8xf32> to vector<8x8xf32>
    %30 = vector.shape_cast %29 : vector<8x8xf32> to vector<8x8x1xf32>
    %31 = vector.broadcast %30 : vector<8x8x1xf32> to vector<8x8x8xf32>
    %32 = arith.subf %28, %31 : vector<8x8x8xf32>
    %33 = math.exp %32 : vector<8x8x8xf32>
    %cst_17 = arith.constant dense<0.000000e+00> : vector<8x8xf32>
    %34 = vector.multi_reduction <add>, %33, %cst_17 [2] : vector<8x8x8xf32> to vector<8x8xf32>
    %35 = vector.shape_cast %34 : vector<8x8xf32> to vector<8x8x1xf32>
    %36 = tpu.reciprocal %35 {approx = true} : vector<8x8x1xf32> -> vector<8x8x1xf32>
    %37 = vector.broadcast %36 : vector<8x8x1xf32> to vector<8x8x8xf32>
    %38 = arith.mulf %33, %37 : vector<8x8x8xf32>
    %39 = arith.truncf %38 : vector<8x8x8xf32> to vector<8x8x8xbf16>
    %40 = vector.extract_strided_slice %21 {offsets = [0, 0, 0], sizes = [8, 8, 32], strides = [1, 1, 1]} : vector<8x8x128xbf16> to vector<8x8x32xbf16>
    "tpu.trace_start"() <{level = 10 : i32, message = "sqk,skd->sqd"}> : () -> ()
    %cst_18 = arith.constant dense<0.000000e+00> : vector<8x8x32xf32>
    %41 = tpu.matmul %39, %40, %cst_18 {dimension_numbers = #tpu.dot_dimension_numbers<[2], [1], [1], [2], [0, 0, 0, 1, 1, 2], [0], [0]>} : vector<8x8x8xbf16>, vector<8x8x32xbf16>, vector<8x8x32xf32> -> vector<8x8x32xf32>
    "tpu.trace_stop"() : () -> ()
    %42 = vector.shape_cast %41 : vector<8x8x32xf32> to vector<64x32xf32>
    %c0_19 = arith.constant 0 : index
    %c0_20 = arith.constant 0 : index
    %43 = vector.load %arg25[%c0_19, %c0_20] : memref<64x128xf32, #tpu.memory_space<vmem>>, vector<64x32xf32>
    tpu.vector_store %arg25[%c0_19, %c0_20], %42 {strides = array<i32>} : memref<64x128xf32, #tpu.memory_space<vmem>>, vector<64x32xf32>,
    %44 = vector.extract_strided_slice %15 {offsets = [0, 0, 32], sizes = [8, 8, 32], strides = [1, 1, 1]} : vector<8x8x128xbf16> to vector<8x8x32xbf16>
    %45 = vector.extract_strided_slice %18 {offsets = [0, 0, 32], sizes = [8, 8, 32], strides = [1, 1, 1]} : vector<8x8x128xbf16> to vector<8x8x32xbf16>
    "tpu.trace_start"() <{level = 10 : i32, message = "sqd,skd->sqk"}> : () -> ()
    %cst_21 = arith.constant dense<0.000000e+00> : vector<8x8x8xf32>
    %46 = tpu.matmul %44, %45, %cst_21 {dimension_numbers = #tpu.dot_dimension_numbers<[2], [2], [1], [1], [0, 0, 0, 1, 1, 1], [0], [0]>} : vector<8x8x32xbf16>, vector<8x8x32xbf16>, vector<8x8x8xf32> -> vector<8x8x8xf32>
    "tpu.trace_stop"() : () -> ()
    %cst_22 = arith.constant dense<0xFF800000> : vector<8x8xf32>
    %47 = vector.multi_reduction <maximumf>, %46, %cst_22 [2] : vector<8x8x8xf32> to vector<8x8xf32>
    %48 = vector.shape_cast %47 : vector<8x8xf32> to vector<8x8x1xf32>
    %49 = vector.broadcast %48 : vector<8x8x1xf32> to vector<8x8x8xf32>
    %50 = arith.subf %46, %49 : vector<8x8x8xf32>
    %51 = math.exp %50 : vector<8x8x8xf32>
    %cst_23 = arith.constant dense<0.000000e+00> : vector<8x8xf32>
    %52 = vector.multi_reduction <add>, %51, %cst_23 [2] : vector<8x8x8xf32> to vector<8x8xf32>
    %53 = vector.shape_cast %52 : vector<8x8xf32> to vector<8x8x1xf32>
    %54 = tpu.reciprocal %53 {approx = true} : vector<8x8x1xf32> -> vector<8x8x1xf32>
    %55 = vector.broadcast %54 : vector<8x8x1xf32> to vector<8x8x8xf32>
    %56 = arith.mulf %51, %55 : vector<8x8x8xf32>
    %57 = arith.truncf %56 : vector<8x8x8xf32> to vector<8x8x8xbf16>
    %58 = vector.extract_strided_slice %21 {offsets = [0, 0, 32], sizes = [8, 8, 32], strides = [1, 1, 1]} : vector<8x8x128xbf16> to vector<8x8x32xbf16>
    "tpu.trace_start"() <{level = 10 : i32, message = "sqk,skd->sqd"}> : () -> ()
    %cst_24 = arith.constant dense<0.000000e+00> : vector<8x8x32xf32>
    %59 = tpu.matmul %57, %58, %cst_24 {dimension_numbers = #tpu.dot_dimension_numbers<[2], [1], [1], [2], [0, 0, 0, 1, 1, 2], [0], [0]>} : vector<8x8x8xbf16>, vector<8x8x32xbf16>, vector<8x8x32xf32> -> vector<8x8x32xf32>
    "tpu.trace_stop"() : () -> ()
    %60 = vector.shape_cast %59 : vector<8x8x32xf32> to vector<64x32xf32>
    %c0_25 = arith.constant 0 : index
    %c32 = arith.constant 32 : index
    %61 = vector.load %arg25[%c0_25, %c32] : memref<64x128xf32, #tpu.memory_space<vmem>>, vector<64x32xf32>
    tpu.vector_store %arg25[%c0_25, %c32], %60 {strides = array<i32>} : memref<64x128xf32, #tpu.memory_space<vmem>>, vector<64x32xf32>,
    %62 = vector.extract_strided_slice %15 {offsets = [0, 0, 64], sizes = [8, 8, 32], strides = [1, 1, 1]} : vector<8x8x128xbf16> to vector<8x8x32xbf16>
    %63 = vector.extract_strided_slice %18 {offsets = [0, 0, 64], sizes = [8, 8, 32], strides = [1, 1, 1]} : vector<8x8x128xbf16> to vector<8x8x32xbf16>
    "tpu.trace_start"() <{level = 10 : i32, message = "sqd,skd->sqk"}> : () -> ()
    %cst_26 = arith.constant dense<0.000000e+00> : vector<8x8x8xf32>
    %64 = tpu.matmul %62, %63, %cst_26 {dimension_numbers = #tpu.dot_dimension_numbers<[2], [2], [1], [1], [0, 0, 0, 1, 1, 1], [0], [0]>} : vector<8x8x32xbf16>, vector<8x8x32xbf16>, vector<8x8x8xf32> -> vector<8x8x8xf32>
    "tpu.trace_stop"() : () -> ()
    %cst_27 = arith.constant dense<0xFF800000> : vector<8x8xf32>
    %65 = vector.multi_reduction <maximumf>, %64, %cst_27 [2] : vector<8x8x8xf32> to vector<8x8xf32>
    %66 = vector.shape_cast %65 : vector<8x8xf32> to vector<8x8x1xf32>
    %67 = vector.broadcast %66 : vector<8x8x1xf32> to vector<8x8x8xf32>
    %68 = arith.subf %64, %67 : vector<8x8x8xf32>
    %69 = math.exp %68 : vector<8x8x8xf32>
    %cst_28 = arith.constant dense<0.000000e+00> : vector<8x8xf32>
    %70 = vector.multi_reduction <add>, %69, %cst_28 [2] : vector<8x8x8xf32> to vector<8x8xf32>
    %71 = vector.shape_cast %70 : vector<8x8xf32> to vector<8x8x1xf32>
    %72 = tpu.reciprocal %71 {approx = true} : vector<8x8x1xf32> -> vector<8x8x1xf32>
    %73 = vector.broadcast %72 : vector<8x8x1xf32> to vector<8x8x8xf32>
    %74 = arith.mulf %69, %73 : vector<8x8x8xf32>
    %75 = arith.truncf %74 : vector<8x8x8xf32> to vector<8x8x8xbf16>
    %76 = vector.extract_strided_slice %21 {offsets = [0, 0, 64], sizes = [8, 8, 32], strides = [1, 1, 1]} : vector<8x8x128xbf16> to vector<8x8x32xbf16>
    "tpu.trace_start"() <{level = 10 : i32, message = "sqk,skd->sqd"}> : () -> ()
    %cst_29 = arith.constant dense<0.000000e+00> : vector<8x8x32xf32>
    %77 = tpu.matmul %75, %76, %cst_29 {dimension_numbers = #tpu.dot_dimension_numbers<[2], [1], [1], [2], [0, 0, 0, 1, 1, 2], [0], [0]>} : vector<8x8x8xbf16>, vector<8x8x32xbf16>, vector<8x8x32xf32> -> vector<8x8x32xf32>
    "tpu.trace_stop"() : () -> ()
    %78 = vector.shape_cast %77 : vector<8x8x32xf32> to vector<64x32xf32>
    %c0_30 = arith.constant 0 : index
    %c64 = arith.constant 64 : index
    %79 = vector.load %arg25[%c0_30, %c64] : memref<64x128xf32, #tpu.memory_space<vmem>>, vector<64x32xf32>
    tpu.vector_store %arg25[%c0_30, %c64], %78 {strides = array<i32>} : memref<64x128xf32, #tpu.memory_space<vmem>>, vector<64x32xf32>,
    %80 = vector.extract_strided_slice %15 {offsets = [0, 0, 96], sizes = [8, 8, 32], strides = [1, 1, 1]} : vector<8x8x128xbf16> to vector<8x8x32xbf16>
    %81 = vector.extract_strided_slice %18 {offsets = [0, 0, 96], sizes = [8, 8, 32], strides = [1, 1, 1]} : vector<8x8x128xbf16> to vector<8x8x32xbf16>
    "tpu.trace_start"() <{level = 10 : i32, message = "sqd,skd->sqk"}> : () -> ()
    %cst_31 = arith.constant dense<0.000000e+00> : vector<8x8x8xf32>
    %82 = tpu.matmul %80, %81, %cst_31 {dimension_numbers = #tpu.dot_dimension_numbers<[2], [2], [1], [1], [0, 0, 0, 1, 1, 1], [0], [0]>} : vector<8x8x32xbf16>, vector<8x8x32xbf16>, vector<8x8x8xf32> -> vector<8x8x8xf32>
    "tpu.trace_stop"() : () -> ()
    %cst_32 = arith.constant dense<0xFF800000> : vector<8x8xf32>
    %83 = vector.multi_reduction <maximumf>, %82, %cst_32 [2] : vector<8x8x8xf32> to vector<8x8xf32>
    %84 = vector.shape_cast %83 : vector<8x8xf32> to vector<8x8x1xf32>
    %85 = vector.broadcast %84 : vector<8x8x1xf32> to vector<8x8x8xf32>
    %86 = arith.subf %82, %85 : vector<8x8x8xf32>
    %87 = math.exp %86 : vector<8x8x8xf32>
    %cst_33 = arith.constant dense<0.000000e+00> : vector<8x8xf32>
    %88 = vector.multi_reduction <add>, %87, %cst_33 [2] : vector<8x8x8xf32> to vector<8x8xf32>
    %89 = vector.shape_cast %88 : vector<8x8xf32> to vector<8x8x1xf32>
    %90 = tpu.reciprocal %89 {approx = true} : vector<8x8x1xf32> -> vector<8x8x1xf32>
    %91 = vector.broadcast %90 : vector<8x8x1xf32> to vector<8x8x8xf32>
    %92 = arith.mulf %87, %91 : vector<8x8x8xf32>
    %93 = arith.truncf %92 : vector<8x8x8xf32> to vector<8x8x8xbf16>
    %94 = vector.extract_strided_slice %21 {offsets = [0, 0, 96], sizes = [8, 8, 32], strides = [1, 1, 1]} : vector<8x8x128xbf16> to vector<8x8x32xbf16>
    "tpu.trace_start"() <{level = 10 : i32, message = "sqk,skd->sqd"}> : () -> ()
    %cst_34 = arith.constant dense<0.000000e+00> : vector<8x8x32xf32>
    %95 = tpu.matmul %93, %94, %cst_34 {dimension_numbers = #tpu.dot_dimension_numbers<[2], [1], [1], [2], [0, 0, 0, 1, 1, 2], [0], [0]>} : vector<8x8x8xbf16>, vector<8x8x32xbf16>, vector<8x8x32xf32> -> vector<8x8x32xf32>
    "tpu.trace_stop"() : () -> ()
    %96 = vector.shape_cast %95 : vector<8x8x32xf32> to vector<64x32xf32>
    %c0_35 = arith.constant 0 : index
    %c96 = arith.constant 96 : index
    %97 = vector.load %arg25[%c0_35, %c96] : memref<64x128xf32, #tpu.memory_space<vmem>>, vector<64x32xf32>
    tpu.vector_store %arg25[%c0_35, %c96], %96 {strides = array<i32>} : memref<64x128xf32, #tpu.memory_space<vmem>>, vector<64x32xf32>,
    %c0_36 = arith.constant 0 : index
    %c0_37 = arith.constant 0 : index
    %98 = vector.load %arg25[%c0_36, %c0_37] : memref<64x128xf32, #tpu.memory_space<vmem>>, vector<64x128xf32>
    %99 = arith.truncf %98 : vector<64x128xf32> to vector<64x128xbf16>
    %cst_38 = arith.constant dense<0.000000e+00> : vector<64x128xf32>
    %100 = tpu.matmul %99, %23, %cst_38 {dimension_numbers = #tpu.dot_dimension_numbers<[1], [0], [0], [1], [0, 0, 1, 1], [], []>} : vector<64x128xbf16>, vector<128x128xbf16>, vector<64x128xf32> -> vector<64x128xf32>
    %101 = vector.broadcast %25 : vector<1x128xf32> to vector<64x128xf32>
    %102 = arith.addf %100, %101 : vector<64x128xf32>
    %103 = arith.addf %4, %102 : vector<64x128xf32>
    %c0_39 = arith.constant 0 : index
    %c0_40 = arith.constant 0 : index
    %c0_41 = arith.constant 0 : index
    %104 = vector.load %arg18[%c0_39, %c0_40, %c0_41] : memref<1x1x128xf32, #tpu.memory_space<vmem>>, vector<1x1x128xf32>
    %105 = vector.shape_cast %104 : vector<1x1x128xf32> to vector<1x128xf32>
    %c0_42 = arith.constant 0 : index
    %c0_43 = arith.constant 0 : index
    %c0_44 = arith.constant 0 : index
    %106 = vector.load %arg19[%c0_42, %c0_43, %c0_44] : memref<1x1x128xf32, #tpu.memory_space<vmem>>, vector<1x1x128xf32>
    %107 = vector.shape_cast %106 : vector<1x1x128xf32> to vector<1x128xf32>
    %cst_45 = arith.constant dense<0.000000e+00> : vector<64xf32>
    %108 = vector.multi_reduction <add>, %103, %cst_45 [1] : vector<64x128xf32> to vector<64xf32>
    %109 = vector.shape_cast %108 : vector<64xf32> to vector<64x1xf32>
    %cst_46 = arith.constant 1.280000e+02 : f32
    %110 = vector.broadcast %cst_46 : f32 to vector<64x1xf32>
    %111 = arith.divf %109, %110 : vector<64x1xf32>
    %112 = vector.broadcast %111 : vector<64x1xf32> to vector<64x128xf32>
    %113 = arith.subf %103, %112 : vector<64x128xf32>
    %114 = arith.mulf %113, %113 : vector<64x128xf32>
    %cst_47 = arith.constant dense<0.000000e+00> : vector<64xf32>
    %115 = vector.multi_reduction <add>, %114, %cst_47 [1] : vector<64x128xf32> to vector<64xf32>
    %116 = vector.shape_cast %115 : vector<64xf32> to vector<64x1xf32>
    %cst_48 = arith.constant 1.280000e+02 : f32
    %117 = vector.broadcast %cst_48 : f32 to vector<64x1xf32>
    %118 = arith.divf %116, %117 : vector<64x1xf32>
    %cst_49 = arith.constant 9.99999974E-6 : f32
    %119 = vector.broadcast %cst_49 : f32 to vector<64x1xf32>
    %120 = arith.addf %118, %119 : vector<64x1xf32>
    %121 = math.rsqrt %120 : vector<64x1xf32>
    %122 = vector.broadcast %121 : vector<64x1xf32> to vector<64x128xf32>
    %123 = arith.mulf %113, %122 : vector<64x128xf32>
    %124 = vector.broadcast %105 : vector<1x128xf32> to vector<64x128xf32>
    %125 = arith.mulf %123, %124 : vector<64x128xf32>
    %126 = vector.broadcast %107 : vector<1x128xf32> to vector<64x128xf32>
    %127 = arith.addf %125, %126 : vector<64x128xf32>
    %c0_50 = arith.constant 0 : index
    %c0_51 = arith.constant 0 : index
    %128 = vector.load %arg3[%c0_50, %c0_51] : memref<64x128xbf16, #tpu.memory_space<vmem>>, vector<64x128xbf16>
    %c0_52 = arith.constant 0 : index
    %c0_53 = arith.constant 0 : index
    %c0_54 = arith.constant 0 : index
    %129 = vector.load %arg10[%c0_52, %c0_53, %c0_54] : memref<1x128x256xbf16, #tpu.memory_space<vmem>>, vector<1x128x256xbf16>
    %130 = vector.shape_cast %129 : vector<1x128x256xbf16> to vector<128x256xbf16>
    %cst_55 = arith.constant dense<0.000000e+00> : vector<64x256xf32>
    %131 = tpu.matmul %128, %130, %cst_55 {dimension_numbers = #tpu.dot_dimension_numbers<[1], [0], [0], [1], [0, 0, 1, 1], [], []>} : vector<64x128xbf16>, vector<128x256xbf16>, vector<64x256xf32> -> vector<64x256xf32>
    %c0_56 = arith.constant 0 : index
    %c0_57 = arith.constant 0 : index
    %c0_58 = arith.constant 0 : index
    %132 = vector.load %arg11[%c0_56, %c0_57, %c0_58] : memref<1x1x256xf32, #tpu.memory_space<vmem>>, vector<1x1x256xf32>
    %133 = vector.shape_cast %132 : vector<1x1x256xf32> to vector<1x256xf32>
    %134 = vector.broadcast %133 : vector<1x256xf32> to vector<64x256xf32>
    %135 = arith.addf %131, %134 : vector<64x256xf32>
    %136 = arith.truncf %127 : vector<64x128xf32> to vector<64x128xbf16>
    %c0_59 = arith.constant 0 : index
    %c0_60 = arith.constant 0 : index
    %c0_61 = arith.constant 0 : index
    %137 = vector.load %arg8[%c0_59, %c0_60, %c0_61] : memref<1x128x128xbf16, #tpu.memory_space<vmem>>, vector<1x128x128xbf16>
    %138 = vector.shape_cast %137 : vector<1x128x128xbf16> to vector<128x128xbf16>
    %cst_62 = arith.constant dense<0.000000e+00> : vector<64x128xf32>
    %139 = tpu.matmul %136, %138, %cst_62 {dimension_numbers = #tpu.dot_dimension_numbers<[1], [0], [0], [1], [0, 0, 1, 1], [], []>} : vector<64x128xbf16>, vector<128x128xbf16>, vector<64x128xf32> -> vector<64x128xf32>
    %c0_63 = arith.constant 0 : index
    %c0_64 = arith.constant 0 : index
    %c0_65 = arith.constant 0 : index
    %140 = vector.load %arg9[%c0_63, %c0_64, %c0_65] : memref<1x1x128xf32, #tpu.memory_space<vmem>>, vector<1x1x128xf32>
    %141 = vector.shape_cast %140 : vector<1x1x128xf32> to vector<1x128xf32>
    %142 = vector.broadcast %141 : vector<1x128xf32> to vector<64x128xf32>
    %143 = arith.addf %139, %142 : vector<64x128xf32>
    %144 = vector.shape_cast %143 : vector<64x128xf32> to vector<8x8x128xf32>
    %145 = arith.truncf %144 : vector<8x8x128xf32> to vector<8x8x128xbf16>
    %146 = vector.extract_strided_slice %135 {offsets = [0, 0], sizes = [64, 128], strides = [1, 1]} : vector<64x256xf32> to vector<64x128xf32>
    %147 = vector.shape_cast %146 : vector<64x128xf32> to vector<8x8x128xf32>
    %148 = arith.truncf %147 : vector<8x8x128xf32> to vector<8x8x128xbf16>
    %149 = vector.extract_strided_slice %135 {offsets = [0, 128], sizes = [64, 128], strides = [1, 1]} : vector<64x256xf32> to vector<64x128xf32>
    %150 = vector.shape_cast %149 : vector<64x128xf32> to vector<8x8x128xf32>
    %151 = arith.truncf %150 : vector<8x8x128xf32> to vector<8x8x128xbf16>
    %c0_66 = arith.constant 0 : index
    %c0_67 = arith.constant 0 : index
    %c0_68 = arith.constant 0 : index
    %152 = vector.load %arg12[%c0_66, %c0_67, %c0_68] : memref<1x128x128xbf16, #tpu.memory_space<vmem>>, vector<1x128x128xbf16>
    %153 = vector.shape_cast %152 : vector<1x128x128xbf16> to vector<128x128xbf16>
    %c0_69 = arith.constant 0 : index
    %c0_70 = arith.constant 0 : index
    %c0_71 = arith.constant 0 : index
    %154 = vector.load %arg13[%c0_69, %c0_70, %c0_71] : memref<1x1x128xf32, #tpu.memory_space<vmem>>, vector<1x1x128xf32>
    %155 = vector.shape_cast %154 : vector<1x1x128xf32> to vector<1x128xf32>
    %156 = vector.extract_strided_slice %145 {offsets = [0, 0, 0], sizes = [8, 8, 32], strides = [1, 1, 1]} : vector<8x8x128xbf16> to vector<8x8x32xbf16>
    %157 = vector.extract_strided_slice %148 {offsets = [0, 0, 0], sizes = [8, 8, 32], strides = [1, 1, 1]} : vector<8x8x128xbf16> to vector<8x8x32xbf16>
    "tpu.trace_start"() <{level = 10 : i32, message = "sqd,skd->sqk"}> : () -> ()
    %cst_72 = arith.constant dense<0.000000e+00> : vector<8x8x8xf32>
    %158 = tpu.matmul %156, %157, %cst_72 {dimension_numbers = #tpu.dot_dimension_numbers<[2], [2], [1], [1], [0, 0, 0, 1, 1, 1], [0], [0]>} : vector<8x8x32xbf16>, vector<8x8x32xbf16>, vector<8x8x8xf32> -> vector<8x8x8xf32>
    "tpu.trace_stop"() : () -> ()
    %cst_73 = arith.constant dense<0xFF800000> : vector<8x8xf32>
    %159 = vector.multi_reduction <maximumf>, %158, %cst_73 [2] : vector<8x8x8xf32> to vector<8x8xf32>
    %160 = vector.shape_cast %159 : vector<8x8xf32> to vector<8x8x1xf32>
    %161 = vector.broadcast %160 : vector<8x8x1xf32> to vector<8x8x8xf32>
    %162 = arith.subf %158, %161 : vector<8x8x8xf32>
    %163 = math.exp %162 : vector<8x8x8xf32>
    %cst_74 = arith.constant dense<0.000000e+00> : vector<8x8xf32>
    %164 = vector.multi_reduction <add>, %163, %cst_74 [2] : vector<8x8x8xf32> to vector<8x8xf32>
    %165 = vector.shape_cast %164 : vector<8x8xf32> to vector<8x8x1xf32>
    %166 = tpu.reciprocal %165 {approx = true} : vector<8x8x1xf32> -> vector<8x8x1xf32>
    %167 = vector.broadcast %166 : vector<8x8x1xf32> to vector<8x8x8xf32>
    %168 = arith.mulf %163, %167 : vector<8x8x8xf32>
    %169 = arith.truncf %168 : vector<8x8x8xf32> to vector<8x8x8xbf16>
    %170 = vector.extract_strided_slice %151 {offsets = [0, 0, 0], sizes = [8, 8, 32], strides = [1, 1, 1]} : vector<8x8x128xbf16> to vector<8x8x32xbf16>
    "tpu.trace_start"() <{level = 10 : i32, message = "sqk,skd->sqd"}> : () -> ()
    %cst_75 = arith.constant dense<0.000000e+00> : vector<8x8x32xf32>
    %171 = tpu.matmul %169, %170, %cst_75 {dimension_numbers = #tpu.dot_dimension_numbers<[2], [1], [1], [2], [0, 0, 0, 1, 1, 2], [0], [0]>} : vector<8x8x8xbf16>, vector<8x8x32xbf16>, vector<8x8x32xf32> -> vector<8x8x32xf32>
    "tpu.trace_stop"() : () -> ()
    %172 = vector.shape_cast %171 : vector<8x8x32xf32> to vector<64x32xf32>
    %c0_76 = arith.constant 0 : index
    %c0_77 = arith.constant 0 : index
    %173 = vector.load %arg25[%c0_76, %c0_77] : memref<64x128xf32, #tpu.memory_space<vmem>>, vector<64x32xf32>
    tpu.vector_store %arg25[%c0_76, %c0_77], %172 {strides = array<i32>} : memref<64x128xf32, #tpu.memory_space<vmem>>, vector<64x32xf32>,
    %174 = vector.extract_strided_slice %145 {offsets = [0, 0, 32], sizes = [8, 8, 32], strides = [1, 1, 1]} : vector<8x8x128xbf16> to vector<8x8x32xbf16>
    %175 = vector.extract_strided_slice %148 {offsets = [0, 0, 32], sizes = [8, 8, 32], strides = [1, 1, 1]} : vector<8x8x128xbf16> to vector<8x8x32xbf16>
    "tpu.trace_start"() <{level = 10 : i32, message = "sqd,skd->sqk"}> : () -> ()
    %cst_78 = arith.constant dense<0.000000e+00> : vector<8x8x8xf32>
    %176 = tpu.matmul %174, %175, %cst_78 {dimension_numbers = #tpu.dot_dimension_numbers<[2], [2], [1], [1], [0, 0, 0, 1, 1, 1], [0], [0]>} : vector<8x8x32xbf16>, vector<8x8x32xbf16>, vector<8x8x8xf32> -> vector<8x8x8xf32>
    "tpu.trace_stop"() : () -> ()
    %cst_79 = arith.constant dense<0xFF800000> : vector<8x8xf32>
    %177 = vector.multi_reduction <maximumf>, %176, %cst_79 [2] : vector<8x8x8xf32> to vector<8x8xf32>
    %178 = vector.shape_cast %177 : vector<8x8xf32> to vector<8x8x1xf32>
    %179 = vector.broadcast %178 : vector<8x8x1xf32> to vector<8x8x8xf32>
    %180 = arith.subf %176, %179 : vector<8x8x8xf32>
    %181 = math.exp %180 : vector<8x8x8xf32>
    %cst_80 = arith.constant dense<0.000000e+00> : vector<8x8xf32>
    %182 = vector.multi_reduction <add>, %181, %cst_80 [2] : vector<8x8x8xf32> to vector<8x8xf32>
    %183 = vector.shape_cast %182 : vector<8x8xf32> to vector<8x8x1xf32>
    %184 = tpu.reciprocal %183 {approx = true} : vector<8x8x1xf32> -> vector<8x8x1xf32>
    %185 = vector.broadcast %184 : vector<8x8x1xf32> to vector<8x8x8xf32>
    %186 = arith.mulf %181, %185 : vector<8x8x8xf32>
    %187 = arith.truncf %186 : vector<8x8x8xf32> to vector<8x8x8xbf16>
    %188 = vector.extract_strided_slice %151 {offsets = [0, 0, 32], sizes = [8, 8, 32], strides = [1, 1, 1]} : vector<8x8x128xbf16> to vector<8x8x32xbf16>
    "tpu.trace_start"() <{level = 10 : i32, message = "sqk,skd->sqd"}> : () -> ()
    %cst_81 = arith.constant dense<0.000000e+00> : vector<8x8x32xf32>
    %189 = tpu.matmul %187, %188, %cst_81 {dimension_numbers = #tpu.dot_dimension_numbers<[2], [1], [1], [2], [0, 0, 0, 1, 1, 2], [0], [0]>} : vector<8x8x8xbf16>, vector<8x8x32xbf16>, vector<8x8x32xf32> -> vector<8x8x32xf32>
    "tpu.trace_stop"() : () -> ()
    %190 = vector.shape_cast %189 : vector<8x8x32xf32> to vector<64x32xf32>
    %c0_82 = arith.constant 0 : index
    %c32_83 = arith.constant 32 : index
    %191 = vector.load %arg25[%c0_82, %c32_83] : memref<64x128xf32, #tpu.memory_space<vmem>>, vector<64x32xf32>
    tpu.vector_store %arg25[%c0_82, %c32_83], %190 {strides = array<i32>} : memref<64x128xf32, #tpu.memory_space<vmem>>, vector<64x32xf32>,
    %192 = vector.extract_strided_slice %145 {offsets = [0, 0, 64], sizes = [8, 8, 32], strides = [1, 1, 1]} : vector<8x8x128xbf16> to vector<8x8x32xbf16>
    %193 = vector.extract_strided_slice %148 {offsets = [0, 0, 64], sizes = [8, 8, 32], strides = [1, 1, 1]} : vector<8x8x128xbf16> to vector<8x8x32xbf16>
    "tpu.trace_start"() <{level = 10 : i32, message = "sqd,skd->sqk"}> : () -> ()
    %cst_84 = arith.constant dense<0.000000e+00> : vector<8x8x8xf32>
    %194 = tpu.matmul %192, %193, %cst_84 {dimension_numbers = #tpu.dot_dimension_numbers<[2], [2], [1], [1], [0, 0, 0, 1, 1, 1], [0], [0]>} : vector<8x8x32xbf16>, vector<8x8x32xbf16>, vector<8x8x8xf32> -> vector<8x8x8xf32>
    "tpu.trace_stop"() : () -> ()
    %cst_85 = arith.constant dense<0xFF800000> : vector<8x8xf32>
    %195 = vector.multi_reduction <maximumf>, %194, %cst_85 [2] : vector<8x8x8xf32> to vector<8x8xf32>
    %196 = vector.shape_cast %195 : vector<8x8xf32> to vector<8x8x1xf32>
    %197 = vector.broadcast %196 : vector<8x8x1xf32> to vector<8x8x8xf32>
    %198 = arith.subf %194, %197 : vector<8x8x8xf32>
    %199 = math.exp %198 : vector<8x8x8xf32>
    %cst_86 = arith.constant dense<0.000000e+00> : vector<8x8xf32>
    %200 = vector.multi_reduction <add>, %199, %cst_86 [2] : vector<8x8x8xf32> to vector<8x8xf32>
    %201 = vector.shape_cast %200 : vector<8x8xf32> to vector<8x8x1xf32>
    %202 = tpu.reciprocal %201 {approx = true} : vector<8x8x1xf32> -> vector<8x8x1xf32>
    %203 = vector.broadcast %202 : vector<8x8x1xf32> to vector<8x8x8xf32>
    %204 = arith.mulf %199, %203 : vector<8x8x8xf32>
    %205 = arith.truncf %204 : vector<8x8x8xf32> to vector<8x8x8xbf16>
    %206 = vector.extract_strided_slice %151 {offsets = [0, 0, 64], sizes = [8, 8, 32], strides = [1, 1, 1]} : vector<8x8x128xbf16> to vector<8x8x32xbf16>
    "tpu.trace_start"() <{level = 10 : i32, message = "sqk,skd->sqd"}> : () -> ()
    %cst_87 = arith.constant dense<0.000000e+00> : vector<8x8x32xf32>
    %207 = tpu.matmul %205, %206, %cst_87 {dimension_numbers = #tpu.dot_dimension_numbers<[2], [1], [1], [2], [0, 0, 0, 1, 1, 2], [0], [0]>} : vector<8x8x8xbf16>, vector<8x8x32xbf16>, vector<8x8x32xf32> -> vector<8x8x32xf32>
    "tpu.trace_stop"() : () -> ()
    %208 = vector.shape_cast %207 : vector<8x8x32xf32> to vector<64x32xf32>
    %c0_88 = arith.constant 0 : index
    %c64_89 = arith.constant 64 : index
    %209 = vector.load %arg25[%c0_88, %c64_89] : memref<64x128xf32, #tpu.memory_space<vmem>>, vector<64x32xf32>
    tpu.vector_store %arg25[%c0_88, %c64_89], %208 {strides = array<i32>} : memref<64x128xf32, #tpu.memory_space<vmem>>, vector<64x32xf32>,
    %210 = vector.extract_strided_slice %145 {offsets = [0, 0, 96], sizes = [8, 8, 32], strides = [1, 1, 1]} : vector<8x8x128xbf16> to vector<8x8x32xbf16>
    %211 = vector.extract_strided_slice %148 {offsets = [0, 0, 96], sizes = [8, 8, 32], strides = [1, 1, 1]} : vector<8x8x128xbf16> to vector<8x8x32xbf16>
    "tpu.trace_start"() <{level = 10 : i32, message = "sqd,skd->sqk"}> : () -> ()
    %cst_90 = arith.constant dense<0.000000e+00> : vector<8x8x8xf32>
    %212 = tpu.matmul %210, %211, %cst_90 {dimension_numbers = #tpu.dot_dimension_numbers<[2], [2], [1], [1], [0, 0, 0, 1, 1, 1], [0], [0]>} : vector<8x8x32xbf16>, vector<8x8x32xbf16>, vector<8x8x8xf32> -> vector<8x8x8xf32>
    "tpu.trace_stop"() : () -> ()
    %cst_91 = arith.constant dense<0xFF800000> : vector<8x8xf32>
    %213 = vector.multi_reduction <maximumf>, %212, %cst_91 [2] : vector<8x8x8xf32> to vector<8x8xf32>
    %214 = vector.shape_cast %213 : vector<8x8xf32> to vector<8x8x1xf32>
    %215 = vector.broadcast %214 : vector<8x8x1xf32> to vector<8x8x8xf32>
    %216 = arith.subf %212, %215 : vector<8x8x8xf32>
    %217 = math.exp %216 : vector<8x8x8xf32>
    %cst_92 = arith.constant dense<0.000000e+00> : vector<8x8xf32>
    %218 = vector.multi_reduction <add>, %217, %cst_92 [2] : vector<8x8x8xf32> to vector<8x8xf32>
    %219 = vector.shape_cast %218 : vector<8x8xf32> to vector<8x8x1xf32>
    %220 = tpu.reciprocal %219 {approx = true} : vector<8x8x1xf32> -> vector<8x8x1xf32>
    %221 = vector.broadcast %220 : vector<8x8x1xf32> to vector<8x8x8xf32>
    %222 = arith.mulf %217, %221 : vector<8x8x8xf32>
    %223 = arith.truncf %222 : vector<8x8x8xf32> to vector<8x8x8xbf16>
    %224 = vector.extract_strided_slice %151 {offsets = [0, 0, 96], sizes = [8, 8, 32], strides = [1, 1, 1]} : vector<8x8x128xbf16> to vector<8x8x32xbf16>
    "tpu.trace_start"() <{level = 10 : i32, message = "sqk,skd->sqd"}> : () -> ()
    %cst_93 = arith.constant dense<0.000000e+00> : vector<8x8x32xf32>
    %225 = tpu.matmul %223, %224, %cst_93 {dimension_numbers = #tpu.dot_dimension_numbers<[2], [1], [1], [2], [0, 0, 0, 1, 1, 2], [0], [0]>} : vector<8x8x8xbf16>, vector<8x8x32xbf16>, vector<8x8x32xf32> -> vector<8x8x32xf32>
    "tpu.trace_stop"() : () -> ()
    %226 = vector.shape_cast %225 : vector<8x8x32xf32> to vector<64x32xf32>
    %c0_94 = arith.constant 0 : index
    %c96_95 = arith.constant 96 : index
    %227 = vector.load %arg25[%c0_94, %c96_95] : memref<64x128xf32, #tpu.memory_space<vmem>>, vector<64x32xf32>
    tpu.vector_store %arg25[%c0_94, %c96_95], %226 {strides = array<i32>} : memref<64x128xf32, #tpu.memory_space<vmem>>, vector<64x32xf32>,
    %c0_96 = arith.constant 0 : index
    %c0_97 = arith.constant 0 : index
    %228 = vector.load %arg25[%c0_96, %c0_97] : memref<64x128xf32, #tpu.memory_space<vmem>>, vector<64x128xf32>
    %229 = arith.truncf %228 : vector<64x128xf32> to vector<64x128xbf16>
    %cst_98 = arith.constant dense<0.000000e+00> : vector<64x128xf32>
    %230 = tpu.matmul %229, %153, %cst_98 {dimension_numbers = #tpu.dot_dimension_numbers<[1], [0], [0], [1], [0, 0, 1, 1], [], []>} : vector<64x128xbf16>, vector<128x128xbf16>, vector<64x128xf32> -> vector<64x128xf32>
    %231 = vector.broadcast %155 : vector<1x128xf32> to vector<64x128xf32>
    %232 = arith.addf %230, %231 : vector<64x128xf32>
    %233 = arith.addf %127, %232 : vector<64x128xf32>
    %c0_99 = arith.constant 0 : index
    %c0_100 = arith.constant 0 : index
    %c0_101 = arith.constant 0 : index
    %234 = vector.load %arg20[%c0_99, %c0_100, %c0_101] : memref<1x1x128xf32, #tpu.memory_space<vmem>>, vector<1x1x128xf32>
    %235 = vector.shape_cast %234 : vector<1x1x128xf32> to vector<1x128xf32>
    %c0_102 = arith.constant 0 : index
    %c0_103 = arith.constant 0 : index
    %c0_104 = arith.constant 0 : index
    %236 = vector.load %arg21[%c0_102, %c0_103, %c0_104] : memref<1x1x128xf32, #tpu.memory_space<vmem>>, vector<1x1x128xf32>
    %237 = vector.shape_cast %236 : vector<1x1x128xf32> to vector<1x128xf32>
    %cst_105 = arith.constant dense<0.000000e+00> : vector<64xf32>
    %238 = vector.multi_reduction <add>, %233, %cst_105 [1] : vector<64x128xf32> to vector<64xf32>
    %239 = vector.shape_cast %238 : vector<64xf32> to vector<64x1xf32>
    %cst_106 = arith.constant 1.280000e+02 : f32
    %240 = vector.broadcast %cst_106 : f32 to vector<64x1xf32>
    %241 = arith.divf %239, %240 : vector<64x1xf32>
    %242 = vector.broadcast %241 : vector<64x1xf32> to vector<64x128xf32>
    %243 = arith.subf %233, %242 : vector<64x128xf32>
    %244 = arith.mulf %243, %243 : vector<64x128xf32>
    %cst_107 = arith.constant dense<0.000000e+00> : vector<64xf32>
    %245 = vector.multi_reduction <add>, %244, %cst_107 [1] : vector<64x128xf32> to vector<64xf32>
    %246 = vector.shape_cast %245 : vector<64xf32> to vector<64x1xf32>
    %cst_108 = arith.constant 1.280000e+02 : f32
    %247 = vector.broadcast %cst_108 : f32 to vector<64x1xf32>
    %248 = arith.divf %246, %247 : vector<64x1xf32>
    %cst_109 = arith.constant 9.99999974E-6 : f32
    %249 = vector.broadcast %cst_109 : f32 to vector<64x1xf32>
    %250 = arith.addf %248, %249 : vector<64x1xf32>
    %251 = math.rsqrt %250 : vector<64x1xf32>
    %252 = vector.broadcast %251 : vector<64x1xf32> to vector<64x128xf32>
    %253 = arith.mulf %243, %252 : vector<64x128xf32>
    %254 = vector.broadcast %235 : vector<1x128xf32> to vector<64x128xf32>
    %255 = arith.mulf %253, %254 : vector<64x128xf32>
    %256 = vector.broadcast %237 : vector<1x128xf32> to vector<64x128xf32>
    %257 = arith.addf %255, %256 : vector<64x128xf32>
    %258 = arith.truncf %257 : vector<64x128xf32> to vector<64x128xbf16>
    %c0_110 = arith.constant 0 : index
    %c0_111 = arith.constant 0 : index
    %c0_112 = arith.constant 0 : index
    %259 = vector.load %arg14[%c0_110, %c0_111, %c0_112] : memref<1x128x256xbf16, #tpu.memory_space<vmem>>, vector<1x128x256xbf16>
    %260 = vector.shape_cast %259 : vector<1x128x256xbf16> to vector<128x256xbf16>
    %cst_113 = arith.constant dense<0.000000e+00> : vector<64x256xf32>
    %261 = tpu.matmul %258, %260, %cst_113 {dimension_numbers = #tpu.dot_dimension_numbers<[1], [0], [0], [1], [0, 0, 1, 1], [], []>} : vector<64x128xbf16>, vector<128x256xbf16>, vector<64x256xf32> -> vector<64x256xf32>
    %c0_114 = arith.constant 0 : index
    %c0_115 = arith.constant 0 : index
    %c0_116 = arith.constant 0 : index
    %262 = vector.load %arg15[%c0_114, %c0_115, %c0_116] : memref<1x1x256xf32, #tpu.memory_space<vmem>>, vector<1x1x256xf32>
    %263 = vector.shape_cast %262 : vector<1x1x256xf32> to vector<1x256xf32>
    %264 = vector.broadcast %263 : vector<1x256xf32> to vector<64x256xf32>
    %265 = arith.addf %261, %264 : vector<64x256xf32>
    %cst_117 = arith.constant 0.000000e+00 : f32
    %266 = vector.broadcast %cst_117 : f32 to vector<64x256xf32>
    %267 = arith.maximumf %265, %266 : vector<64x256xf32>
    %268 = arith.truncf %267 : vector<64x256xf32> to vector<64x256xbf16>
    %c0_118 = arith.constant 0 : index
    %c0_119 = arith.constant 0 : index
    %c0_120 = arith.constant 0 : index
    %269 = vector.load %arg16[%c0_118, %c0_119, %c0_120] : memref<1x256x128xbf16, #tpu.memory_space<vmem>>, vector<1x256x128xbf16>
    %270 = vector.shape_cast %269 : vector<1x256x128xbf16> to vector<256x128xbf16>
    %cst_121 = arith.constant dense<0.000000e+00> : vector<64x128xf32>
    %271 = tpu.matmul %268, %270, %cst_121 {dimension_numbers = #tpu.dot_dimension_numbers<[1], [0], [0], [1], [0, 0, 1, 1], [], []>} : vector<64x256xbf16>, vector<256x128xbf16>, vector<64x128xf32> -> vector<64x128xf32>
    %c0_122 = arith.constant 0 : index
    %c0_123 = arith.constant 0 : index
    %c0_124 = arith.constant 0 : index
    %272 = vector.load %arg17[%c0_122, %c0_123, %c0_124] : memref<1x1x128xf32, #tpu.memory_space<vmem>>, vector<1x1x128xf32>
    %273 = vector.shape_cast %272 : vector<1x1x128xf32> to vector<1x128xf32>
    %274 = vector.broadcast %273 : vector<1x128xf32> to vector<64x128xf32>
    %275 = arith.addf %271, %274 : vector<64x128xf32>
    %276 = arith.addf %257, %275 : vector<64x128xf32>
    %c0_125 = arith.constant 0 : index
    %c0_126 = arith.constant 0 : index
    %c0_127 = arith.constant 0 : index
    %277 = vector.load %arg22[%c0_125, %c0_126, %c0_127] : memref<1x1x128xf32, #tpu.memory_space<vmem>>, vector<1x1x128xf32>
    %278 = vector.shape_cast %277 : vector<1x1x128xf32> to vector<1x128xf32>
    %c0_128 = arith.constant 0 : index
    %c0_129 = arith.constant 0 : index
    %c0_130 = arith.constant 0 : index
    %279 = vector.load %arg23[%c0_128, %c0_129, %c0_130] : memref<1x1x128xf32, #tpu.memory_space<vmem>>, vector<1x1x128xf32>
    %280 = vector.shape_cast %279 : vector<1x1x128xf32> to vector<1x128xf32>
    %cst_131 = arith.constant dense<0.000000e+00> : vector<64xf32>
    %281 = vector.multi_reduction <add>, %276, %cst_131 [1] : vector<64x128xf32> to vector<64xf32>
    %282 = vector.shape_cast %281 : vector<64xf32> to vector<64x1xf32>
    %cst_132 = arith.constant 1.280000e+02 : f32
    %283 = vector.broadcast %cst_132 : f32 to vector<64x1xf32>
    %284 = arith.divf %282, %283 : vector<64x1xf32>
    %285 = vector.broadcast %284 : vector<64x1xf32> to vector<64x128xf32>
    %286 = arith.subf %276, %285 : vector<64x128xf32>
    %287 = arith.mulf %286, %286 : vector<64x128xf32>
    %cst_133 = arith.constant dense<0.000000e+00> : vector<64xf32>
    %288 = vector.multi_reduction <add>, %287, %cst_133 [1] : vector<64x128xf32> to vector<64xf32>
    %289 = vector.shape_cast %288 : vector<64xf32> to vector<64x1xf32>
    %cst_134 = arith.constant 1.280000e+02 : f32
    %290 = vector.broadcast %cst_134 : f32 to vector<64x1xf32>
    %291 = arith.divf %289, %290 : vector<64x1xf32>
    %cst_135 = arith.constant 9.99999974E-6 : f32
    %292 = vector.broadcast %cst_135 : f32 to vector<64x1xf32>
    %293 = arith.addf %291, %292 : vector<64x1xf32>
    %294 = math.rsqrt %293 : vector<64x1xf32>
    %295 = vector.broadcast %294 : vector<64x1xf32> to vector<64x128xf32>
    %296 = arith.mulf %286, %295 : vector<64x128xf32>
    %297 = vector.broadcast %278 : vector<1x128xf32> to vector<64x128xf32>
    %298 = arith.mulf %296, %297 : vector<64x128xf32>
    %299 = vector.broadcast %280 : vector<1x128xf32> to vector<64x128xf32>
    %300 = arith.addf %298, %299 : vector<64x128xf32>
    %301 = vector.shape_cast %300 : vector<64x128xf32> to vector<8x8x128xf32>
    %c0_136 = arith.constant 0 : index
    %c0_137 = arith.constant 0 : index
    %c0_138 = arith.constant 0 : index
    %302 = vector.load %arg24[%c0_136, %c0_137, %c0_138] : memref<8x8x128xf32, #tpu.memory_space<vmem>>, vector<8x8x128xf32>
    tpu.vector_store %arg24[%c0_136, %c0_137, %c0_138], %301 {strides = array<i32>} : memref<8x8x128xf32, #tpu.memory_space<vmem>>, vector<8x8x128xf32>,
    return
  }
  func.func @transform_0(%arg0: i32, %arg1: i32) -> (i32, i32, i32) {
    %c0_i32 = arith.constant 0 : i32
    %c0_i32_0 = arith.constant 0 : i32
    %c0_i32_1 = arith.constant 0 : i32
    return %arg0, %c0_i32, %c0_i32_0 : i32, i32, i32
  }
  func.func @transform_1(%arg0: i32, %arg1: i32) -> (i32, i32) {
    %c0_i32 = arith.constant 0 : i32
    %c0_i32_0 = arith.constant 0 : i32
    return %arg0, %c0_i32 : i32, i32
  }
  func.func @transform_2(%arg0: i32, %arg1: i32) -> (i32, i32, i32) {
    %c0_i32 = arith.constant 0 : i32
    %c0_i32_0 = arith.constant 0 : i32
    %c0_i32_1 = arith.constant 0 : i32
    return %arg1, %c0_i32, %c0_i32_0 : i32, i32, i32
  }
  func.func @transform_3(%arg0: i32, %arg1: i32) -> (i32, i32, i32) {
    %c0_i32 = arith.constant 0 : i32
    %c0_i32_0 = arith.constant 0 : i32
    %c0_i32_1 = arith.constant 0 : i32
    return %arg1, %c0_i32, %c0_i32_0 : i32, i32, i32
  }
  func.func @transform_4(%arg0: i32, %arg1: i32) -> (i32, i32, i32) {
    %c0_i32 = arith.constant 0 : i32
    %c0_i32_0 = arith.constant 0 : i32
    %c0_i32_1 = arith.constant 0 : i32
    return %arg1, %c0_i32, %c0_i32_0 : i32, i32, i32
  }
  func.func @transform_5(%arg0: i32, %arg1: i32) -> (i32, i32, i32) {
    %c0_i32 = arith.constant 0 : i32
    %c0_i32_0 = arith.constant 0 : i32
    %c0_i32_1 = arith.constant 0 : i32
    return %arg1, %c0_i32, %c0_i32_0 : i32, i32, i32
  }
  func.func @transform_6(%arg0: i32, %arg1: i32) -> (i32, i32, i32) {
    %c0_i32 = arith.constant 0 : i32
    %c0_i32_0 = arith.constant 0 : i32
    %c0_i32_1 = arith.constant 0 : i32
    return %arg1, %c0_i32, %c0_i32_0 : i32, i32, i32
  }
  func.func @transform_7(%arg0: i32, %arg1: i32) -> (i32, i32, i32) {
    %c0_i32 = arith.constant 0 : i32
    %c0_i32_0 = arith.constant 0 : i32
    %c0_i32_1 = arith.constant 0 : i32
    return %arg1, %c0_i32, %c0_i32_0 : i32, i32, i32
  }
  func.func @transform_8(%arg0: i32, %arg1: i32) -> (i32, i32, i32) {
    %c0_i32 = arith.constant 0 : i32
    %c0_i32_0 = arith.constant 0 : i32
    %c0_i32_1 = arith.constant 0 : i32
    return %arg1, %c0_i32, %c0_i32_0 : i32, i32, i32
  }
  func.func @transform_9(%arg0: i32, %arg1: i32) -> (i32, i32, i32) {
    %c0_i32 = arith.constant 0 : i32
    %c0_i32_0 = arith.constant 0 : i32
    %c0_i32_1 = arith.constant 0 : i32
    return %arg1, %c0_i32, %c0_i32_0 : i32, i32, i32
  }
  func.func @transform_10(%arg0: i32, %arg1: i32) -> (i32, i32, i32) {
    %c0_i32 = arith.constant 0 : i32
    %c0_i32_0 = arith.constant 0 : i32
    %c0_i32_1 = arith.constant 0 : i32
    return %arg1, %c0_i32, %c0_i32_0 : i32, i32, i32
  }
  func.func @transform_11(%arg0: i32, %arg1: i32) -> (i32, i32, i32) {
    %c0_i32 = arith.constant 0 : i32
    %c0_i32_0 = arith.constant 0 : i32
    %c0_i32_1 = arith.constant 0 : i32
    return %arg1, %c0_i32, %c0_i32_0 : i32, i32, i32
  }
  func.func @transform_12(%arg0: i32, %arg1: i32) -> (i32, i32, i32) {
    %c0_i32 = arith.constant 0 : i32
    %c0_i32_0 = arith.constant 0 : i32
    %c0_i32_1 = arith.constant 0 : i32
    return %arg1, %c0_i32, %c0_i32_0 : i32, i32, i32
  }
  func.func @transform_13(%arg0: i32, %arg1: i32) -> (i32, i32, i32) {
    %c0_i32 = arith.constant 0 : i32
    %c0_i32_0 = arith.constant 0 : i32
    %c0_i32_1 = arith.constant 0 : i32
    return %arg1, %c0_i32, %c0_i32_0 : i32, i32, i32
  }
  func.func @transform_14(%arg0: i32, %arg1: i32) -> (i32, i32, i32) {
    %c0_i32 = arith.constant 0 : i32
    %c0_i32_0 = arith.constant 0 : i32
    %c0_i32_1 = arith.constant 0 : i32
    return %arg1, %c0_i32, %c0_i32_0 : i32, i32, i32
  }
  func.func @transform_15(%arg0: i32, %arg1: i32) -> (i32, i32, i32) {
    %c0_i32 = arith.constant 0 : i32
    %c0_i32_0 = arith.constant 0 : i32
    %c0_i32_1 = arith.constant 0 : i32
    return %arg1, %c0_i32, %c0_i32_0 : i32, i32, i32
  }
  func.func @transform_16(%arg0: i32, %arg1: i32) -> (i32, i32, i32) {
    %c0_i32 = arith.constant 0 : i32
    %c0_i32_0 = arith.constant 0 : i32
    %c0_i32_1 = arith.constant 0 : i32
    return %arg1, %c0_i32, %c0_i32_0 : i32, i32, i32
  }
  func.func @transform_17(%arg0: i32, %arg1: i32) -> (i32, i32, i32) {
    %c0_i32 = arith.constant 0 : i32
    %c0_i32_0 = arith.constant 0 : i32
    %c0_i32_1 = arith.constant 0 : i32
    return %arg1, %c0_i32, %c0_i32_0 : i32, i32, i32
  }
  func.func @transform_18(%arg0: i32, %arg1: i32) -> (i32, i32, i32) {
    %c0_i32 = arith.constant 0 : i32
    %c0_i32_0 = arith.constant 0 : i32
    %c0_i32_1 = arith.constant 0 : i32
    return %arg1, %c0_i32, %c0_i32_0 : i32, i32, i32
  }
  func.func @transform_19(%arg0: i32, %arg1: i32) -> (i32, i32, i32) {
    %c0_i32 = arith.constant 0 : i32
    %c0_i32_0 = arith.constant 0 : i32
    %c0_i32_1 = arith.constant 0 : i32
    return %arg1, %c0_i32, %c0_i32_0 : i32, i32, i32
  }
  func.func @transform_20(%arg0: i32, %arg1: i32) -> (i32, i32, i32) {
    %c0_i32 = arith.constant 0 : i32
    %c0_i32_0 = arith.constant 0 : i32
    %c0_i32_1 = arith.constant 0 : i32
    return %arg1, %c0_i32, %c0_i32_0 : i32, i32, i32
  }
  func.func @transform_21(%arg0: i32, %arg1: i32) -> (i32, i32, i32) {
    %c0_i32 = arith.constant 0 : i32
    %c0_i32_0 = arith.constant 0 : i32
    %c0_i32_1 = arith.constant 0 : i32
    return %arg1, %c0_i32, %c0_i32_0 : i32, i32, i32
  }
  func.func @transform_22(%arg0: i32, %arg1: i32) -> (i32, i32, i32) {
    %c0_i32 = arith.constant 0 : i32
    %c0_i32_0 = arith.constant 0 : i32
    %c0_i32_1 = arith.constant 0 : i32
    return %arg0, %c0_i32, %c0_i32_0 : i32, i32, i32
  }
}

</mosaic_0001>

<bundles_post_ra>
// kernel: _lambda_.3
= control target key start
LH: loop header
LB: loop body
LE: loop exit
PB: predicated region body
PF: predicated region fallthrough
CT: control target
= control target key end

     0   :  { %v544_v2 = vmov 0   ;;  %s751_s0 = inlined_call_operand.vmem [shape: f32[64,128], index: 0, kind: input, shape index: {}]   ;;  %s752_s1 = inlined_call_operand.vmem [shape: bf16[128,512], index: 1, kind: input, shape index: {}]   ;;  %s753_s2 = inlined_call_operand.vmem [shape: f32[1,512], index: 2, kind: input, shape index: {}]   ;;  %s754_s3 = inlined_call_operand.hbm [shape: f32[64,512], index: 3, kind: output, shape index: {}]  }
   0x1   :  { %v472_v0 = vld [vmem:[%s752_s1 + $0x4] ss:$16 sps:$4 sm:$0xff]   ;;  %v474_v1 = vld [vmem:[%s752_s1 + $0xc] ss:$16 sps:$4 sm:$0xff]   ;;  %274 = vmatprep.mubr.bf16.mxu0 %v544_v2  ;;  %347 = vmatprep.mubr.bf16.mxu1 %v544_v2  ;;  %v476_v3 = vld [vmem:[%s752_s1] ss:$16 sps:$4 sm:$0xff]  }
   0x2   :  { %242 = vmatprep.subr.bf16.mxu0 %v472_v0  ;;  %v477_v4 = vld [vmem:[%s752_s1 + $0x8] ss:$16 sps:$4 sm:$0xff]   ;;  %315 = vmatprep.subr.bf16.mxu1 %v474_v1  ;;  %v478_v5 = vld [vmem:[%s752_s1 + $0x24] ss:$16 sps:$4 sm:$0xff]   ;;  %v480_v6 = vld [vmem:[%s752_s1 + $0x2c] ss:$16 sps:$4 sm:$0xff]  }
   0x3   :  { %243 = vmatpush1.bf16.msra.mxu0 %v476_v3  ;;  %316 = vmatpush1.bf16.msra.mxu1 %v477_v4  ;;  %v482_v7 = vld [vmem:[%s752_s1 + $0x20] ss:$16 sps:$4 sm:$0xff]   ;;  %v483_v8 = vld [vmem:[%s752_s1 + $0x28] ss:$16 sps:$4 sm:$0xff]   ;;  %v484_v9 = vld [vmem:[%s752_s1 + $0x44] ss:$16 sps:$4 sm:$0xff]  }
   0x4   :  { %244 = vmatprep.subr.bf16.mxu0 %v478_v5  ;;  %317 = vmatprep.subr.bf16.mxu1 %v480_v6  ;;  %v486_v10 = vld [vmem:[%s752_s1 + $0x4c] ss:$16 sps:$4 sm:$0xff]   ;;  %v488_v11 = vld [vmem:[%s752_s1 + $0x40] ss:$16 sps:$4 sm:$0xff]   ;;  %v489_v12 = vld [vmem:[%s752_s1 + $0x48] ss:$16 sps:$4 sm:$0xff]  }
   0x5   :  { %v490_v13 = vld [vmem:[%s752_s1 + $0x64] ss:$16 sps:$4 sm:$0xff]   ;;  %v492_v14 = vld [vmem:[%s752_s1 + $0x6c] ss:$16 sps:$4 sm:$0xff]   ;;  %v494_v15 = vld [vmem:[%s752_s1 + $0x60] ss:$16 sps:$4 sm:$0xff]  }
   0x6   :  { %v495_v16 = vld [vmem:[%s752_s1 + $0x68] ss:$16 sps:$4 sm:$0xff]   ;;  %v496_v17 = vld [vmem:[%s752_s1 + $0x84] ss:$16 sps:$4 sm:$0xff]   ;;  %v498_v18 = vld [vmem:[%s752_s1 + $0x8c] ss:$16 sps:$4 sm:$0xff]  }
   0x7   :  { %245 = vmatpush1.bf16.msra.mxu0 %v482_v7  ;;  %318 = vmatpush1.bf16.msra.mxu1 %v483_v8  ;;  %v500_v19 = vld [vmem:[%s752_s1 + $0x80] ss:$16 sps:$4 sm:$0xff]   ;;  %v501_v20 = vld [vmem:[%s752_s1 + $0x88] ss:$16 sps:$4 sm:$0xff]   ;;  %v502_v21 = vld [vmem:[%s752_s1 + $0xa4] ss:$16 sps:$4 sm:$0xff]  }
   0x8   :  { %246 = vmatprep.subr.bf16.mxu0 %v484_v9  ;;  %319 = vmatprep.subr.bf16.mxu1 %v486_v10  ;;  %v504_v22 = vld [vmem:[%s752_s1 + $0xac] ss:$16 sps:$4 sm:$0xff]   ;;  %v506_v23 = vld [vmem:[%s752_s1 + $0xa0] ss:$16 sps:$4 sm:$0xff]   ;;  %v507_v24 = vld [vmem:[%s752_s1 + $0xa8] ss:$16 sps:$4 sm:$0xff]  }
   0x9   :  { %v508_v25 = vld [vmem:[%s752_s1 + $0xc4] ss:$16 sps:$4 sm:$0xff]   ;;  %v510_v26 = vld [vmem:[%s752_s1 + $0xcc] ss:$16 sps:$4 sm:$0xff]   ;;  %v512_v27 = vld [vmem:[%s752_s1 + $0xc0] ss:$16 sps:$4 sm:$0xff]  }
   0xa   :  { %v513_v28 = vld [vmem:[%s752_s1 + $0xc8] ss:$16 sps:$4 sm:$0xff]  }
   0xb   :  { %247 = vmatpush1.bf16.msra.mxu0 %v488_v11  ;;  %320 = vmatpush1.bf16.msra.mxu1 %v489_v12 }
   0xc   :  { %248 = vmatprep.subr.bf16.mxu0 %v490_v13  ;;  %321 = vmatprep.subr.bf16.mxu1 %v492_v14 }
   0xf   :  { %249 = vmatpush1.bf16.msra.mxu0 %v494_v15  ;;  %322 = vmatpush1.bf16.msra.mxu1 %v495_v16 }
  0x10   :  { %250 = vmatprep.subr.bf16.mxu0 %v496_v17  ;;  %323 = vmatprep.subr.bf16.mxu1 %v498_v18 }
  0x13   :  { %251 = vmatpush1.bf16.msra.mxu0 %v500_v19  ;;  %324 = vmatpush1.bf16.msra.mxu1 %v501_v20 }
  0x14   :  { %252 = vmatprep.subr.bf16.mxu0 %v502_v21  ;;  %325 = vmatprep.subr.bf16.mxu1 %v504_v22 }
  0x17   :  { %253 = vmatpush1.bf16.msra.mxu0 %v506_v23  ;;  %326 = vmatpush1.bf16.msra.mxu1 %v507_v24 }
  0x18   :  { %8 = vsyncpa [#allocation3], 0  ;;  %254 = vmatprep.subr.bf16.mxu0 %v508_v25  ;;  %327 = vmatprep.subr.bf16.mxu1 %v510_v26  ;;  %v514_v29 = vld [vmem:[%s752_s1 + $0xe4] ss:$16 sps:$4 sm:$0xff]   ;;  %v516_v30 = vld [vmem:[%s752_s1 + $0xec] ss:$16 sps:$4 sm:$0xff]   ;;  %v62_v45 = vlaneseq }
  0x19   :  { %v518_v31 = vld [vmem:[%s752_s1 + $0xe0] ss:$16 sps:$4 sm:$0xff]   ;;  %v519_v32 = vld [vmem:[%s752_s1 + $0xe8] ss:$16 sps:$4 sm:$0xff]  }
  0x1a   :  { %v16_v33 = vld [vmem:[%s751_s0] sm:$0xff]  ;;  %v17_v34 = vld [vmem:[%s751_s0 + $0x8] sm:$0xff]  ;;  %v18_v36 = vld [vmem:[%s751_s0 + $0x10] sm:$0xff]  ;;  %v63_v46 = vshrl.u32 %v62_v45, 7 }
  0x1b   :  { %255 = vmatpush1.bf16.msra.mxu0 %v512_v27  ;;  %328 = vmatpush1.bf16.msra.mxu1 %v513_v28  ;;  %v24_v35 = vpack.c.bf16 %v17_v34, %v16_v33  ;;  %v19_v37 = vld [vmem:[%s751_s0 + $0x18] sm:$0xff]  ;;  %v20_v39 = vld [vmem:[%s751_s0 + $0x20] sm:$0xff]  ;;  %v21_v40 = vld [vmem:[%s751_s0 + $0x28] sm:$0xff] }
  0x1c   :  { %256 = vmatprep.subr.bf16.mxu0 %v514_v29  ;;  %329 = vmatprep.subr.bf16.mxu1 %v516_v30  ;;  %v25_v38 = vpack.c.bf16 %v19_v37, %v18_v36  ;;  %v26_v41 = vpack.c.bf16 %v21_v40, %v20_v39  ;;  %v22_v42 = vld [vmem:[%s751_s0 + $0x30] sm:$0xff]  ;;  %v23_v43 = vld [vmem:[%s751_s0 + $0x38] sm:$0xff]  ;;  %v64_v47 = vsub.s32 0, %v63_v46  ;;  %v72_v48 = vsub.s32 2, %v63_v46  ;;  %v60_v49 = vld [vmem:[%s753_s2] sm:$0xf] }
  0x1d   :  { %v27_v44 = vpack.c.bf16 %v23_v43, %v22_v42  ;;  %v68_v50 = vsub.s32 1, %v63_v46  ;;  %v76_v51 = vsub.s32 3, %v63_v46  ;;  %s545_s0 = smov [#allocation2]  }
  0x1e   :  { %v699_v52 = vrot.slane %v60_v49, %v64_v47  ;;  %v701_v53 = vrot.slane %v60_v49, %v72_v48  ;;  %s425_s2 = sshll.u32 %s545_s0, 4  ;;  %s426_s2 = int_to_ptr.vmem [resolvable:$true] %s425_s2 }
  0x1f   :  { %257 = vmatpush1.bf16.msra.mxu0 %v518_v31  ;;  %330 = vmatpush1.bf16.msra.mxu1 %v519_v32  ;;  %v703_v54 = vrot.slane %v60_v49, %v68_v50  ;;  %v705_v55 = vrot.slane %v60_v49, %v76_v51  ;;  %s520_s12 = scalar_lea.vmem %s426_s2, 4096  ;;  %p525_p1 = scmp.lt.s32.totalorder %s426_s2, %s426_s2 }
  0x20   :  { %p521_p0 = scmp.ne.s32.totalorder %s426_s2, %s520_s12  ;;  %p526_p2 = scmp.lt.s32.totalorder %s520_s12, %s520_s12 }
  0x22   :  { %275 = vmatmul.mubr.bf16.vlgmr.msra.gmra.mrb[0].mxu0 %v24_v35  ;;  %348 = vmatmul.mubr.bf16.vlgmr.msra.gmra.mrb[0].mxu1 %v24_v35  ;;  %p527_p3 = por %p526_p2, %p525_p1 }
  0x23   :  { %284 = vmatprep.mubr.bf16.mxu0 %v544_v2  ;;  %357 = vmatprep.mubr.bf16.mxu1 %v544_v2 }
  0x24   :  { %p528_p4 = pnand %p527_p3, %p521_p0 }
  0x2a   :  { %285 = vmatmul.mubr.bf16.gmra.mrb[4].mxu0 %v25_v38  ;;  %358 = vmatmul.mubr.bf16.gmra.mrb[4].mxu1 %v25_v38 }
  0x2b   :  { %294 = vmatprep.mubr.bf16.mxu0 %v544_v2  ;;  %367 = vmatprep.mubr.bf16.mxu1 %v544_v2 }
  0x32   :  { %295 = vmatmul.mubr.bf16.gmra.mrb[8].mxu0 %v26_v41  ;;  %368 = vmatmul.mubr.bf16.gmra.mrb[8].mxu1 %v26_v41 }
  0x33   :  { %304 = vmatprep.mubr.bf16.mxu0 %v544_v2  ;;  %377 = vmatprep.mubr.bf16.mxu1 %v544_v2 }
  0x3a   :  { %305 = vmatmul.mubr.bf16.gmra.mrb[12].mxu0 %v27_v44  ;;  %378 = vmatmul.mubr.bf16.gmra.mrb[12].mxu1 %v27_v44 }
  0xf5   :  { %v276_v56 = vpop.f32.mrb[0].mxu0  ;;  %v349_v57 = vpop.f32.mrb[0].mxu1 }
  0xf6   :  { %v277_v58 = vadd.f32 %v276_v56, %v699_v52  ;;  %v350_v59 = vadd.f32 %v349_v57, %v701_v53  ;;  %v278_v60 = vpop.f32.mrb[1].mxu0  ;;  %v351_v61 = vpop.f32.mrb[1].mxu1 }
  0xf7   :  { %v279_v62 = vadd.f32 %v278_v60, %v703_v54  ;;  %v352_v63 = vadd.f32 %v351_v61, %v705_v55  ;;  %v280_v0 = vpop.f32.mrb[2].mxu0  ;;  %v353_v1 = vpop.f32.mrb[2].mxu1 }
  0xf8   :  { %388 = vst [vmem:[#allocation2] sm:$0xff] %v277_v58  ;;  %390 = vst [vmem:[#allocation2 + $0x10] sm:$0xff] %v350_v59  ;;  %v281_v2 = vadd.f32 %v280_v0, %v699_v52  ;;  %v354_v3 = vadd.f32 %v353_v1, %v701_v53  ;;  %v282_v4 = vpop.f32.mrb[3].mxu0  ;;  %v355_v5 = vpop.f32.mrb[3].mxu1 }
  0xf9   :  { %389 = vst [vmem:[#allocation2 + $0x8] sm:$0xff] %v279_v62  ;;  %391 = vst [vmem:[#allocation2 + $0x18] sm:$0xff] %v352_v63  ;;  %v283_v6 = vadd.f32 %v282_v4, %v703_v54  ;;  %v356_v7 = vadd.f32 %v355_v5, %v705_v55 }
  0xfa   :  { %392 = vst [vmem:[#allocation2 + $0x20] sm:$0xff] %v281_v2  ;;  %394 = vst [vmem:[#allocation2 + $0x30] sm:$0xff] %v354_v3 }
  0xfb   :  { %393 = vst [vmem:[#allocation2 + $0x28] sm:$0xff] %v283_v6  ;;  %395 = vst [vmem:[#allocation2 + $0x38] sm:$0xff] %v356_v7 }
  0xfd   :  { %v286_v8 = vpop.f32.mrb[4].mxu0  ;;  %v359_v9 = vpop.f32.mrb[4].mxu1 }
  0xfe   :  { %v287_v10 = vadd.f32 %v286_v8, %v699_v52  ;;  %v360_v11 = vadd.f32 %v359_v9, %v701_v53  ;;  %v288_v12 = vpop.f32.mrb[5].mxu0  ;;  %v361_v13 = vpop.f32.mrb[5].mxu1 }
  0xff   :  { %v289_v14 = vadd.f32 %v288_v12, %v703_v54  ;;  %v362_v15 = vadd.f32 %v361_v13, %v705_v55  ;;  %v290_v16 = vpop.f32.mrb[6].mxu0  ;;  %v363_v17 = vpop.f32.mrb[6].mxu1 }
 0x100   :  { %396 = vst [vmem:[#allocation2 + $0x40] sm:$0xff] %v287_v10  ;;  %398 = vst [vmem:[#allocation2 + $0x50] sm:$0xff] %v360_v11  ;;  %v291_v18 = vadd.f32 %v290_v16, %v699_v52  ;;  %v364_v19 = vadd.f32 %v363_v17, %v701_v53  ;;  %v292_v20 = vpop.f32.mrb[7].mxu0  ;;  %v365_v21 = vpop.f32.mrb[7].mxu1 }
 0x101   :  { %397 = vst [vmem:[#allocation2 + $0x48] sm:$0xff] %v289_v14  ;;  %399 = vst [vmem:[#allocation2 + $0x58] sm:$0xff] %v362_v15  ;;  %v293_v22 = vadd.f32 %v292_v20, %v703_v54  ;;  %v366_v23 = vadd.f32 %v365_v21, %v705_v55 }
 0x102   :  { %400 = vst [vmem:[#allocation2 + $0x60] sm:$0xff] %v291_v18  ;;  %402 = vst [vmem:[#allocation2 + $0x70] sm:$0xff] %v364_v19 }
 0x103   :  { %401 = vst [vmem:[#allocation2 + $0x68] sm:$0xff] %v293_v22  ;;  %403 = vst [vmem:[#allocation2 + $0x78] sm:$0xff] %v366_v23 }
 0x105   :  { %v296_v24 = vpop.f32.mrb[8].mxu0  ;;  %v369_v25 = vpop.f32.mrb[8].mxu1 }
 0x106   :  { %v297_v26 = vadd.f32 %v296_v24, %v699_v52  ;;  %v370_v27 = vadd.f32 %v369_v25, %v701_v53  ;;  %v298_v28 = vpop.f32.mrb[9].mxu0  ;;  %v371_v29 = vpop.f32.mrb[9].mxu1 }
 0x107   :  { %v299_v30 = vadd.f32 %v298_v28, %v703_v54  ;;  %v372_v31 = vadd.f32 %v371_v29, %v705_v55  ;;  %v300_v32 = vpop.f32.mrb[10].mxu0  ;;  %v373_v33 = vpop.f32.mrb[10].mxu1 }
 0x108   :  { %404 = vst [vmem:[#allocation2 + $0x80] sm:$0xff] %v297_v26  ;;  %406 = vst [vmem:[#allocation2 + $0x90] sm:$0xff] %v370_v27  ;;  %v301_v34 = vadd.f32 %v300_v32, %v699_v52  ;;  %v374_v35 = vadd.f32 %v373_v33, %v701_v53  ;;  %v302_v36 = vpop.f32.mrb[11].mxu0  ;;  %v375_v37 = vpop.f32.mrb[11].mxu1 }
 0x109   :  { %405 = vst [vmem:[#allocation2 + $0x88] sm:$0xff] %v299_v30  ;;  %407 = vst [vmem:[#allocation2 + $0x98] sm:$0xff] %v372_v31  ;;  %v303_v38 = vadd.f32 %v302_v36, %v703_v54  ;;  %v376_v39 = vadd.f32 %v375_v37, %v705_v55 }
 0x10a   :  { %408 = vst [vmem:[#allocation2 + $0xa0] sm:$0xff] %v301_v34  ;;  %410 = vst [vmem:[#allocation2 + $0xb0] sm:$0xff] %v374_v35 }
 0x10b   :  { %409 = vst [vmem:[#allocation2 + $0xa8] sm:$0xff] %v303_v38  ;;  %411 = vst [vmem:[#allocation2 + $0xb8] sm:$0xff] %v376_v39 }
 0x10d   :  { %v306_v40 = vpop.f32.mrb[12].mxu0  ;;  %v379_v41 = vpop.f32.mrb[12].mxu1 }
 0x10e   :  { %v307_v42 = vadd.f32 %v306_v40, %v699_v52  ;;  %v380_v43 = vadd.f32 %v379_v41, %v701_v53  ;;  %v308_v44 = vpop.f32.mrb[13].mxu0  ;;  %v381_v45 = vpop.f32.mrb[13].mxu1 }
 0x10f   :  { %v309_v46 = vadd.f32 %v308_v44, %v703_v54  ;;  %v382_v47 = vadd.f32 %v381_v45, %v705_v55  ;;  %v310_v48 = vpop.f32.mrb[14].mxu0  ;;  %v383_v49 = vpop.f32.mrb[14].mxu1 }
 0x110   :  { %412 = vst [vmem:[#allocation2 + $0xc0] sm:$0xff] %v307_v42  ;;  %414 = vst [vmem:[#allocation2 + $0xd0] sm:$0xff] %v380_v43  ;;  %v311_v50 = vadd.f32 %v310_v48, %v699_v52  ;;  %v384_v51 = vadd.f32 %v383_v49, %v701_v53  ;;  %v312_v56 = vpop.f32.mrb[15].mxu0  ;;  %v385_v57 = vpop.f32.mrb[15].mxu1 }
 0x111   :  { %413 = vst [vmem:[#allocation2 + $0xc8] sm:$0xff] %v309_v46  ;;  %415 = vst [vmem:[#allocation2 + $0xd8] sm:$0xff] %v382_v47  ;;  %v313_v58 = vadd.f32 %v312_v56, %v703_v54  ;;  %v386_v59 = vadd.f32 %v385_v57, %v705_v55 }
 0x112   :  { %416 = vst [vmem:[#allocation2 + $0xe0] sm:$0xff] %v311_v50  ;;  %418 = vst [vmem:[#allocation2 + $0xf0] sm:$0xff] %v384_v51 }
 0x113   :  { %417 = vst [vmem:[#allocation2 + $0xe8] sm:$0xff] %v313_v58  ;;  %419 = vst [vmem:[#allocation2 + $0xf8] sm:$0xff] %v386_v59 }
 0x114   :  { %531 = shalt.err (!%p528_p4)
}
 0x115   :  { %s532_s15 = scalar_lea.hbm %s754_s3, 4096 }
 0x116   :  { %p533_p5 = scmp.ne.s32.totalorder %s754_s3, %s532_s15  ;;  %p536_p6 = scmp.lt.u32.totalorder %s532_s15, %s754_s3 }
 0x118   :  { %p538_p7 = pnand %p536_p6, %p533_p5 }
 0x11a   :  { %541 = shalt.err (!%p538_p7)
}
 0x11b   :  { %s546_s20 = smov 512   ;;  %s547_s21 = smov 32  }
 0x11c   :  { %431 = dma.vmem_to_hbm [thread:$0]  %s426_s2, 4096, %s754_s3, [#allocation3], %s546_s20, %s546_s20, %s547_s21  }
 0x11d   :  { %542 = dma.done.wait [#allocation3], 4096  }
 0x11e   :  { %543 = vsyncadd [#allocation3], 4294963200 }
 0x11f   :  { %435 = vsyncpa [#allocation3], 1 }

// kernel: _lambda_.2
= control target key start
LH: loop header
LB: loop body
LE: loop exit
PB: predicated region body
PF: predicated region fallthrough
CT: control target
= control target key end

     0   :  { %s12546_s28 = smov 0   ;;  %s12548_s29 = smov 0   ;;  %s15049_s0 = inlined_call_operand.vmem [shape: f32[8,8,128], index: 0, kind: input, shape index: {}]   ;;  %s15050_s1 = inlined_call_operand.vmem [shape: bf16[128,128], index: 1, kind: input, shape index: {}]   ;;  %s15051_s2 = inlined_call_operand.vmem [shape: bf16[2,128,384], index: 2, kind: input, shape index: {}]   ;;  %s15052_s3 = inlined_call_operand.vmem [shape: f32[2,1,384], index: 3, kind: input, shape index: {}]   ;;  %s15053_s4 = inlined_call_operand.vmem [shape: bf16[2,128,128], index: 4, kind: input, shape index: {}]   ;;  %s15054_s5 = inlined_call_operand.vmem [shape: f32[2,1,128], index: 5, kind: input, shape index: {}]   ;;  %s15055_s6 = inlined_call_operand.vmem [shape: bf16[2,128,128], index: 6, kind: input, shape index: {}]   ;;  %s15056_s7 = inlined_call_operand.vmem [shape: f32[2,1,128], index: 7, kind: input, shape index: {}]   ;;  %s15057_s8 = inlined_call_operand.vmem [shape: bf16[2,128,256], index: 8, kind: input, shape index: {}]   ;;  %s15058_s9 = inlined_call_operand.vmem [shape: f32[2,1,256], index: 9, kind: input, shape index: {}]   ;;  %s15059_s10 = inlined_call_operand.vmem [shape: bf16[2,128,128], index: 10, kind: input, shape index: {}]   ;;  %s15060_s11 = inlined_call_operand.vmem [shape: f32[2,1,128], index: 11, kind: input, shape index: {}]   ;;  %s15061_s12 = inlined_call_operand.vmem [shape: bf16[2,128,256], index: 12, kind: input, shape index: {}]   ;;  %s15062_s13 = inlined_call_operand.vmem [shape: f32[2,1,256], index: 13, kind: input, shape index: {}]   ;;  %s15063_s14 = inlined_call_operand.vmem [shape: bf16[2,256,128], index: 14, kind: input, shape index: {}]   ;;  %s15064_s15 = inlined_call_operand.vmem [shape: f32[2,1,128], index: 15, kind: input, shape index: {}]   ;;  %s15065_s16 = inlined_call_operand.vmem [shape: f32[2,1,128], index: 16, kind: input, shape index: {}, may-alias: {16,18,20}]   ;;  %s15066_s17 = inlined_call_operand.vmem [shape: f32[2,1,128], index: 17, kind: input, shape index: {}, may-alias: {17,19,21}]   ;;  %s15067_s18 = inlined_call_operand.vmem [shape: f32[2,1,128], index: 18, kind: input, shape index: {}, may-alias: {16,18,20}]   ;;  %s15068_s19 = inlined_call_operand.vmem [shape: f32[2,1,128], index: 19, kind: input, shape index: {}, may-alias: {17,19,21}]   ;;  %s15069_s20 = inlined_call_operand.vmem [shape: f32[2,1,128], index: 20, kind: input, shape index: {}, may-alias: {16,18,20}]   ;;  %s15070_s21 = inlined_call_operand.vmem [shape: f32[2,1,128], index: 21, kind: input, shape index: {}, may-alias: {17,19,21}]   ;;  %s15071_s22 = inlined_call_operand.vmem [shape: f32[8,8,128], index: 22, kind: output, shape index: {}]  }
   0x1   :  { %15085 = sst [smem:[#allocation10_spill]] %s15049_s0 }
   0x2   :  { %15086 = sst [smem:[#allocation11_spill]] %s15050_s1 }
   0x3   :  { %15087 = sst [smem:[#allocation12_spill]] %s15051_s2 }
   0x4   :  { %15088 = sst [smem:[#allocation13_spill]] %s15052_s3  ;;  %s12544_s3 = smov 0  }
   0x5   :  { %15089 = sst [smem:[#allocation14_spill]] %s15053_s4 }
   0x6   :  { %15090 = sst [smem:[#allocation15_spill]] %s15054_s5 }
   0x7   :  { %15091 = sst [smem:[#allocation16_spill]] %s15055_s6 }
   0x8   :  { %15092 = sst [smem:[#allocation17_spill]] %s15056_s7 }
   0x9   :  { %15093 = sst [smem:[#allocation18_spill]] %s15057_s8 }
   0xa   :  { %15094 = sst [smem:[#allocation19_spill]] %s15058_s9 }
   0xb   :  { %15095 = sst [smem:[#allocation20_spill]] %s15059_s10 }
   0xc   :  { %15096 = sst [smem:[#allocation21_spill]] %s15061_s12 }
   0xd   :  { %15097 = sst [smem:[#allocation22_spill]] %s15062_s13 }
   0xe   :  { %15098 = sst [smem:[#allocation23_spill]] %s15063_s14 }
   0xf   :  { %15099 = sst [smem:[#allocation24_spill]] %s15064_s15 }
  0x10   :  { %15100 = sst [smem:[#allocation25_spill]] %s15067_s18 }
  0x11   :  { %15101 = sst [smem:[#allocation26_spill]] %s15068_s19 }
  0x12   :  { %15102 = sst [smem:[#allocation27_spill]] %s15069_s20 }
  0x13   :  { %15103 = sst [smem:[#allocation28_spill]] %s15070_s21 }
  0x14   :  { %15104 = sst [smem:[#allocation29_spill]] %s15071_s22 }
  0x15 LB: > { %15105 = sst [smem:[#allocation3_spill]] %s12413_s3  ;;  %s41_s30 = sadd.s32 1, %s12417_s28  ;;  %s12421_s29 = sphi %s12548_s29, %s32_s29   ;;  %s12417_s28 = sphi %s12546_s28, %s15154_s28   ;;  %s12413_s3 = sphi %s12544_s3, %s15153_s3  }
  0x16   : > { %15106 = sst [smem:[#allocation4_spill]] %s12417_s28  ;;  %p10442_p0 = scmp.ge.s32.totalorder %s12421_s29, 1 }
  0x17   : > { %15107 = sst [smem:[#allocation5_spill]] %s12421_s29  ;;  %p42_p1 = scmp.ge.s32.totalorder %s41_s30, 2 }
  0x18   : > { %p813_p2 = scmp.lt.s32.totalorder %s12421_s29, 3 }
  0x19   : > { %s15156_s30 = smov (%p42_p1, %s41_s30), 0 }
  0x1a   : > { %15108 = sst [smem:[#allocation6_spill]] %s15156_s30  ;;  %p814_p3 = pnand %p10442_p0, %p813_p2 }
  0x1c   : > { %817 = sbr.rel (%p814_p3) target bundleno = 8108 (0x1fac), region = 108 }
  0x23   : > { %p969_p4 = scmp.lt.s32.totalorder %s12413_s3, 1  ;;  %s15109_s6 = sld [smem:[#allocation14_spill]] }
  0x24   : > { %s15111_s27 = sld [smem:[#allocation12_spill]]  ;;  %s15113_s19 = sld [smem:[#allocation13_spill]] }
  0x25   : > { %s12566_s4 = scalar_select %p969_p4, %s12413_s3, 1 }
  0x26   : > { %s15116_s8 = sld [smem:[#allocation18_spill]]  ;;  %s15117_s9 = sld [smem:[#allocation19_spill]] }
  0x27   : > { %s11931_s0 = smul.u32 192, %s12566_s4  ;;  %s10701_s23 = sshll.u32 %s12566_s4, 6 }
  0x28   : > { %s11932_s1 = smul.u32 3, %s12566_s4  ;;  %s10703_s28 = sshll.u32 %s12566_s4, 7 }
  0x29   : > { %s12574_s25 = scalar_lea.vmem %s15109_s6, %s10701_s23  ;;  %s15114_s6 = sld [smem:[#allocation16_spill]] }
  0x2a   : > { %15110 = sst [smem:[#allocation7_spill]] %s12574_s25  ;;  %s12579_s30 = scalar_lea.vmem %s15111_s27, %s11931_s0 }
  0x2b   : > { %s12588_s18 = scalar_lea.vmem %s15113_s19, %s11932_s1  ;;  %s10450_s19 = sshll.u32 %s12566_s4, 1 }
  0x2c   : > { %s12603_s20 = scalar_lea.vmem %s15116_s8, %s10703_s28  ;;  %s12609_s27 = scalar_lea.vmem %s15117_s9, %s10450_s19 }
  0x2d   : > { %s15118_s10 = sld [smem:[#allocation20_spill]]  ;;  %s15119_s12 = sld [smem:[#allocation21_spill]] }
  0x2e   : > { %s15120_s13 = sld [smem:[#allocation22_spill]]  ;;  %s15122_s14 = sld [smem:[#allocation23_spill]] }
  0x2f   : > { %s12593_s25 = scalar_lea.vmem %s15114_s6, %s10701_s23  ;;  %s15125_s29 = sld [smem:[#allocation25_spill]] }
  0x30   : > { %s15128_s2 = sld [smem:[#allocation28_spill]]  ;;  %s15129_s7 = sld [smem:[#allocation3_spill]] }
  0x33   : > { %s12614_s6 = scalar_lea.vmem %s15118_s10, %s10701_s23  ;;  %s12623_s22 = scalar_lea.vmem %s15119_s12, %s10703_s28 }
  0x34   : > { %s12628_s21 = scalar_lea.vmem %s15120_s13, %s10450_s19  ;;  %s12633_s5 = scalar_lea.vmem %s15122_s14, %s10703_s28 }
  0x35   : > { %15121 = sst [smem:[#allocation8_spill]] %s12628_s21  ;;  %s1036_s13 = scalar_lea.vmem %s15125_s29, %s12566_s4 }
  0x36   : > { %15123 = sst [smem:[#allocation9_spill]] %s12633_s5  ;;  %s15126_s28 = sld [smem:[#allocation26_spill]] }
  0x37   : > { %s15127_s23 = sld [smem:[#allocation27_spill]]  ;;  %s1045_s0 = scalar_lea.vmem %s15128_s2, %s12566_s4 }
  0x38   : > { %p10458_p5 = scmp.ne.s32.totalorder %s15129_s7, 0 }
  0x39   : > { %s15130_s12 = sld [smem:[#allocation10_spill]] (!%p10458_p5)  ;;  %s15131_s9 = sld [smem:[#allocation29_spill]] (!%p10458_p5) }
  0x3a   : > { %1056 = sbr.rel (%p10458_p5) target bundleno = 68 (0x44), region = 112 }
  0x3c   : > { %s1039_s1 = scalar_lea.vmem %s15126_s28, %s12566_s4 }
  0x3d   : > { %s1042_s24 = scalar_lea.vmem %s15127_s23, %s12566_s4 }
  0x3f   : > { %v1057_v0 = vld [vmem:[%s15130_s12] sm:$0xff] (!%p10458_p5)  ;;  %v1058_v1 = vld [vmem:[%s15130_s12 + $0x8] sm:$0xff] (!%p10458_p5)  ;;  %v1059_v2 = vld [vmem:[%s15130_s12 + $0x10] sm:$0xff] (!%p10458_p5) }
  0x40   : > { %1065 = vst [vmem:[%s15131_s9] sm:$0xff] (!%p10458_p5), %v1057_v0  ;;  %1066 = vst [vmem:[%s15131_s9 + $0x8] sm:$0xff] (!%p10458_p5), %v1058_v1  ;;  %v1060_v3 = vld [vmem:[%s15130_s12 + $0x18] sm:$0xff] (!%p10458_p5)  ;;  %v1061_v4 = vld [vmem:[%s15130_s12 + $0x20] sm:$0xff] (!%p10458_p5) }
  0x41   : > { %1067 = vst [vmem:[%s15131_s9 + $0x10] sm:$0xff] %v1059_v2  ;;  %v1062_v5 = vld [vmem:[%s15130_s12 + $0x28] sm:$0xff]  ;;  %1068 = vst [vmem:[%s15131_s9 + $0x18] sm:$0xff] %v1060_v3  ;;  %v1063_v6 = vld [vmem:[%s15130_s12 + $0x30] sm:$0xff] }
  0x42   : > { %1069 = vst [vmem:[%s15131_s9 + $0x20] sm:$0xff] %v1061_v4  ;;  %1070 = vst [vmem:[%s15131_s9 + $0x28] sm:$0xff] %v1062_v5  ;;  %v1064_v7 = vld [vmem:[%s15130_s12 + $0x38] sm:$0xff] }
  0x43   : > { %1071 = vst [vmem:[%s15131_s9 + $0x30] sm:$0xff] %v1063_v6  ;;  %1072 = vst [vmem:[%s15131_s9 + $0x38] sm:$0xff] %v1064_v7 }
  0x44 PF: > { %v11963_v8 = vld [vmem:[%s12579_s30 + $0x4] ss:$12 sps:$4 sm:$0xff]   ;;  %v11965_v9 = vld [vmem:[%s12579_s30] ss:$12 sps:$4 sm:$0xff]   ;;  %v15081_v10 = vmov 0   ;;  %s15132_s29 = sld [smem:[#allocation29_spill]]  ;;  %v1119_v46 = vlaneseq  ;;  %s15138_s10 = scalar_lea.vmem %s15066_s17, %s12566_s4 }
  0x45   : > { %1294 = vmatprep.mubr.bf16.mxu0 %v15081_v10  ;;  %1262 = vmatprep.subr.bf16.mxu0 %v11963_v8  ;;  %v11966_v11 = vld [vmem:[%s12579_s30 + $0x1c] ss:$12 sps:$4 sm:$0xff]   ;;  %v11968_v12 = vld [vmem:[%s12579_s30 + $0x18] ss:$12 sps:$4 sm:$0xff]   ;;  %v11969_v13 = vld [vmem:[%s12579_s30 + $0x34] ss:$12 sps:$4 sm:$0xff]  }
  0x46   : > { %1263 = vmatpush1.bf16.msra.mxu0 %v11965_v9  ;;  %v11971_v14 = vld [vmem:[%s12579_s30 + $0x30] ss:$12 sps:$4 sm:$0xff]   ;;  %v11972_v15 = vld [vmem:[%s12579_s30 + $0x4c] ss:$12 sps:$4 sm:$0xff]   ;;  %v11974_v16 = vld [vmem:[%s12579_s30 + $0x48] ss:$12 sps:$4 sm:$0xff]  }
  0x47   : > { %1264 = vmatprep.subr.bf16.mxu0 %v11966_v11  ;;  %v11975_v17 = vld [vmem:[%s12579_s30 + $0x64] ss:$12 sps:$4 sm:$0xff]   ;;  %v11977_v20 = vld [vmem:[%s12579_s30 + $0x60] ss:$12 sps:$4 sm:$0xff]   ;;  %v11987_v22 = vld [vmem:[%s12579_s30 + $0x8] ss:$12 sps:$4 sm:$0xff]  }
  0x48   : > { %v11988_v23 = vld [vmem:[%s12579_s30 + $0x20] ss:$12 sps:$4 sm:$0xff]   ;;  %v11978_v24 = vld [vmem:[%s12579_s30 + $0x7c] ss:$12 sps:$4 sm:$0xff]   ;;  %11915 = vmatprep.subr.bf16.mxu1 %v11987_v22  ;;  %v11989_v25 = vld [vmem:[%s12579_s30 + $0x38] ss:$12 sps:$4 sm:$0xff]  }
  0x49   : > { %11923 = vmatpush3.bf16.msra.mxu1 %v11987_v22  ;;  %v11980_v26 = vld [vmem:[%s12579_s30 + $0x78] ss:$12 sps:$4 sm:$0xff]   ;;  %v11981_v27 = vld [vmem:[%s12579_s30 + $0x94] ss:$12 sps:$4 sm:$0xff]   ;;  %v11983_v28 = vld [vmem:[%s12579_s30 + $0x90] ss:$12 sps:$4 sm:$0xff]  }
  0x4a   : > { %1265 = vmatpush1.bf16.msra.mxu0 %v11968_v12  ;;  %v1077_v18 = vld [vmem:[%s15132_s29 + $0x20] sm:$0xff]  ;;  %v1078_v19 = vld [vmem:[%s15132_s29 + $0x28] sm:$0xff]  ;;  %11916 = vmatprep.subr.bf16.mxu1 %v11988_v23  ;;  %v11990_v29 = vld [vmem:[%s12579_s30 + $0x50] ss:$12 sps:$4 sm:$0xff]   ;;  %v15083_v45 = vmov 0.0   ;;  %vm12425_vm0 = vmmov 0  }
  0x4b   : > { %1266 = vmatprep.subr.bf16.mxu0 %v11969_v13  ;;  %v12729_v21 = vpack.c.bf16 %v1078_v19, %v1077_v18  ;;  %v11984_v30 = vld [vmem:[%s12579_s30 + $0xac] ss:$12 sps:$4 sm:$0xff]   ;;  %v11991_v31 = vld [vmem:[%s12579_s30 + $0x68] ss:$12 sps:$4 sm:$0xff]   ;;  %v1073_v33 = vld [vmem:[%s15132_s29] sm:$0xff]  ;;  %v12774_v47 = vshrl.u32 %v1119_v46, 7 }
  0x4c   : > { %v11986_v32 = vld [vmem:[%s12579_s30 + $0xa8] ss:$12 sps:$4 sm:$0xff]   ;;  %v11992_v35 = vld [vmem:[%s12579_s30 + $0x80] ss:$12 sps:$4 sm:$0xff]   ;;  %v11993_v37 = vld [vmem:[%s12579_s30 + $0x98] ss:$12 sps:$4 sm:$0xff]  }
  0x4d   : > { %11071 = vmatprep.mubr.bf16.mxu1 %v12729_v21  ;;  %11924 = vmatpush3.bf16.msra.mxu1 %v11988_v23  ;;  %v1074_v34 = vld [vmem:[%s15132_s29 + $0x8] sm:$0xff]  ;;  %v1075_v38 = vld [vmem:[%s15132_s29 + $0x10] sm:$0xff]  ;;  %v1076_v39 = vld [vmem:[%s15132_s29 + $0x18] sm:$0xff]  ;;  %v12777_v48 = vsub.s32 1, %v12774_v47  ;;  %v12787_v51 = vsub.s32 0, %v12774_v47  ;;  %vm1441_vm1 = vcmask 261120  }
  0x4e   : > { %1267 = vmatpush1.bf16.msra.mxu0 %v11971_v14  ;;  %11917 = vmatprep.subr.bf16.mxu1 %v11989_v25  ;;  %v1081_v36 = vpack.c.bf16 %v1074_v34, %v1073_v33  ;;  %v11994_v40 = vld [vmem:[%s12579_s30 + $0xb0] ss:$12 sps:$4 sm:$0xff]   ;;  %v1082_v41 = vpack.c.bf16 %v1076_v39, %v1075_v38  ;;  %v12780_v49 = vld [vmem:[%s12588_s18] sm:$0x7]  ;;  %vm1910_vm2 = vcmask 1043456   ;;  %vm1810_vm3 = vcmask 64512  }
  0x4f   : > { %1268 = vmatprep.subr.bf16.mxu0 %v11972_v15  ;;  %v1079_v42 = vld [vmem:[%s15132_s29 + $0x30] sm:$0xff]  ;;  %v1080_v43 = vld [vmem:[%s15132_s29 + $0x38] sm:$0xff]  ;;  %v12784_v50 = vrot.slane %v12780_v49, %v12777_v48  ;;  %v12792_v57 = vrot.slane %v12780_v49, %v12787_v51  ;;  %s12426_s18 = smov 96   ;;  %s12427_s30 = smov 64   ;;  %vm3220_vm4 = vcmask 523520   ;;  %vm4141_vm5 = vcmask 785920  }
  0x50   : > { %v1084_v44 = vpack.c.bf16 %v1080_v43, %v1079_v42  ;;  %s12428_s14 = smov 32   ;;  %s15133_s5 = sld [smem:[#allocation7_spill]]  ;;  %vm5062_vm6 = vcmask 1048320  }
  0x51   : > { %11925 = vmatpush3.bf16.msra.mxu1 %v11989_v25  ;;  %s15134_s7 = sld [smem:[#allocation15_spill]]  ;;  %s15136_s19 = sld [smem:[#allocation11_spill]] }
  0x52   : > { %1269 = vmatpush1.bf16.msra.mxu0 %v11974_v16  ;;  %11918 = vmatprep.subr.bf16.mxu1 %v11990_v29  ;;  %s15139_s8 = sld [smem:[#allocation17_spill]] }
  0x53   : > { %1270 = vmatprep.subr.bf16.mxu0 %v11975_v17 }
  0x55   : > { %11926 = vmatpush3.bf16.msra.mxu1 %v11990_v29 }
  0x56   : > { %1271 = vmatpush1.bf16.msra.mxu0 %v11977_v20  ;;  %11919 = vmatprep.subr.bf16.mxu1 %v11991_v31 }
  0x57   : > { %1272 = vmatprep.subr.bf16.mxu0 %v11978_v24  ;;  %s15135_s28 = scalar_lea.vmem %s15134_s7, %s12566_s4  ;;  %s15148_s7 = sld [smem:[#allocation24_spill]] }
  0x59   : > { %11927 = vmatpush3.bf16.msra.mxu1 %v11991_v31 }
  0x5a   : > { %1273 = vmatpush1.bf16.msra.mxu0 %v11980_v26  ;;  %11920 = vmatprep.subr.bf16.mxu1 %v11992_v35 }
  0x5b   : > { %1274 = vmatprep.subr.bf16.mxu0 %v11981_v27 }
  0x5d   : > { %11928 = vmatpush3.bf16.msra.mxu1 %v11992_v35 }
  0x5e   : > { %1275 = vmatpush1.bf16.msra.mxu0 %v11983_v28  ;;  %11921 = vmatprep.subr.bf16.mxu1 %v11993_v37 }
  0x5f   : > { %1276 = vmatprep.subr.bf16.mxu0 %v11984_v30 }
  0x61   : > { %11929 = vmatpush3.bf16.msra.mxu1 %v11993_v37 }
  0x62   : > { %1277 = vmatpush1.bf16.msra.mxu0 %v11986_v32  ;;  %11922 = vmatprep.subr.bf16.mxu1 %v11994_v40 }
  0x63   : > { %11051 = vmatprep.subr.bf16.mxu0 %v11987_v22 }
  0x65   : > { %1295 = vmatmul.mubr.bf16.vlgmr.msra.gmra.mrb[0].mxu0 %v1081_v36  ;;  %11930 = vmatpush3.bf16.msra.mxu1 %v11994_v40 }
  0x66   : > { %1304 = vmatprep.mubr.bf16.mxu0 %v15081_v10  ;;  %11052 = vmatpush3.bf16.msra.mxu0 %v11987_v22 }
  0x67   : > { %11053 = vmatprep.subr.bf16.mxu0 %v11988_v23  ;;  %11075 = vmatprep.subr.bf16.mxu1 %v15083_v45 }
  0x68   : > { %11072 = vmatmul.mubr.bf16.vlgmr.msra.gmra.mrb[0].mxu1 %v1084_v44 }
  0x69   : > { %11077 = vmatprep.mubr.msk.bf16.mxu1 %vm12425_vm0, %v15083_v45 }
  0x6a   : > { %11054 = vmatpush3.bf16.msra.mxu0 %v11988_v23 }
  0x6b   : > { %11055 = vmatprep.subr.bf16.mxu0 %v11989_v25 }
  0x6d   : > { %1305 = vmatmul.mubr.bf16.gmra.mrb[4].mxu0 %v1082_v41 }
  0x6e   : > { %1314 = vmatprep.mubr.bf16.mxu0 %v15081_v10  ;;  %11056 = vmatpush3.bf16.msra.mxu0 %v11989_v25 }
  0x6f   : > { %11057 = vmatprep.subr.bf16.mxu0 %v11990_v29 }
  0x72   : > { %11058 = vmatpush3.bf16.msra.mxu0 %v11990_v29 }
  0x73   : > { %11059 = vmatprep.subr.bf16.mxu0 %v11991_v31 }
  0x75   : > { %1315 = vmatmul.mubr.bf16.gmra.mrb[8].mxu0 %v12729_v21 }
  0x76   : > { %1324 = vmatprep.mubr.bf16.mxu0 %v15081_v10  ;;  %11060 = vmatpush3.bf16.msra.mxu0 %v11991_v31 }
  0x77   : > { %11061 = vmatprep.subr.bf16.mxu0 %v11992_v35 }
  0x7a   : > { %11062 = vmatpush3.bf16.msra.mxu0 %v11992_v35 }
  0x7b   : > { %11063 = vmatprep.subr.bf16.mxu0 %v11993_v37 }
  0x7d   : > { %1325 = vmatmul.mubr.bf16.gmra.mrb[12].mxu0 %v1084_v44 }
  0x7e   : > { %11064 = vmatpush3.bf16.msra.mxu0 %v11993_v37  ;;  %11067 = vmatprep.mubr.bf16.mxu0 %v1081_v36 }
  0x7f   : > { %11065 = vmatprep.subr.bf16.mxu0 %v11994_v40 }
  0x82   : > { %11066 = vmatpush3.bf16.msra.mxu0 %v11994_v40 }
  0x83   : > { %11087 = vmatprep.subr.bf16.mxu0 %v15083_v45 }
  0x85   : > { %11068 = vmatmul.mubr.bf16.vlgmr.msra.gmra.mrb[16].mxu0 %v1082_v41 }
  0x86   : > { %11089 = vmatprep.mubr.msk.bf16.mxu0 %vm12425_vm0, %v15083_v45 }
 0x138   : > { %v1296_v52 = vpop.f32.mrb[0].mxu0 }
 0x139   : > { %v1298_v53 = vpop.f32.mrb[1].mxu0  ;;  %v1297_v61 = vadd.f32 %v1296_v52, %v12792_v57 }
 0x13a   : > { %v1299_v54 = vadd.f32 %v1298_v53, %v12784_v50  ;;  %v1300_v55 = vpop.f32.mrb[2].mxu0 }
 0x13b   : > { %v1302_v56 = vpop.f32.mrb[3].mxu0  ;;  %v12804_v4 = vpack.c.bf16 %v1297_v61, %v1297_v61  ;;  %v12815_v9 = vpop.f32.mrb[0].mxu1  ;;  %v1301_v12 = vadd.f32 %v1300_v55, %v12792_v57  ;;  %v1129_v55 = vsub.s32 2, %v12774_v47 }
 0x13c   : > { %v12794_v58 = vpack.c.bf16 %v1299_v54, %v1299_v54  ;;  %v1303_v59 = vadd.f32 %v1302_v56, %v12784_v50  ;;  %v12817_v11 = vpop.f32.mrb[1].mxu1 }
 0x13d   : > { %v12824_v15 = vpop.f32.mrb[2].mxu1  ;;  %v12832_v22 = vpack.c.bf16 %v1301_v12, %v1301_v12  ;;  %v12907_v56 = vrot.slane %v12780_v49, %v1129_v55 }
 0x13e   : > { %v1446_v60 = vsel %vm1441_vm1, %v12794_v58, 0  ;;  %v12801_v0 = vpack.c.bf16 %v1303_v59, %v1303_v59  ;;  %v12827_v17 = vpop.f32.mrb[3].mxu1 }
 0x13f   : > { %11076 = vmatpush3.bf16.xpose.msra.mxu1 %v1446_v60 }
 0x140   : > { %v1306_v62 = vpop.f32.mrb[4].mxu0  ;;  %11081 = vmatprep.subr.bf16.mxu1 %v15083_v45  ;;  %v1492_v7 = vsel %vm1441_vm1, %v12801_v0, 0 }
 0x141   : > { %v1308_v63 = vpop.f32.mrb[5].mxu0  ;;  %v1307_v13 = vadd.f32 %v1306_v62, %v12792_v57 }
 0x142   : > { %v1309_v1 = vadd.f32 %v1308_v63, %v12784_v50  ;;  %v1310_v2 = vpop.f32.mrb[6].mxu0 }
 0x143   : > { %v1312_v3 = vpop.f32.mrb[7].mxu0  ;;  %v12834_v23 = vpack.c.bf16 %v1307_v13, %v1307_v13  ;;  %v1311_v28 = vadd.f32 %v1310_v2, %v12792_v57 }
 0x144   : > { %v12806_v5 = vpack.c.bf16 %v1309_v1, %v1309_v1  ;;  %v1313_v6 = vadd.f32 %v1312_v3, %v12784_v50 }
 0x145   : > { %v12858_v36 = vpack.c.bf16 %v1311_v28, %v1311_v28 }
 0x146   : > { %11078 = vmatmul.mubr.msk.bf16.vlgmr.msra.gmra.mrb[4].mxu1 %vm1441_vm1, %v12804_v4  ;;  %v1538_v8 = vsel %vm1441_vm1, %v12806_v5, 0  ;;  %v12829_v18 = vpack.c.bf16 %v1313_v6, %v1313_v6 }
 0x147   : > { %11082 = vmatpush3.bf16.xpose.msra.mxu1 %v1492_v7  ;;  %11088 = vmatpush3.bf16.xpose.msra.mxu0 %v1538_v8 }
 0x148   : > { %v1316_v14 = vpop.f32.mrb[8].mxu0  ;;  %11083 = vmatprep.mubr.msk.bf16.mxu1 %vm12425_vm0, %v15083_v45  ;;  %11093 = vmatprep.subr.bf16.mxu1 %v15083_v45  ;;  %v1584_v26 = vsel %vm1441_vm1, %v12829_v18, 0 }
 0x149   : > { %v1318_v16 = vpop.f32.mrb[9].mxu0  ;;  %11099 = vmatprep.subr.bf16.mxu0 %v15083_v45  ;;  %v1317_v29 = vadd.f32 %v1316_v14, %v12792_v57 }
 0x14a   : > { %v1319_v19 = vadd.f32 %v1318_v16, %v12784_v50  ;;  %v1320_v20 = vpop.f32.mrb[10].mxu0 }
 0x14b   : > { %v1322_v21 = vpop.f32.mrb[11].mxu0  ;;  %v12860_v37 = vpack.c.bf16 %v1317_v29, %v1317_v29  ;;  %v1321_v43 = vadd.f32 %v1320_v20, %v12792_v57 }
 0x14c   : > { %v12836_v24 = vpack.c.bf16 %v1319_v19, %v1319_v19  ;;  %v1323_v25 = vadd.f32 %v1322_v21, %v12784_v50 }
 0x14e   : > { %11084 = vmatmul.mubr.msk.bf16.vlgmr.msra.gmra.mrb[8].mxu1 %vm1441_vm1, %v12832_v22  ;;  %11090 = vmatmul.mubr.msk.bf16.vlgmr.msra.gmra.mrb[20].mxu0 %vm1441_vm1, %v12834_v23  ;;  %v1630_v27 = vsel %vm1441_vm1, %v12836_v24, 0  ;;  %v12855_v32 = vpack.c.bf16 %v1323_v25, %v1323_v25 }
 0x14f   : > { %11094 = vmatpush3.bf16.xpose.msra.mxu1 %v1584_v26  ;;  %11100 = vmatpush3.bf16.xpose.msra.mxu0 %v1630_v27 }
 0x150   : > { %v1326_v30 = vpop.f32.mrb[12].mxu0  ;;  %11095 = vmatprep.mubr.msk.bf16.mxu1 %vm12425_vm0, %v15083_v45  ;;  %11101 = vmatprep.mubr.msk.bf16.mxu0 %vm12425_vm0, %v15083_v45  ;;  %v1676_v41 = vsel %vm1441_vm1, %v12855_v32, 0 }
 0x151   : > { %v1328_v31 = vpop.f32.mrb[13].mxu0  ;;  %11105 = vmatprep.subr.bf16.mxu1 %v15083_v45  ;;  %11111 = vmatprep.subr.bf16.mxu0 %v15083_v45  ;;  %v1327_v40 = vadd.f32 %v1326_v30, %v12792_v57 }
 0x152   : > { %v1329_v33 = vadd.f32 %v1328_v31, %v12784_v50  ;;  %v1330_v34 = vpop.f32.mrb[14].mxu0 }
 0x153   : > { %v1332_v35 = vpop.f32.mrb[15].mxu0  ;;  %v12883_v46 = vpack.c.bf16 %v1327_v40, %v1327_v40  ;;  %v1331_v53 = vadd.f32 %v1330_v34, %v12792_v57 }
 0x154   : > { %v12862_v38 = vpack.c.bf16 %v1329_v33, %v1329_v33  ;;  %v1333_v39 = vadd.f32 %v1332_v35, %v12784_v50  ;;  %v12885_v50 = vpack.c.bf16 %v1321_v43, %v1321_v43 }
 0x155   : > { %v12899_v54 = vpack.c.bf16 %v1331_v53, %v1331_v53 }
 0x156   : > { %11096 = vmatmul.mubr.msk.bf16.vlgmr.msra.gmra.mrb[12].mxu1 %vm1441_vm1, %v12858_v36  ;;  %11102 = vmatmul.mubr.msk.bf16.vlgmr.msra.gmra.mrb[24].mxu0 %vm1441_vm1, %v12860_v37  ;;  %v1722_v42 = vsel %vm1441_vm1, %v12862_v38, 0  ;;  %v12875_v44 = vpack.c.bf16 %v1333_v39, %v1333_v39 }
 0x157   : > { %11106 = vmatpush3.bf16.xpose.msra.mxu1 %v1676_v41  ;;  %11112 = vmatpush3.bf16.xpose.msra.mxu0 %v1722_v42 }
 0x158   : > { %11107 = vmatprep.mubr.msk.bf16.mxu1 %vm12425_vm0, %v15083_v45  ;;  %11113 = vmatprep.mubr.msk.bf16.mxu0 %vm12425_vm0, %v15083_v45  ;;  %v1768_v52 = vsel %vm1441_vm1, %v12875_v44, 0  ;;  %v12909_v57 = vpop.f32.mrb[16].mxu0 }
 0x159   : > { %11117 = vmatprep.subr.bf16.mxu1 %v15083_v45  ;;  %11123 = vmatprep.subr.bf16.mxu0 %v15083_v45  ;;  %v1369_v59 = vpop.f32.mrb[17].mxu0 }
 0x15a   : > { %v1370_v60 = vadd.f32 %v1369_v59, %v12907_v56  ;;  %v12912_v61 = vpop.f32.mrb[18].mxu0 }
 0x15b   : > { %v1372_v62 = vpop.f32.mrb[19].mxu0 }
 0x15c   : > { %v12914_v63 = vpack.c.bf16 %v1370_v60, %v1370_v60  ;;  %v1373_v1 = vadd.f32 %v1372_v62, %v12907_v56 }
 0x15e   : > { %11108 = vmatmul.mubr.msk.bf16.vlgmr.msra.gmra.mrb[16].mxu1 %vm1441_vm1, %v12885_v50  ;;  %11114 = vmatmul.mubr.msk.bf16.vlgmr.msra.gmra.mrb[28].mxu0 %vm1441_vm1, %v12883_v46  ;;  %v12917_v2 = vpack.c.bf16 %v1373_v1, %v1373_v1  ;;  %v1912_v47 = vsel %vm1910_vm2, %v12914_v63, 0 }
 0x15f   : > { %11118 = vmatpush3.bf16.xpose.msra.mxu1 %v1768_v52  ;;  %11119 = vmatprep.mubr.msk.bf16.mxu1 %vm12425_vm0, %v15083_v45 }
 0x160   : > { %11129 = vmatprep.subr.bf16.mxu1 %v15083_v45  ;;  %11125 = vmatprep.mubr.msk.bf16.mxu0 %vm12425_vm0, %v15083_v45  ;;  %v1958_v49 = vsel %vm1910_vm2, %v12917_v2, 0 }
 0x161   : > { %11124 = vmatpush3.bf16.msra.mxu0 %v1912_v47 }
 0x162   : > { %11135 = vmatprep.subr.bf16.mxu0 %v15083_v45 }
 0x166   : > { %11120 = vmatmul.mubr.msk.bf16.vlgmr.msra.gmra.mrb[20].mxu1 %vm1441_vm1, %v12899_v54 }
 0x167   : > { %11131 = vmatprep.mubr.msk.bf16.mxu1 %vm12425_vm0, %v15083_v45  ;;  %11130 = vmatpush3.bf16.msra.mxu1 %v1958_v49 }
 0x168   : > { %11141 = vmatprep.subr.bf16.mxu1 %v15083_v45 }
 0x219   : > { %v1482_v3 = vpop.f32.mrb[4].mxu1 }
 0x21a   : > { %v11079_v6 = vpop.f32.mrb[5].mxu1  ;;  %v1811_v7 = vsel %vm1810_vm3, %v1482_v3, -inf }
 0x21b   : > { %1812 = vmax.xlane.f32.xlu0 %v1811_v7  ;;  %v1485_v8 = vpop.f32.mrb[6].mxu1 }
 0x21c   : > { %v11080_v12 = vpop.f32.mrb[7].mxu1 }
 0x221   : > { %v1528_v13 = vpop.f32.mrb[8].mxu1  ;;  %v1574_v14 = vpop.f32.mrb[20].mxu0 }
 0x222   : > { %v11085_v16 = vpop.f32.mrb[9].mxu1  ;;  %v11091_v19 = vpop.f32.mrb[21].mxu0  ;;  %v1817_v20 = vsel %vm1810_vm3, %v1574_v14, -inf  ;;  %v1814_v21 = vsel %vm1810_vm3, %v1528_v13, -inf }
 0x223   : > { %1818 = vmax.xlane.f32.xlu1 %v1817_v20  ;;  %v1577_v25 = vpop.f32.mrb[22].mxu0  ;;  %1815 = vmax.xlane.f32.xlu0 %v1814_v21  ;;  %v1531_v26 = vpop.f32.mrb[10].mxu1 }
 0x224   : > { %v11086_v27 = vpop.f32.mrb[11].mxu1  ;;  %v11092_v28 = vpop.f32.mrb[23].mxu0 }
 0x229   : > { %v1620_v29 = vpop.f32.mrb[12].mxu1  ;;  %v1666_v30 = vpop.f32.mrb[24].mxu0 }
 0x22a   : > { %v11097_v31 = vpop.f32.mrb[13].mxu1  ;;  %v11103_v33 = vpop.f32.mrb[25].mxu0  ;;  %v1823_v34 = vsel %vm1810_vm3, %v1666_v30, -inf  ;;  %v1820_v35 = vsel %vm1810_vm3, %v1620_v29, -inf }
 0x22b   : > { %v1669_v39 = vpop.f32.mrb[26].mxu0  ;;  %1824 = vmax.xlane.f32.xlu0 %v1823_v34  ;;  %1821 = vmax.xlane.f32.xlu1 %v1820_v35  ;;  %v1623_v40 = vpop.f32.mrb[14].mxu1 }
 0x22c   : > { %v11098_v41 = vpop.f32.mrb[15].mxu1  ;;  %v11104_v42 = vpop.f32.mrb[27].mxu0 }
 0x231   : > { %v1712_v43 = vpop.f32.mrb[16].mxu1  ;;  %v1758_v52 = vpop.f32.mrb[28].mxu0 }
 0x232   : > { %v11109_v53 = vpop.f32.mrb[17].mxu1  ;;  %v1829_v55 = vsel %vm1810_vm3, %v1758_v52, -inf  ;;  %v1826_v59 = vsel %vm1810_vm3, %v1712_v43, -inf  ;;  %v11115_v60 = vpop.f32.mrb[29].mxu0 }
 0x233   : > { %1830 = vmax.xlane.f32.xlu0 %v1829_v55  ;;  %1827 = vmax.xlane.f32.xlu1 %v1826_v59  ;;  %v1715_v62 = vpop.f32.mrb[18].mxu1  ;;  %v1761_v1 = vpop.f32.mrb[30].mxu0 }
 0x234   : > { %v11110_v47 = vpop.f32.mrb[19].mxu1  ;;  %v11116_v49 = vpop.f32.mrb[31].mxu0 }
 0x239   : > { %v12932_v6 = vpop.f32.mrb[20].mxu1 }
 0x23a   : > { %v1832_v7 = vsel %vm1810_vm3, %v12932_v6, -inf  ;;  %v11121_v8 = vpop.f32.mrb[21].mxu1 }
 0x23b   : > { %1833 = vmax.xlane.f32.xlu1 %v1832_v7  ;;  %v1807_v12 = vpop.f32.mrb[22].mxu1 }
 0x23c   : > { %v11122_v16 = vpop.f32.mrb[23].mxu1 }
 0x2a8   : > { %v1813_v19 = vpop.xlane.xlu0 %1812 }
 0x2a9   : > { %v1835_v20 = vsub.f32 %v1482_v3, %v1813_v19 }
 0x2ab   : > { %v1843_v21 = vmul.f32 1.442695, %v1835_v20 }
 0x2ad   : > { %12087 = vpow2.f32 %v1843_v21 }
 0x2b0   : > { %v1819_v25 = vpop.xlane.xlu1 %1818  ;;  %v1816_v26 = vpop.xlane.xlu0 %1815 }
 0x2b1   : > { %v1837_v27 = vsub.f32 %v1574_v14, %v1819_v25  ;;  %v1836_v28 = vsub.f32 %v1528_v13, %v1816_v26 }
 0x2b3   : > { %v1847_v31 = vmul.f32 1.442695, %v1837_v27  ;;  %v1845_v33 = vmul.f32 1.442695, %v1836_v28 }
 0x2b5   : > { %12089 = vpow2.f32 %v1847_v31  ;;  %v1381_v31 = vadd.f32 %v12912_v61, %v12907_v56  ;;  %v1386_v61 = vadd.f32 %v12817_v11, %v12907_v56 }
 0x2b6   : > { %12091 = vpow2.f32 %v1845_v33 }
 0x2b7   : > { %v12936_v34 = vpop.eup %12087  ;;  %v13013_v33 = vpack.c.bf16 %v1381_v31, %v1381_v31 }
 0x2b8   : > { %v1825_v35 = vpop.xlane.xlu0 %1824  ;;  %v1822_v39 = vpop.xlane.xlu1 %1821  ;;  %v1859_v40 = vsel %vm1810_vm3, %v12936_v34, 0.0 }
 0x2b9   : > { %v1839_v41 = vsub.f32 %v1666_v30, %v1825_v35  ;;  %v1838_v42 = vsub.f32 %v1620_v29, %v1822_v39  ;;  %1860 = vadd.xlane.f32.xlu0 %v1859_v40 }
 0x2bb   : > { %v1851_v3 = vmul.f32 1.442695, %v1839_v41  ;;  %v1849_v53 = vmul.f32 1.442695, %v1838_v42 }
 0x2bd   : > { %12093 = vpow2.f32 %v1851_v3 }
 0x2be   : > { %12095 = vpow2.f32 %v1849_v53 }
 0x2bf   : > { %v12940_v14 = vpop.eup %12089 }
 0x2c0   : > { %v12942_v13 = vpop.eup %12091  ;;  %v1831_v55 = vpop.xlane.xlu0 %1830  ;;  %v1865_v60 = vsel %vm1810_vm3, %v12940_v14, 0.0 }
 0x2c1   : > { %v1828_v59 = vpop.xlane.xlu1 %1827  ;;  %v1841_v62 = vsub.f32 %v1758_v52, %v1831_v55  ;;  %1866 = vadd.xlane.f32.xlu0 %v1865_v60  ;;  %v1862_v29 = vsel %vm1810_vm3, %v12942_v13, 0.0  ;;  %v13026_v60 = vpack.c.bf16 %v1386_v61, %v1386_v61 }
 0x2c2   : > { %v1840_v1 = vsub.f32 %v1712_v43, %v1828_v59  ;;  %1863 = vadd.xlane.f32.xlu1 %v1862_v29 }
 0x2c3   : > { %v1855_v30 = vmul.f32 1.442695, %v1841_v62 }
 0x2c4   : > { %v1853_v47 = vmul.f32 1.442695, %v1840_v1 }
 0x2c5   : > { %12097 = vpow2.f32 %v1855_v30  ;;  %v1394_v30 = vadd.f32 %v12815_v9, %v12907_v56 }
 0x2c6   : > { %12099 = vpow2.f32 %v1853_v47  ;;  %v2096_v47 = vsel %vm1910_vm2, %v13026_v60, 0 }
 0x2c7   : > { %v12948_v49 = vpop.eup %12093 }
 0x2c8   : > { %v12950_v7 = vpop.eup %12095  ;;  %v1871_v8 = vsel %vm1810_vm3, %v12948_v49, 0.0  ;;  %v1834_v20 = vpop.xlane.xlu1 %1833 }
 0x2c9   : > { %1872 = vadd.xlane.f32.xlu0 %v1871_v8  ;;  %v1868_v43 = vsel %vm1810_vm3, %v12950_v7, 0.0  ;;  %v1842_v21 = vsub.f32 %v12932_v6, %v1834_v20  ;;  %v1378_v6 = vadd.f32 %v12909_v57, %v12907_v56 }
 0x2ca   : > { %1869 = vadd.xlane.f32.xlu1 %v1868_v43  ;;  %v1389_v43 = vadd.f32 %v12827_v17, %v12907_v56 }
 0x2cb   : > { %v1857_v25 = vmul.f32 1.442695, %v1842_v21  ;;  %v13007_v28 = vpack.c.bf16 %v1378_v6, %v1378_v6 }
 0x2cc   : > { %v13049_v21 = vpack.c.bf16 %v1389_v43, %v1389_v43 }
 0x2cd   : > { %12101 = vpow2.f32 %v1857_v25  ;;  %v2004_v3 = vsel %vm1910_vm2, %v13007_v28, 0 }
 0x2cf   : > { %v12956_v52 = vpop.eup %12097 }
 0x2d0   : > { %v12958_v12 = vpop.eup %12099  ;;  %v1877_v16 = vsel %vm1810_vm3, %v12956_v52, 0.0 }
 0x2d1   : > { %1878 = vadd.xlane.f32.xlu0 %v1877_v16  ;;  %v1874_v19 = vsel %vm1810_vm3, %v12958_v12, 0.0  ;;  %v13045_v16 = vpack.c.bf16 %v1394_v30, %v1394_v30 }
 0x2d2   : > { %1875 = vadd.xlane.f32.xlu1 %v1874_v19 }
 0x2d3   : > { %v2188_v31 = vsel %vm1910_vm2, %v13045_v16, 0 }
 0x2d7   : > { %v12985_v26 = vpop.eup %12101 }
 0x2d8   : > { %v1880_v27 = vsel %vm1810_vm3, %v12985_v26, 0.0 }
 0x2e3   : > { %2340 = vrot.lane.b32.xlu1 %v12801_v0, %s12426_s18 }
 0x2e7   : > { %2285 = vrot.lane.b32.xlu1 %v12804_v4, %s12426_s18  ;;  %2288 = vrot.lane.b32.xlu0 %v12794_v58, %s12426_s18 }
 0x2eb   : > { %2392 = vrot.lane.b32.xlu0 %v12806_v5, %s12426_s18 }
 0x2ef   : > { %2389 = vrot.lane.b32.xlu0 %v12834_v23, %s12426_s18 }
 0x2f3   : > { %2496 = vrot.lane.b32.xlu0 %v12836_v24, %s12426_s18 }
 0x2f7   : > { %2493 = vrot.lane.b32.xlu0 %v12860_v37, %s12426_s18 }
 0x2fb   : > { %2600 = vrot.lane.b32.xlu0 %v12862_v38, %s12426_s18 }
 0x2ff   : > { %2597 = vrot.lane.b32.xlu0 %v12883_v46, %s12426_s18 }
 0x303   : > { %2797 = vrot.lane.b32.xlu0 %v12914_v63, %s12426_s18 }
 0x30b   : > { %1881 = vadd.xlane.f32.xlu1 %v1880_v27 }
 0x31c   : > { %2337 = vrot.lane.b32.xlu1 %v12832_v22, %s12426_s18 }
 0x320   : > { %2444 = vrot.lane.b32.xlu1 %v12829_v18, %s12426_s18 }
 0x324   : > { %2441 = vrot.lane.b32.xlu1 %v12858_v36, %s12426_s18 }
 0x328   : > { %2548 = vrot.lane.b32.xlu1 %v12855_v32, %s12426_s18 }
 0x32c   : > { %2545 = vrot.lane.b32.xlu1 %v12885_v50, %s12426_s18 }
 0x330   : > { %2652 = vrot.lane.b32.xlu1 %v12875_v44, %s12426_s18 }
 0x334   : > { %2649 = vrot.lane.b32.xlu1 %v12899_v54, %s12426_s18 }
 0x338   : > { %2846 = vrot.lane.b32.xlu1 %v12917_v2, %s12426_s18 }
 0x33c   : > { %2895 = vrot.lane.b32.xlu1 %v13007_v28, %s12426_s18 }
 0x340   : > { %2944 = vrot.lane.b32.xlu1 %v13013_v33, %s12426_s18 }
 0x346   : > { %v1861_v35 = vpop.xlane.xlu0 %1860 }
 0x347   : > { %12103 = vrcp.f32 %v1861_v35  ;;  %v1397_v35 = vadd.f32 %v12824_v15, %v12907_v56 }
 0x349   : > { %v13067_v56 = vpack.c.bf16 %v1397_v35, %v1397_v35 }
 0x34e   : > { %v1867_v39 = vpop.xlane.xlu0 %1866 }
 0x34f   : > { %12105 = vrcp.f32 %v1867_v39  ;;  %v1864_v57 = vpop.xlane.xlu1 %1863 }
 0x350   : > { %12107 = vrcp.f32 %v1864_v57 }
 0x351   : > { %v12104_v40 = vpop.eup %12103 }
 0x352   : > { %v1891_v41 = vmul.f32 %v12104_v40, %v12936_v34 }
 0x354   : > { %v1899_v42 = vpack.c.bf16 %v1891_v41, %v1891_v41 }
 0x356   : > { %11126 = vmatmul.mubr.msk.bf16.vlgmr.msra.gmra.mrb[32].mxu0 %vm1810_vm3, %v1899_v42  ;;  %v1873_v53 = vpop.xlane.xlu0 %1872 }
 0x357   : > { %11136 = vmatpush3.bf16.msra.mxu0 %v2004_v3  ;;  %12109 = vrcp.f32 %v1873_v53  ;;  %v1870_v55 = vpop.xlane.xlu1 %1869  ;;  %11137 = vmatprep.mubr.msk.bf16.mxu0 %vm12425_vm0, %v15083_v45  ;;  %v2234_v53 = vsel %vm1910_vm2, %v13067_v56, 0 }
 0x358   : > { %12111 = vrcp.f32 %v1870_v55  ;;  %11147 = vmatprep.subr.bf16.mxu0 %v15083_v45 }
 0x359   : > { %v12106_v34 = vpop.eup %12105 }
 0x35a   : > { %v12108_v59 = vpop.eup %12107  ;;  %v1893_v11 = vmul.f32 %v12106_v34, %v12940_v14  ;;  %v2050_v14 = vsel %vm1910_vm2, %v13013_v33, 0 }
 0x35b   : > { %v1892_v62 = vmul.f32 %v12108_v59, %v12942_v13 }
 0x35c   : > { %v1901_v1 = vpack.c.bf16 %v1893_v11, %v1893_v11 }
 0x35d   : > { %v1900_v29 = vpack.c.bf16 %v1892_v62, %v1892_v62 }
 0x35e   : > { %11138 = vmatmul.mubr.msk.bf16.vlgmr.msra.gmra.mrb[36].mxu0 %vm1810_vm3, %v1901_v1  ;;  %v1879_v8 = vpop.xlane.xlu0 %1878 }
 0x35f   : > { %11148 = vmatpush3.bf16.msra.mxu0 %v2096_v47  ;;  %12113 = vrcp.f32 %v1879_v8  ;;  %11132 = vmatmul.mubr.msk.bf16.vlgmr.msra.gmra.mrb[24].mxu1 %vm1810_vm3, %v1900_v29  ;;  %v1876_v13 = vpop.xlane.xlu1 %1875 }
 0x360   : > { %11142 = vmatpush3.bf16.msra.mxu1 %v2050_v14  ;;  %12115 = vrcp.f32 %v1876_v13  ;;  %11143 = vmatprep.mubr.msk.bf16.mxu1 %vm12425_vm0, %v15083_v45 }
 0x361   : > { %v12110_v9 = vpop.eup %12109  ;;  %11149 = vmatprep.mubr.msk.bf16.mxu0 %vm12425_vm0, %v15083_v45  ;;  %11153 = vmatprep.subr.bf16.mxu1 %v15083_v45 }
 0x362   : > { %v12112_v17 = vpop.eup %12111  ;;  %v2289_v19 = vpop.permute.xlu0 %2288  ;;  %11159 = vmatprep.subr.bf16.mxu0 %v15083_v45  ;;  %v1895_v20 = vmul.f32 %v12110_v9, %v12948_v49  ;;  %v2142_v49 = vsel %vm1910_vm2, %v13049_v21, 0 }
 0x363   : > { %v1894_v25 = vmul.f32 %v12112_v17, %v12950_v7  ;;  %v2294_v3 = vsel %vm1441_vm1, %v2289_v19, 0 }
 0x364   : > { %v1903_v27 = vpack.c.bf16 %v1895_v20, %v1895_v20 }
 0x365   : > { %v1902_v6 = vpack.c.bf16 %v1894_v25, %v1894_v25 }
 0x366   : > { %11150 = vmatmul.mubr.msk.bf16.vlgmr.msra.gmra.mrb[40].mxu0 %vm1810_vm3, %v1903_v27  ;;  %v2393_v39 = vpop.permute.xlu0 %2392 }
 0x367   : > { %11160 = vmatpush3.bf16.msra.mxu0 %v2188_v31  ;;  %11144 = vmatmul.mubr.msk.bf16.vlgmr.msra.gmra.mrb[28].mxu1 %vm1810_vm3, %v1902_v6  ;;  %v2398_v34 = vsel %vm1441_vm1, %v2393_v39, 0 }
 0x368   : > { %11154 = vmatpush3.bf16.msra.mxu1 %v2142_v49  ;;  %11155 = vmatprep.mubr.msk.bf16.mxu1 %vm12425_vm0, %v15083_v45 }
 0x369   : > { %v12114_v7 = vpop.eup %12113  ;;  %11161 = vmatprep.mubr.msk.bf16.mxu0 %vm12425_vm0, %v15083_v45  ;;  %11165 = vmatprep.subr.bf16.mxu1 %v15083_v45 }
 0x36a   : > { %v12116_v57 = vpop.eup %12115  ;;  %v1897_v15 = vmul.f32 %v12114_v7, %v12956_v52  ;;  %11171 = vmatprep.subr.bf16.mxu0 %v15083_v45  ;;  %v2390_v61 = vpop.permute.xlu0 %2389 }
 0x36b   : > { %v1896_v40 = vmul.f32 %v12116_v57, %v12958_v12  ;;  %v2341_v52 = vpop.permute.xlu1 %2340 }
 0x36c   : > { %v1905_v41 = vpack.c.bf16 %v1897_v15, %v1897_v15  ;;  %v2346_v20 = vsel %vm1441_vm1, %v2341_v52, 0 }
 0x36d   : > { %v1904_v42 = vpack.c.bf16 %v1896_v40, %v1896_v40 }
 0x36e   : > { %11162 = vmatmul.mubr.msk.bf16.vlgmr.msra.gmra.mrb[44].mxu0 %vm1810_vm3, %v1905_v41  ;;  %v2497_v12 = vpop.permute.xlu0 %2496 }
 0x36f   : > { %11156 = vmatmul.mubr.msk.bf16.vlgmr.msra.gmra.mrb[32].mxu1 %vm1810_vm3, %v1904_v42  ;;  %11173 = vmatprep.mubr.msk.bf16.mxu0 %vm12425_vm0, %v15083_v45  ;;  %v2286_v55 = vpop.permute.xlu1 %2285  ;;  %v2502_v11 = vsel %vm1441_vm1, %v2497_v12, 0 }
 0x370   : > { %11166 = vmatpush3.bf16.msra.mxu1 %v2234_v53  ;;  %11172 = vmatpush3.bf16.xpose.msra.mxu0 %v2294_v3 }
 0x371   : > { %11183 = vmatprep.subr.bf16.mxu0 %v15083_v45  ;;  %11167 = vmatprep.mubr.msk.bf16.mxu1 %vm12425_vm0, %v15083_v45 }
 0x372   : > { %11177 = vmatprep.subr.bf16.mxu1 %v15083_v45  ;;  %v2494_v59 = vpop.permute.xlu0 %2493 }
 0x376   : > { %v2601_v62 = vpop.permute.xlu0 %2600 }
 0x377   : > { %11174 = vmatmul.mubr.msk.bf16.vlgmr.msra.gmra.mrb[48].mxu0 %vm1441_vm1, %v2286_v55  ;;  %v2606_v29 = vsel %vm1441_vm1, %v2601_v62, 0 }
 0x378   : > { %11184 = vmatpush3.bf16.xpose.msra.mxu0 %v2398_v34  ;;  %11185 = vmatprep.mubr.msk.bf16.mxu0 %vm12425_vm0, %v15083_v45 }
 0x379   : > { %11195 = vmatprep.subr.bf16.mxu0 %v15083_v45 }
 0x37a   : > { %v2598_v1 = vpop.permute.xlu0 %2597 }
 0x37e   : > { %v2798_v30 = vpop.permute.xlu0 %2797 }
 0x37f   : > { %11186 = vmatmul.mubr.msk.bf16.vlgmr.msra.gmra.mrb[52].mxu0 %vm1441_vm1, %v2390_v61  ;;  %v2803_v47 = vsel %vm1910_vm2, %v2798_v30, 0 }
 0x380   : > { %11196 = vmatpush3.bf16.xpose.msra.mxu0 %v2502_v11  ;;  %11197 = vmatprep.mubr.msk.bf16.mxu0 %vm12425_vm0, %v15083_v45 }
 0x381   : > { %11207 = vmatprep.subr.bf16.mxu0 %v15083_v45 }
 0x387   : > { %11198 = vmatmul.mubr.msk.bf16.vlgmr.msra.gmra.mrb[56].mxu0 %vm1441_vm1, %v2494_v59 }
 0x388   : > { %11208 = vmatpush3.bf16.xpose.msra.mxu0 %v2606_v29  ;;  %11209 = vmatprep.mubr.msk.bf16.mxu0 %vm12425_vm0, %v15083_v45 }
 0x389   : > { %11219 = vmatprep.subr.bf16.mxu0 %v15083_v45 }
 0x38f   : > { %11210 = vmatmul.mubr.msk.bf16.vlgmr.msra.gmra.mrb[60].mxu0 %vm1441_vm1, %v2598_v1 }
 0x390   : > { %11220 = vmatpush3.bf16.msra.mxu0 %v2803_v47  ;;  %11221 = vmatprep.mubr.msk.bf16.mxu0 %vm12425_vm0, %v15083_v45 }
 0x391   : > { %11231 = vmatprep.subr.bf16.mxu0 %v15083_v45 }
 0x398   : > { %v1882_v8 = vpop.xlane.xlu1 %1881 }
 0x399   : > { %12117 = vrcp.f32 %v1882_v8 }
 0x39c   : > { %v2338_v43 = vpop.permute.xlu1 %2337 }
 0x3a0   : > { %v2445_v14 = vpop.permute.xlu1 %2444 }
 0x3a1   : > { %v2450_v27 = vsel %vm1441_vm1, %v2445_v14, 0 }
 0x3a3   : > { %v12118_v13 = vpop.eup %12117 }
 0x3a4   : > { %v1898_v9 = vmul.f32 %v12118_v13, %v12985_v26  ;;  %v2442_v19 = vpop.permute.xlu1 %2441 }
 0x3a6   : > { %v1906_v17 = vpack.c.bf16 %v1898_v9, %v1898_v9 }
 0x3a8   : > { %11168 = vmatmul.mubr.msk.bf16.vlgmr.msra.gmra.mrb[36].mxu1 %vm1810_vm3, %v1906_v17  ;;  %v2549_v25 = vpop.permute.xlu1 %2548 }
 0x3a9   : > { %11178 = vmatpush3.bf16.xpose.msra.mxu1 %v2346_v20  ;;  %11179 = vmatprep.mubr.msk.bf16.mxu1 %vm12425_vm0, %v15083_v45  ;;  %v2554_v6 = vsel %vm1441_vm1, %v2549_v25, 0 }
 0x3aa   : > { %11189 = vmatprep.subr.bf16.mxu1 %v15083_v45 }
 0x3ac   : > { %v2546_v26 = vpop.permute.xlu1 %2545 }
 0x3b0   : > { %11180 = vmatmul.mubr.msk.bf16.vlgmr.msra.gmra.mrb[40].mxu1 %vm1441_vm1, %v2338_v43  ;;  %v2653_v31 = vpop.permute.xlu1 %2652 }
 0x3b1   : > { %11190 = vmatpush3.bf16.xpose.msra.mxu1 %v2450_v27  ;;  %11191 = vmatprep.mubr.msk.bf16.mxu1 %vm12425_vm0, %v15083_v45  ;;  %v2658_v49 = vsel %vm1441_vm1, %v2653_v31, 0 }
 0x3b2   : > { %11201 = vmatprep.subr.bf16.mxu1 %v15083_v45 }
 0x3b4   : > { %v2650_v35 = vpop.permute.xlu1 %2649 }
 0x3b8   : > { %11192 = vmatmul.mubr.msk.bf16.vlgmr.msra.gmra.mrb[44].mxu1 %vm1441_vm1, %v2442_v19  ;;  %v2847_v39 = vpop.permute.xlu1 %2846 }
 0x3b9   : > { %11202 = vmatpush3.bf16.xpose.msra.mxu1 %v2554_v6  ;;  %11203 = vmatprep.mubr.msk.bf16.mxu1 %vm12425_vm0, %v15083_v45  ;;  %v2852_v7 = vsel %vm1910_vm2, %v2847_v39, 0 }
 0x3ba   : > { %11213 = vmatprep.subr.bf16.mxu1 %v15083_v45 }
 0x3c0   : > { %11204 = vmatmul.mubr.msk.bf16.vlgmr.msra.gmra.mrb[48].mxu1 %vm1441_vm1, %v2546_v26 }
 0x3c1   : > { %11214 = vmatpush3.bf16.xpose.msra.mxu1 %v2658_v49  ;;  %11215 = vmatprep.mubr.msk.bf16.mxu1 %vm12425_vm0, %v15083_v45 }
 0x3c2   : > { %11225 = vmatprep.subr.bf16.mxu1 %v15083_v45 }
 0x3c8   : > { %11216 = vmatmul.mubr.msk.bf16.vlgmr.msra.gmra.mrb[52].mxu1 %vm1441_vm1, %v2650_v35 }
 0x3c9   : > { %11226 = vmatpush3.bf16.msra.mxu1 %v2852_v7  ;;  %11227 = vmatprep.mubr.msk.bf16.mxu1 %vm12425_vm0, %v15083_v45 }
 0x3ca   : > { %11237 = vmatprep.subr.bf16.mxu1 %v15083_v45 }
 0x429   : > { %v1948_v57 = vpop.f32.mrb[32].mxu0 }
 0x42a   : > { %2276 = vst.msk [vmem:[#allocation2] sm:$0xff] %vm1441_vm1, %v1948_v57  ;;  %v11127_v15 = vpop.f32.mrb[33].mxu0 }
 0x42b   : > { %v1951_v40 = vpop.f32.mrb[34].mxu0 }
 0x42c   : > { %v11128_v41 = vpop.f32.mrb[35].mxu0 }
 0x431   : > { %v2040_v42 = vpop.f32.mrb[36].mxu0 }
 0x432   : > { %v1994_v61 = vpop.f32.mrb[24].mxu1  ;;  %2278 = vst.msk [vmem:[#allocation2 + $0x10] sm:$0xff] %vm1441_vm1, %v2040_v42  ;;  %v11139_v3 = vpop.f32.mrb[37].mxu0 }
 0x433   : > { %2277 = vst.msk [vmem:[#allocation2 + $0x8] sm:$0xff] %vm1441_vm1, %v1994_v61  ;;  %v11133_v53 = vpop.f32.mrb[25].mxu1  ;;  %v2043_v52 = vpop.f32.mrb[38].mxu0 }
 0x434   : > { %v1997_v12 = vpop.f32.mrb[26].mxu1  ;;  %v11140_v55 = vpop.f32.mrb[39].mxu0 }
 0x435   : > { %v11134_v34 = vpop.f32.mrb[27].mxu1 }
 0x439   : > { %v2132_v59 = vpop.f32.mrb[40].mxu0 }
 0x43a   : > { %v2086_v11 = vpop.f32.mrb[28].mxu1  ;;  %2280 = vst.msk [vmem:[#allocation2 + $0x20] sm:$0xff] %vm1441_vm1, %v2132_v59  ;;  %v11151_v62 = vpop.f32.mrb[41].mxu0 }
 0x43b   : > { %2279 = vst.msk [vmem:[#allocation2 + $0x18] sm:$0xff] %vm1441_vm1, %v2086_v11  ;;  %v11145_v1 = vpop.f32.mrb[29].mxu1  ;;  %v2135_v29 = vpop.f32.mrb[42].mxu0 }
 0x43c   : > { %v2089_v30 = vpop.f32.mrb[30].mxu1  ;;  %v11152_v47 = vpop.f32.mrb[43].mxu0 }
 0x43d   : > { %v11146_v8 = vpop.f32.mrb[31].mxu1 }
 0x441   : > { %v2224_v43 = vpop.f32.mrb[44].mxu0 }
 0x442   : > { %v2178_v14 = vpop.f32.mrb[32].mxu1  ;;  %2282 = vst.msk [vmem:[#allocation2 + $0x30] sm:$0xff] %vm1441_vm1, %v2224_v43  ;;  %v11163_v13 = vpop.f32.mrb[45].mxu0 }
 0x443   : > { %2281 = vst.msk [vmem:[#allocation2 + $0x28] sm:$0xff] %vm1441_vm1, %v2178_v14  ;;  %v11157_v9 = vpop.f32.mrb[33].mxu1  ;;  %v2227_v17 = vpop.f32.mrb[46].mxu0 }
 0x444   : > { %v2181_v19 = vpop.f32.mrb[34].mxu1  ;;  %v11164_v20 = vpop.f32.mrb[47].mxu0 }
 0x445   : > { %v11158_v25 = vpop.f32.mrb[35].mxu1 }
 0x44a   : > { %v2330_v27 = vpop.f32.mrb[48].mxu0 }
 0x44b   : > { %v11175_v26 = vpop.f32.mrb[49].mxu0  ;;  %v2700_v6 = vsel %vm1810_vm3, %v2330_v27, -inf }
 0x44c   : > { %2701 = vmax.xlane.f32.xlu0 %v2700_v6  ;;  %v2333_v31 = vpop.f32.mrb[50].mxu0 }
 0x44d   : > { %v11176_v35 = vpop.f32.mrb[51].mxu0 }
 0x452   : > { %v2434_v49 = vpop.f32.mrb[52].mxu0 }
 0x453   : > { %v11187_v39 = vpop.f32.mrb[53].mxu0  ;;  %v2706_v7 = vsel %vm1810_vm3, %v2434_v49, -inf }
 0x454   : > { %2707 = vmax.xlane.f32.xlu0 %v2706_v7  ;;  %v2437_v57 = vpop.f32.mrb[54].mxu0 }
 0x455   : > { %v11188_v15 = vpop.f32.mrb[55].mxu0 }
 0x45a   : > { %v13136_v40 = vpop.f32.mrb[56].mxu0 }
 0x45b   : > { %v11199_v41 = vpop.f32.mrb[57].mxu0  ;;  %v2712_v17 = vsel %vm1810_vm3, %v13136_v40, -inf }
 0x45c   : > { %v2541_v42 = vpop.f32.mrb[58].mxu0 }
 0x45d   : > { %v11200_v61 = vpop.f32.mrb[59].mxu0 }
 0x462   : > { %v13138_v3 = vpop.f32.mrb[60].mxu0 }
 0x463   : > { %v11211_v53 = vpop.f32.mrb[61].mxu0  ;;  %v2718_v25 = vsel %vm1810_vm3, %v13138_v3, -inf }
 0x464   : > { %v2645_v52 = vpop.f32.mrb[62].mxu0 }
 0x465   : > { %v11212_v12 = vpop.f32.mrb[63].mxu0 }
 0x47b   : > { %v2270_v55 = vpop.f32.mrb[36].mxu1 }
 0x47c   : > { %2283 = vst.msk [vmem:[#allocation2 + $0x38] sm:$0xff] %vm1441_vm1, %v2270_v55  ;;  %v11169_v34 = vpop.f32.mrb[37].mxu1 }
 0x47d   : > { %v2273_v59 = vpop.f32.mrb[38].mxu1 }
 0x47e   : > { %v11170_v11 = vpop.f32.mrb[39].mxu1 }
 0x483   : > { %v2382_v62 = vpop.f32.mrb[40].mxu1 }
 0x484   : > { %v11181_v1 = vpop.f32.mrb[41].mxu1  ;;  %v2703_v29 = vsel %vm1810_vm3, %v2382_v62, -inf }
 0x485   : > { %2704 = vmax.xlane.f32.xlu1 %v2703_v29  ;;  %v2385_v30 = vpop.f32.mrb[42].mxu1  ;;  %v2896_v1 = vpop.permute.xlu1 %2895 }
 0x486   : > { %v11182_v47 = vpop.f32.mrb[43].mxu1 }
 0x489   : > { %v13161_v29 = vpop.permute.xlu1 %2944 }
 0x48b   : > { %v2486_v8 = vpop.f32.mrb[44].mxu1 }
 0x48c   : > { %v11193_v43 = vpop.f32.mrb[45].mxu1  ;;  %v2709_v14 = vsel %vm1810_vm3, %v2486_v8, -inf }
 0x48d   : > { %2710 = vmax.xlane.f32.xlu0 %v2709_v14  ;;  %v2489_v13 = vpop.f32.mrb[46].mxu1 }
 0x48e   : > { %v11194_v9 = vpop.f32.mrb[47].mxu1 }
 0x491   : > { %2713 = vmax.xlane.f32.xlu0 %v2712_v17 }
 0x493   : > { %v2590_v19 = vpop.f32.mrb[48].mxu1 }
 0x494   : > { %v11205_v20 = vpop.f32.mrb[49].mxu1  ;;  %v2715_v26 = vsel %vm1810_vm3, %v2590_v19, -inf }
 0x495   : > { %2719 = vmax.xlane.f32.xlu0 %v2718_v25  ;;  %2716 = vmax.xlane.f32.xlu1 %v2715_v26  ;;  %v2593_v6 = vpop.f32.mrb[50].mxu1 }
 0x496   : > { %v11206_v31 = vpop.f32.mrb[51].mxu1 }
 0x49b   : > { %v13148_v35 = vpop.f32.mrb[52].mxu1 }
 0x49c   : > { %v11217_v39 = vpop.f32.mrb[53].mxu1  ;;  %v2721_v15 = vsel %vm1810_vm3, %v13148_v35, -inf }
 0x49d   : > { %v2697_v7 = vpop.f32.mrb[54].mxu1 }
 0x49e   : > { %v11218_v57 = vpop.f32.mrb[55].mxu1 }
 0x4a6   : > { %3042 = vrot.lane.b32.xlu1 %v13049_v21, %s12426_s18 }
 0x4ab   : > { %2993 = vrot.lane.b32.xlu0 %v13026_v60, %s12426_s18 }
 0x4ca   : > { %2722 = vmax.xlane.f32.xlu1 %v2721_v15 }
 0x4d9   : > { %v2702_v41 = vpop.xlane.xlu0 %2701 }
 0x4da   : > { %v2724_v42 = vsub.f32 %v2330_v27, %v2702_v41 }
 0x4dc   : > { %v2732_v61 = vmul.f32 1.442695, %v2724_v42 }
 0x4de   : > { %12119 = vpow2.f32 %v2732_v61 }
 0x4e1   : > { %v2708_v53 = vpop.xlane.xlu0 %2707 }
 0x4e2   : > { %v2726_v52 = vsub.f32 %v2434_v49, %v2708_v53 }
 0x4e4   : > { %v2736_v12 = vmul.f32 1.442695, %v2726_v52 }
 0x4e6   : > { %12121 = vpow2.f32 %v2736_v12 }
 0x4e8   : > { %v12120_v55 = vpop.eup %12119 }
 0x4e9   : > { %v2748_v34 = vsel %vm1810_vm3, %v12120_v55, 0.0 }
 0x4ea   : > { %2749 = vadd.xlane.f32.xlu0 %v2748_v34 }
 0x4f0   : > { %v13157_v59 = vpop.eup %12121 }
 0x4f1   : > { %v2754_v11 = vsel %vm1810_vm3, %v13157_v59, 0.0 }
 0x4f2   : > { %2755 = vadd.xlane.f32.xlu0 %v2754_v11 }
 0x512   : > { %v2705_v27 = vpop.xlane.xlu1 %2704 }
 0x513   : > { %v2725_v30 = vsub.f32 %v2382_v62, %v2705_v27 }
 0x515   : > { %v2734_v47 = vmul.f32 1.442695, %v2725_v30 }
 0x517   : > { %12123 = vpow2.f32 %v2734_v47 }
 0x51a   : > { %v2711_v49 = vpop.xlane.xlu0 %2710 }
 0x51b   : > { %v2727_v43 = vsub.f32 %v2486_v8, %v2711_v49 }
 0x51d   : > { %v2738_v14 = vmul.f32 1.442695, %v2727_v43  ;;  %v2901_v43 = vsel %vm1910_vm2, %v2896_v1, 0 }
 0x51e   : > { %v2714_v13 = vpop.xlane.xlu0 %2713 }
 0x51f   : > { %12125 = vpow2.f32 %v2738_v14  ;;  %v2728_v9 = vsub.f32 %v13136_v40, %v2714_v13 }
 0x521   : > { %v13164_v17 = vpop.eup %12123  ;;  %v2740_v20 = vmul.f32 1.442695, %v2728_v9 }
 0x522   : > { %v2751_v25 = vsel %vm1810_vm3, %v13164_v17, 0.0  ;;  %v2717_v40 = vpop.xlane.xlu1 %2716  ;;  %v2720_v39 = vpop.xlane.xlu0 %2719 }
 0x523   : > { %12127 = vpow2.f32 %v2740_v20  ;;  %2752 = vadd.xlane.f32.xlu1 %v2751_v25  ;;  %v2729_v31 = vsub.f32 %v2590_v19, %v2717_v40  ;;  %v2730_v7 = vsub.f32 %v13138_v3, %v2720_v39 }
 0x525   : > { %v2742_v57 = vmul.f32 1.442695, %v2729_v31  ;;  %v2744_v15 = vmul.f32 1.442695, %v2730_v7  ;;  %v2950_v31 = vsel %vm1910_vm2, %v13161_v29, 0 }
 0x526   : > { %v2994_v3 = vpop.permute.xlu0 %2993  ;;  %v13191_v52 = vpop.permute.xlu1 %3042 }
 0x527   : > { %12129 = vpow2.f32 %v2742_v57  ;;  %v2999_v1 = vsel %vm1910_vm2, %v2994_v3, 0  ;;  %v3048_v29 = vsel %vm1910_vm2, %v13191_v52, 0 }
 0x528   : > { %12131 = vpow2.f32 %v2744_v15 }
 0x529   : > { %v13168_v26 = vpop.eup %12125 }
 0x52a   : > { %v2757_v62 = vsel %vm1810_vm3, %v13168_v26, 0.0 }
 0x52b   : > { %2758 = vadd.xlane.f32.xlu1 %v2757_v62 }
 0x52d   : > { %v13172_v8 = vpop.eup %12127 }
 0x52e   : > { %v2760_v6 = vsel %vm1810_vm3, %v13172_v8, 0.0 }
 0x52f   : > { %2761 = vadd.xlane.f32.xlu0 %v2760_v6 }
 0x531   : > { %v13181_v41 = vpop.eup %12129 }
 0x532   : > { %v2763_v42 = vsel %vm1810_vm3, %v13181_v41, 0.0  ;;  %v13185_v61 = vpop.eup %12131 }
 0x533   : > { %v2766_v53 = vsel %vm1810_vm3, %v13185_v61, 0.0 }
 0x53c   : > { %3140 = vrot.lane.b32.xlu1 %v13067_v56, %s12426_s18 }
 0x545   : > { %3091 = vrot.lane.b32.xlu0 %v13045_v16, %s12426_s18 }
 0x557   : > { %v2723_v12 = vpop.xlane.xlu1 %2722 }
 0x558   : > { %v2731_v34 = vsub.f32 %v13148_v35, %v2723_v12 }
 0x55a   : > { %v2746_v30 = vmul.f32 1.442695, %v2731_v34 }
 0x560   : > { %2764 = vadd.xlane.f32.xlu1 %v2763_v42 }
 0x564   : > { %2767 = vadd.xlane.f32.xlu0 %v2766_v53 }
 0x571   : > { %3281 = vrot.lane.b32.xlu1 %v12801_v0, %s12427_s30 }
 0x577   : > { %v2750_v19 = vpop.xlane.xlu0 %2749 }
 0x578   : > { %12133 = vrcp.f32 %v2750_v19 }
 0x57a   : > { %3231 = vrot.lane.b32.xlu0 %v12794_v58, %s12427_s30 }
 0x57e   : > { %3229 = vrot.lane.b32.xlu0 %v12804_v4, %s12427_s30 }
 0x57f   : > { %v2756_v11 = vpop.xlane.xlu0 %2755 }
 0x580   : > { %12135 = vrcp.f32 %v2756_v11 }
 0x581   : > { %12137 = vpow2.f32 %v2746_v30 }
 0x582   : > { %v12134_v27 = vpop.eup %12133  ;;  %3331 = vrot.lane.b32.xlu0 %v12806_v5, %s12427_s30 }
 0x583   : > { %v2780_v47 = vmul.f32 %v12134_v27, %v12120_v55 }
 0x585   : > { %v2788_v49 = vpack.c.bf16 %v2780_v47, %v2780_v47 }
 0x586   : > { %3329 = vrot.lane.b32.xlu0 %v12834_v23, %s12427_s30 }
 0x587   : > { %11222 = vmatmul.mubr.msk.bf16.vlgmr.msra.gmra.mrb[64].mxu0 %vm1810_vm3, %v2788_v49 }
 0x588   : > { %11232 = vmatpush3.bf16.msra.mxu0 %v2901_v43  ;;  %11233 = vmatprep.mubr.msk.bf16.mxu0 %vm12425_vm0, %v15083_v45 }
 0x589   : > { %11243 = vmatprep.subr.bf16.mxu0 %v15083_v45 }
 0x58a   : > { %v12136_v35 = vpop.eup %12135  ;;  %3431 = vrot.lane.b32.xlu0 %v12836_v24, %s12427_s30 }
 0x58b   : > { %v2782_v55 = vmul.f32 %v12136_v35, %v13157_v59  ;;  %v13216_v13 = vpop.eup %12137 }
 0x58c   : > { %v2769_v59 = vsel %vm1810_vm3, %v13216_v13, 0.0 }
 0x58d   : > { %v2790_v14 = vpack.c.bf16 %v2782_v55, %v2782_v55 }
 0x58e   : > { %3429 = vrot.lane.b32.xlu0 %v12860_v37, %s12427_s30 }
 0x58f   : > { %11234 = vmatmul.mubr.msk.bf16.vlgmr.msra.gmra.mrb[68].mxu0 %vm1810_vm3, %v2790_v14 }
 0x590   : > { %11244 = vmatpush3.bf16.msra.mxu0 %v2999_v1  ;;  %11245 = vmatprep.mubr.msk.bf16.mxu0 %vm12425_vm0, %v15083_v45 }
 0x591   : > { %11255 = vmatprep.subr.bf16.mxu0 %v15083_v45 }
 0x592   : > { %3531 = vrot.lane.b32.xlu0 %v12862_v38, %s12427_s30 }
 0x595   : > { %2770 = vadd.xlane.f32.xlu1 %v2769_v59 }
 0x596   : > { %3529 = vrot.lane.b32.xlu0 %v12883_v46, %s12427_s30 }
 0x59a   : > { %3725 = vrot.lane.b32.xlu0 %v12914_v63, %s12427_s30 }
 0x5a6   : > { %3279 = vrot.lane.b32.xlu1 %v12832_v22, %s12427_s30 }
 0x5aa   : > { %3381 = vrot.lane.b32.xlu1 %v12829_v18, %s12427_s30 }
 0x5ae   : > { %3379 = vrot.lane.b32.xlu1 %v12858_v36, %s12427_s30 }
 0x5b0   : > { %v2753_v9 = vpop.xlane.xlu1 %2752 }
 0x5b1   : > { %12139 = vrcp.f32 %v2753_v9 }
 0x5b2   : > { %3481 = vrot.lane.b32.xlu1 %v12855_v32, %s12427_s30 }
 0x5b6   : > { %3479 = vrot.lane.b32.xlu1 %v12885_v50, %s12427_s30 }
 0x5b8   : > { %v2759_v20 = vpop.xlane.xlu1 %2758 }
 0x5b9   : > { %12141 = vrcp.f32 %v2759_v20 }
 0x5ba   : > { %3581 = vrot.lane.b32.xlu1 %v12875_v44, %s12427_s30 }
 0x5bb   : > { %v12140_v25 = vpop.eup %12139 }
 0x5bc   : > { %v2762_v62 = vpop.xlane.xlu0 %2761  ;;  %v2781_v6 = vmul.f32 %v12140_v25, %v13164_v17 }
 0x5bd   : > { %12143 = vrcp.f32 %v2762_v62 }
 0x5be   : > { %3579 = vrot.lane.b32.xlu1 %v12899_v54, %s12427_s30  ;;  %v2789_v40 = vpack.c.bf16 %v2781_v6, %v2781_v6 }
 0x5c0   : > { %11228 = vmatmul.mubr.msk.bf16.vlgmr.msra.gmra.mrb[56].mxu1 %vm1810_vm3, %v2789_v40  ;;  %v3092_v42 = vpop.permute.xlu0 %3091 }
 0x5c1   : > { %11238 = vmatpush3.bf16.msra.mxu1 %v2950_v31  ;;  %11239 = vmatprep.mubr.msk.bf16.mxu1 %vm12425_vm0, %v15083_v45  ;;  %v3097_v53 = vsel %vm1910_vm2, %v3092_v42, 0 }
 0x5c2   : > { %3773 = vrot.lane.b32.xlu1 %v12917_v2, %s12427_s30  ;;  %11249 = vmatprep.subr.bf16.mxu1 %v15083_v45 }
 0x5c3   : > { %v12142_v17 = vpop.eup %12141 }
 0x5c4   : > { %v2783_v39 = vmul.f32 %v12142_v17, %v13168_v26 }
 0x5c6   : > { %3821 = vrot.lane.b32.xlu1 %v13007_v28, %s12427_s30  ;;  %v2791_v7 = vpack.c.bf16 %v2783_v39, %v2783_v39 }
 0x5c7   : > { %v12144_v57 = vpop.eup %12143 }
 0x5c8   : > { %11240 = vmatmul.mubr.msk.bf16.vlgmr.msra.gmra.mrb[60].mxu1 %vm1810_vm3, %v2791_v7  ;;  %v2784_v15 = vmul.f32 %v12144_v57, %v13172_v8  ;;  %v3141_v8 = vpop.permute.xlu1 %3140 }
 0x5c9   : > { %11250 = vmatpush3.bf16.msra.mxu1 %v3048_v29  ;;  %11251 = vmatprep.mubr.msk.bf16.mxu1 %vm12425_vm0, %v15083_v45  ;;  %v3146_v47 = vsel %vm1910_vm2, %v3141_v8, 0 }
 0x5ca   : > { %3869 = vrot.lane.b32.xlu1 %v13013_v33, %s12427_s30  ;;  %v2792_v26 = vpack.c.bf16 %v2784_v15, %v2784_v15  ;;  %11261 = vmatprep.subr.bf16.mxu1 %v15083_v45 }
 0x5cc   : > { %11246 = vmatmul.mubr.msk.bf16.vlgmr.msra.gmra.mrb[72].mxu0 %vm1810_vm3, %v2792_v26 }
 0x5cd   : > { %11256 = vmatpush3.bf16.msra.mxu0 %v3097_v53  ;;  %11257 = vmatprep.mubr.msk.bf16.mxu0 %vm12425_vm0, %v15083_v45 }
 0x5ce   : > { %11267 = vmatprep.subr.bf16.mxu0 %v15083_v45 }
 0x5ed   : > { %v2765_v3 = vpop.xlane.xlu1 %2764 }
 0x5ee   : > { %12145 = vrcp.f32 %v2765_v3 }
 0x5f1   : > { %v2768_v19 = vpop.xlane.xlu0 %2767  ;;  %v3282_v62 = vpop.permute.xlu1 %3281 }
 0x5f2   : > { %12147 = vrcp.f32 %v2768_v19  ;;  %v3287_v42 = vsel %vm1441_vm1, %v3282_v62, 0 }
 0x5f5   : > { %v3232_v52 = vpop.permute.xlu0 %3231 }
 0x5f6   : > { %v3237_v55 = vsel %vm1441_vm1, %v3232_v52, 0 }
 0x5f8   : > { %v12146_v12 = vpop.eup %12145 }
 0x5f9   : > { %v3230_v34 = vpop.permute.xlu0 %3229  ;;  %v2785_v11 = vmul.f32 %v12146_v12, %v13181_v41 }
 0x5fb   : > { %v2793_v27 = vpack.c.bf16 %v2785_v11, %v2785_v11 }
 0x5fc   : > { %v12148_v30 = vpop.eup %12147 }
 0x5fd   : > { %v3332_v49 = vpop.permute.xlu0 %3331  ;;  %11252 = vmatmul.mubr.msk.bf16.vlgmr.msra.gmra.mrb[64].mxu1 %vm1810_vm3, %v2793_v27  ;;  %v2786_v43 = vmul.f32 %v12148_v30, %v13185_v61 }
 0x5fe   : > { %11262 = vmatpush3.bf16.msra.mxu1 %v3146_v47  ;;  %11263 = vmatprep.mubr.msk.bf16.mxu1 %vm12425_vm0, %v15083_v45  ;;  %v3337_v61 = vsel %vm1441_vm1, %v3332_v49, 0 }
 0x5ff   : > { %v2794_v35 = vpack.c.bf16 %v2786_v43, %v2786_v43  ;;  %11273 = vmatprep.subr.bf16.mxu1 %v15083_v45 }
 0x601   : > { %11258 = vmatmul.mubr.msk.bf16.vlgmr.msra.gmra.mrb[76].mxu0 %vm1810_vm3, %v2794_v35  ;;  %v3330_v41 = vpop.permute.xlu0 %3329 }
 0x602   : > { %11268 = vmatpush3.bf16.xpose.msra.mxu0 %v3237_v55  ;;  %11269 = vmatprep.mubr.msk.bf16.mxu0 %vm12425_vm0, %v15083_v45 }
 0x603   : > { %11279 = vmatprep.subr.bf16.mxu0 %v15083_v45 }
 0x605   : > { %v3432_v14 = vpop.permute.xlu0 %3431 }
 0x606   : > { %v3437_v59 = vsel %vm1441_vm1, %v3432_v14, 0 }
 0x609   : > { %11270 = vmatmul.mubr.msk.bf16.vlgmr.msra.gmra.mrb[80].mxu0 %vm1441_vm1, %v3230_v34  ;;  %v3430_v1 = vpop.permute.xlu0 %3429 }
 0x60a   : > { %11280 = vmatpush3.bf16.xpose.msra.mxu0 %v3337_v61  ;;  %11281 = vmatprep.mubr.msk.bf16.mxu0 %vm12425_vm0, %v15083_v45 }
 0x60b   : > { %11291 = vmatprep.subr.bf16.mxu0 %v15083_v45 }
 0x60d   : > { %v3532_v9 = vpop.permute.xlu0 %3531 }
 0x60e   : > { %v3537_v25 = vsel %vm1441_vm1, %v3532_v9, 0 }
 0x611   : > { %11282 = vmatmul.mubr.msk.bf16.vlgmr.msra.gmra.mrb[84].mxu0 %vm1441_vm1, %v3330_v41  ;;  %v3530_v20 = vpop.permute.xlu0 %3529 }
 0x612   : > { %11292 = vmatpush3.bf16.xpose.msra.mxu0 %v3437_v59  ;;  %11293 = vmatprep.mubr.msk.bf16.mxu0 %vm12425_vm0, %v15083_v45 }
 0x613   : > { %11303 = vmatprep.subr.bf16.mxu0 %v15083_v45 }
 0x615   : > { %v3726_v6 = vpop.permute.xlu0 %3725 }
 0x616   : > { %v3731_v40 = vsel %vm1910_vm2, %v3726_v6, 0 }
 0x619   : > { %11294 = vmatmul.mubr.msk.bf16.vlgmr.msra.gmra.mrb[88].mxu0 %vm1441_vm1, %v3430_v1 }
 0x61a   : > { %11304 = vmatpush3.bf16.xpose.msra.mxu0 %v3537_v25  ;;  %11305 = vmatprep.mubr.msk.bf16.mxu0 %vm12425_vm0, %v15083_v45 }
 0x61b   : > { %11315 = vmatprep.subr.bf16.mxu0 %v15083_v45 }
 0x621   : > { %11306 = vmatmul.mubr.msk.bf16.vlgmr.msra.gmra.mrb[92].mxu0 %vm1441_vm1, %v3530_v20 }
 0x622   : > { %11316 = vmatpush3.bf16.msra.mxu0 %v3731_v40  ;;  %v2771_v31 = vpop.xlane.xlu1 %2770  ;;  %11317 = vmatprep.mubr.msk.bf16.mxu0 %vm12425_vm0, %v15083_v45 }
 0x623   : > { %12149 = vrcp.f32 %v2771_v31  ;;  %11327 = vmatprep.subr.bf16.mxu0 %v15083_v45 }
 0x626   : > { %v3280_v17 = vpop.permute.xlu1 %3279 }
 0x62a   : > { %v3382_v39 = vpop.permute.xlu1 %3381 }
 0x62b   : > { %v3387_v53 = vsel %vm1441_vm1, %v3382_v39, 0 }
 0x62d   : > { %v12150_v7 = vpop.eup %12149 }
 0x62e   : > { %v2787_v57 = vmul.f32 %v12150_v7, %v13216_v13  ;;  %v3380_v15 = vpop.permute.xlu1 %3379 }
 0x630   : > { %v2795_v29 = vpack.c.bf16 %v2787_v57, %v2787_v57 }
 0x632   : > { %11264 = vmatmul.mubr.msk.bf16.vlgmr.msra.gmra.mrb[68].mxu1 %vm1810_vm3, %v2795_v29  ;;  %v3482_v26 = vpop.permute.xlu1 %3481 }
 0x633   : > { %11274 = vmatpush3.bf16.xpose.msra.mxu1 %v3287_v42  ;;  %11275 = vmatprep.mubr.msk.bf16.mxu1 %vm12425_vm0, %v15083_v45  ;;  %v3487_v8 = vsel %vm1441_vm1, %v3482_v26, 0 }
 0x634   : > { %11285 = vmatprep.subr.bf16.mxu1 %v15083_v45 }
 0x636   : > { %v3480_v13 = vpop.permute.xlu1 %3479 }
 0x63a   : > { %11276 = vmatmul.mubr.msk.bf16.vlgmr.msra.gmra.mrb[72].mxu1 %vm1441_vm1, %v3280_v17  ;;  %v3582_v3 = vpop.permute.xlu1 %3581 }
 0x63b   : > { %11286 = vmatpush3.bf16.xpose.msra.mxu1 %v3387_v53  ;;  %11287 = vmatprep.mubr.msk.bf16.mxu1 %vm12425_vm0, %v15083_v45  ;;  %v3587_v52 = vsel %vm1441_vm1, %v3582_v3, 0 }
 0x63c   : > { %11297 = vmatprep.subr.bf16.mxu1 %v15083_v45 }
 0x63e   : > { %v3580_v19 = vpop.permute.xlu1 %3579 }
 0x642   : > { %11288 = vmatmul.mubr.msk.bf16.vlgmr.msra.gmra.mrb[76].mxu1 %vm1441_vm1, %v3380_v15  ;;  %v3774_v12 = vpop.permute.xlu1 %3773 }
 0x643   : > { %11298 = vmatpush3.bf16.xpose.msra.mxu1 %v3487_v8  ;;  %11299 = vmatprep.mubr.msk.bf16.mxu1 %vm12425_vm0, %v15083_v45  ;;  %v3779_v34 = vsel %vm1910_vm2, %v3774_v12, 0 }
 0x644   : > { %11309 = vmatprep.subr.bf16.mxu1 %v15083_v45 }
 0x64a   : > { %11300 = vmatmul.mubr.msk.bf16.vlgmr.msra.gmra.mrb[80].mxu1 %vm1441_vm1, %v3480_v13 }
 0x64b   : > { %11310 = vmatpush3.bf16.xpose.msra.mxu1 %v3587_v52  ;;  %11311 = vmatprep.mubr.msk.bf16.mxu1 %vm12425_vm0, %v15083_v45 }
 0x64c   : > { %11321 = vmatprep.subr.bf16.mxu1 %v15083_v45 }
 0x652   : > { %11312 = vmatmul.mubr.msk.bf16.vlgmr.msra.gmra.mrb[84].mxu1 %vm1441_vm1, %v3580_v19 }
 0x653   : > { %11322 = vmatpush3.bf16.msra.mxu1 %v3779_v34  ;;  %11323 = vmatprep.mubr.msk.bf16.mxu1 %vm12425_vm0, %v15083_v45 }
 0x654   : > { %11333 = vmatprep.subr.bf16.mxu1 %v15083_v45 }
 0x65a   : > { %v13325_v11 = vpop.f32.mrb[64].mxu0 }
 0x65b   : > { %v11223_v27 = vpop.f32.mrb[65].mxu0 }
 0x65c   : > { %v2842_v30 = vpop.f32.mrb[66].mxu0 }
 0x65d   : > { %v11224_v47 = vpop.f32.mrb[67].mxu0 }
 0x662   : > { %v13327_v49 = vpop.f32.mrb[68].mxu0 }
 0x663   : > { %v11235_v43 = vpop.f32.mrb[69].mxu0 }
 0x664   : > { %v2940_v35 = vpop.f32.mrb[70].mxu0 }
 0x665   : > { %v11236_v55 = vpop.f32.mrb[71].mxu0 }
 0x693   : > { %v13329_v41 = vpop.f32.mrb[56].mxu1 }
 0x694   : > { %v11229_v14 = vpop.f32.mrb[57].mxu1 }
 0x695   : > { %v2891_v61 = vpop.f32.mrb[58].mxu1 }
 0x696   : > { %v11230_v1 = vpop.f32.mrb[59].mxu1 }
 0x69b   : > { %v13331_v59 = vpop.f32.mrb[60].mxu1 }
 0x69c   : > { %v11241_v9 = vpop.f32.mrb[61].mxu1 }
 0x69d   : > { %v2989_v20 = vpop.f32.mrb[62].mxu1 }
 0x69e   : > { %v11242_v25 = vpop.f32.mrb[63].mxu1 }
 0x69f   : > { %v13333_v62 = vpop.f32.mrb[72].mxu0 }
 0x6a0   : > { %v11247_v6 = vpop.f32.mrb[73].mxu0 }
 0x6a1   : > { %v3038_v40 = vpop.f32.mrb[74].mxu0 }
 0x6a2   : > { %v11248_v31 = vpop.f32.mrb[75].mxu0 }
 0x6d0   : > { %v13335_v17 = vpop.f32.mrb[64].mxu1 }
 0x6d1   : > { %v11253_v39 = vpop.f32.mrb[65].mxu1 }
 0x6d2   : > { %v3087_v7 = vpop.f32.mrb[66].mxu1 }
 0x6d3   : > { %v11254_v57 = vpop.f32.mrb[67].mxu1 }
 0x6d4   : > { %v13337_v29 = vpop.f32.mrb[76].mxu0 }
 0x6d5   : > { %v11259_v15 = vpop.f32.mrb[77].mxu0 }
 0x6d6   : > { %v3136_v42 = vpop.f32.mrb[78].mxu0 }
 0x6d7   : > { %v11260_v26 = vpop.f32.mrb[79].mxu0 }
 0x6dc   : > { %v3273_v53 = vpop.f32.mrb[80].mxu0 }
 0x6dd   : > { %v11271_v13 = vpop.f32.mrb[81].mxu0  ;;  %v3629_v8 = vsel %vm1810_vm3, %v3273_v53, -inf }
 0x6de   : > { %3630 = vmax.xlane.f32.xlu0 %v3629_v8  ;;  %v3276_v3 = vpop.f32.mrb[82].mxu0 }
 0x6df   : > { %v11272_v19 = vpop.f32.mrb[83].mxu0 }
 0x6e4   : > { %v3373_v52 = vpop.f32.mrb[84].mxu0 }
 0x6e5   : > { %v11283_v12 = vpop.f32.mrb[85].mxu0  ;;  %v3635_v34 = vsel %vm1810_vm3, %v3373_v52, -inf }
 0x6e6   : > { %3636 = vmax.xlane.f32.xlu0 %v3635_v34  ;;  %v3376_v27 = vpop.f32.mrb[86].mxu0 }
 0x6e7   : > { %v11284_v30 = vpop.f32.mrb[87].mxu0 }
 0x6ec   : > { %v13341_v47 = vpop.f32.mrb[88].mxu0 }
 0x6ed   : > { %v11295_v43 = vpop.f32.mrb[89].mxu0  ;;  %v3641_v19 = vsel %vm1810_vm3, %v13341_v47, -inf }
 0x6ee   : > { %v3476_v35 = vpop.f32.mrb[90].mxu0 }
 0x6ef   : > { %v11296_v55 = vpop.f32.mrb[91].mxu0 }
 0x6f4   : > { %v13343_v14 = vpop.f32.mrb[92].mxu0 }
 0x6f5   : > { %v11307_v61 = vpop.f32.mrb[93].mxu0  ;;  %v3647_v27 = vsel %vm1810_vm3, %v13343_v14, -inf }
 0x6f6   : > { %v3576_v1 = vpop.f32.mrb[94].mxu0 }
 0x6f7   : > { %v11308_v9 = vpop.f32.mrb[95].mxu0 }
 0x705   : > { %v13345_v20 = vpop.f32.mrb[68].mxu1 }
 0x706   : > { %v11265_v25 = vpop.f32.mrb[69].mxu1 }
 0x707   : > { %v3185_v6 = vpop.f32.mrb[70].mxu1 }
 0x708   : > { %v11266_v40 = vpop.f32.mrb[71].mxu1 }
 0x70d   : > { %v3323_v31 = vpop.f32.mrb[72].mxu1 }
 0x70e   : > { %v11277_v39 = vpop.f32.mrb[73].mxu1  ;;  %v3632_v7 = vsel %vm1810_vm3, %v3323_v31, -inf }
 0x70f   : > { %3633 = vmax.xlane.f32.xlu1 %v3632_v7  ;;  %v3326_v57 = vpop.f32.mrb[74].mxu1 }
 0x710   : > { %v11278_v15 = vpop.f32.mrb[75].mxu1 }
 0x715   : > { %v3423_v42 = vpop.f32.mrb[76].mxu1 }
 0x716   : > { %v11289_v26 = vpop.f32.mrb[77].mxu1  ;;  %v3638_v13 = vsel %vm1810_vm3, %v3423_v42, -inf }
 0x717   : > { %3639 = vmax.xlane.f32.xlu0 %v3638_v13  ;;  %v3426_v8 = vpop.f32.mrb[78].mxu1 }
 0x718   : > { %v11290_v3 = vpop.f32.mrb[79].mxu1 }
 0x71b   : > { %3642 = vmax.xlane.f32.xlu0 %v3641_v19  ;;  %v3822_v19 = vpop.permute.xlu1 %3821 }
 0x71d   : > { %v3523_v12 = vpop.f32.mrb[80].mxu1 }
 0x71e   : > { %v11301_v34 = vpop.f32.mrb[81].mxu1  ;;  %v3644_v30 = vsel %vm1810_vm3, %v3523_v12, -inf }
 0x71f   : > { %3648 = vmax.xlane.f32.xlu0 %v3647_v27  ;;  %3645 = vmax.xlane.f32.xlu1 %v3644_v30  ;;  %v3526_v43 = vpop.f32.mrb[82].mxu1 }
 0x720   : > { %v11302_v35 = vpop.f32.mrb[83].mxu1 }
 0x725   : > { %v13354_v55 = vpop.f32.mrb[84].mxu1 }
 0x726   : > { %v11313_v61 = vpop.f32.mrb[85].mxu1  ;;  %v3650_v25 = vsel %vm1810_vm3, %v13354_v55, -inf }
 0x727   : > { %v3626_v1 = vpop.f32.mrb[86].mxu1 }
 0x728   : > { %v11314_v9 = vpop.f32.mrb[87].mxu1 }
 0x730   : > { %3965 = vrot.lane.b32.xlu1 %v13049_v21, %s12427_s30 }
 0x735   : > { %3917 = vrot.lane.b32.xlu0 %v13026_v60, %s12427_s30 }
 0x754   : > { %3651 = vmax.xlane.f32.xlu1 %v3650_v25 }
 0x76b   : > { %v3631_v6 = vpop.xlane.xlu0 %3630 }
 0x76c   : > { %v3653_v40 = vsub.f32 %v3273_v53, %v3631_v6  ;;  %v13370_v53 = vpop.permute.xlu1 %3869 }
 0x76e   : > { %v3661_v39 = vmul.f32 1.442695, %v3653_v40 }
 0x770   : > { %12151 = vpow2.f32 %v3661_v39 }
 0x773   : > { %v3637_v7 = vpop.xlane.xlu0 %3636 }
 0x774   : > { %v3655_v57 = vsub.f32 %v3373_v52, %v3637_v7 }
 0x776   : > { %v3665_v15 = vmul.f32 1.442695, %v3655_v57 }
 0x778   : > { %12153 = vpow2.f32 %v3665_v15 }
 0x77a   : > { %v13362_v26 = vpop.eup %12151 }
 0x77b   : > { %v3677_v13 = vsel %vm1810_vm3, %v13362_v26, 0.0 }
 0x77c   : > { %3678 = vadd.xlane.f32.xlu0 %v3677_v13 }
 0x782   : > { %v13366_v8 = vpop.eup %12153 }
 0x783   : > { %v3683_v3 = vsel %vm1810_vm3, %v13366_v8, 0.0 }
 0x784   : > { %3684 = vadd.xlane.f32.xlu0 %v3683_v3 }
 0x79c   : > { %v3634_v34 = vpop.xlane.xlu1 %3633 }
 0x79d   : > { %v3654_v27 = vsub.f32 %v3323_v31, %v3634_v34 }
 0x79f   : > { %v3663_v52 = vmul.f32 1.442695, %v3654_v27 }
 0x7a1   : > { %12155 = vpow2.f32 %v3663_v52 }
 0x7a4   : > { %v3640_v30 = vpop.xlane.xlu0 %3639 }
 0x7a5   : > { %v3656_v43 = vsub.f32 %v3423_v42, %v3640_v30 }
 0x7a7   : > { %v3667_v35 = vmul.f32 1.442695, %v3656_v43 }
 0x7a8   : > { %v3643_v61 = vpop.xlane.xlu0 %3642 }
 0x7a9   : > { %12157 = vpow2.f32 %v3667_v35  ;;  %v3657_v1 = vsub.f32 %v13341_v47, %v3643_v61 }
 0x7ab   : > { %v13373_v9 = vpop.eup %12155  ;;  %v3669_v25 = vmul.f32 1.442695, %v3657_v1 }
 0x7ac   : > { %v3680_v6 = vsel %vm1810_vm3, %v13373_v9, 0.0  ;;  %v3646_v47 = vpop.xlane.xlu1 %3645  ;;  %v3649_v57 = vpop.xlane.xlu0 %3648 }
 0x7ad   : > { %12159 = vpow2.f32 %v3669_v25  ;;  %3681 = vadd.xlane.f32.xlu1 %v3680_v6  ;;  %v3658_v7 = vsub.f32 %v3523_v12, %v3646_v47  ;;  %v3659_v15 = vsub.f32 %v13343_v14, %v3649_v57 }
 0x7af   : > { %v3671_v13 = vmul.f32 1.442695, %v3658_v7  ;;  %v3673_v3 = vmul.f32 1.442695, %v3659_v15 }
 0x7b0   : > { %v3966_v14 = vpop.permute.xlu1 %3965  ;;  %v3918_v12 = vpop.permute.xlu0 %3917 }
 0x7b1   : > { %12161 = vpow2.f32 %v3671_v13 }
 0x7b2   : > { %12163 = vpow2.f32 %v3673_v3 }
 0x7b3   : > { %v13377_v40 = vpop.eup %12157 }
 0x7b4   : > { %v3686_v31 = vsel %vm1810_vm3, %v13377_v40, 0.0 }
 0x7b5   : > { %3687 = vadd.xlane.f32.xlu1 %v3686_v31  ;;  %v3971_v31 = vsel %vm1910_vm2, %v3966_v14, 0 }
 0x7b7   : > { %v13381_v42 = vpop.eup %12159 }
 0x7b8   : > { %v3689_v39 = vsel %vm1810_vm3, %v13381_v42, 0.0 }
 0x7b9   : > { %3690 = vadd.xlane.f32.xlu0 %v3689_v39 }
 0x7bb   : > { %v13390_v34 = vpop.eup %12161 }
 0x7bc   : > { %v3692_v27 = vsel %vm1810_vm3, %v13390_v34, 0.0  ;;  %v13394_v52 = vpop.eup %12163 }
 0x7bd   : > { %v3695_v30 = vsel %vm1810_vm3, %v13394_v52, 0.0 }
 0x7c6   : > { %4061 = vrot.lane.b32.xlu1 %v13067_v56, %s12427_s30 }
 0x7cf   : > { %4013 = vrot.lane.b32.xlu0 %v13045_v16, %s12427_s30 }
 0x7e1   : > { %v3652_v43 = vpop.xlane.xlu1 %3651 }
 0x7e2   : > { %v3660_v35 = vsub.f32 %v13354_v55, %v3652_v43  ;;  %v3827_v55 = vsel %vm1910_vm2, %v3822_v19, 0  ;;  %v3923_v19 = vsel %vm1910_vm2, %v3918_v12, 0 }
 0x7e4   : > { %v3675_v1 = vmul.f32 1.442695, %v3660_v35 }
 0x7ea   : > { %3693 = vadd.xlane.f32.xlu1 %v3692_v27 }
 0x7ee   : > { %3696 = vadd.xlane.f32.xlu0 %v3695_v30 }
 0x7fb   : > { %4202 = vrot.lane.b32.xlu1 %v12801_v0, %s12428_s14 }
 0x804   : > { %4152 = vrot.lane.b32.xlu0 %v12794_v58, %s12428_s14 }
 0x808   : > { %4150 = vrot.lane.b32.xlu0 %v12804_v4, %s12428_s14 }
 0x809   : > { %v3679_v61 = vpop.xlane.xlu0 %3678 }
 0x80a   : > { %12165 = vrcp.f32 %v3679_v61 }
 0x80b   : > { %12167 = vpow2.f32 %v3675_v1 }
 0x80c   : > { %4252 = vrot.lane.b32.xlu0 %v12806_v5, %s12428_s14 }
 0x810   : > { %4250 = vrot.lane.b32.xlu0 %v12834_v23, %s12428_s14 }
 0x811   : > { %v3685_v0 = vpop.xlane.xlu0 %3684 }
 0x812   : > { %12169 = vrcp.f32 %v3685_v0 }
 0x814   : > { %v12166_v58 = vpop.eup %12165  ;;  %4352 = vrot.lane.b32.xlu0 %v12836_v24, %s12428_s14 }
 0x815   : > { %v3709_v4 = vmul.f32 %v12166_v58, %v13362_v26  ;;  %v13418_v5 = vpop.eup %12167 }
 0x817   : > { %v3717_v25 = vpack.c.bf16 %v3709_v4, %v3709_v4 }
 0x818   : > { %4350 = vrot.lane.b32.xlu0 %v12860_v37, %s12428_s14  ;;  %v3698_v37 = vsel %vm1810_vm3, %v13418_v5, 0.0 }
 0x819   : > { %11318 = vmatmul.mubr.msk.bf16.vlgmr.msra.gmra.mrb[96].mxu0 %vm1810_vm3, %v3717_v25 }
 0x81a   : > { %11328 = vmatpush3.bf16.msra.mxu0 %v3827_v55  ;;  %11329 = vmatprep.mubr.msk.bf16.mxu0 %vm12425_vm0, %v15083_v45 }
 0x81b   : > { %11339 = vmatprep.subr.bf16.mxu0 %v15083_v45 }
 0x81c   : > { %v12170_v23 = vpop.eup %12169  ;;  %4452 = vrot.lane.b32.xlu0 %v12862_v38, %s12428_s14 }
 0x81d   : > { %v3711_v24 = vmul.f32 %v12170_v23, %v13366_v8 }
 0x81f   : > { %3699 = vadd.xlane.f32.xlu1 %v3698_v37  ;;  %v3719_v26 = vpack.c.bf16 %v3711_v24, %v3711_v24 }
 0x820   : > { %4450 = vrot.lane.b32.xlu0 %v12883_v46, %s12428_s14 }
 0x821   : > { %11330 = vmatmul.mubr.msk.bf16.vlgmr.msra.gmra.mrb[100].mxu0 %vm1810_vm3, %v3719_v26 }
 0x822   : > { %11340 = vmatpush3.bf16.msra.mxu0 %v3923_v19  ;;  %11341 = vmatprep.mubr.msk.bf16.mxu0 %vm12425_vm0, %v15083_v45 }
 0x823   : > { %11351 = vmatprep.subr.bf16.mxu0 %v15083_v45 }
 0x830   : > { %4200 = vrot.lane.b32.xlu1 %v12832_v22, %s12428_s14 }
 0x834   : > { %4302 = vrot.lane.b32.xlu1 %v12829_v18, %s12428_s14 }
 0x838   : > { %4300 = vrot.lane.b32.xlu1 %v12858_v36, %s12428_s14 }
 0x83a   : > { %v3682_v38 = vpop.xlane.xlu1 %3681 }
 0x83b   : > { %12171 = vrcp.f32 %v3682_v38 }
 0x83c   : > { %4402 = vrot.lane.b32.xlu1 %v12855_v32, %s12428_s14  ;;  %v3875_v32 = vsel %vm1910_vm2, %v13370_v53, 0 }
 0x840   : > { %4400 = vrot.lane.b32.xlu1 %v12885_v50, %s12428_s14 }
 0x842   : > { %v3688_v46 = vpop.xlane.xlu1 %3687 }
 0x843   : > { %12173 = vrcp.f32 %v3688_v46 }
 0x844   : > { %4502 = vrot.lane.b32.xlu1 %v12875_v44, %s12428_s14 }
 0x845   : > { %v12172_v22 = vpop.eup %12171 }
 0x846   : > { %v3691_v8 = vpop.xlane.xlu0 %3690  ;;  %v3710_v18 = vmul.f32 %v12172_v22, %v13373_v9 }
 0x847   : > { %12175 = vrcp.f32 %v3691_v8 }
 0x848   : > { %4500 = vrot.lane.b32.xlu1 %v12899_v54, %s12428_s14  ;;  %v3718_v36 = vpack.c.bf16 %v3710_v18, %v3710_v18 }
 0x84a   : > { %11324 = vmatmul.mubr.msk.bf16.vlgmr.msra.gmra.mrb[88].mxu1 %vm1810_vm3, %v3718_v36  ;;  %v4014_v53 = vpop.permute.xlu0 %4013 }
 0x84b   : > { %11334 = vmatpush3.bf16.msra.mxu1 %v3875_v32  ;;  %11335 = vmatprep.mubr.msk.bf16.mxu1 %vm12425_vm0, %v15083_v45  ;;  %v4019_v47 = vsel %vm1910_vm2, %v4014_v53, 0 }
 0x84c   : > { %11345 = vmatprep.subr.bf16.mxu1 %v15083_v45 }
 0x84d   : > { %v12174_v44 = vpop.eup %12173 }
 0x84e   : > { %v3712_v50 = vmul.f32 %v12174_v44, %v13377_v40  ;;  %v4062_v40 = vpop.permute.xlu1 %4061 }
 0x84f   : > { %v4067_v14 = vsel %vm1910_vm2, %v4062_v40, 0 }
 0x850   : > { %v3720_v9 = vpack.c.bf16 %v3712_v50, %v3712_v50 }
 0x851   : > { %v12176_v6 = vpop.eup %12175 }
 0x852   : > { %11336 = vmatmul.mubr.msk.bf16.vlgmr.msra.gmra.mrb[92].mxu1 %vm1810_vm3, %v3720_v9  ;;  %v3713_v54 = vmul.f32 %v12176_v6, %v13381_v42 }
 0x853   : > { %11346 = vmatpush3.bf16.msra.mxu1 %v3971_v31  ;;  %11347 = vmatprep.mubr.msk.bf16.mxu1 %vm12425_vm0, %v15083_v45 }
 0x854   : > { %v3721_v39 = vpack.c.bf16 %v3713_v54, %v3713_v54  ;;  %11357 = vmatprep.subr.bf16.mxu1 %v15083_v45 }
 0x856   : > { %11342 = vmatmul.mubr.msk.bf16.vlgmr.msra.gmra.mrb[104].mxu0 %vm1810_vm3, %v3721_v39 }
 0x857   : > { %11352 = vmatpush3.bf16.msra.mxu0 %v4019_v47  ;;  %11353 = vmatprep.mubr.msk.bf16.mxu0 %vm12425_vm0, %v15083_v45 }
 0x858   : > { %11363 = vmatprep.subr.bf16.mxu0 %v15083_v45 }
 0x877   : > { %v3694_v42 = vpop.xlane.xlu1 %3693 }
 0x878   : > { %12177 = vrcp.f32 %v3694_v42 }
 0x87b   : > { %v3697_v7 = vpop.xlane.xlu0 %3696  ;;  %v4203_v55 = vpop.permute.xlu1 %4202 }
 0x87c   : > { %12179 = vrcp.f32 %v3697_v7  ;;  %v4208_v22 = vsel %vm1441_vm1, %v4203_v55, 0 }
 0x87f   : > { %v4153_v57 = vpop.permute.xlu0 %4152 }
 0x880   : > { %v4158_v61 = vsel %vm1441_vm1, %v4153_v57, 0 }
 0x882   : > { %v12178_v15 = vpop.eup %12177 }
 0x883   : > { %v4151_v13 = vpop.permute.xlu0 %4150  ;;  %v3714_v3 = vmul.f32 %v12178_v15, %v13390_v34 }
 0x885   : > { %v3722_v27 = vpack.c.bf16 %v3714_v3, %v3714_v3 }
 0x886   : > { %v12180_v30 = vpop.eup %12179 }
 0x887   : > { %11348 = vmatmul.mubr.msk.bf16.vlgmr.msra.gmra.mrb[96].mxu1 %vm1810_vm3, %v3722_v27  ;;  %v3715_v12 = vmul.f32 %v12180_v30, %v13394_v52  ;;  %v4253_v43 = vpop.permute.xlu0 %4252 }
 0x888   : > { %11358 = vmatpush3.bf16.msra.mxu1 %v4067_v14  ;;  %11359 = vmatprep.mubr.msk.bf16.mxu1 %vm12425_vm0, %v15083_v45  ;;  %v4258_v52 = vsel %vm1441_vm1, %v4253_v43, 0 }
 0x889   : > { %v3723_v35 = vpack.c.bf16 %v3715_v12, %v3715_v12  ;;  %11369 = vmatprep.subr.bf16.mxu1 %v15083_v45 }
 0x88b   : > { %11354 = vmatmul.mubr.msk.bf16.vlgmr.msra.gmra.mrb[108].mxu0 %vm1810_vm3, %v3723_v35  ;;  %v4251_v34 = vpop.permute.xlu0 %4250 }
 0x88c   : > { %11364 = vmatpush3.bf16.xpose.msra.mxu0 %v4158_v61  ;;  %11365 = vmatprep.mubr.msk.bf16.mxu0 %vm12425_vm0, %v15083_v45 }
 0x88d   : > { %11375 = vmatprep.subr.bf16.mxu0 %v15083_v45 }
 0x88f   : > { %v4353_v1 = vpop.permute.xlu0 %4352 }
 0x890   : > { %v4358_v58 = vsel %vm1441_vm1, %v4353_v1, 0 }
 0x893   : > { %11366 = vmatmul.mubr.msk.bf16.vlgmr.msra.gmra.mrb[112].mxu0 %vm1441_vm1, %v4151_v13  ;;  %v4351_v0 = vpop.permute.xlu0 %4350 }
 0x894   : > { %11376 = vmatpush3.bf16.xpose.msra.mxu0 %v4258_v52  ;;  %11377 = vmatprep.mubr.msk.bf16.mxu0 %vm12425_vm0, %v15083_v45 }
 0x895   : > { %11387 = vmatprep.subr.bf16.mxu0 %v15083_v45 }
 0x897   : > { %v4453_v4 = vpop.permute.xlu0 %4452 }
 0x898   : > { %v4458_v25 = vsel %vm1441_vm1, %v4453_v4, 0 }
 0x89b   : > { %11378 = vmatmul.mubr.msk.bf16.vlgmr.msra.gmra.mrb[116].mxu0 %vm1441_vm1, %v4251_v34  ;;  %v4451_v23 = vpop.permute.xlu0 %4450 }
 0x89c   : > { %11388 = vmatpush3.bf16.xpose.msra.mxu0 %v4358_v58  ;;  %11389 = vmatprep.mubr.msk.bf16.mxu0 %vm12425_vm0, %v15083_v45 }
 0x89d   : > { %11399 = vmatprep.subr.bf16.mxu0 %v15083_v45 }
 0x8a3   : > { %11390 = vmatmul.mubr.msk.bf16.vlgmr.msra.gmra.mrb[120].mxu0 %vm1441_vm1, %v4351_v0 }
 0x8a4   : > { %11400 = vmatpush3.bf16.xpose.msra.mxu0 %v4458_v25  ;;  %11401 = vmatprep.mubr.msk.bf16.mxu0 %vm12425_vm0, %v15083_v45 }
 0x8a5   : > { %11411 = vmatprep.subr.bf16.mxu0 %v15083_v45 }
 0x8ab   : > { %11402 = vmatmul.mubr.msk.bf16.vlgmr.msra.gmra.mrb[124].mxu0 %vm1441_vm1, %v4451_v23 }
 0x8ac   : > { %v3700_v24 = vpop.xlane.xlu1 %3699  ;;  %11413 = vmatprep.mubr.msk.bf16.mxu0 %vm12425_vm0, %v15083_v45 }
 0x8ad   : > { %12181 = vrcp.f32 %v3700_v24 }
 0x8b0   : > { %v4201_v37 = vpop.permute.xlu1 %4200 }
 0x8b4   : > { %v4303_v38 = vpop.permute.xlu1 %4302 }
 0x8b5   : > { %v4308_v18 = vsel %vm1441_vm1, %v4303_v38, 0 }
 0x8b7   : > { %v12182_v26 = vpop.eup %12181 }
 0x8b8   : > { %v3716_v19 = vmul.f32 %v12182_v26, %v13418_v5  ;;  %v4301_v8 = vpop.permute.xlu1 %4300 }
 0x8ba   : > { %v3724_v46 = vpack.c.bf16 %v3716_v19, %v3716_v19 }
 0x8bc   : > { %11360 = vmatmul.mubr.msk.bf16.vlgmr.msra.gmra.mrb[100].mxu1 %vm1810_vm3, %v3724_v46  ;;  %v4403_v36 = vpop.permute.xlu1 %4402 }
 0x8bd   : > { %11370 = vmatpush3.bf16.xpose.msra.mxu1 %v4208_v22  ;;  %11371 = vmatprep.mubr.msk.bf16.mxu1 %vm12425_vm0, %v15083_v45  ;;  %v4408_v32 = vsel %vm1441_vm1, %v4403_v36, 0 }
 0x8be   : > { %11381 = vmatprep.subr.bf16.mxu1 %v15083_v45 }
 0x8c0   : > { %v4401_v5 = vpop.permute.xlu1 %4400 }
 0x8c4   : > { %11372 = vmatmul.mubr.msk.bf16.vlgmr.msra.gmra.mrb[104].mxu1 %vm1441_vm1, %v4201_v37  ;;  %v4503_v44 = vpop.permute.xlu1 %4502 }
 0x8c5   : > { %11382 = vmatpush3.bf16.xpose.msra.mxu1 %v4308_v18  ;;  %11383 = vmatprep.mubr.msk.bf16.mxu1 %vm12425_vm0, %v15083_v45  ;;  %v4508_v50 = vsel %vm1441_vm1, %v4503_v44, 0 }
 0x8c6   : > { %11393 = vmatprep.subr.bf16.mxu1 %v15083_v45 }
 0x8c8   : > { %v4501_v9 = vpop.permute.xlu1 %4500 }
 0x8cc   : > { %11384 = vmatmul.mubr.msk.bf16.vlgmr.msra.gmra.mrb[108].mxu1 %vm1441_vm1, %v4301_v8 }
 0x8cd   : > { %11394 = vmatpush3.bf16.xpose.msra.mxu1 %v4408_v32  ;;  %11395 = vmatprep.mubr.msk.bf16.mxu1 %vm12425_vm0, %v15083_v45 }
 0x8ce   : > { %11405 = vmatprep.subr.bf16.mxu1 %v15083_v45 }
 0x8d4   : > { %11396 = vmatmul.mubr.msk.bf16.vlgmr.msra.gmra.mrb[112].mxu1 %vm1441_vm1, %v4401_v5 }
 0x8d5   : > { %11406 = vmatpush3.bf16.xpose.msra.mxu1 %v4508_v50  ;;  %11407 = vmatprep.mubr.msk.bf16.mxu1 %vm12425_vm0, %v15083_v45 }
 0x8d6   : > { %11417 = vmatprep.subr.bf16.mxu1 %v15083_v45 }
 0x8dc   : > { %11408 = vmatmul.mubr.msk.bf16.vlgmr.msra.gmra.mrb[116].mxu1 %vm1441_vm1, %v4501_v9 }
 0x8dd   : > { %11419 = vmatprep.mubr.msk.bf16.mxu1 %vm12425_vm0, %v15083_v45 }
 0x8ec   : > { %v13520_v6 = vpop.f32.mrb[96].mxu0 }
 0x8ed   : > { %v11319_v31 = vpop.f32.mrb[97].mxu0 }
 0x8ee   : > { %v3770_v54 = vpop.f32.mrb[98].mxu0 }
 0x8ef   : > { %v11320_v53 = vpop.f32.mrb[99].mxu0 }
 0x8f4   : > { %v13522_v39 = vpop.f32.mrb[100].mxu0 }
 0x8f5   : > { %v11331_v47 = vpop.f32.mrb[101].mxu0 }
 0x8f6   : > { %v3866_v40 = vpop.f32.mrb[102].mxu0 }
 0x8f7   : > { %v11332_v42 = vpop.f32.mrb[103].mxu0 }
 0x91d   : > { %v13524_v7 = vpop.f32.mrb[88].mxu1 }
 0x91e   : > { %v11325_v57 = vpop.f32.mrb[89].mxu1 }
 0x91f   : > { %v3818_v15 = vpop.f32.mrb[90].mxu1 }
 0x920   : > { %v11326_v13 = vpop.f32.mrb[91].mxu1 }
 0x925   : > { %v13526_v3 = vpop.f32.mrb[92].mxu1 }
 0x926   : > { %v11337_v27 = vpop.f32.mrb[93].mxu1 }
 0x927   : > { %v3914_v30 = vpop.f32.mrb[94].mxu1 }
 0x928   : > { %v11338_v14 = vpop.f32.mrb[95].mxu1 }
 0x929   : > { %v13528_v12 = vpop.f32.mrb[104].mxu0 }
 0x92a   : > { %v11343_v43 = vpop.f32.mrb[105].mxu0 }
 0x92b   : > { %v3962_v35 = vpop.f32.mrb[106].mxu0 }
 0x92c   : > { %v11344_v61 = vpop.f32.mrb[107].mxu0 }
 0x95a   : > { %v13530_v34 = vpop.f32.mrb[96].mxu1 }
 0x95b   : > { %v11349_v52 = vpop.f32.mrb[97].mxu1 }
 0x95c   : > { %v4010_v1 = vpop.f32.mrb[98].mxu1 }
 0x95d   : > { %v11350_v0 = vpop.f32.mrb[99].mxu1 }
 0x95e   : > { %v13532_v58 = vpop.f32.mrb[108].mxu0 }
 0x95f   : > { %v11355_v4 = vpop.f32.mrb[109].mxu0 }
 0x960   : > { %v4058_v25 = vpop.f32.mrb[110].mxu0 }
 0x961   : > { %v11356_v55 = vpop.f32.mrb[111].mxu0 }
 0x966   : > { %v4194_v23 = vpop.f32.mrb[112].mxu0 }
 0x967   : > { %v11367_v24 = vpop.f32.mrb[113].mxu0  ;;  %v4550_v37 = vsel %vm1810_vm3, %v4194_v23, -inf }
 0x968   : > { %4551 = vmax.xlane.f32.xlu0 %v4550_v37  ;;  %v4197_v26 = vpop.f32.mrb[114].mxu0 }
 0x969   : > { %v11368_v19 = vpop.f32.mrb[115].mxu0 }
 0x96e   : > { %v4294_v38 = vpop.f32.mrb[116].mxu0 }
 0x96f   : > { %v11379_v46 = vpop.f32.mrb[117].mxu0  ;;  %v4556_v22 = vsel %vm1810_vm3, %v4294_v38, -inf }
 0x970   : > { %4557 = vmax.xlane.f32.xlu0 %v4556_v22  ;;  %v4297_v8 = vpop.f32.mrb[118].mxu0 }
 0x971   : > { %v11380_v18 = vpop.f32.mrb[119].mxu0 }
 0x976   : > { %v13536_v36 = vpop.f32.mrb[120].mxu0 }
 0x977   : > { %v11391_v5 = vpop.f32.mrb[121].mxu0  ;;  %v4562_v1 = vsel %vm1810_vm3, %v13536_v36, -inf }
 0x978   : > { %v4397_v32 = vpop.f32.mrb[122].mxu0 }
 0x979   : > { %v11392_v44 = vpop.f32.mrb[123].mxu0 }
 0x97e   : > { %v13538_v50 = vpop.f32.mrb[124].mxu0 }
 0x97f   : > { %v11403_v9 = vpop.f32.mrb[125].mxu0  ;;  %v4568_v25 = vsel %vm1810_vm3, %v13538_v50, -inf }
 0x980   : > { %v4497_v31 = vpop.f32.mrb[126].mxu0 }
 0x981   : > { %v11404_v54 = vpop.f32.mrb[127].mxu0 }
 0x98f   : > { %v13540_v53 = vpop.f32.mrb[100].mxu1 }
 0x990   : > { %v11361_v47 = vpop.f32.mrb[101].mxu1 }
 0x991   : > { %v4106_v40 = vpop.f32.mrb[102].mxu1 }
 0x992   : > { %v11362_v42 = vpop.f32.mrb[103].mxu1 }
 0x997   : > { %v4244_v57 = vpop.f32.mrb[104].mxu1 }
 0x998   : > { %v11373_v15 = vpop.f32.mrb[105].mxu1  ;;  %v4553_v13 = vsel %vm1810_vm3, %v4244_v57, -inf }
 0x999   : > { %4554 = vmax.xlane.f32.xlu1 %v4553_v13  ;;  %v4247_v27 = vpop.f32.mrb[106].mxu1 }
 0x99a   : > { %v11374_v30 = vpop.f32.mrb[107].mxu1 }
 0x99f   : > { %v13543_v14 = vpop.f32.mrb[108].mxu1 }
 0x9a0   : > { %v11385_v43 = vpop.f32.mrb[109].mxu1  ;;  %v4559_v35 = vsel %vm1810_vm3, %v13543_v14, -inf }
 0x9a1   : > { %4560 = vmax.xlane.f32.xlu0 %v4559_v35  ;;  %v4347_v61 = vpop.f32.mrb[110].mxu1 }
 0x9a2   : > { %v11386_v52 = vpop.f32.mrb[111].mxu1 }
 0x9a5   : > { %4563 = vmax.xlane.f32.xlu0 %v4562_v1 }
 0x9a7   : > { %v13549_v0 = vpop.f32.mrb[112].mxu1 }
 0x9a8   : > { %v11397_v4 = vpop.f32.mrb[113].mxu1  ;;  %v4565_v55 = vsel %vm1810_vm3, %v13549_v0, -inf }
 0x9a9   : > { %4569 = vmax.xlane.f32.xlu0 %v4568_v25  ;;  %4566 = vmax.xlane.f32.xlu1 %v4565_v55  ;;  %v4447_v24 = vpop.f32.mrb[114].mxu1 }
 0x9aa   : > { %v11398_v37 = vpop.f32.mrb[115].mxu1 }
 0x9af   : > { %v4544_v26 = vpop.f32.mrb[116].mxu1 }
 0x9b0   : > { %v11409_v19 = vpop.f32.mrb[117].mxu1  ;;  %v4571_v8 = vsel %vm1810_vm3, %v4544_v26, -inf }
 0x9b1   : > { %v4547_v46 = vpop.f32.mrb[118].mxu1 }
 0x9b2   : > { %v11410_v22 = vpop.f32.mrb[119].mxu1 }
 0x9ba   : > { %4694 = vrot.lane.b32.xlu1 %v12917_v2, %s12428_s14 }
 0x9bf   : > { %4646 = vrot.lane.b32.xlu0 %v12914_v63, %s12428_s14 }
 0x9de   : > { %4572 = vmax.xlane.f32.xlu1 %v4571_v8 }
 0x9f5   : > { %v4552_v18 = vpop.xlane.xlu0 %4551 }
 0x9f6   : > { %v4574_v5 = vsub.f32 %v4194_v23, %v4552_v18 }
 0x9f8   : > { %v4582_v32 = vmul.f32 1.442695, %v4574_v5 }
 0x9fa   : > { %12183 = vpow2.f32 %v4582_v32 }
 0x9fd   : > { %v4558_v44 = vpop.xlane.xlu0 %4557 }
 0x9fe   : > { %v4576_v9 = vsub.f32 %v4294_v38, %v4558_v44 }
 0xa00   : > { %v4586_v31 = vmul.f32 1.442695, %v4576_v9 }
 0xa02   : > { %12185 = vpow2.f32 %v4586_v31 }
 0xa04   : > { %v13560_v54 = vpop.eup %12183 }
 0xa05   : > { %v4598_v47 = vsel %vm1810_vm3, %v13560_v54, 0.0 }
 0xa06   : > { %4599 = vadd.xlane.f32.xlu0 %v4598_v47 }
 0xa0c   : > { %v13564_v2 = vpop.eup %12185 }
 0xa0d   : > { %v4604_v63 = vsel %vm1810_vm3, %v13564_v2, 0.0 }
 0xa0e   : > { %4605 = vadd.xlane.f32.xlu0 %v4604_v63 }
 0xa24   : > { %4742 = vrot.lane.b32.xlu0 %v13007_v28, %s12428_s14 }
 0xa26   : > { %v4555_v23 = vpop.xlane.xlu1 %4554 }
 0xa27   : > { %v4575_v40 = vsub.f32 %v4244_v57, %v4555_v23 }
 0xa29   : > { %v4584_v38 = vmul.f32 1.442695, %v4575_v40 }
 0xa2b   : > { %12187 = vpow2.f32 %v4584_v38 }
 0xa2e   : > { %v4561_v42 = vpop.xlane.xlu0 %4560 }
 0xa2f   : > { %v4577_v25 = vsub.f32 %v13543_v14, %v4561_v42 }
 0xa31   : > { %v4588_v55 = vmul.f32 1.442695, %v4577_v25 }
 0xa32   : > { %v4564_v15 = vpop.xlane.xlu0 %4563 }
 0xa33   : > { %v4578_v13 = vsub.f32 %v13536_v36, %v4564_v15 }
 0xa35   : > { %v13571_v27 = vpop.eup %12187  ;;  %v4590_v30 = vmul.f32 1.442695, %v4578_v13 }
 0xa36   : > { %v4570_v43 = vpop.xlane.xlu0 %4569  ;;  %v4567_v35 = vpop.xlane.xlu1 %4566  ;;  %v4601_v61 = vsel %vm1810_vm3, %v13571_v27, 0.0 }
 0xa37   : > { %12189 = vpow2.f32 %v4590_v30  ;;  %4602 = vadd.xlane.f32.xlu1 %v4601_v61  ;;  %v4580_v14 = vsub.f32 %v13538_v50, %v4570_v43 }
 0xa38   : > { %12191 = vpow2.f32 %v4588_v55 }
 0xa39   : > { %v4594_v5 = vmul.f32 1.442695, %v4580_v14 }
 0xa3a   : > { %v4647_v52 = vpop.permute.xlu0 %4646  ;;  %v4695_v28 = vpop.permute.xlu1 %4694 }
 0xa3b   : > { %v4652_v57 = vsel %vm1910_vm2, %v4647_v52, 0  ;;  %v4700_v1 = vsel %vm1910_vm2, %v4695_v28, 0 }
 0xa3c   : > { %11412 = vmatpush3.bf16.msra.mxu0 %v4652_v57  ;;  %11418 = vmatpush3.bf16.msra.mxu1 %v4700_v1 }
 0xa3d   : > { %11423 = vmatprep.subr.bf16.mxu0 %v15083_v45  ;;  %11429 = vmatprep.subr.bf16.mxu1 %v15083_v45 }
 0xa41   : > { %v13579_v36 = vpop.eup %12189 }
 0xa42   : > { %v4610_v4 = vsel %vm1810_vm3, %v13579_v36, 0.0  ;;  %v13588_v37 = vpop.eup %12191 }
 0xa43   : > { %4611 = vadd.xlane.f32.xlu0 %v4610_v4  ;;  %v4607_v22 = vsel %vm1810_vm3, %v13588_v37, 0.0 }
 0xa48   : > { %4790 = vrot.lane.b32.xlu1 %v13013_v33, %s12428_s14 }
 0xa4c   : > { %4838 = vrot.lane.b32.xlu1 %v13026_v60, %s12428_s14  ;;  %v4579_v60 = vsub.f32 %v13549_v0, %v4567_v35 }
 0xa6b   : > { %v4573_v24 = vpop.xlane.xlu1 %4572 }
 0xa6c   : > { %v4581_v19 = vsub.f32 %v4544_v26, %v4573_v24  ;;  %v4592_v26 = vmul.f32 1.442695, %v4579_v60 }
 0xa6e   : > { %v4596_v46 = vmul.f32 1.442695, %v4581_v19 }
 0xa70   : > { %12193 = vpow2.f32 %v4596_v46  ;;  %4608 = vadd.xlane.f32.xlu1 %v4607_v22 }
 0xa7a   : > { %v13592_v8 = vpop.eup %12193 }
 0xa7b   : > { %v4619_v33 = vsel %vm1810_vm3, %v13592_v8, 0.0 }
 0xa7c   : > { %4620 = vadd.xlane.f32.xlu0 %v4619_v33 }
 0xa81   : > { %4886 = vrot.lane.b32.xlu1 %v13049_v21, %s12428_s14 }
 0xa92   : > { %4934 = vrot.lane.b32.xlu0 %v13045_v16, %s12428_s14 }
 0xa93   : > { %v4600_v18 = vpop.xlane.xlu0 %4599 }
 0xa94   : > { %12195 = vrcp.f32 %v4600_v18 }
 0xa95   : > { %12197 = vpow2.f32 %v4592_v26 }
 0xa96   : > { %3196 = vrot.lane.b32.xlu0 %v13325_v11, %s12428_s14  ;;  %12199 = vpow2.f32 %v4594_v5 }
 0xa9a   : > { %3200 = vrot.lane.b32.xlu0 %v13327_v49, %s12428_s14 }
 0xa9b   : > { %v4606_v21 = vpop.xlane.xlu0 %4605 }
 0xa9c   : > { %12201 = vrcp.f32 %v4606_v21 }
 0xa9e   : > { %v12196_v0 = vpop.eup %12195  ;;  %4117 = vrot.lane.b32.xlu0 %v13520_v6, %s12427_s30 }
 0xa9f   : > { %v4630_v16 = vmul.f32 %v12196_v0, %v13560_v54  ;;  %v4743_v50 = vpop.permute.xlu0 %4742  ;;  %v13609_v32 = vpop.eup %12197 }
 0xaa0   : > { %v4748_v11 = vsel %vm1910_vm2, %v4743_v50, 0  ;;  %v4613_v49 = vsel %vm1810_vm3, %v13609_v32, 0.0  ;;  %v13619_v6 = vpop.eup %12199 }
 0xaa1   : > { %v4638_v44 = vpack.c.bf16 %v4630_v16, %v4630_v16 }
 0xaa2   : > { %4121 = vrot.lane.b32.xlu0 %v13522_v39, %s12427_s30  ;;  %v4616_v39 = vsel %vm1810_vm3, %v13619_v6, 0.0 }
 0xaa3   : > { %11414 = vmatmul.mubr.msk.bf16.vlgmr.msra.gmra.mrb[128].mxu0 %vm1810_vm3, %v4638_v44 }
 0xaa4   : > { %11424 = vmatpush3.bf16.msra.mxu0 %v4748_v11  ;;  %11425 = vmatprep.mubr.msk.bf16.mxu0 %vm12425_vm0, %v15083_v45 }
 0xaa5   : > { %4614 = vadd.xlane.f32.xlu1 %v4613_v49  ;;  %11435 = vmatprep.subr.bf16.mxu0 %v15083_v45 }
 0xaa6   : > { %v12202_v9 = vpop.eup %12201 }
 0xaa7   : > { %v4632_v31 = vmul.f32 %v12202_v9, %v13564_v2 }
 0xaa9   : > { %4617 = vadd.xlane.f32.xlu1 %v4616_v39  ;;  %v4640_v54 = vpack.c.bf16 %v4632_v31, %v4632_v31 }
 0xaab   : > { %11426 = vmatmul.mubr.msk.bf16.vlgmr.msra.gmra.mrb[132].mxu0 %vm1810_vm3, %v4640_v54  ;;  %v11995_v54 = vld [vmem:[%s15133_s5] sm:$0xff]  }
 0xaac   : > { %11437 = vmatprep.mubr.msk.bf16.mxu0 %vm12425_vm0, %v15083_v45 }
 0xaba   : > { %4982 = vrot.lane.b32.xlu1 %v13067_v56, %s12428_s14 }
 0xabe   : > { %3198 = vrot.lane.b32.xlu1 %v13329_v41, %s12428_s14 }
 0xac2   : > { %3202 = vrot.lane.b32.xlu1 %v13331_v59, %s12428_s14 }
 0xac4   : > { %v4603_v47 = vpop.xlane.xlu1 %4602 }
 0xac5   : > { %12203 = vrcp.f32 %v4603_v47  ;;  %v11996_v47 = vld [vmem:[%s15133_s5 + $0x8] sm:$0xff]  }
 0xac6   : > { %4119 = vrot.lane.b32.xlu1 %v13524_v7, %s12427_s30 }
 0xac8   : > { %v4791_v2 = vpop.permute.xlu1 %4790 }
 0xac9   : > { %v4796_v38 = vsel %vm1910_vm2, %v4791_v2, 0 }
 0xaca   : > { %4123 = vrot.lane.b32.xlu1 %v13526_v3, %s12427_s30 }
 0xacc   : > { %v4839_v63 = vpop.permute.xlu1 %4838 }
 0xacd   : > { %v4844_v23 = vsel %vm1910_vm2, %v4839_v63, 0 }
 0xace   : > { %11436 = vmatpush3.bf16.msra.mxu0 %v4844_v23  ;;  %v11999_v23 = vld [vmem:[%s15133_s5 + $0x20] sm:$0xff]  }
 0xacf   : > { %v12204_v56 = vpop.eup %12203  ;;  %11447 = vmatprep.subr.bf16.mxu0 %v15083_v45 }
 0xad0   : > { %v4612_v41 = vpop.xlane.xlu0 %4611  ;;  %v4631_v40 = vmul.f32 %v12204_v56, %v13571_v27 }
 0xad1   : > { %12205 = vrcp.f32 %v4612_v41 }
 0xad2   : > { %v4639_v59 = vpack.c.bf16 %v4631_v40, %v4631_v40 }
 0xad4   : > { %11420 = vmatmul.mubr.msk.bf16.vlgmr.msra.gmra.mrb[120].mxu1 %vm1810_vm3, %v4639_v59  ;;  %v12000_v59 = vld [vmem:[%s15133_s5 + $0x28] sm:$0xff]  }
 0xad5   : > { %11430 = vmatpush3.bf16.msra.mxu1 %v4796_v38  ;;  %11431 = vmatprep.mubr.msk.bf16.mxu1 %vm12425_vm0, %v15083_v45  ;;  %v12001_v38 = vld [vmem:[%s15133_s5 + $0x30] sm:$0xff]  }
 0xad6   : > { %11441 = vmatprep.subr.bf16.mxu1 %v15083_v45 }
 0xadb   : > { %v12206_v7 = vpop.eup %12205 }
 0xadc   : > { %v4634_v3 = vmul.f32 %v12206_v7, %v13579_v36  ;;  %v12002_v7 = vld [vmem:[%s15133_s5 + $0x38] sm:$0xff]  }
 0xade   : > { %v4642_v42 = vpack.c.bf16 %v4634_v3, %v4634_v3 }
 0xae0   : > { %11438 = vmatmul.mubr.msk.bf16.vlgmr.msra.gmra.mrb[136].mxu0 %vm1810_vm3, %v4642_v42 }
 0xae1   : > { %11449 = vmatprep.mubr.msk.bf16.mxu0 %vm12425_vm0, %v15083_v45 }
 0xafd   : > { %v4609_v15 = vpop.xlane.xlu1 %4608 }
 0xafe   : > { %12207 = vrcp.f32 %v4609_v15 }
 0xb01   : > { %v4887_v43 = vpop.permute.xlu1 %4886 }
 0xb02   : > { %v4892_v61 = vsel %vm1910_vm2, %v4887_v43, 0 }
 0xb08   : > { %v12208_v13 = vpop.eup %12207 }
 0xb09   : > { %v4621_v27 = vpop.xlane.xlu0 %4620  ;;  %v4633_v30 = vmul.f32 %v12208_v13, %v13588_v37 }
 0xb0b   : > { %v4641_v35 = vpack.c.bf16 %v4633_v30, %v4633_v30 }
 0xb0d   : > { %v4935_v52 = vpop.permute.xlu0 %4934  ;;  %11432 = vmatmul.mubr.msk.bf16.vlgmr.msra.gmra.mrb[124].mxu1 %vm1810_vm3, %v4641_v35 }
 0xb0e   : > { %v4940_v28 = vsel %vm1910_vm2, %v4935_v52, 0  ;;  %11442 = vmatpush3.bf16.msra.mxu1 %v4892_v61  ;;  %11443 = vmatprep.mubr.msk.bf16.mxu1 %vm12425_vm0, %v15083_v45 }
 0xb0f   : > { %11448 = vmatpush3.bf16.msra.mxu0 %v4940_v28  ;;  %11453 = vmatprep.subr.bf16.mxu1 %v15083_v45 }
 0xb10   : > { %11459 = vmatprep.subr.bf16.mxu0 %v11995_v54 }
 0xb11   : > { %v3197_v57 = vpop.permute.xlu0 %3196 }
 0xb12   : > { %3221 = vst.msk [vmem:[#allocation2] sm:$0xff] %vm3220_vm4, %v3197_v57 }
 0xb15   : > { %v3201_v1 = vpop.permute.xlu0 %3200 }
 0xb16   : > { %3223 = vst.msk [vmem:[#allocation2 + $0x10] sm:$0xff] %vm3220_vm4, %v3201_v1 }
 0xb19   : > { %v4118_v36 = vpop.permute.xlu0 %4117 }
 0xb1a   : > { %4142 = vst.msk [vmem:[#allocation2] sm:$0xff] %vm4141_vm5, %v4118_v36 }
 0xb1d   : > { %v4122_v4 = vpop.permute.xlu0 %4121 }
 0xb1e   : > { %4144 = vst.msk [vmem:[#allocation2 + $0x10] sm:$0xff] %vm4141_vm5, %v4122_v4 }
 0xb32   : > { %v4615_v25 = vpop.xlane.xlu1 %4614 }
 0xb33   : > { %12209 = vrcp.f32 %v4615_v25 }
 0xb34   : > { %12211 = vrcp.f32 %v4621_v27 }
 0xb36   : > { %v4618_v55 = vpop.xlane.xlu1 %4617 }
 0xb37   : > { %12213 = vrcp.f32 %v4618_v55 }
 0xb3a   : > { %v4983_v24 = vpop.permute.xlu1 %4982 }
 0xb3b   : > { %v4988_v14 = vsel %vm1910_vm2, %v4983_v24, 0 }
 0xb3d   : > { %v12210_v37 = vpop.eup %12209 }
 0xb3e   : > { %v3199_v19 = vpop.permute.xlu1 %3198  ;;  %v4635_v46 = vmul.f32 %v12210_v37, %v13609_v32  ;;  %v12212_v22 = vpop.eup %12211 }
 0xb3f   : > { %3222 = vst.msk [vmem:[#allocation2 + $0x8] sm:$0xff] %vm3220_vm4, %v3199_v19  ;;  %v4637_v21 = vmul.f32 %v12212_v22, %v13592_v8 }
 0xb40   : > { %v4643_v33 = vpack.c.bf16 %v4635_v46, %v4635_v46 }
 0xb41   : > { %v12214_v60 = vpop.eup %12213  ;;  %v4645_v16 = vpack.c.bf16 %v4637_v21, %v4637_v21 }
 0xb42   : > { %11444 = vmatmul.mubr.msk.bf16.vlgmr.msra.gmra.mrb[128].mxu1 %vm1810_vm3, %v4643_v33  ;;  %v3203_v26 = vpop.permute.xlu1 %3202  ;;  %v4636_v18 = vmul.f32 %v12214_v60, %v13619_v6 }
 0xb43   : > { %11454 = vmatpush3.bf16.msra.mxu1 %v4988_v14  ;;  %3224 = vst.msk [vmem:[#allocation2 + $0x18] sm:$0xff] %vm3220_vm4, %v3203_v26  ;;  %11455 = vmatprep.mubr.msk.bf16.mxu1 %vm12425_vm0, %v15083_v45 }
 0xb44   : > { %v4644_v5 = vpack.c.bf16 %v4636_v18, %v4636_v18 }
 0xb46   : > { %11450 = vmatmul.mubr.msk.bf16.vlgmr.msra.gmra.mrb[140].mxu0 %vm1810_vm3, %v4644_v5  ;;  %v4120_v0 = vpop.permute.xlu1 %4119 }
 0xb47   : > { %4143 = vst.msk [vmem:[#allocation2 + $0x8] sm:$0xff] %vm4141_vm5, %v4120_v0  ;;  %11460 = vmatpush3.bf16.msra.mxu0 %v11995_v54 }
 0xb48   : > { %11461 = vmatprep.subr.bf16.mxu0 %v11996_v47 }
 0xb4a   : > { %11456 = vmatmul.mubr.msk.bf16.vlgmr.msra.gmra.mrb[132].mxu1 %vm1810_vm3, %v4645_v16  ;;  %v4124_v50 = vpop.permute.xlu1 %4123 }
 0xb4b   : > { %4145 = vst.msk [vmem:[#allocation2 + $0x18] sm:$0xff] %vm4141_vm5, %v4124_v50  ;;  %5501 = vmatprep.mubr.bf16.mxu1 %v15081_v10  ;;  %11462 = vmatpush3.bf16.msra.mxu0 %v11996_v47 }
 0xb76   : > { %v4688_v32 = vpop.f32.mrb[128].mxu0 }
 0xb77   : > { %v11415_v44 = vpop.f32.mrb[129].mxu0  ;;  %5038 = vrot.lane.b32.xlu0 %v4688_v32, %s12426_s18 }
 0xb78   : > { %v4691_v8 = vpop.f32.mrb[130].mxu0 }
 0xb79   : > { %v11416_v11 = vpop.f32.mrb[131].mxu0 }
 0xb7e   : > { %v4784_v49 = vpop.f32.mrb[132].mxu0 }
 0xb7f   : > { %v11427_v6 = vpop.f32.mrb[133].mxu0  ;;  %5042 = vrot.lane.b32.xlu0 %v4784_v49, %s12426_s18 }
 0xb80   : > { %v4787_v9 = vpop.f32.mrb[134].mxu0 }
 0xb81   : > { %v11428_v31 = vpop.f32.mrb[135].mxu0 }
 0xb83   : > { %3204 = vrot.lane.b32.xlu0 %v13333_v62, %s12428_s14 }
 0xb87   : > { %3208 = vrot.lane.b32.xlu0 %v13337_v29, %s12428_s14  ;;  %v11997_v29 = vld [vmem:[%s15133_s5 + $0x10] sm:$0xff]  }
 0xb88   : > { %11463 = vmatprep.subr.bf16.mxu0 %v11997_v29 }
 0xb89   : > { %11464 = vmatpush3.bf16.msra.mxu0 %v11997_v29 }
 0xb8b   : > { %4125 = vrot.lane.b32.xlu0 %v13528_v12, %s12427_s30  ;;  %v11998_v12 = vld [vmem:[%s15133_s5 + $0x18] sm:$0xff]  }
 0xb8c   : > { %11465 = vmatprep.subr.bf16.mxu0 %v11998_v12 }
 0xb8d   : > { %11466 = vmatpush3.bf16.msra.mxu0 %v11998_v12  ;;  %v12391_v12 = vld [vmem:[%s15132_s29] sm:$0xff] }
 0xb8e   : > { %11467 = vmatprep.subr.bf16.mxu0 %v11999_v23 }
 0xb8f   : > { %4129 = vrot.lane.b32.xlu0 %v13532_v58, %s12427_s30 }
 0xb91   : > { %11468 = vmatpush3.bf16.msra.mxu0 %v11999_v23 }
 0xb92   : > { %11469 = vmatprep.subr.bf16.mxu0 %v12000_v59 }
 0xb95   : > { %11470 = vmatpush3.bf16.msra.mxu0 %v12000_v59 }
 0xb96   : > { %11471 = vmatprep.subr.bf16.mxu0 %v12001_v38 }
 0xb99   : > { %11472 = vmatpush3.bf16.msra.mxu0 %v12001_v38 }
 0xb9a   : > { %11473 = vmatprep.subr.bf16.mxu0 %v12002_v7 }
 0xb9d   : > { %11474 = vmatpush3.bf16.msra.mxu0 %v12002_v7  ;;  %v12394_v7 = vld [vmem:[%s15132_s29 + $0x18] sm:$0xff] }
 0xb9e   : > { %11519 = vmatprep.subr.bf16.mxu0 %v15083_v45 }
 0xba7   : > { %v4736_v39 = vpop.f32.mrb[120].mxu1 }
 0xba8   : > { %5040 = vrot.lane.b32.xlu1 %v4736_v39, %s12426_s18  ;;  %v11421_v2 = vpop.f32.mrb[121].mxu1  ;;  %v10547_v39 = vld [vmem:[%s15135_s28] ss:$0 sm:$0xff]  ;;  %s15137_s28 = scalar_lea.vmem %s15065_s16, %s12566_s4 }
 0xba9   : > { %v4739_v63 = vpop.f32.mrb[122].mxu1 }
 0xbaa   : > { %v11422_v62 = vpop.f32.mrb[123].mxu1 }
 0xbb3   : > { %v4880_v58 = vpop.f32.mrb[136].mxu0 }
 0xbb4   : > { %5046 = vrot.lane.b32.xlu0 %v4880_v58, %s12426_s18  ;;  %v11439_v56 = vpop.f32.mrb[137].mxu0 }
 0xbb5   : > { %v4883_v41 = vpop.f32.mrb[138].mxu0  ;;  %v12392_v56 = vld [vmem:[%s15132_s29 + $0x8] sm:$0xff] }
 0xbb6   : > { %v11440_v40 = vpop.f32.mrb[139].mxu0 }
 0xbb7   : > { %v12393_v40 = vld [vmem:[%s15132_s29 + $0x10] sm:$0xff] }
 0xbe0   : > { %v4832_v3 = vpop.f32.mrb[124].mxu1 }
 0xbe1   : > { %5044 = vrot.lane.b32.xlu1 %v4832_v3, %s12426_s18  ;;  %v11433_v42 = vpop.f32.mrb[125].mxu1 }
 0xbe2   : > { %v4835_v15 = vpop.f32.mrb[126].mxu1 }
 0xbe3   : > { %v11434_v13 = vpop.f32.mrb[127].mxu1 }
 0xbe5   : > { %3206 = vrot.lane.b32.xlu1 %v13335_v17, %s12428_s14 }
 0xbe9   : > { %v5039_v27 = vpop.permute.xlu0 %5038  ;;  %3210 = vrot.lane.b32.xlu1 %v13345_v20, %s12428_s14 }
 0xbea   : > { %5063 = vst.msk [vmem:[#allocation2] sm:$0xff] %vm5062_vm6, %v5039_v27 }
 0xbed   : > { %4127 = vrot.lane.b32.xlu1 %v13530_v34, %s12427_s30 }
 0xbf1   : > { %v5043_v30 = vpop.permute.xlu0 %5042  ;;  %4131 = vrot.lane.b32.xlu1 %v13540_v53, %s12427_s30  ;;  %v5071_v19 = vld [vmem:[#allocation2] sm:$0xff] }
 0xbf2   : > { %5065 = vst.msk [vmem:[#allocation2 + $0x10] sm:$0xff] %vm5062_vm6, %v5043_v30 }
 0xbf5   : > { %v3205_v43 = vpop.permute.xlu0 %3204 }
 0xbf6   : > { %3225 = vst.msk [vmem:[#allocation2 + $0x20] sm:$0xff] %vm3220_vm4, %v3205_v43 }
 0xbf9   : > { %v3209_v17 = vpop.permute.xlu0 %3208  ;;  %v5073_v18 = vld [vmem:[#allocation2 + $0x10] sm:$0xff] }
 0xbfa   : > { %3227 = vst.msk [vmem:[#allocation2 + $0x30] sm:$0xff] %vm3220_vm4, %v3209_v17 }
 0xbfd   : > { %v4126_v35 = vpop.permute.xlu0 %4125 }
 0xbfe   : > { %4146 = vst.msk [vmem:[#allocation2 + $0x20] sm:$0xff] %vm4141_vm5, %v4126_v35  ;;  %v12395_v35 = vld [vmem:[%s15132_s29 + $0x20] sm:$0xff] }
 0xc01   : > { %v4130_v20 = vpop.permute.xlu0 %4129 }
 0xc02   : > { %4148 = vst.msk [vmem:[#allocation2 + $0x30] sm:$0xff] %vm4141_vm5, %v4130_v20 }
 0xc15   : > { %v4928_v61 = vpop.f32.mrb[128].mxu1 }
 0xc16   : > { %5048 = vrot.lane.b32.xlu1 %v4928_v61, %s12426_s18  ;;  %v11445_v34 = vpop.f32.mrb[129].mxu1 }
 0xc17   : > { %v4931_v52 = vpop.f32.mrb[130].mxu1  ;;  %v12396_v34 = vld [vmem:[%s15132_s29 + $0x28] sm:$0xff] }
 0xc18   : > { %v11446_v53 = vpop.f32.mrb[131].mxu1 }
 0xc19   : > { %v4976_v28 = vpop.f32.mrb[140].mxu0  ;;  %v12397_v53 = vld [vmem:[%s15132_s29 + $0x30] sm:$0xff] }
 0xc1a   : > { %5050 = vrot.lane.b32.xlu0 %v4976_v28, %s12426_s18  ;;  %v11451_v57 = vpop.f32.mrb[141].mxu0  ;;  %v5041_v1 = vpop.permute.xlu1 %5040 }
 0xc1b   : > { %5064 = vst.msk [vmem:[#allocation2 + $0x8] sm:$0xff] %vm5062_vm6, %v5041_v1  ;;  %v4979_v36 = vpop.f32.mrb[142].mxu0  ;;  %v12398_v57 = vld [vmem:[%s15132_s29 + $0x38] sm:$0xff] }
 0xc1c   : > { %v11452_v4 = vpop.f32.mrb[143].mxu0  ;;  %v12003_v36 = vld [vmem:[%s12603_s20] ss:$8 sps:$4 sm:$0xff]  }
 0xc1d   : > { %v5024_v25 = vpop.f32.mrb[132].mxu1  ;;  %v12005_v4 = vld [vmem:[%s12603_s20 + $0x4] ss:$8 sps:$4 sm:$0xff]  }
 0xc1e   : > { %5052 = vrot.lane.b32.xlu1 %v5024_v25, %s12426_s18  ;;  %v11457_v55 = vpop.f32.mrb[133].mxu1  ;;  %v12008_v25 = vld [vmem:[%s12603_s20 + $0x14] ss:$8 sps:$4 sm:$0xff]   ;;  %5469 = vmatprep.subr.bf16.mxu1 %v12005_v4 }
 0xc1f   : > { %v5027_v24 = vpop.f32.mrb[134].mxu1  ;;  %5470 = vmatpush1.bf16.msra.mxu1 %v12003_v36  ;;  %v12006_v55 = vld [vmem:[%s12603_s20 + $0x10] ss:$8 sps:$4 sm:$0xff]  }
 0xc20   : > { %v11458_v37 = vpop.f32.mrb[135].mxu1  ;;  %5471 = vmatprep.subr.bf16.mxu1 %v12008_v25  ;;  %v12011_v24 = vld [vmem:[%s12603_s20 + $0x24] ss:$8 sps:$4 sm:$0xff]  }
 0xc21   : > { %v12009_v37 = vld [vmem:[%s12603_s20 + $0x20] ss:$8 sps:$4 sm:$0xff]  }
 0xc22   : > { %v5072_v46 = vld [vmem:[#allocation2 + $0x8] sm:$0xff] }
 0xc23   : > { %v5079_v22 = vpack.c.bf16 %v5072_v46, %v5071_v19  ;;  %5472 = vmatpush1.bf16.msra.mxu1 %v12006_v55  ;;  %v12014_v19 = vld [vmem:[%s12603_s20 + $0x34] ss:$8 sps:$4 sm:$0xff]   ;;  %v12012_v46 = vld [vmem:[%s12603_s20 + $0x30] ss:$8 sps:$4 sm:$0xff]  }
 0xc24   : > { %5473 = vmatprep.subr.bf16.mxu1 %v12011_v24 }
 0xc25   : > { %11475 = vmatprep.mubr.bf16.mxu0 %v5079_v22  ;;  %v12017_v22 = vld [vmem:[%s12603_s20 + $0x44] ss:$8 sps:$4 sm:$0xff]  }
 0xc26   : > { %v5047_v33 = vpop.permute.xlu0 %5046 }
 0xc27   : > { %5067 = vst.msk [vmem:[#allocation2 + $0x20] sm:$0xff] %vm5062_vm6, %v5047_v33  ;;  %5474 = vmatpush1.bf16.msra.mxu1 %v12009_v37  ;;  %v12015_v33 = vld [vmem:[%s12603_s20 + $0x40] ss:$8 sps:$4 sm:$0xff]  }
 0xc28   : > { %5475 = vmatprep.subr.bf16.mxu1 %v12014_v19 }
 0xc2b   : > { %5476 = vmatpush1.bf16.msra.mxu1 %v12012_v46 }
 0xc2c   : > { %5477 = vmatprep.subr.bf16.mxu1 %v12017_v22 }
 0xc2e   : > { %v5075_v8 = vld [vmem:[#allocation2 + $0x20] sm:$0xff] }
 0xc2f   : > { %5478 = vmatpush1.bf16.msra.mxu1 %v12015_v33 }
 0xc53   : > { %v5045_v60 = vpop.permute.xlu1 %5044 }
 0xc54   : > { %5066 = vst.msk [vmem:[#allocation2 + $0x18] sm:$0xff] %vm5062_vm6, %v5045_v60  ;;  %v12020_v60 = vld [vmem:[%s12603_s20 + $0x54] ss:$8 sps:$4 sm:$0xff]  }
 0xc55   : > { %5479 = vmatprep.subr.bf16.mxu1 %v12020_v60 }
 0xc57   : > { %v3207_v14 = vpop.permute.xlu1 %3206 }
 0xc58   : > { %3226 = vst.msk [vmem:[#allocation2 + $0x28] sm:$0xff] %vm3220_vm4, %v3207_v14  ;;  %v12018_v14 = vld [vmem:[%s12603_s20 + $0x50] ss:$8 sps:$4 sm:$0xff]  }
 0xc59   : > { %5480 = vmatpush1.bf16.msra.mxu1 %v12018_v14 }
 0xc5b   : > { %v3211_v26 = vpop.permute.xlu1 %3210  ;;  %v5074_v5 = vld [vmem:[#allocation2 + $0x18] sm:$0xff] }
 0xc5c   : > { %3228 = vst.msk [vmem:[#allocation2 + $0x38] sm:$0xff] %vm3220_vm4, %v3211_v26  ;;  %v5080_v21 = vpack.c.bf16 %v5074_v5, %v5073_v18  ;;  %v12023_v26 = vld [vmem:[%s12603_s20 + $0x64] ss:$8 sps:$4 sm:$0xff]   ;;  %v12021_v18 = vld [vmem:[%s12603_s20 + $0x60] ss:$8 sps:$4 sm:$0xff]  }
 0xc5d   : > { %5481 = vmatprep.subr.bf16.mxu1 %v12023_v26  ;;  %v12026_v5 = vld [vmem:[%s12603_s20 + $0x74] ss:$8 sps:$4 sm:$0xff]  }
 0xc5e   : > { %11476 = vmatmul.mubr.bf16.vlgmr.msra.gmra.mrb[144].mxu0 %v5080_v21  ;;  %5482 = vmatpush1.bf16.msra.mxu1 %v12021_v18  ;;  %v12024_v21 = vld [vmem:[%s12603_s20 + $0x70] ss:$8 sps:$4 sm:$0xff]   ;;  %v10556_v18 = vld [vmem:[%s15137_s28] ss:$0 sm:$0xff]  ;;  %s15140_s20 = scalar_lea.vmem %s15139_s8, %s12566_s4  ;;  %s15149_s28 = scalar_lea.vmem %s15148_s7, %s12566_s4 }
 0xc5f   : > { %v4128_v0 = vpop.permute.xlu1 %4127  ;;  %5483 = vmatprep.subr.bf16.mxu1 %v12026_v5 }
 0xc60   : > { %4147 = vst.msk [vmem:[#allocation2 + $0x28] sm:$0xff] %vm4141_vm5, %v4128_v0  ;;  %v12028_v0 = vld [vmem:[%s12593_s25] sm:$0xff]  }
 0xc62   : > { %5484 = vmatpush1.bf16.msra.mxu1 %v12024_v21 }
 0xc63   : > { %v4132_v16 = vpop.permute.xlu1 %4131  ;;  %11483 = vmatprep.subr.bf16.mxu1 %v12028_v0 }
 0xc64   : > { %4149 = vst.msk [vmem:[#allocation2 + $0x38] sm:$0xff] %vm4141_vm5, %v4132_v16  ;;  %v12027_v16 = vld [vmem:[%s15136_s19] sm:$0xff]  }
 0xc65   : > { %5502 = vmatmul.mubr.bf16.vlgmr.msra.gmra.mrb[136].mxu1 %v12027_v16 }
 0xc66   : > { %11484 = vmatpush3.bf16.msra.mxu1 %v12028_v0  ;;  %5511 = vmatprep.mubr.bf16.mxu1 %v15081_v10 }
 0xc88   : > { %v5049_v50 = vpop.permute.xlu1 %5048 }
 0xc89   : > { %5068 = vst.msk [vmem:[#allocation2 + $0x28] sm:$0xff] %vm5062_vm6, %v5049_v50 }
 0xc8c   : > { %v5051_v32 = vpop.permute.xlu0 %5050 }
 0xc8d   : > { %5069 = vst.msk [vmem:[#allocation2 + $0x30] sm:$0xff] %vm5062_vm6, %v5051_v32 }
 0xc90   : > { %v5053_v44 = vpop.permute.xlu1 %5052  ;;  %v5076_v11 = vld [vmem:[#allocation2 + $0x28] sm:$0xff] }
 0xc91   : > { %5070 = vst.msk [vmem:[#allocation2 + $0x38] sm:$0xff] %vm5062_vm6, %v5053_v44  ;;  %v5081_v49 = vpack.c.bf16 %v5076_v11, %v5075_v8 }
 0xc93   : > { %11479 = vmatprep.mubr.bf16.mxu0 %v5081_v49 }
 0xc94   : > { %v5077_v6 = vld [vmem:[#allocation2 + $0x30] sm:$0xff] }
 0xc98   : > { %v5078_v9 = vld [vmem:[#allocation2 + $0x38] sm:$0xff] }
 0xc99   : > { %v5082_v31 = vpack.c.bf16 %v5078_v9, %v5077_v6 }
 0xc9b   : > { %11480 = vmatmul.mubr.bf16.gmra.mrb[148].mxu0 %v5082_v31 }
 0xc9c   : > { %11521 = vmatprep.mubr.msk.bf16.mxu0 %vm12425_vm0, %v15083_v45 }
 0xd31   : > { %v11477_v54 = vpop.f32.mrb[144].mxu0 }
 0xd32   : > { %v5171_v47 = vpop.f32.mrb[145].mxu0  ;;  %v5180_v29 = vadd.f32 %v11477_v54, %v10547_v39 }
 0xd33   : > { %v5172_v2 = vadd.f32 %v10547_v39, %v5171_v47  ;;  %v11478_v63 = vpop.f32.mrb[146].mxu0 }
 0xd34   : > { %v5174_v62 = vpop.f32.mrb[147].mxu0  ;;  %v13745_v59 = vadd.f32 %v12393_v40, %v5180_v29  ;;  %v5183_v38 = vadd.f32 %v11478_v63, %v10547_v39  ;;  %v12034_v40 = vld [vmem:[%s12593_s25 + $0x20] sm:$0xff]  }
 0xd35   : > { %v13734_v58 = vadd.f32 %v12391_v12, %v5172_v2  ;;  %v5175_v23 = vadd.f32 %v10547_v39, %v5174_v62  ;;  %v12029_v12 = vld [vmem:[%s12593_s25 + $0x8] sm:$0xff]  }
 0xd36   : > { %v13752_v3 = vadd.f32 %v12394_v7, %v5183_v38  ;;  %11485 = vmatprep.subr.bf16.mxu1 %v12029_v12  ;;  %v12036_v38 = vld [vmem:[%s15136_s19 + $0x18] sm:$0xff]   ;;  %v12037_v7 = vld [vmem:[%s12593_s25 + $0x30] sm:$0xff]  }
 0xd37   : > { %v13739_v41 = vadd.f32 %v12392_v56, %v5175_v23  ;;  %5212 = vadd.xlane.f32.xlu0 %v13734_v58  ;;  %11486 = vmatpush3.bf16.msra.mxu1 %v12029_v12  ;;  %v12031_v23 = vld [vmem:[%s12593_s25 + $0x10] sm:$0xff]   ;;  %v12032_v56 = vld [vmem:[%s12593_s25 + $0x18] sm:$0xff]  }
 0xd38   : > { %11487 = vmatprep.subr.bf16.mxu1 %v12031_v23 }
 0xd39   : > { %5214 = vadd.xlane.f32.xlu1 %v13739_v41 }
 0xd3b   : > { %5216 = vadd.xlane.f32.xlu0 %v13745_v59  ;;  %11488 = vmatpush3.bf16.msra.mxu1 %v12031_v23 }
 0xd3c   : > { %11489 = vmatprep.subr.bf16.mxu1 %v12032_v56 }
 0xd3f   : > { %5218 = vadd.xlane.f32.xlu0 %v13752_v3  ;;  %11490 = vmatpush3.bf16.msra.mxu1 %v12032_v56 }
 0xd40   : > { %11491 = vmatprep.subr.bf16.mxu1 %v12034_v40 }
 0xd43   : > { %11492 = vmatpush3.bf16.msra.mxu1 %v12034_v40 }
 0xd6e   : > { %v11481_v42 = vpop.f32.mrb[148].mxu0 }
 0xd6f   : > { %v5196_v15 = vadd.f32 %v11481_v42, %v10547_v39  ;;  %v5187_v13 = vpop.f32.mrb[149].mxu0 }
 0xd70   : > { %v5188_v27 = vadd.f32 %v10547_v39, %v5187_v13  ;;  %v11482_v30 = vpop.f32.mrb[150].mxu0 }
 0xd71   : > { %v5199_v43 = vadd.f32 %v11482_v30, %v10547_v39  ;;  %v5190_v17 = vpop.f32.mrb[151].mxu0  ;;  %v13769_v28 = vadd.f32 %v12397_v53, %v5196_v15 }
 0xd72   : > { %v13758_v20 = vadd.f32 %v12395_v35, %v5188_v27  ;;  %v5191_v61 = vadd.f32 %v10547_v39, %v5190_v17 }
 0xd73   : > { %v13775_v1 = vadd.f32 %v12398_v57, %v5199_v43 }
 0xd74   : > { %v13763_v52 = vadd.f32 %v12396_v34, %v5191_v61  ;;  %5220 = vadd.xlane.f32.xlu0 %v13758_v20 }
 0xd76   : > { %5222 = vadd.xlane.f32.xlu1 %v13763_v52 }
 0xd78   : > { %5224 = vadd.xlane.f32.xlu0 %v13769_v28 }
 0xd7a   : > { %5226 = vadd.xlane.f32.xlu1 %v13775_v1 }
 0xdc4   : > { %v5213_v50 = vpop.xlane.xlu0 %5212 }
 0xdc5   : > { %v5229_v32 = vmul.f32 0.0078125, %v5213_v50 }
 0xdc6   : > { %v5215_v44 = vpop.xlane.xlu1 %5214 }
 0xdc7   : > { %v13801_v8 = vsub.f32 %v13734_v58, %v5229_v32  ;;  %v5230_v11 = vmul.f32 0.0078125, %v5215_v44  ;;  %v12030_v58 = vld [vmem:[%s15136_s19 + $0x8] sm:$0xff]   ;;  %v10557_v32 = vld [vmem:[%s15138_s10] ss:$0 sm:$0xff] }
 0xdc8   : > { %v5217_v49 = vpop.xlane.xlu0 %5216  ;;  %5512 = vmatmul.mubr.bf16.gmra.mrb[140].mxu1 %v12030_v58 }
 0xdc9   : > { %v13804_v6 = vsub.f32 %v13739_v41, %v5230_v11  ;;  %v5231_v9 = vmul.f32 0.0078125, %v5217_v49  ;;  %v5245_v31 = vmul.f32 %v13801_v8, %v13801_v8  ;;  %5521 = vmatprep.mubr.bf16.mxu1 %v15081_v10  ;;  %v12033_v41 = vld [vmem:[%s15136_s19 + $0x10] sm:$0xff]  }
 0xdcb   : > { %v13809_v39 = vsub.f32 %v13745_v59, %v5231_v9  ;;  %5253 = vadd.xlane.f32.xlu0 %v5245_v31  ;;  %v5246_v54 = vmul.f32 %v13804_v6, %v13804_v6  ;;  %v12035_v59 = vld [vmem:[%s12593_s25 + $0x28] sm:$0xff]  }
 0xdcc   : > { %v5219_v47 = vpop.xlane.xlu0 %5218  ;;  %11493 = vmatprep.subr.bf16.mxu1 %v12035_v59 }
 0xdcd   : > { %v5232_v2 = vmul.f32 0.0078125, %v5219_v47  ;;  %5255 = vadd.xlane.f32.xlu1 %v5246_v54  ;;  %v5247_v63 = vmul.f32 %v13809_v39, %v13809_v39  ;;  %11494 = vmatpush3.bf16.msra.mxu1 %v12035_v59 }
 0xdce   : > { %11495 = vmatprep.subr.bf16.mxu1 %v12037_v7 }
 0xdcf   : > { %v13816_v62 = vsub.f32 %v13752_v3, %v5232_v2  ;;  %5257 = vadd.xlane.f32.xlu0 %v5247_v63  ;;  %v12038_v3 = vld [vmem:[%s12593_s25 + $0x38] sm:$0xff]  }
 0xdd0   : > { %5522 = vmatmul.mubr.bf16.gmra.mrb[144].mxu1 %v12033_v41 }
 0xdd1   : > { %v5248_v29 = vmul.f32 %v13816_v62, %v13816_v62  ;;  %5531 = vmatprep.mubr.bf16.mxu1 %v15081_v10  ;;  %11496 = vmatpush3.bf16.msra.mxu1 %v12037_v7 }
 0xdd2   : > { %11497 = vmatprep.subr.bf16.mxu1 %v12038_v3 }
 0xdd3   : > { %5259 = vadd.xlane.f32.xlu1 %v5248_v29  ;;  %v13886_v29 = vld [vmem:[%s12609_s27] sm:$0x3] }
 0xdd4   : > { %v13890_v12 = vrot.slane %v13886_v29, %v12787_v51 }
 0xdd5   : > { %11498 = vmatpush3.bf16.msra.mxu1 %v12038_v3 }
 0xdd6   : > { %11507 = vmatprep.subr.bf16.mxu1 %v15083_v45 }
 0xdd8   : > { %5532 = vmatmul.mubr.bf16.gmra.mrb[148].mxu1 %v12036_v38 }
 0xe01   : > { %v5221_v42 = vpop.xlane.xlu0 %5220 }
 0xe02   : > { %v5233_v15 = vmul.f32 0.0078125, %v5221_v42 }
 0xe03   : > { %v5223_v13 = vpop.xlane.xlu1 %5222 }
 0xe04   : > { %v13840_v27 = vsub.f32 %v13758_v20, %v5233_v15  ;;  %v5234_v30 = vmul.f32 0.0078125, %v5223_v13 }
 0xe05   : > { %v5225_v43 = vpop.xlane.xlu0 %5224 }
 0xe06   : > { %v13843_v17 = vsub.f32 %v13763_v52, %v5234_v30  ;;  %v5235_v35 = vmul.f32 0.0078125, %v5225_v43  ;;  %v5249_v61 = vmul.f32 %v13840_v27, %v13840_v27 }
 0xe07   : > { %v5227_v34 = vpop.xlane.xlu1 %5226 }
 0xe08   : > { %v13848_v53 = vsub.f32 %v13769_v28, %v5235_v35  ;;  %v5236_v57 = vmul.f32 0.0078125, %v5227_v34  ;;  %5261 = vadd.xlane.f32.xlu0 %v5249_v61  ;;  %v5250_v36 = vmul.f32 %v13843_v17, %v13843_v17 }
 0xe0a   : > { %v13853_v20 = vsub.f32 %v13775_v1, %v5236_v57  ;;  %5263 = vadd.xlane.f32.xlu1 %v5250_v36  ;;  %v5251_v52 = vmul.f32 %v13848_v53, %v13848_v53 }
 0xe0c   : > { %5265 = vadd.xlane.f32.xlu0 %v5251_v52  ;;  %v5252_v4 = vmul.f32 %v13853_v20, %v13853_v20 }
 0xe0e   : > { %5267 = vadd.xlane.f32.xlu1 %v5252_v4 }
 0xe58   : > { %v5254_v25 = vpop.xlane.xlu0 %5253 }
 0xe59   : > { %v5269_v28 = vmul.f32 0.0078125, %v5254_v25 }
 0xe5a   : > { %v5256_v55 = vpop.xlane.xlu1 %5255 }
 0xe5b   : > { %v5277_v24 = vadd.f32 1e-05, %v5269_v28  ;;  %v5270_v37 = vmul.f32 0.0078125, %v5256_v55 }
 0xe5c   : > { %v5258_v19 = vpop.xlane.xlu0 %5257 }
 0xe5d   : > { %12215 = vrsqrt.f32 %v5277_v24  ;;  %v5278_v46 = vadd.f32 1e-05, %v5270_v37  ;;  %v5271_v1 = vmul.f32 0.0078125, %v5258_v19 }
 0xe5f   : > { %12217 = vrsqrt.f32 %v5278_v46  ;;  %v5279_v22 = vadd.f32 1e-05, %v5271_v1 }
 0xe60   : > { %v5260_v33 = vpop.xlane.xlu1 %5259 }
 0xe61   : > { %12219 = vrsqrt.f32 %v5279_v22  ;;  %v5272_v60 = vmul.f32 0.0078125, %v5260_v33 }
 0xe63   : > { %v5280_v14 = vadd.f32 1e-05, %v5272_v60 }
 0xe65   : > { %12221 = vrsqrt.f32 %v5280_v14 }
 0xe67   : > { %v12216_v26 = vpop.eup %12215 }
 0xe68   : > { %v5293_v5 = vmul.f32 %v12216_v26, %v13801_v8 }
 0xe69   : > { %v12218_v21 = vpop.eup %12217 }
 0xe6a   : > { %v5294_v0 = vmul.f32 %v12218_v21, %v13804_v6  ;;  %v5307_v16 = vmul.f32 %v10556_v18, %v5293_v5 }
 0xe6b   : > { %v12220_v50 = vpop.eup %12219 }
 0xe6c   : > { %v5295_v44 = vmul.f32 %v12220_v50, %v13809_v39  ;;  %v5308_v11 = vmul.f32 %v10556_v18, %v5294_v0  ;;  %v13872_v49 = vadd.f32 %v10557_v32, %v5307_v16 }
 0xe6e   : > { %v13874_v9 = vadd.f32 %v10557_v32, %v5308_v11  ;;  %v5309_v8 = vmul.f32 %v10556_v18, %v5295_v44 }
 0xe6f   : > { %v12222_v31 = vpop.eup %12221 }
 0xe70   : > { %v5296_v54 = vmul.f32 %v12222_v31, %v13816_v62  ;;  %v5542_v6 = vpack.c.bf16 %v13874_v9, %v13872_v49  ;;  %v13879_v2 = vadd.f32 %v10557_v32, %v5309_v8  ;;  %v5503_v62 = vpop.f32.mrb[136].mxu1 }
 0xe71   : > { %v5504_v58 = vadd.f32 %v5503_v62, %v13890_v12  ;;  %v13893_v23 = vpop.f32.mrb[137].mxu1  ;;  %v10578_v62 = vld [vmem:[%s15140_s20] ss:$0 sm:$0xff] }
 0xe72   : > { %v5310_v47 = vmul.f32 %v10556_v18, %v5296_v54  ;;  %11499 = vmatprep.mubr.bf16.mxu1 %v5542_v6  ;;  %v5507_v56 = vpop.f32.mrb[138].mxu1 }
 0xe73   : > { %v13895_v41 = vpack.c.bf16 %v5504_v58, %v5504_v58  ;;  %v13897_v40 = vpop.f32.mrb[139].mxu1 }
 0xe74   : > { %v13881_v63 = vadd.f32 %v10557_v32, %v5310_v47 }
 0xe75   : > { %v5727_v59 = vsel %vm1441_vm1, %v13895_v41, 0 }
 0xe76   : > { %v5543_v39 = vpack.c.bf16 %v13881_v63, %v13879_v2 }
 0xe78   : > { %11500 = vmatmul.mubr.bf16.vlgmr.msra.gmra.mrb[152].mxu1 %v5543_v39  ;;  %v5508_v39 = vadd.f32 %v5507_v56, %v13890_v12 }
 0xe79   : > { %11508 = vmatpush3.bf16.xpose.msra.mxu1 %v5727_v59 }
 0xe7a   : > { %11513 = vmatprep.subr.bf16.mxu1 %v15083_v45  ;;  %v13947_v59 = vpack.c.bf16 %v5508_v39, %v5508_v39 }
 0xe95   : > { %v5262_v38 = vpop.xlane.xlu0 %5261 }
 0xe96   : > { %v5273_v7 = vmul.f32 0.0078125, %v5262_v38 }
 0xe97   : > { %v5264_v3 = vpop.xlane.xlu1 %5263 }
 0xe98   : > { %v5281_v42 = vadd.f32 1e-05, %v5273_v7  ;;  %v5274_v15 = vmul.f32 0.0078125, %v5264_v3 }
 0xe99   : > { %v5266_v13 = vpop.xlane.xlu0 %5265 }
 0xe9a   : > { %12223 = vrsqrt.f32 %v5281_v42  ;;  %v5282_v30 = vadd.f32 1e-05, %v5274_v15  ;;  %v5275_v43 = vmul.f32 0.0078125, %v5266_v13 }
 0xe9b   : > { %v5268_v35 = vpop.xlane.xlu1 %5267  ;;  %v5513_v26 = vpop.f32.mrb[140].mxu1 }
 0xe9c   : > { %12225 = vrsqrt.f32 %v5282_v30  ;;  %v5283_v61 = vadd.f32 1e-05, %v5275_v43  ;;  %v5276_v34 = vmul.f32 0.0078125, %v5268_v35  ;;  %v13921_v5 = vpop.f32.mrb[141].mxu1 }
 0xe9d   : > { %v5517_v21 = vpop.f32.mrb[142].mxu1 }
 0xe9e   : > { %12227 = vrsqrt.f32 %v5283_v61  ;;  %v5284_v57 = vadd.f32 1e-05, %v5276_v34  ;;  %v13925_v0 = vpop.f32.mrb[143].mxu1  ;;  %v5518_v43 = vadd.f32 %v5517_v21, %v13890_v12  ;;  %v5773_v61 = vsel %vm1441_vm1, %v13947_v59, 0 }
 0xea0   : > { %12229 = vrsqrt.f32 %v5284_v57  ;;  %v13964_v34 = vpack.c.bf16 %v5518_v43, %v5518_v43 }
 0xea3   : > { %v5523_v50 = vpop.f32.mrb[144].mxu1 }
 0xea4   : > { %v12224_v36 = vpop.eup %12223  ;;  %v5524_v47 = vadd.f32 %v5523_v50, %v13890_v12 }
 0xea5   : > { %v5297_v52 = vmul.f32 %v12224_v36, %v13840_v27 }
 0xea6   : > { %v12226_v4 = vpop.eup %12225  ;;  %v13945_v58 = vpack.c.bf16 %v5524_v47, %v5524_v47 }
 0xea7   : > { %v5298_v25 = vmul.f32 %v12226_v4, %v13843_v17  ;;  %v5311_v28 = vmul.f32 %v10556_v18, %v5297_v52  ;;  %v5865_v4 = vsel %vm1441_vm1, %v13964_v34, 0 }
 0xea8   : > { %v12228_v55 = vpop.eup %12227  ;;  %v5911_v56 = vsel %vm1441_vm1, %v13945_v58, 0 }
 0xea9   : > { %v5312_v24 = vmul.f32 %v10556_v18, %v5298_v25  ;;  %v5299_v37 = vmul.f32 %v12228_v55, %v13848_v53  ;;  %v13905_v46 = vadd.f32 %v10557_v32, %v5311_v28 }
 0xeaa   : > { %v12230_v19 = vpop.eup %12229 }
 0xeab   : > { %v13907_v1 = vadd.f32 %v10557_v32, %v5312_v24  ;;  %v5300_v22 = vmul.f32 %v12230_v19, %v13853_v20  ;;  %v5313_v33 = vmul.f32 %v10556_v18, %v5299_v37  ;;  %v5514_v20 = vadd.f32 %v5513_v26, %v13890_v12 }
 0xead   : > { %v5544_v60 = vpack.c.bf16 %v13907_v1, %v13905_v46  ;;  %v5314_v27 = vmul.f32 %v10556_v18, %v5300_v22  ;;  %v13912_v14 = vadd.f32 %v10557_v32, %v5313_v33  ;;  %v13923_v18 = vpack.c.bf16 %v5514_v20, %v5514_v20 }
 0xeaf   : > { %11503 = vmatprep.mubr.bf16.mxu1 %v5544_v60  ;;  %v13914_v17 = vadd.f32 %v10557_v32, %v5314_v27  ;;  %v5819_v16 = vsel %vm1441_vm1, %v13923_v18, 0  ;;  %v13930_v32 = vpop.f32.mrb[145].mxu1  ;;  %v13995_v27 = vrot.slane %v13886_v29, %v12777_v48 }
 0xeb0   : > { %11520 = vmatpush3.bf16.xpose.msra.mxu0 %v5819_v16  ;;  %v5527_v44 = vpop.f32.mrb[146].mxu1 }
 0xeb1   : > { %v5545_v53 = vpack.c.bf16 %v13914_v17, %v13912_v14  ;;  %11531 = vmatprep.subr.bf16.mxu0 %v15083_v45  ;;  %v13932_v11 = vpop.f32.mrb[147].mxu1  ;;  %v5528_v36 = vadd.f32 %v5527_v44, %v13890_v12  ;;  %v5510_v47 = vadd.f32 %v13897_v40, %v13995_v27 }
 0xeb2   : > { %v5533_v31 = vpop.f32.mrb[148].mxu1 }
 0xeb3   : > { %11504 = vmatmul.mubr.bf16.gmra.mrb[156].mxu1 %v5545_v53  ;;  %v13934_v8 = vpop.f32.mrb[149].mxu1  ;;  %v13979_v25 = vpack.c.bf16 %v5528_v36, %v5528_v36  ;;  %v5534_v37 = vadd.f32 %v5533_v31, %v13890_v12 }
 0xeb4   : > { %11509 = vmatprep.mubr.msk.bf16.mxu1 %vm12425_vm0, %v15083_v45  ;;  %v5537_v54 = vpop.f32.mrb[150].mxu1 }
 0xeb5   : > { %v13936_v6 = vpop.f32.mrb[151].mxu1  ;;  %v5957_v24 = vsel %vm1441_vm1, %v13979_v25, 0  ;;  %v5538_v19 = vadd.f32 %v5537_v54, %v13890_v12  ;;  %v13997_v53 = vpack.c.bf16 %v5534_v37, %v5534_v37  ;;  %v5506_v12 = vadd.f32 %v13893_v23, %v13995_v27 }
 0xeb7   : > { %v13999_v50 = vpack.c.bf16 %v5538_v19, %v5538_v19  ;;  %v6003_v29 = vsel %vm1441_vm1, %v13997_v53, 0  ;;  %v14022_v39 = vpack.c.bf16 %v5506_v12, %v5506_v12 }
 0xeb9   : > { %v6049_v23 = vsel %vm1441_vm1, %v13999_v50, 0 }
 0xf4b   : > { %v11501_v38 = vpop.f32.mrb[152].mxu1 }
 0xf4c   : > { %v5660_v7 = vadd.f32 %v11501_v38, %v10578_v62  ;;  %v5651_v3 = vpop.f32.mrb[153].mxu1 }
 0xf4d   : > { %v5652_v42 = vadd.f32 %v10578_v62, %v5651_v3  ;;  %v11502_v15 = vpop.f32.mrb[154].mxu1 }
 0xf4e   : > { %v13949_v13 = vpack.c.bf16 %v5660_v7, %v5660_v7  ;;  %v5654_v30 = vpop.f32.mrb[155].mxu1  ;;  %v5663_v28 = vadd.f32 %v11502_v15, %v10578_v62  ;;  %v6191_v7 = vsel %vm1910_vm2, %v14022_v39, 0 }
 0xf4f   : > { %v13954_v35 = vpack.c.bf16 %v5652_v42, %v5652_v42  ;;  %v5655_v57 = vadd.f32 %v10578_v62, %v5654_v30 }
 0xf50   : > { %11522 = vmatmul.mubr.msk.bf16.vlgmr.msra.gmra.mrb[152].mxu0 %vm1441_vm1, %v13949_v13  ;;  %v13982_v55 = vpack.c.bf16 %v5663_v28, %v5663_v28 }
 0xf51   : > { %11510 = vmatmul.mubr.msk.bf16.vlgmr.msra.gmra.mrb[160].mxu1 %vm1441_vm1, %v13954_v35  ;;  %11532 = vmatpush3.bf16.xpose.msra.mxu0 %v5911_v56  ;;  %v13971_v52 = vpack.c.bf16 %v5655_v57, %v5655_v57 }
 0xf52   : > { %11514 = vmatpush3.bf16.xpose.msra.mxu1 %v5773_v61  ;;  %11515 = vmatprep.mubr.msk.bf16.mxu1 %vm12425_vm0, %v15083_v45 }
 0xf53   : > { %11525 = vmatprep.subr.bf16.mxu1 %v15083_v45  ;;  %11533 = vmatprep.mubr.msk.bf16.mxu0 %vm12425_vm0, %v15083_v45 }
 0xf54   : > { %11543 = vmatprep.subr.bf16.mxu0 %v15083_v45 }
 0xf59   : > { %11516 = vmatmul.mubr.msk.bf16.vlgmr.msra.gmra.mrb[164].mxu1 %vm1441_vm1, %v13971_v52 }
 0xf5a   : > { %11526 = vmatpush3.bf16.xpose.msra.mxu1 %v5865_v4  ;;  %11527 = vmatprep.mubr.msk.bf16.mxu1 %vm12425_vm0, %v15083_v45 }
 0xf5b   : > { %11537 = vmatprep.subr.bf16.mxu1 %v15083_v45 }
 0xf61   : > { %11528 = vmatmul.mubr.msk.bf16.vlgmr.msra.gmra.mrb[168].mxu1 %vm1441_vm1, %v13982_v55 }
 0xf62   : > { %11538 = vmatpush3.bf16.xpose.msra.mxu1 %v5957_v24  ;;  %11539 = vmatprep.mubr.msk.bf16.mxu1 %vm12425_vm0, %v15083_v45 }
 0xf63   : > { %11549 = vmatprep.subr.bf16.mxu1 %v15083_v45 }
 0xf86   : > { %v11505_v22 = vpop.f32.mrb[156].mxu1 }
 0xf87   : > { %v5676_v33 = vadd.f32 %v11505_v22, %v10578_v62  ;;  %v5667_v60 = vpop.f32.mrb[157].mxu1 }
 0xf88   : > { %v5668_v26 = vadd.f32 %v10578_v62, %v5667_v60  ;;  %v11506_v20 = vpop.f32.mrb[158].mxu1 }
 0xf89   : > { %v5679_v21 = vadd.f32 %v11506_v20, %v10578_v62  ;;  %v5670_v16 = vpop.f32.mrb[159].mxu1  ;;  %v14027_v38 = vpack.c.bf16 %v5676_v33, %v5676_v33 }
 0xf8a   : > { %v14001_v44 = vpack.c.bf16 %v5668_v26, %v5668_v26  ;;  %v5671_v31 = vadd.f32 %v10578_v62, %v5670_v16  ;;  %v14025_v62 = vpack.c.bf16 %v5510_v47, %v5510_v47 }
 0xf8b   : > { %v14029_v40 = vpack.c.bf16 %v5679_v21, %v5679_v21 }
 0xf8c   : > { %v14005_v54 = vpack.c.bf16 %v5671_v31, %v5671_v31  ;;  %11534 = vmatmul.mubr.msk.bf16.vlgmr.msra.gmra.mrb[156].mxu0 %vm1441_vm1, %v14001_v44  ;;  %v6237_v3 = vsel %vm1910_vm2, %v14025_v62, 0 }
 0xf8d   : > { %11544 = vmatpush3.bf16.xpose.msra.mxu0 %v6003_v29  ;;  %11545 = vmatprep.mubr.msk.bf16.mxu0 %vm12425_vm0, %v15083_v45 }
 0xf8e   : > { %11540 = vmatmul.mubr.msk.bf16.vlgmr.msra.gmra.mrb[172].mxu1 %vm1441_vm1, %v14005_v54  ;;  %11555 = vmatprep.subr.bf16.mxu0 %v15083_v45 }
 0xf8f   : > { %11550 = vmatpush3.bf16.xpose.msra.mxu1 %v6049_v23  ;;  %11551 = vmatprep.mubr.msk.bf16.mxu1 %vm12425_vm0, %v15083_v45 }
 0xf90   : > { %11561 = vmatprep.subr.bf16.mxu1 %v15083_v45 }
 0xf94   : > { %11546 = vmatmul.mubr.msk.bf16.vlgmr.msra.gmra.mrb[160].mxu0 %vm1441_vm1, %v14027_v38 }
 0xf95   : > { %11556 = vmatpush3.bf16.msra.mxu0 %v6191_v7  ;;  %11557 = vmatprep.mubr.msk.bf16.mxu0 %vm12425_vm0, %v15083_v45 }
 0xf96   : > { %11552 = vmatmul.mubr.msk.bf16.vlgmr.msra.gmra.mrb[176].mxu1 %vm1441_vm1, %v14029_v40  ;;  %11567 = vmatprep.subr.bf16.mxu0 %v15083_v45 }
 0xf97   : > { %11562 = vmatpush3.bf16.msra.mxu1 %v6237_v3  ;;  %11563 = vmatprep.mubr.msk.bf16.mxu1 %vm12425_vm0, %v15083_v45 }
 0xf98   : > { %11573 = vmatprep.subr.bf16.mxu1 %v15083_v45 }
0x1023   : > { %v5855_v42 = vpop.f32.mrb[152].mxu0 }
0x1024   : > { %v5763_v15 = vpop.f32.mrb[160].mxu1  ;;  %v11523_v30 = vpop.f32.mrb[153].mxu0  ;;  %v6097_v28 = vsel %vm1810_vm3, %v5855_v42, -inf }
0x1025   : > { %v11511_v56 = vpop.f32.mrb[161].mxu1  ;;  %v5858_v43 = vpop.f32.mrb[154].mxu0  ;;  %v6091_v61 = vsel %vm1810_vm3, %v5763_v15, -inf }
0x1026   : > { %v11524_v57 = vpop.f32.mrb[155].mxu0  ;;  %6092 = vmax.xlane.f32.xlu0 %v6091_v61  ;;  %v5766_v36 = vpop.f32.mrb[162].mxu1 }
0x1027   : > { %v11512_v4 = vpop.f32.mrb[163].mxu1 }
0x102a   : > { %6098 = vmax.xlane.f32.xlu0 %v6097_v28 }
0x102c   : > { %v5809_v24 = vpop.f32.mrb[164].mxu1 }
0x102d   : > { %v11517_v37 = vpop.f32.mrb[165].mxu1  ;;  %v6094_v19 = vsel %vm1810_vm3, %v5809_v24, -inf }
0x102e   : > { %6095 = vmax.xlane.f32.xlu1 %v6094_v19  ;;  %v5812_v22 = vpop.f32.mrb[166].mxu1 }
0x102f   : > { %v11518_v33 = vpop.f32.mrb[167].mxu1 }
0x1034   : > { %v5901_v60 = vpop.f32.mrb[168].mxu1 }
0x1035   : > { %v11529_v26 = vpop.f32.mrb[169].mxu1  ;;  %v6100_v20 = vsel %vm1810_vm3, %v5901_v60, -inf }
0x1036   : > { %6101 = vmax.xlane.f32.xlu1 %v6100_v20  ;;  %v5904_v21 = vpop.f32.mrb[170].mxu1 }
0x1037   : > { %v11530_v16 = vpop.f32.mrb[171].mxu1 }
0x105f   : > { %v5947_v31 = vpop.f32.mrb[156].mxu0 }
0x1060   : > { %v11535_v12 = vpop.f32.mrb[157].mxu0  ;;  %v6103_v29 = vsel %vm1810_vm3, %v5947_v31, -inf }
0x1061   : > { %v5950_v47 = vpop.f32.mrb[158].mxu0  ;;  %6104 = vmax.xlane.f32.xlu0 %v6103_v29  ;;  %v5993_v23 = vpop.f32.mrb[172].mxu1 }
0x1062   : > { %v11536_v7 = vpop.f32.mrb[159].mxu0  ;;  %v11541_v3 = vpop.f32.mrb[173].mxu1  ;;  %v6106_v30 = vsel %vm1810_vm3, %v5993_v23, -inf }
0x1063   : > { %6107 = vmax.xlane.f32.xlu1 %v6106_v30  ;;  %v5996_v56 = vpop.f32.mrb[174].mxu1 }
0x1064   : > { %v11542_v43 = vpop.f32.mrb[175].mxu1 }
0x1067   : > { %v6039_v61 = vpop.f32.mrb[160].mxu0 }
0x1068   : > { %v11547_v57 = vpop.f32.mrb[161].mxu0  ;;  %v6109_v36 = vsel %vm1810_vm3, %v6039_v61, -inf }
0x1069   : > { %v6042_v4 = vpop.f32.mrb[162].mxu0  ;;  %6110 = vmax.xlane.f32.xlu0 %v6109_v36  ;;  %v14052_v28 = vpop.f32.mrb[176].mxu1 }
0x106a   : > { %v11548_v37 = vpop.f32.mrb[163].mxu0  ;;  %v11553_v19 = vpop.f32.mrb[177].mxu1  ;;  %v6112_v22 = vsel %vm1810_vm3, %v14052_v28, -inf }
0x106b   : > { %6113 = vmax.xlane.f32.xlu1 %v6112_v22  ;;  %v6088_v33 = vpop.f32.mrb[178].mxu1 }
0x106c   : > { %v11554_v26 = vpop.f32.mrb[179].mxu1 }
0x10b3   : > { %v6093_v20 = vpop.xlane.xlu0 %6092 }
0x10b4   : > { %v6115_v21 = vsub.f32 %v5763_v15, %v6093_v20 }
0x10b6   : > { %v6123_v16 = vmul.f32 1.442695, %v6115_v21 }
0x10b7   : > { %v6099_v12 = vpop.xlane.xlu0 %6098 }
0x10b8   : > { %12231 = vpow2.f32 %v6123_v16  ;;  %v6117_v29 = vsub.f32 %v5855_v42, %v6099_v12 }
0x10ba   : > { %v6127_v47 = vmul.f32 1.442695, %v6117_v29 }
0x10bb   : > { %v6096_v7 = vpop.xlane.xlu1 %6095 }
0x10bc   : > { %12233 = vpow2.f32 %v6127_v47  ;;  %v6116_v3 = vsub.f32 %v5809_v24, %v6096_v7 }
0x10be   : > { %v6125_v30 = vmul.f32 1.442695, %v6116_v3 }
0x10c0   : > { %12235 = vpow2.f32 %v6125_v30 }
0x10c2   : > { %v14056_v56 = vpop.eup %12231 }
0x10c3   : > { %v6102_v43 = vpop.xlane.xlu1 %6101  ;;  %v6139_v57 = vsel %vm1810_vm3, %v14056_v56, 0.0 }
0x10c4   : > { %v6118_v36 = vsub.f32 %v5901_v60, %v6102_v43  ;;  %6140 = vadd.xlane.f32.xlu0 %v6139_v57 }
0x10c6   : > { %v14060_v4 = vpop.eup %12233  ;;  %v6129_v15 = vmul.f32 1.442695, %v6118_v36 }
0x10c7   : > { %v6145_v42 = vsel %vm1810_vm3, %v14060_v4, 0.0 }
0x10c8   : > { %12237 = vpow2.f32 %v6129_v15  ;;  %6146 = vadd.xlane.f32.xlu0 %v6145_v42 }
0x10ca   : > { %v14064_v37 = vpop.eup %12235 }
0x10cb   : > { %v6142_v24 = vsel %vm1810_vm3, %v14064_v37, 0.0 }
0x10cc   : > { %6143 = vadd.xlane.f32.xlu1 %v6142_v24 }
0x10d2   : > { %v14068_v19 = vpop.eup %12237 }
0x10d3   : > { %v6148_v60 = vsel %vm1810_vm3, %v14068_v19, 0.0 }
0x10d4   : > { %6149 = vadd.xlane.f32.xlu1 %v6148_v60  ;;  %v5516_v60 = vadd.f32 %v13921_v5, %v13995_v27  ;;  %v5526_v5 = vadd.f32 %v13930_v32, %v13995_v27 }
0x10ee   : > { %v6105_v22 = vpop.xlane.xlu0 %6104 }
0x10ef   : > { %v6119_v33 = vsub.f32 %v5947_v31, %v6105_v22 }
0x10f0   : > { %v6108_v26 = vpop.xlane.xlu1 %6107 }
0x10f1   : > { %v6131_v20 = vmul.f32 1.442695, %v6119_v33  ;;  %v6120_v21 = vsub.f32 %v5993_v23, %v6108_v26  ;;  %v14121_v26 = vpack.c.bf16 %v5516_v60, %v5516_v60 }
0x10f3   : > { %12239 = vpow2.f32 %v6131_v20  ;;  %v6133_v16 = vmul.f32 1.442695, %v6120_v21 }
0x10f5   : > { %12241 = vpow2.f32 %v6133_v16 }
0x10f6   : > { %v6111_v12 = vpop.xlane.xlu0 %6110 }
0x10f7   : > { %v6121_v29 = vsub.f32 %v6039_v61, %v6111_v12  ;;  %v5520_v12 = vadd.f32 %v13925_v0, %v13995_v27 }
0x10f8   : > { %v6114_v61 = vpop.xlane.xlu1 %6113 }
0x10f9   : > { %v6135_v47 = vmul.f32 1.442695, %v6121_v29  ;;  %v6122_v57 = vsub.f32 %v14052_v28, %v6114_v61  ;;  %v6283_v29 = vsel %vm1910_vm2, %v14121_v26, 0  ;;  %v14139_v32 = vpack.c.bf16 %v5520_v12, %v5520_v12 }
0x10fb   : > { %12243 = vpow2.f32 %v6135_v47  ;;  %v6137_v36 = vmul.f32 1.442695, %v6122_v57  ;;  %v5530_v57 = vadd.f32 %v13932_v11, %v13995_v27 }
0x10fd   : > { %v14072_v7 = vpop.eup %12239  ;;  %12245 = vpow2.f32 %v6137_v36  ;;  %v14161_v11 = vpack.c.bf16 %v5530_v57, %v5530_v57 }
0x10fe   : > { %v6151_v3 = vsel %vm1810_vm3, %v14072_v7, 0.0 }
0x10ff   : > { %v14076_v30 = vpop.eup %12241  ;;  %6152 = vadd.xlane.f32.xlu0 %v6151_v3  ;;  %v14141_v3 = vpack.c.bf16 %v5526_v5, %v5526_v5 }
0x1100   : > { %v6154_v31 = vsel %vm1810_vm3, %v14076_v30, 0.0 }
0x1101   : > { %6155 = vadd.xlane.f32.xlu1 %v6154_v31  ;;  %v6375_v36 = vsel %vm1910_vm2, %v14141_v3, 0 }
0x1105   : > { %v14080_v23 = vpop.eup %12243 }
0x1106   : > { %v6157_v43 = vsel %vm1810_vm3, %v14080_v23, 0.0 }
0x1107   : > { %6158 = vadd.xlane.f32.xlu0 %v6157_v43  ;;  %v14103_v15 = vpop.eup %12245 }
0x1108   : > { %v6160_v28 = vsel %vm1810_vm3, %v14103_v15, 0.0 }
0x1112   : > { %6619 = vrot.lane.b32.xlu1 %v13947_v59, %s12426_s18 }
0x1116   : > { %6564 = vrot.lane.b32.xlu1 %v13954_v35, %s12426_s18 }
0x111d   : > { %6567 = vrot.lane.b32.xlu0 %v13895_v41, %s12426_s18 }
0x1121   : > { %6671 = vrot.lane.b32.xlu0 %v13923_v18, %s12426_s18 }
0x1125   : > { %6668 = vrot.lane.b32.xlu0 %v13949_v13, %s12426_s18 }
0x1129   : > { %6775 = vrot.lane.b32.xlu0 %v13945_v58, %s12426_s18 }
0x112d   : > { %6772 = vrot.lane.b32.xlu0 %v14001_v44, %s12426_s18 }
0x1131   : > { %6879 = vrot.lane.b32.xlu0 %v13997_v53, %s12426_s18 }
0x1135   : > { %6876 = vrot.lane.b32.xlu0 %v14027_v38, %s12426_s18 }
0x1139   : > { %7076 = vrot.lane.b32.xlu0 %v14022_v39, %s12426_s18 }
0x113a   : > { %6161 = vadd.xlane.f32.xlu1 %v6160_v28 }
0x114b   : > { %6616 = vrot.lane.b32.xlu1 %v13971_v52, %s12426_s18 }
0x114f   : > { %6723 = vrot.lane.b32.xlu1 %v13964_v34, %s12426_s18 }
0x1151   : > { %v6141_v42 = vpop.xlane.xlu0 %6140 }
0x1152   : > { %12247 = vrcp.f32 %v6141_v42 }
0x1153   : > { %6720 = vrot.lane.b32.xlu1 %v13982_v55, %s12426_s18 }
0x1155   : > { %v6147_v24 = vpop.xlane.xlu0 %6146 }
0x1156   : > { %12249 = vrcp.f32 %v6147_v24  ;;  %v6421_v24 = vsel %vm1910_vm2, %v14161_v11, 0 }
0x1157   : > { %6827 = vrot.lane.b32.xlu1 %v13979_v25, %s12426_s18 }
0x1159   : > { %v6144_v22 = vpop.xlane.xlu1 %6143 }
0x115a   : > { %12251 = vrcp.f32 %v6144_v22  ;;  %v5536_v22 = vadd.f32 %v13934_v8, %v13995_v27 }
0x115b   : > { %6824 = vrot.lane.b32.xlu1 %v14005_v54, %s12426_s18 }
0x115c   : > { %v12248_v33 = vpop.eup %12247 }
0x115d   : > { %v6171_v20 = vmul.f32 %v12248_v33, %v14056_v56 }
0x115f   : > { %6931 = vrot.lane.b32.xlu1 %v13999_v50, %s12426_s18  ;;  %v6179_v21 = vpack.c.bf16 %v6171_v20, %v6171_v20  ;;  %v5540_v20 = vadd.f32 %v13936_v6, %v13995_v27 }
0x1160   : > { %v12250_v16 = vpop.eup %12249 }
0x1161   : > { %11558 = vmatmul.mubr.msk.bf16.vlgmr.msra.gmra.mrb[164].mxu0 %vm1810_vm3, %v6179_v21  ;;  %v6150_v47 = vpop.xlane.xlu1 %6149  ;;  %v6173_v0 = vmul.f32 %v12250_v16, %v14060_v4  ;;  %v6329_v4 = vsel %vm1910_vm2, %v14139_v32, 0  ;;  %v14177_v16 = vpack.c.bf16 %v5536_v22, %v5536_v22 }
0x1162   : > { %11568 = vmatpush3.bf16.msra.mxu0 %v6283_v29  ;;  %12253 = vrcp.f32 %v6150_v47  ;;  %11569 = vmatprep.mubr.msk.bf16.mxu0 %vm12425_vm0, %v15083_v45  ;;  %v14180_v47 = vpack.c.bf16 %v5540_v20, %v5540_v20 }
0x1163   : > { %6928 = vrot.lane.b32.xlu1 %v14029_v40, %s12426_s18  ;;  %11579 = vmatprep.subr.bf16.mxu0 %v15083_v45  ;;  %v6181_v61 = vpack.c.bf16 %v6173_v0, %v6173_v0  ;;  %v6467_v8 = vsel %vm1910_vm2, %v14177_v16, 0 }
0x1164   : > { %v12252_v56 = vpop.eup %12251  ;;  %v6513_v27 = vsel %vm1910_vm2, %v14180_v47, 0 }
0x1165   : > { %v6172_v31 = vmul.f32 %v12252_v56, %v14064_v37 }
0x1167   : > { %7125 = vrot.lane.b32.xlu1 %v14025_v62, %s12426_s18  ;;  %v6180_v43 = vpack.c.bf16 %v6172_v31, %v6172_v31 }
0x1169   : > { %11564 = vmatmul.mubr.msk.bf16.vlgmr.msra.gmra.mrb[180].mxu1 %vm1810_vm3, %v6180_v43  ;;  %11570 = vmatmul.mubr.msk.bf16.vlgmr.msra.gmra.mrb[168].mxu0 %vm1810_vm3, %v6181_v61 }
0x116a   : > { %11574 = vmatpush3.bf16.msra.mxu1 %v6329_v4  ;;  %11580 = vmatpush3.bf16.msra.mxu0 %v6375_v36 }
0x116b   : > { %7174 = vrot.lane.b32.xlu1 %v14121_v26, %s12426_s18  ;;  %11575 = vmatprep.mubr.msk.bf16.mxu1 %vm12425_vm0, %v15083_v45 }
0x116c   : > { %v12254_v37 = vpop.eup %12253  ;;  %11585 = vmatprep.subr.bf16.mxu1 %v15083_v45  ;;  %11581 = vmatprep.mubr.msk.bf16.mxu0 %vm12425_vm0, %v15083_v45 }
0x116d   : > { %v6174_v28 = vmul.f32 %v12254_v37, %v14068_v19  ;;  %11591 = vmatprep.subr.bf16.mxu0 %v15083_v45 }
0x116f   : > { %7223 = vrot.lane.b32.xlu1 %v14139_v32, %s12426_s18  ;;  %v6182_v42 = vpack.c.bf16 %v6174_v28, %v6174_v28 }
0x1171   : > { %11576 = vmatmul.mubr.msk.bf16.vlgmr.msra.gmra.mrb[184].mxu1 %vm1810_vm3, %v6182_v42 }
0x1172   : > { %11586 = vmatpush3.bf16.msra.mxu1 %v6421_v24  ;;  %11587 = vmatprep.mubr.msk.bf16.mxu1 %vm12425_vm0, %v15083_v45 }
0x1173   : > { %11597 = vmatprep.subr.bf16.mxu1 %v15083_v45 }
0x118c   : > { %v6153_v60 = vpop.xlane.xlu0 %6152 }
0x118d   : > { %12255 = vrcp.f32 %v6153_v60 }
0x118e   : > { %v6156_v19 = vpop.xlane.xlu1 %6155 }
0x118f   : > { %12257 = vrcp.f32 %v6156_v19 }
0x1192   : > { %v6620_v4 = vpop.permute.xlu1 %6619 }
0x1194   : > { %v6159_v33 = vpop.xlane.xlu0 %6158 }
0x1195   : > { %12259 = vrcp.f32 %v6159_v33 }
0x1196   : > { %v6565_v37 = vpop.permute.xlu1 %6564 }
0x1197   : > { %v12256_v21 = vpop.eup %12255 }
0x1198   : > { %v6568_v12 = vpop.permute.xlu0 %6567  ;;  %v6175_v5 = vmul.f32 %v12256_v21, %v14072_v7 }
0x1199   : > { %v12258_v29 = vpop.eup %12257  ;;  %v6573_v57 = vsel %vm1441_vm1, %v6568_v12, 0 }
0x119a   : > { %v6183_v0 = vpack.c.bf16 %v6175_v5, %v6175_v5  ;;  %v6176_v56 = vmul.f32 %v12258_v29, %v14076_v30 }
0x119c   : > { %11582 = vmatmul.mubr.msk.bf16.vlgmr.msra.gmra.mrb[172].mxu0 %vm1810_vm3, %v6183_v0  ;;  %v6184_v31 = vpack.c.bf16 %v6176_v56, %v6176_v56  ;;  %v6672_v6 = vpop.permute.xlu0 %6671 }
0x119d   : > { %11592 = vmatpush3.bf16.msra.mxu0 %v6467_v8  ;;  %11593 = vmatprep.mubr.msk.bf16.mxu0 %vm12425_vm0, %v15083_v45  ;;  %v6677_v28 = vsel %vm1441_vm1, %v6672_v6, 0  ;;  %v6625_v8 = vsel %vm1441_vm1, %v6620_v4, 0 }
0x119e   : > { %11588 = vmatmul.mubr.msk.bf16.vlgmr.msra.gmra.mrb[188].mxu1 %vm1810_vm3, %v6184_v31  ;;  %11603 = vmatprep.subr.bf16.mxu0 %v15083_v45 }
0x119f   : > { %v12260_v7 = vpop.eup %12259  ;;  %11598 = vmatpush3.bf16.msra.mxu1 %v6513_v27  ;;  %11599 = vmatprep.mubr.msk.bf16.mxu1 %vm12425_vm0, %v15083_v45 }
0x11a0   : > { %v6177_v30 = vmul.f32 %v12260_v7, %v14080_v23  ;;  %11609 = vmatprep.subr.bf16.mxu1 %v15083_v45  ;;  %v6669_v61 = vpop.permute.xlu0 %6668 }
0x11a2   : > { %v6185_v43 = vpack.c.bf16 %v6177_v30, %v6177_v30 }
0x11a4   : > { %11594 = vmatmul.mubr.msk.bf16.vlgmr.msra.gmra.mrb[176].mxu0 %vm1810_vm3, %v6185_v43  ;;  %v6776_v36 = vpop.permute.xlu0 %6775 }
0x11a5   : > { %11605 = vmatprep.mubr.msk.bf16.mxu0 %vm12425_vm0, %v15083_v45  ;;  %v6781_v42 = vsel %vm1441_vm1, %v6776_v36, 0 }
0x11a6   : > { %11604 = vmatpush3.bf16.xpose.msra.mxu0 %v6573_v57 }
0x11a7   : > { %11615 = vmatprep.subr.bf16.mxu0 %v15083_v45 }
0x11a8   : > { %v6773_v23 = vpop.permute.xlu0 %6772 }
0x11ac   : > { %v6880_v24 = vpop.permute.xlu0 %6879 }
0x11ad   : > { %11606 = vmatmul.mubr.msk.bf16.vlgmr.msra.gmra.mrb[180].mxu0 %vm1441_vm1, %v6565_v37  ;;  %v6885_v19 = vsel %vm1441_vm1, %v6880_v24, 0 }
0x11ae   : > { %11616 = vmatpush3.bf16.xpose.msra.mxu0 %v6677_v28  ;;  %11617 = vmatprep.mubr.msk.bf16.mxu0 %vm12425_vm0, %v15083_v45 }
0x11af   : > { %11627 = vmatprep.subr.bf16.mxu0 %v15083_v45 }
0x11b0   : > { %v6877_v60 = vpop.permute.xlu0 %6876 }
0x11b4   : > { %v7077_v22 = vpop.permute.xlu0 %7076 }
0x11b5   : > { %11618 = vmatmul.mubr.msk.bf16.vlgmr.msra.gmra.mrb[184].mxu0 %vm1441_vm1, %v6669_v61  ;;  %v7082_v33 = vsel %vm1910_vm2, %v7077_v22, 0 }
0x11b6   : > { %11628 = vmatpush3.bf16.xpose.msra.mxu0 %v6781_v42  ;;  %11629 = vmatprep.mubr.msk.bf16.mxu0 %vm12425_vm0, %v15083_v45 }
0x11b7   : > { %11639 = vmatprep.subr.bf16.mxu0 %v15083_v45 }
0x11bd   : > { %11630 = vmatmul.mubr.msk.bf16.vlgmr.msra.gmra.mrb[188].mxu0 %vm1441_vm1, %v6773_v23 }
0x11be   : > { %11640 = vmatpush3.bf16.xpose.msra.mxu0 %v6885_v19  ;;  %11641 = vmatprep.mubr.msk.bf16.mxu0 %vm12425_vm0, %v15083_v45 }
0x11bf   : > { %11651 = vmatprep.subr.bf16.mxu0 %v15083_v45 }
0x11c5   : > { %11642 = vmatmul.mubr.msk.bf16.vlgmr.msra.gmra.mrb[192].mxu0 %vm1441_vm1, %v6877_v60 }
0x11c6   : > { %11652 = vmatpush3.bf16.msra.mxu0 %v7082_v33  ;;  %11653 = vmatprep.mubr.msk.bf16.mxu0 %vm12425_vm0, %v15083_v45 }
0x11c7   : > { %v6162_v20 = vpop.xlane.xlu1 %6161  ;;  %11663 = vmatprep.subr.bf16.mxu0 %v15083_v45 }
0x11c8   : > { %12261 = vrcp.f32 %v6162_v20 }
0x11cb   : > { %v6617_v21 = vpop.permute.xlu1 %6616 }
0x11cf   : > { %v6724_v12 = vpop.permute.xlu1 %6723 }
0x11d0   : > { %v6729_v6 = vsel %vm1441_vm1, %v6724_v12, 0 }
0x11d2   : > { %v12262_v5 = vpop.eup %12261 }
0x11d3   : > { %v6178_v29 = vmul.f32 %v12262_v5, %v14103_v15  ;;  %v6721_v56 = vpop.permute.xlu1 %6720 }
0x11d5   : > { %v6186_v0 = vpack.c.bf16 %v6178_v29, %v6178_v29 }
0x11d7   : > { %11600 = vmatmul.mubr.msk.bf16.vlgmr.msra.gmra.mrb[192].mxu1 %vm1810_vm3, %v6186_v0  ;;  %v6828_v31 = vpop.permute.xlu1 %6827 }
0x11d8   : > { %11610 = vmatpush3.bf16.xpose.msra.mxu1 %v6625_v8  ;;  %11611 = vmatprep.mubr.msk.bf16.mxu1 %vm12425_vm0, %v15083_v45  ;;  %v6833_v27 = vsel %vm1441_vm1, %v6828_v31, 0 }
0x11d9   : > { %11621 = vmatprep.subr.bf16.mxu1 %v15083_v45 }
0x11db   : > { %v6825_v15 = vpop.permute.xlu1 %6824 }
0x11df   : > { %11612 = vmatmul.mubr.msk.bf16.vlgmr.msra.gmra.mrb[196].mxu1 %vm1441_vm1, %v6617_v21  ;;  %v6932_v7 = vpop.permute.xlu1 %6931 }
0x11e0   : > { %11622 = vmatpush3.bf16.xpose.msra.mxu1 %v6729_v6  ;;  %11623 = vmatprep.mubr.msk.bf16.mxu1 %vm12425_vm0, %v15083_v45  ;;  %v6937_v43 = vsel %vm1441_vm1, %v6932_v7, 0 }
0x11e1   : > { %11633 = vmatprep.subr.bf16.mxu1 %v15083_v45 }
0x11e3   : > { %v6929_v30 = vpop.permute.xlu1 %6928 }
0x11e7   : > { %11624 = vmatmul.mubr.msk.bf16.vlgmr.msra.gmra.mrb[200].mxu1 %vm1441_vm1, %v6721_v56  ;;  %v7126_v61 = vpop.permute.xlu1 %7125 }
0x11e8   : > { %11634 = vmatpush3.bf16.xpose.msra.mxu1 %v6833_v27  ;;  %11635 = vmatprep.mubr.msk.bf16.mxu1 %vm12425_vm0, %v15083_v45  ;;  %v7131_v57 = vsel %vm1910_vm2, %v7126_v61, 0 }
0x11e9   : > { %11645 = vmatprep.subr.bf16.mxu1 %v15083_v45 }
0x11ef   : > { %11636 = vmatmul.mubr.msk.bf16.vlgmr.msra.gmra.mrb[204].mxu1 %vm1441_vm1, %v6825_v15 }
0x11f0   : > { %11646 = vmatpush3.bf16.xpose.msra.mxu1 %v6937_v43  ;;  %11647 = vmatprep.mubr.msk.bf16.mxu1 %vm12425_vm0, %v15083_v45 }
0x11f1   : > { %11657 = vmatprep.subr.bf16.mxu1 %v15083_v45 }
0x11f7   : > { %11648 = vmatmul.mubr.msk.bf16.vlgmr.msra.gmra.mrb[208].mxu1 %vm1441_vm1, %v6929_v30 }
0x11f8   : > { %11658 = vmatpush3.bf16.msra.mxu1 %v7131_v57  ;;  %11659 = vmatprep.mubr.msk.bf16.mxu1 %vm12425_vm0, %v15083_v45 }
0x11f9   : > { %11669 = vmatprep.subr.bf16.mxu1 %v15083_v45 }
0x1234   : > { %v6227_v4 = vpop.f32.mrb[164].mxu0 }
0x1235   : > { %6555 = vst.msk [vmem:[#allocation2] sm:$0xff] %vm1441_vm1, %v6227_v4  ;;  %v11559_v36 = vpop.f32.mrb[165].mxu0 }
0x1236   : > { %v6230_v37 = vpop.f32.mrb[166].mxu0 }
0x1237   : > { %v11560_v28 = vpop.f32.mrb[167].mxu0 }
0x123c   : > { %v6273_v23 = vpop.f32.mrb[180].mxu1  ;;  %v6319_v42 = vpop.f32.mrb[168].mxu0 }
0x123d   : > { %6556 = vst.msk [vmem:[#allocation2 + $0x8] sm:$0xff] %vm1441_vm1, %v6273_v23  ;;  %6557 = vst.msk [vmem:[#allocation2 + $0x10] sm:$0xff] %vm1441_vm1, %v6319_v42  ;;  %v11565_v24 = vpop.f32.mrb[181].mxu1  ;;  %v11571_v60 = vpop.f32.mrb[169].mxu0 }
0x123e   : > { %v6276_v19 = vpop.f32.mrb[182].mxu1  ;;  %v6322_v22 = vpop.f32.mrb[170].mxu0 }
0x123f   : > { %v11566_v33 = vpop.f32.mrb[183].mxu1  ;;  %v11572_v20 = vpop.f32.mrb[171].mxu0 }
0x1244   : > { %v6365_v21 = vpop.f32.mrb[184].mxu1 }
0x1245   : > { %6558 = vst.msk [vmem:[#allocation2 + $0x18] sm:$0xff] %vm1441_vm1, %v6365_v21  ;;  %v11577_v12 = vpop.f32.mrb[185].mxu1 }
0x1246   : > { %v6368_v5 = vpop.f32.mrb[186].mxu1 }
0x1247   : > { %v11578_v29 = vpop.f32.mrb[187].mxu1 }
0x126f   : > { %v6411_v0 = vpop.f32.mrb[172].mxu0 }
0x1270   : > { %6559 = vst.msk [vmem:[#allocation2 + $0x20] sm:$0xff] %vm1441_vm1, %v6411_v0  ;;  %v11583_v56 = vpop.f32.mrb[173].mxu0 }
0x1271   : > { %v6414_v8 = vpop.f32.mrb[174].mxu0  ;;  %v6457_v31 = vpop.f32.mrb[188].mxu1 }
0x1272   : > { %6560 = vst.msk [vmem:[#allocation2 + $0x28] sm:$0xff] %vm1441_vm1, %v6457_v31  ;;  %v11584_v6 = vpop.f32.mrb[175].mxu0  ;;  %v11589_v15 = vpop.f32.mrb[189].mxu1 }
0x1273   : > { %v6460_v27 = vpop.f32.mrb[190].mxu1 }
0x1274   : > { %v11590_v7 = vpop.f32.mrb[191].mxu1 }
0x1277   : > { %v6503_v30 = vpop.f32.mrb[176].mxu0 }
0x1278   : > { %6561 = vst.msk [vmem:[#allocation2 + $0x30] sm:$0xff] %vm1441_vm1, %v6503_v30  ;;  %v11595_v43 = vpop.f32.mrb[177].mxu0 }
0x1279   : > { %v6506_v61 = vpop.f32.mrb[178].mxu0 }
0x127a   : > { %v11596_v57 = vpop.f32.mrb[179].mxu0 }
0x1280   : > { %v6609_v4 = vpop.f32.mrb[180].mxu0 }
0x1281   : > { %v11607_v36 = vpop.f32.mrb[181].mxu0  ;;  %v6979_v37 = vsel %vm1810_vm3, %v6609_v4, -inf }
0x1282   : > { %6980 = vmax.xlane.f32.xlu0 %v6979_v37  ;;  %v6612_v28 = vpop.f32.mrb[182].mxu0 }
0x1283   : > { %v11608_v23 = vpop.f32.mrb[183].mxu0 }
0x1288   : > { %v6713_v42 = vpop.f32.mrb[184].mxu0 }
0x1289   : > { %v11619_v24 = vpop.f32.mrb[185].mxu0  ;;  %v6985_v60 = vsel %vm1810_vm3, %v6713_v42, -inf }
0x128a   : > { %6986 = vmax.xlane.f32.xlu0 %v6985_v60  ;;  %v6716_v19 = vpop.f32.mrb[186].mxu0 }
0x128b   : > { %v11620_v22 = vpop.f32.mrb[187].mxu0 }
0x1290   : > { %v14256_v33 = vpop.f32.mrb[188].mxu0 }
0x1291   : > { %v11631_v20 = vpop.f32.mrb[189].mxu0  ;;  %v6991_v24 = vsel %vm1810_vm3, %v14256_v33, -inf }
0x1292   : > { %v6820_v21 = vpop.f32.mrb[190].mxu0 }
0x1293   : > { %v11632_v12 = vpop.f32.mrb[191].mxu0 }
0x1298   : > { %v14258_v5 = vpop.f32.mrb[192].mxu0 }
0x1299   : > { %v11643_v29 = vpop.f32.mrb[193].mxu0  ;;  %v6997_v22 = vsel %vm1810_vm3, %v14258_v5, -inf }
0x129a   : > { %v6924_v0 = vpop.f32.mrb[194].mxu0 }
0x129b   : > { %v11644_v56 = vpop.f32.mrb[195].mxu0 }
0x12aa   : > { %v6549_v8 = vpop.f32.mrb[192].mxu1 }
0x12ab   : > { %6562 = vst.msk [vmem:[#allocation2 + $0x38] sm:$0xff] %vm1441_vm1, %v6549_v8  ;;  %v11601_v31 = vpop.f32.mrb[193].mxu1 }
0x12ac   : > { %v6552_v6 = vpop.f32.mrb[194].mxu1 }
0x12ad   : > { %v11602_v15 = vpop.f32.mrb[195].mxu1 }
0x12b2   : > { %v6661_v27 = vpop.f32.mrb[196].mxu1 }
0x12b3   : > { %v11613_v7 = vpop.f32.mrb[197].mxu1  ;;  %v6982_v30 = vsel %vm1810_vm3, %v6661_v27, -inf }
0x12b4   : > { %6983 = vmax.xlane.f32.xlu1 %v6982_v30  ;;  %v6664_v43 = vpop.f32.mrb[198].mxu1 }
0x12b5   : > { %v11614_v61 = vpop.f32.mrb[199].mxu1 }
0x12ba   : > { %v6765_v57 = vpop.f32.mrb[200].mxu1 }
0x12bb   : > { %v11625_v36 = vpop.f32.mrb[201].mxu1  ;;  %v6988_v37 = vsel %vm1810_vm3, %v6765_v57, -inf }
0x12bc   : > { %6989 = vmax.xlane.f32.xlu0 %v6988_v37  ;;  %v6768_v28 = vpop.f32.mrb[202].mxu1 }
0x12bd   : > { %v11626_v23 = vpop.f32.mrb[203].mxu1 }
0x12c0   : > { %6992 = vmax.xlane.f32.xlu0 %v6991_v24  ;;  %v7175_v24 = vpop.permute.xlu1 %7174 }
0x12c2   : > { %v6869_v60 = vpop.f32.mrb[204].mxu1 }
0x12c3   : > { %v11637_v19 = vpop.f32.mrb[205].mxu1  ;;  %v6994_v20 = vsel %vm1810_vm3, %v6869_v60, -inf }
0x12c4   : > { %6998 = vmax.xlane.f32.xlu0 %v6997_v22  ;;  %6995 = vmax.xlane.f32.xlu1 %v6994_v20  ;;  %v6872_v21 = vpop.f32.mrb[206].mxu1  ;;  %v14281_v19 = vpop.permute.xlu1 %7223 }
0x12c5   : > { %v11638_v12 = vpop.f32.mrb[207].mxu1 }
0x12ca   : > { %v14268_v29 = vpop.f32.mrb[208].mxu1 }
0x12cb   : > { %v11649_v0 = vpop.f32.mrb[209].mxu1  ;;  %v7000_v31 = vsel %vm1810_vm3, %v14268_v29, -inf }
0x12cc   : > { %v6976_v56 = vpop.f32.mrb[210].mxu1 }
0x12cd   : > { %v11650_v8 = vpop.f32.mrb[211].mxu1 }
0x12d5   : > { %7321 = vrot.lane.b32.xlu1 %v14161_v11, %s12426_s18 }
0x12da   : > { %7272 = vrot.lane.b32.xlu0 %v14141_v3, %s12426_s18 }
0x12f9   : > { %7001 = vmax.xlane.f32.xlu1 %v7000_v31 }
0x130f   : > { %v6981_v6 = vpop.xlane.xlu0 %6980 }
0x1310   : > { %v7003_v15 = vsub.f32 %v6609_v4, %v6981_v6 }
0x1312   : > { %v7011_v7 = vmul.f32 1.442695, %v7003_v15 }
0x1314   : > { %12263 = vpow2.f32 %v7011_v7 }
0x1317   : > { %v6987_v30 = vpop.xlane.xlu0 %6986 }
0x1318   : > { %v7005_v43 = vsub.f32 %v6713_v42, %v6987_v30 }
0x131a   : > { %v7015_v61 = vmul.f32 1.442695, %v7005_v43 }
0x131c   : > { %12265 = vpow2.f32 %v7015_v61 }
0x131e   : > { %v12264_v36 = vpop.eup %12263 }
0x131f   : > { %v7027_v37 = vsel %vm1810_vm3, %v12264_v36, 0.0 }
0x1320   : > { %7028 = vadd.xlane.f32.xlu0 %v7027_v37 }
0x1326   : > { %v14277_v28 = vpop.eup %12265 }
0x1327   : > { %v7033_v23 = vsel %vm1810_vm3, %v14277_v28, 0.0 }
0x1328   : > { %7034 = vadd.xlane.f32.xlu0 %v7033_v23 }
0x1341   : > { %v6984_v4 = vpop.xlane.xlu1 %6983 }
0x1342   : > { %v7004_v22 = vsub.f32 %v6661_v27, %v6984_v4 }
0x1344   : > { %v7013_v20 = vmul.f32 1.442695, %v7004_v22 }
0x1346   : > { %12267 = vpow2.f32 %v7013_v20 }
0x1349   : > { %v6990_v42 = vpop.xlane.xlu0 %6989 }
0x134a   : > { %v7006_v21 = vsub.f32 %v6765_v57, %v6990_v42 }
0x134c   : > { %v7017_v12 = vmul.f32 1.442695, %v7006_v21 }
0x134d   : > { %v6993_v0 = vpop.xlane.xlu0 %6992 }
0x134e   : > { %12269 = vpow2.f32 %v7017_v12  ;;  %v7007_v56 = vsub.f32 %v14256_v33, %v6993_v0 }
0x1350   : > { %v14284_v8 = vpop.eup %12267  ;;  %v7019_v31 = vmul.f32 1.442695, %v7007_v56 }
0x1351   : > { %v7030_v6 = vsel %vm1810_vm3, %v14284_v8, 0.0  ;;  %v6996_v33 = vpop.xlane.xlu1 %6995  ;;  %v6999_v43 = vpop.xlane.xlu0 %6998 }
0x1352   : > { %12271 = vpow2.f32 %v7019_v31  ;;  %7031 = vadd.xlane.f32.xlu1 %v7030_v6  ;;  %v7008_v30 = vsub.f32 %v6869_v60, %v6996_v33  ;;  %v7009_v61 = vsub.f32 %v14258_v5, %v6999_v43 }
0x1354   : > { %v7021_v37 = vmul.f32 1.442695, %v7008_v30  ;;  %v7023_v23 = vmul.f32 1.442695, %v7009_v61 }
0x1355   : > { %v14311_v5 = vpop.permute.xlu1 %7321  ;;  %v7273_v60 = vpop.permute.xlu0 %7272 }
0x1356   : > { %12273 = vpow2.f32 %v7021_v37  ;;  %v7278_v61 = vsel %vm1910_vm2, %v7273_v60, 0 }
0x1357   : > { %12275 = vpow2.f32 %v7023_v23 }
0x1358   : > { %v14288_v15 = vpop.eup %12269 }
0x1359   : > { %v7036_v27 = vsel %vm1810_vm3, %v14288_v15, 0.0 }
0x135a   : > { %7037 = vadd.xlane.f32.xlu1 %v7036_v27 }
0x135c   : > { %v14292_v57 = vpop.eup %12271 }
0x135d   : > { %v7039_v7 = vsel %vm1810_vm3, %v14292_v57, 0.0 }
0x135e   : > { %7040 = vadd.xlane.f32.xlu0 %v7039_v7  ;;  %v7180_v7 = vsel %vm1910_vm2, %v7175_v24, 0 }
0x1360   : > { %v14301_v4 = vpop.eup %12273 }
0x1361   : > { %v7042_v22 = vsel %vm1810_vm3, %v14301_v4, 0.0  ;;  %v14305_v20 = vpop.eup %12275 }
0x1362   : > { %v7045_v42 = vsel %vm1810_vm3, %v14305_v20, 0.0 }
0x136b   : > { %7419 = vrot.lane.b32.xlu1 %v14180_v47, %s12426_s18 }
0x1374   : > { %7370 = vrot.lane.b32.xlu0 %v14177_v16, %s12426_s18 }
0x1386   : > { %v7002_v21 = vpop.xlane.xlu1 %7001 }
0x1387   : > { %v7010_v12 = vsub.f32 %v14268_v29, %v7002_v21  ;;  %v7229_v21 = vsel %vm1910_vm2, %v14281_v19, 0  ;;  %v7327_v19 = vsel %vm1910_vm2, %v14311_v5, 0 }
0x1389   : > { %v7025_v56 = vmul.f32 1.442695, %v7010_v12 }
0x138f   : > { %7043 = vadd.xlane.f32.xlu1 %v7042_v22 }
0x1393   : > { %7046 = vadd.xlane.f32.xlu0 %v7045_v42 }
0x13a0   : > { %7559 = vrot.lane.b32.xlu1 %v13947_v59, %s12427_s30 }
0x13a9   : > { %7509 = vrot.lane.b32.xlu0 %v13895_v41, %s12427_s30 }
0x13ad   : > { %v7029_v0 = vpop.xlane.xlu0 %7028  ;;  %7507 = vrot.lane.b32.xlu0 %v13954_v35, %s12427_s30 }
0x13ae   : > { %12277 = vrcp.f32 %v7029_v0 }
0x13af   : > { %12279 = vpow2.f32 %v7025_v56 }
0x13b1   : > { %7609 = vrot.lane.b32.xlu0 %v13923_v18, %s12427_s30 }
0x13b5   : > { %v7035_v31 = vpop.xlane.xlu0 %7034  ;;  %7607 = vrot.lane.b32.xlu0 %v13949_v13, %s12427_s30 }
0x13b6   : > { %12281 = vrcp.f32 %v7035_v31 }
0x13b8   : > { %v12278_v6 = vpop.eup %12277 }
0x13b9   : > { %7709 = vrot.lane.b32.xlu0 %v13945_v58, %s12427_s30  ;;  %v7059_v29 = vmul.f32 %v12278_v6, %v12264_v36  ;;  %v14330_v33 = vpop.eup %12279 }
0x13ba   : > { %v7048_v43 = vsel %vm1810_vm3, %v14330_v33, 0.0 }
0x13bb   : > { %v7067_v27 = vpack.c.bf16 %v7059_v29, %v7059_v29 }
0x13bd   : > { %11654 = vmatmul.mubr.msk.bf16.vlgmr.msra.gmra.mrb[196].mxu0 %vm1810_vm3, %v7067_v27  ;;  %7707 = vrot.lane.b32.xlu0 %v14001_v44, %s12427_s30 }
0x13be   : > { %11664 = vmatpush3.bf16.msra.mxu0 %v7180_v7  ;;  %11665 = vmatprep.mubr.msk.bf16.mxu0 %vm12425_vm0, %v15083_v45 }
0x13bf   : > { %11675 = vmatprep.subr.bf16.mxu0 %v15083_v45 }
0x13c0   : > { %v12282_v30 = vpop.eup %12281 }
0x13c1   : > { %7809 = vrot.lane.b32.xlu0 %v13997_v53, %s12427_s30  ;;  %v7061_v36 = vmul.f32 %v12282_v30, %v14277_v28 }
0x13c3   : > { %v7069_v24 = vpack.c.bf16 %v7061_v36, %v7061_v36 }
0x13c4   : > { %7049 = vadd.xlane.f32.xlu1 %v7048_v43 }
0x13c5   : > { %11666 = vmatmul.mubr.msk.bf16.vlgmr.msra.gmra.mrb[200].mxu0 %vm1810_vm3, %v7069_v24  ;;  %7807 = vrot.lane.b32.xlu0 %v14027_v38, %s12427_s30 }
0x13c6   : > { %11676 = vmatpush3.bf16.msra.mxu0 %v7278_v61  ;;  %11677 = vmatprep.mubr.msk.bf16.mxu0 %vm12425_vm0, %v15083_v45 }
0x13c7   : > { %11687 = vmatprep.subr.bf16.mxu0 %v15083_v45 }
0x13c9   : > { %8003 = vrot.lane.b32.xlu0 %v14022_v39, %s12427_s30 }
0x13d5   : > { %7557 = vrot.lane.b32.xlu1 %v13971_v52, %s12427_s30 }
0x13d9   : > { %7659 = vrot.lane.b32.xlu1 %v13964_v34, %s12427_s30 }
0x13dd   : > { %7657 = vrot.lane.b32.xlu1 %v13982_v55, %s12427_s30 }
0x13df   : > { %v7032_v28 = vpop.xlane.xlu1 %7031 }
0x13e0   : > { %12283 = vrcp.f32 %v7032_v28 }
0x13e1   : > { %7759 = vrot.lane.b32.xlu1 %v13979_v25, %s12427_s30 }
0x13e5   : > { %7757 = vrot.lane.b32.xlu1 %v14005_v54, %s12427_s30 }
0x13e7   : > { %v7038_v37 = vpop.xlane.xlu1 %7037 }
0x13e8   : > { %12285 = vrcp.f32 %v7038_v37 }
0x13e9   : > { %7859 = vrot.lane.b32.xlu1 %v13999_v50, %s12427_s30 }
0x13ea   : > { %v12284_v23 = vpop.eup %12283 }
0x13eb   : > { %v7041_v22 = vpop.xlane.xlu0 %7040  ;;  %v7060_v42 = vmul.f32 %v12284_v23, %v14284_v8 }
0x13ec   : > { %12287 = vrcp.f32 %v7041_v22 }
0x13ed   : > { %7857 = vrot.lane.b32.xlu1 %v14029_v40, %s12427_s30  ;;  %v7068_v60 = vpack.c.bf16 %v7060_v42, %v7060_v42 }
0x13ef   : > { %11660 = vmatmul.mubr.msk.bf16.vlgmr.msra.gmra.mrb[212].mxu1 %vm1810_vm3, %v7068_v60  ;;  %v7371_v6 = vpop.permute.xlu0 %7370 }
0x13f0   : > { %11670 = vmatpush3.bf16.msra.mxu1 %v7229_v21  ;;  %11671 = vmatprep.mubr.msk.bf16.mxu1 %vm12425_vm0, %v15083_v45  ;;  %v7376_v29 = vsel %vm1910_vm2, %v7371_v6, 0 }
0x13f1   : > { %8051 = vrot.lane.b32.xlu1 %v14025_v62, %s12427_s30  ;;  %11681 = vmatprep.subr.bf16.mxu1 %v15083_v45 }
0x13f2   : > { %v12286_v8 = vpop.eup %12285 }
0x13f3   : > { %v7062_v12 = vmul.f32 %v12286_v8, %v14288_v15 }
0x13f5   : > { %8099 = vrot.lane.b32.xlu1 %v14121_v26, %s12427_s30  ;;  %v7070_v0 = vpack.c.bf16 %v7062_v12, %v7062_v12 }
0x13f6   : > { %v12288_v56 = vpop.eup %12287 }
0x13f7   : > { %11672 = vmatmul.mubr.msk.bf16.vlgmr.msra.gmra.mrb[216].mxu1 %vm1810_vm3, %v7070_v0  ;;  %v7063_v31 = vmul.f32 %v12288_v56, %v14292_v57  ;;  %v7420_v57 = vpop.permute.xlu1 %7419 }
0x13f8   : > { %11682 = vmatpush3.bf16.msra.mxu1 %v7327_v19  ;;  %11683 = vmatprep.mubr.msk.bf16.mxu1 %vm12425_vm0, %v15083_v45  ;;  %v7425_v28 = vsel %vm1910_vm2, %v7420_v57, 0 }
0x13f9   : > { %8147 = vrot.lane.b32.xlu1 %v14139_v32, %s12427_s30  ;;  %v7071_v15 = vpack.c.bf16 %v7063_v31, %v7063_v31  ;;  %11693 = vmatprep.subr.bf16.mxu1 %v15083_v45 }
0x13fb   : > { %11678 = vmatmul.mubr.msk.bf16.vlgmr.msra.gmra.mrb[204].mxu0 %vm1810_vm3, %v7071_v15 }
0x13fc   : > { %11688 = vmatpush3.bf16.msra.mxu0 %v7376_v29  ;;  %11689 = vmatprep.mubr.msk.bf16.mxu0 %vm12425_vm0, %v15083_v45 }
0x13fd   : > { %11699 = vmatprep.subr.bf16.mxu0 %v15083_v45 }
0x141c   : > { %v7044_v5 = vpop.xlane.xlu1 %7043 }
0x141d   : > { %12289 = vrcp.f32 %v7044_v5 }
0x1420   : > { %v7047_v27 = vpop.xlane.xlu0 %7046  ;;  %v7560_v19 = vpop.permute.xlu1 %7559 }
0x1421   : > { %12291 = vrcp.f32 %v7047_v27 }
0x1424   : > { %v7510_v7 = vpop.permute.xlu0 %7509 }
0x1425   : > { %v7515_v42 = vsel %vm1441_vm1, %v7510_v7, 0 }
0x1427   : > { %v12290_v30 = vpop.eup %12289 }
0x1428   : > { %v7508_v36 = vpop.permute.xlu0 %7507  ;;  %v7064_v24 = vmul.f32 %v12290_v30, %v14301_v4 }
0x142a   : > { %v7072_v43 = vpack.c.bf16 %v7064_v24, %v7064_v24 }
0x142b   : > { %v12292_v61 = vpop.eup %12291 }
0x142c   : > { %v7610_v37 = vpop.permute.xlu0 %7609  ;;  %11684 = vmatmul.mubr.msk.bf16.vlgmr.msra.gmra.mrb[220].mxu1 %vm1810_vm3, %v7072_v43  ;;  %v7065_v23 = vmul.f32 %v12292_v61, %v14305_v20 }
0x142d   : > { %11694 = vmatpush3.bf16.msra.mxu1 %v7425_v28  ;;  %11695 = vmatprep.mubr.msk.bf16.mxu1 %vm12425_vm0, %v15083_v45  ;;  %v7615_v20 = vsel %vm1441_vm1, %v7610_v37, 0 }
0x142e   : > { %v7073_v22 = vpack.c.bf16 %v7065_v23, %v7065_v23  ;;  %11705 = vmatprep.subr.bf16.mxu1 %v15083_v45 }
0x1430   : > { %11690 = vmatmul.mubr.msk.bf16.vlgmr.msra.gmra.mrb[208].mxu0 %vm1810_vm3, %v7073_v22  ;;  %v7608_v4 = vpop.permute.xlu0 %7607 }
0x1431   : > { %11700 = vmatpush3.bf16.xpose.msra.mxu0 %v7515_v42  ;;  %11701 = vmatprep.mubr.msk.bf16.mxu0 %vm12425_vm0, %v15083_v45 }
0x1432   : > { %11711 = vmatprep.subr.bf16.mxu0 %v15083_v45 }
0x1434   : > { %v7710_v60 = vpop.permute.xlu0 %7709 }
0x1435   : > { %v7715_v8 = vsel %vm1441_vm1, %v7710_v60, 0 }
0x1438   : > { %11702 = vmatmul.mubr.msk.bf16.vlgmr.msra.gmra.mrb[212].mxu0 %vm1441_vm1, %v7508_v36  ;;  %v7708_v21 = vpop.permute.xlu0 %7707  ;;  %v7565_v36 = vsel %vm1441_vm1, %v7560_v19, 0 }
0x1439   : > { %11712 = vmatpush3.bf16.xpose.msra.mxu0 %v7615_v20  ;;  %11713 = vmatprep.mubr.msk.bf16.mxu0 %vm12425_vm0, %v15083_v45 }
0x143a   : > { %11723 = vmatprep.subr.bf16.mxu0 %v15083_v45 }
0x143c   : > { %v7810_v12 = vpop.permute.xlu0 %7809 }
0x143d   : > { %v7815_v56 = vsel %vm1441_vm1, %v7810_v12, 0 }
0x1440   : > { %11714 = vmatmul.mubr.msk.bf16.vlgmr.msra.gmra.mrb[216].mxu0 %vm1441_vm1, %v7608_v4  ;;  %v7808_v0 = vpop.permute.xlu0 %7807 }
0x1441   : > { %11724 = vmatpush3.bf16.xpose.msra.mxu0 %v7715_v8  ;;  %11725 = vmatprep.mubr.msk.bf16.mxu0 %vm12425_vm0, %v15083_v45 }
0x1442   : > { %11735 = vmatprep.subr.bf16.mxu0 %v15083_v45 }
0x1444   : > { %v8004_v31 = vpop.permute.xlu0 %8003 }
0x1445   : > { %v8009_v6 = vsel %vm1910_vm2, %v8004_v31, 0 }
0x1448   : > { %11726 = vmatmul.mubr.msk.bf16.vlgmr.msra.gmra.mrb[220].mxu0 %vm1441_vm1, %v7708_v21 }
0x1449   : > { %11736 = vmatpush3.bf16.xpose.msra.mxu0 %v7815_v56  ;;  %11737 = vmatprep.mubr.msk.bf16.mxu0 %vm12425_vm0, %v15083_v45 }
0x144a   : > { %11747 = vmatprep.subr.bf16.mxu0 %v15083_v45 }
0x1450   : > { %11738 = vmatmul.mubr.msk.bf16.vlgmr.msra.gmra.mrb[224].mxu0 %vm1441_vm1, %v7808_v0 }
0x1451   : > { %11748 = vmatpush3.bf16.msra.mxu0 %v8009_v6  ;;  %v7050_v15 = vpop.xlane.xlu1 %7049  ;;  %11749 = vmatprep.mubr.msk.bf16.mxu0 %vm12425_vm0, %v15083_v45 }
0x1452   : > { %12293 = vrcp.f32 %v7050_v15  ;;  %11759 = vmatprep.subr.bf16.mxu0 %v15083_v45 }
0x1455   : > { %v7558_v29 = vpop.permute.xlu1 %7557 }
0x1459   : > { %v7660_v57 = vpop.permute.xlu1 %7659 }
0x145a   : > { %v7665_v43 = vsel %vm1441_vm1, %v7660_v57, 0 }
0x145c   : > { %v12294_v5 = vpop.eup %12293 }
0x145d   : > { %v7066_v27 = vmul.f32 %v12294_v5, %v14330_v33  ;;  %v7658_v30 = vpop.permute.xlu1 %7657 }
0x145f   : > { %v7074_v7 = vpack.c.bf16 %v7066_v27, %v7066_v27 }
0x1461   : > { %11696 = vmatmul.mubr.msk.bf16.vlgmr.msra.gmra.mrb[224].mxu1 %vm1810_vm3, %v7074_v7  ;;  %v7760_v24 = vpop.permute.xlu1 %7759 }
0x1462   : > { %11706 = vmatpush3.bf16.xpose.msra.mxu1 %v7565_v36  ;;  %11707 = vmatprep.mubr.msk.bf16.mxu1 %vm12425_vm0, %v15083_v45  ;;  %v7765_v61 = vsel %vm1441_vm1, %v7760_v24, 0 }
0x1463   : > { %11717 = vmatprep.subr.bf16.mxu1 %v15083_v45 }
0x1465   : > { %v7758_v33 = vpop.permute.xlu1 %7757 }
0x1469   : > { %11708 = vmatmul.mubr.msk.bf16.vlgmr.msra.gmra.mrb[228].mxu1 %vm1441_vm1, %v7558_v29  ;;  %v7860_v28 = vpop.permute.xlu1 %7859 }
0x146a   : > { %11718 = vmatpush3.bf16.xpose.msra.mxu1 %v7665_v43  ;;  %11719 = vmatprep.mubr.msk.bf16.mxu1 %vm12425_vm0, %v15083_v45  ;;  %v7865_v23 = vsel %vm1441_vm1, %v7860_v28, 0 }
0x146b   : > { %11729 = vmatprep.subr.bf16.mxu1 %v15083_v45 }
0x146d   : > { %v7858_v37 = vpop.permute.xlu1 %7857 }
0x1471   : > { %11720 = vmatmul.mubr.msk.bf16.vlgmr.msra.gmra.mrb[232].mxu1 %vm1441_vm1, %v7658_v30  ;;  %v8052_v22 = vpop.permute.xlu1 %8051 }
0x1472   : > { %11730 = vmatpush3.bf16.xpose.msra.mxu1 %v7765_v61  ;;  %11731 = vmatprep.mubr.msk.bf16.mxu1 %vm12425_vm0, %v15083_v45  ;;  %v8057_v42 = vsel %vm1910_vm2, %v8052_v22, 0 }
0x1473   : > { %11741 = vmatprep.subr.bf16.mxu1 %v15083_v45 }
0x1479   : > { %11732 = vmatmul.mubr.msk.bf16.vlgmr.msra.gmra.mrb[236].mxu1 %vm1441_vm1, %v7758_v33 }
0x147a   : > { %11742 = vmatpush3.bf16.xpose.msra.mxu1 %v7865_v23  ;;  %11743 = vmatprep.mubr.msk.bf16.mxu1 %vm12425_vm0, %v15083_v45 }
0x147b   : > { %11753 = vmatprep.subr.bf16.mxu1 %v15083_v45 }
0x1481   : > { %11744 = vmatmul.mubr.msk.bf16.vlgmr.msra.gmra.mrb[240].mxu1 %vm1441_vm1, %v7858_v37 }
0x1482   : > { %11754 = vmatpush3.bf16.msra.mxu1 %v8057_v42  ;;  %11755 = vmatprep.mubr.msk.bf16.mxu1 %vm12425_vm0, %v15083_v45 }
0x1483   : > { %11765 = vmatprep.subr.bf16.mxu1 %v15083_v45 }
0x1490   : > { %v14445_v4 = vpop.f32.mrb[196].mxu0 }
0x1491   : > { %v11655_v60 = vpop.f32.mrb[197].mxu0 }
0x1492   : > { %v7121_v20 = vpop.f32.mrb[198].mxu0 }
0x1493   : > { %v11656_v21 = vpop.f32.mrb[199].mxu0 }
0x1498   : > { %v14447_v8 = vpop.f32.mrb[200].mxu0 }
0x1499   : > { %v11667_v12 = vpop.f32.mrb[201].mxu0 }
0x149a   : > { %v7219_v0 = vpop.f32.mrb[202].mxu0 }
0x149b   : > { %v11668_v56 = vpop.f32.mrb[203].mxu0 }
0x14c2   : > { %v14449_v19 = vpop.f32.mrb[212].mxu1 }
0x14c3   : > { %v11661_v31 = vpop.f32.mrb[213].mxu1 }
0x14c4   : > { %v7170_v6 = vpop.f32.mrb[214].mxu1 }
0x14c5   : > { %v11662_v15 = vpop.f32.mrb[215].mxu1 }
0x14ca   : > { %v14451_v29 = vpop.f32.mrb[216].mxu1 }
0x14cb   : > { %v11673_v57 = vpop.f32.mrb[217].mxu1 }
0x14cc   : > { %v7268_v5 = vpop.f32.mrb[218].mxu1 }
0x14cd   : > { %v11674_v27 = vpop.f32.mrb[219].mxu1 }
0x14ce   : > { %v14453_v7 = vpop.f32.mrb[204].mxu0 }
0x14cf   : > { %v11679_v30 = vpop.f32.mrb[205].mxu0 }
0x14d0   : > { %v7317_v36 = vpop.f32.mrb[206].mxu0 }
0x14d1   : > { %v11680_v24 = vpop.f32.mrb[207].mxu0 }
0x14ff   : > { %v14455_v43 = vpop.f32.mrb[220].mxu1 }
0x1500   : > { %v11685_v33 = vpop.f32.mrb[221].mxu1 }
0x1501   : > { %v7366_v61 = vpop.f32.mrb[222].mxu1 }
0x1502   : > { %v11686_v28 = vpop.f32.mrb[223].mxu1 }
0x1503   : > { %v14457_v37 = vpop.f32.mrb[208].mxu0 }
0x1504   : > { %v11691_v23 = vpop.f32.mrb[209].mxu0 }
0x1505   : > { %v7415_v22 = vpop.f32.mrb[210].mxu0 }
0x1506   : > { %v11692_v42 = vpop.f32.mrb[211].mxu0 }
0x150b   : > { %v7551_v60 = vpop.f32.mrb[212].mxu0 }
0x150c   : > { %v11703_v20 = vpop.f32.mrb[213].mxu0  ;;  %v7907_v21 = vsel %vm1810_vm3, %v7551_v60, -inf }
0x150d   : > { %7908 = vmax.xlane.f32.xlu0 %v7907_v21  ;;  %v7554_v12 = vpop.f32.mrb[214].mxu0 }
0x150e   : > { %v11704_v0 = vpop.f32.mrb[215].mxu0 }
0x1513   : > { %v7651_v56 = vpop.f32.mrb[216].mxu0 }
0x1514   : > { %v11715_v31 = vpop.f32.mrb[217].mxu0  ;;  %v7913_v6 = vsel %vm1810_vm3, %v7651_v56, -inf }
0x1515   : > { %7914 = vmax.xlane.f32.xlu0 %v7913_v6  ;;  %v7654_v15 = vpop.f32.mrb[218].mxu0 }
0x1516   : > { %v11716_v57 = vpop.f32.mrb[219].mxu0 }
0x151b   : > { %v14461_v5 = vpop.f32.mrb[220].mxu0 }
0x151c   : > { %v11727_v27 = vpop.f32.mrb[221].mxu0 }
0x151d   : > { %v7754_v30 = vpop.f32.mrb[222].mxu0 }
0x151e   : > { %v11728_v36 = vpop.f32.mrb[223].mxu0 }
0x1523   : > { %v14463_v24 = vpop.f32.mrb[224].mxu0 }
0x1524   : > { %v11739_v33 = vpop.f32.mrb[225].mxu0 }
0x1525   : > { %v7854_v61 = vpop.f32.mrb[226].mxu0  ;;  %v7919_v33 = vsel %vm1810_vm3, %v14461_v5, -inf }
0x1526   : > { %v11740_v28 = vpop.f32.mrb[227].mxu0 }
0x1534   : > { %v14465_v23 = vpop.f32.mrb[224].mxu1 }
0x1535   : > { %v11697_v22 = vpop.f32.mrb[225].mxu1 }
0x1536   : > { %v7464_v42 = vpop.f32.mrb[226].mxu1  ;;  %v7925_v22 = vsel %vm1810_vm3, %v14463_v24, -inf }
0x1537   : > { %v11698_v20 = vpop.f32.mrb[227].mxu1 }
0x153c   : > { %v7601_v21 = vpop.f32.mrb[228].mxu1 }
0x153d   : > { %v11709_v12 = vpop.f32.mrb[229].mxu1  ;;  %v7910_v0 = vsel %vm1810_vm3, %v7601_v21, -inf }
0x153e   : > { %7911 = vmax.xlane.f32.xlu1 %v7910_v0  ;;  %v7604_v31 = vpop.f32.mrb[230].mxu1 }
0x153f   : > { %v11710_v6 = vpop.f32.mrb[231].mxu1 }
0x1544   : > { %v7701_v15 = vpop.f32.mrb[232].mxu1 }
0x1545   : > { %v11721_v57 = vpop.f32.mrb[233].mxu1  ;;  %v7916_v27 = vsel %vm1810_vm3, %v7701_v15, -inf }
0x1546   : > { %7917 = vmax.xlane.f32.xlu0 %v7916_v27  ;;  %v7704_v30 = vpop.f32.mrb[234].mxu1 }
0x1547   : > { %v11722_v36 = vpop.f32.mrb[235].mxu1 }
0x154a   : > { %7920 = vmax.xlane.f32.xlu0 %v7919_v33 }
0x154c   : > { %v7801_v61 = vpop.f32.mrb[236].mxu1 }
0x154d   : > { %v11733_v28 = vpop.f32.mrb[237].mxu1  ;;  %v7922_v42 = vsel %vm1810_vm3, %v7801_v61, -inf }
0x154e   : > { %7926 = vmax.xlane.f32.xlu0 %v7925_v22  ;;  %7923 = vmax.xlane.f32.xlu1 %v7922_v42  ;;  %v7804_v20 = vpop.f32.mrb[238].mxu1 }
0x154f   : > { %v11734_v12 = vpop.f32.mrb[239].mxu1 }
0x1554   : > { %v14474_v0 = vpop.f32.mrb[240].mxu1 }
0x1555   : > { %v11745_v31 = vpop.f32.mrb[241].mxu1  ;;  %v7928_v27 = vsel %vm1810_vm3, %v14474_v0, -inf }
0x1556   : > { %v7904_v6 = vpop.f32.mrb[242].mxu1 }
0x1557   : > { %v11746_v57 = vpop.f32.mrb[243].mxu1 }
0x1558   : > { %v8100_v57 = vpop.permute.xlu1 %8099 }
0x155f   : > { %8243 = vrot.lane.b32.xlu1 %v14161_v11, %s12427_s30 }
0x1564   : > { %8195 = vrot.lane.b32.xlu0 %v14141_v3, %s12427_s30 }
0x1583   : > { %7929 = vmax.xlane.f32.xlu1 %v7928_v27  ;;  %v14487_v27 = vpop.permute.xlu1 %8147 }
0x159a   : > { %v7909_v30 = vpop.xlane.xlu0 %7908 }
0x159b   : > { %v7931_v36 = vsub.f32 %v7551_v60, %v7909_v30 }
0x159d   : > { %v7939_v33 = vmul.f32 1.442695, %v7931_v36 }
0x159f   : > { %12295 = vpow2.f32 %v7939_v33 }
0x15a2   : > { %v7915_v28 = vpop.xlane.xlu0 %7914 }
0x15a3   : > { %v7933_v22 = vsub.f32 %v7651_v56, %v7915_v28 }
0x15a5   : > { %v7943_v42 = vmul.f32 1.442695, %v7933_v22 }
0x15a7   : > { %12297 = vpow2.f32 %v7943_v42 }
0x15a9   : > { %v12296_v20 = vpop.eup %12295 }
0x15aa   : > { %v7955_v12 = vsel %vm1810_vm3, %v12296_v20, 0.0 }
0x15ab   : > { %7956 = vadd.xlane.f32.xlu0 %v7955_v12 }
0x15b1   : > { %v14483_v31 = vpop.eup %12297 }
0x15b2   : > { %v7961_v6 = vsel %vm1810_vm3, %v14483_v31, 0.0 }
0x15b3   : > { %7962 = vadd.xlane.f32.xlu0 %v7961_v6 }
0x15cb   : > { %v7912_v60 = vpop.xlane.xlu1 %7911 }
0x15cc   : > { %v7932_v30 = vsub.f32 %v7601_v21, %v7912_v60 }
0x15ce   : > { %v7941_v36 = vmul.f32 1.442695, %v7932_v30 }
0x15d0   : > { %12299 = vpow2.f32 %v7941_v36 }
0x15d3   : > { %v7918_v56 = vpop.xlane.xlu0 %7917 }
0x15d4   : > { %v7934_v33 = vsub.f32 %v7701_v15, %v7918_v56 }
0x15d6   : > { %v7945_v28 = vmul.f32 1.442695, %v7934_v33 }
0x15d7   : > { %v7921_v22 = vpop.xlane.xlu0 %7920 }
0x15d8   : > { %12301 = vpow2.f32 %v7945_v28  ;;  %v7935_v42 = vsub.f32 %v14461_v5, %v7921_v22 }
0x15da   : > { %v14490_v12 = vpop.eup %12299  ;;  %v7947_v10 = vmul.f32 1.442695, %v7935_v42 }
0x15db   : > { %v7958_v6 = vsel %vm1810_vm3, %v14490_v12, 0.0  ;;  %v7927_v30 = vpop.xlane.xlu0 %7926 }
0x15dc   : > { %12303 = vpow2.f32 %v7947_v10  ;;  %7959 = vadd.xlane.f32.xlu1 %v7958_v6  ;;  %v7924_v10 = vpop.xlane.xlu1 %7923  ;;  %v7937_v36 = vsub.f32 %v14463_v24, %v7927_v30 }
0x15dd   : > { %v7936_v5 = vsub.f32 %v7801_v61, %v7924_v10 }
0x15de   : > { %v7951_v33 = vmul.f32 1.442695, %v7937_v36 }
0x15df   : > { %v7949_v56 = vmul.f32 1.442695, %v7936_v5  ;;  %v8196_v61 = vpop.permute.xlu0 %8195 }
0x15e0   : > { %v8244_v24 = vpop.permute.xlu1 %8243 }
0x15e1   : > { %12305 = vpow2.f32 %v7949_v56 }
0x15e2   : > { %v14494_v45 = vpop.eup %12301  ;;  %12307 = vpow2.f32 %v7951_v33  ;;  %v8249_v33 = vsel %vm1910_vm2, %v8244_v24, 0 }
0x15e3   : > { %v7964_v21 = vsel %vm1810_vm3, %v14494_v45, 0.0 }
0x15e4   : > { %7965 = vadd.xlane.f32.xlu1 %v7964_v21 }
0x15e6   : > { %v14498_v15 = vpop.eup %12303 }
0x15e7   : > { %v7967_v60 = vsel %vm1810_vm3, %v14498_v15, 0.0 }
0x15e8   : > { %7968 = vadd.xlane.f32.xlu0 %v7967_v60 }
0x15eb   : > { %v14507_v28 = vpop.eup %12305 }
0x15ec   : > { %v7970_v22 = vsel %vm1810_vm3, %v14507_v28, 0.0  ;;  %v14511_v42 = vpop.eup %12307 }
0x15ed   : > { %v7973_v6 = vsel %vm1810_vm3, %v14511_v42, 0.0 }
0x15f5   : > { %8339 = vrot.lane.b32.xlu1 %v14180_v47, %s12427_s30 }
0x15fe   : > { %8291 = vrot.lane.b32.xlu0 %v14177_v16, %s12427_s30 }
0x1610   : > { %v7930_v21 = vpop.xlane.xlu1 %7929 }
0x1611   : > { %v7938_v60 = vsub.f32 %v14474_v0, %v7930_v21  ;;  %v8105_v0 = vsel %vm1910_vm2, %v8100_v57, 0  ;;  %v8201_v57 = vsel %vm1910_vm2, %v8196_v61, 0 }
0x1613   : > { %v7953_v5 = vmul.f32 1.442695, %v7938_v60 }
0x1619   : > { %7971 = vadd.xlane.f32.xlu1 %v7970_v22 }
0x161d   : > { %7974 = vadd.xlane.f32.xlu0 %v7973_v6 }
0x162a   : > { %8479 = vrot.lane.b32.xlu1 %v13947_v59, %s12428_s14 }
0x1633   : > { %8429 = vrot.lane.b32.xlu0 %v13895_v41, %s12428_s14 }
0x1637   : > { %8427 = vrot.lane.b32.xlu0 %v13954_v35, %s12428_s14 }
0x1638   : > { %v7957_v10 = vpop.xlane.xlu0 %7956 }
0x1639   : > { %12309 = vrcp.f32 %v7957_v10 }
0x163a   : > { %12311 = vpow2.f32 %v7953_v5 }
0x163b   : > { %8529 = vrot.lane.b32.xlu0 %v13923_v18, %s12428_s14  ;;  %v15141_v18 = vmov 0.0  }
0x163f   : > { %8527 = vrot.lane.b32.xlu0 %v13949_v13, %s12428_s14 }
0x1640   : > { %v7963_v59 = vpop.xlane.xlu0 %7962 }
0x1641   : > { %12313 = vrcp.f32 %v7963_v59 }
0x1643   : > { %v12310_v41 = vpop.eup %12309  ;;  %8629 = vrot.lane.b32.xlu0 %v13945_v58, %s12428_s14 }
0x1644   : > { %v7987_v30 = vmul.f32 %v12310_v41, %v12296_v20  ;;  %v14534_v13 = vpop.eup %12311 }
0x1646   : > { %v7995_v35 = vpack.c.bf16 %v7987_v30, %v7987_v30 }
0x1647   : > { %8627 = vrot.lane.b32.xlu0 %v14001_v44, %s12428_s14  ;;  %v7976_v44 = vsel %vm1810_vm3, %v14534_v13, 0.0 }
0x1648   : > { %11750 = vmatmul.mubr.msk.bf16.vlgmr.msra.gmra.mrb[228].mxu0 %vm1810_vm3, %v7995_v35 }
0x1649   : > { %11760 = vmatpush3.bf16.msra.mxu0 %v8105_v0  ;;  %11761 = vmatprep.mubr.msk.bf16.mxu0 %vm12425_vm0, %v15141_v18 }
0x164a   : > { %11771 = vmatprep.subr.bf16.mxu0 %v15141_v18 }
0x164b   : > { %v12314_v36 = vpop.eup %12313  ;;  %8729 = vrot.lane.b32.xlu0 %v13997_v53, %s12428_s14 }
0x164c   : > { %v7989_v58 = vmul.f32 %v12314_v36, %v14483_v31 }
0x164e   : > { %7977 = vadd.xlane.f32.xlu1 %v7976_v44  ;;  %v7997_v20 = vpack.c.bf16 %v7989_v58, %v7989_v58 }
0x164f   : > { %8727 = vrot.lane.b32.xlu0 %v14027_v38, %s12428_s14 }
0x1650   : > { %11762 = vmatmul.mubr.msk.bf16.vlgmr.msra.gmra.mrb[232].mxu0 %vm1810_vm3, %v7997_v20 }
0x1651   : > { %11772 = vmatpush3.bf16.msra.mxu0 %v8201_v57  ;;  %11773 = vmatprep.mubr.msk.bf16.mxu0 %vm12425_vm0, %v15141_v18 }
0x1652   : > { %11783 = vmatprep.subr.bf16.mxu0 %v15141_v18 }
0x165f   : > { %8477 = vrot.lane.b32.xlu1 %v13971_v52, %s12428_s14 }
0x1663   : > { %8579 = vrot.lane.b32.xlu1 %v13964_v34, %s12428_s14 }
0x1667   : > { %8577 = vrot.lane.b32.xlu1 %v13982_v55, %s12428_s14 }
0x1669   : > { %v7960_v53 = vpop.xlane.xlu1 %7959 }
0x166a   : > { %12315 = vrcp.f32 %v7960_v53 }
0x166b   : > { %8679 = vrot.lane.b32.xlu1 %v13979_v25, %s12428_s14  ;;  %v8153_v25 = vsel %vm1910_vm2, %v14487_v27, 0 }
0x166f   : > { %8677 = vrot.lane.b32.xlu1 %v14005_v54, %s12428_s14 }
0x1671   : > { %v7966_v38 = vpop.xlane.xlu1 %7965 }
0x1672   : > { %12317 = vrcp.f32 %v7966_v38 }
0x1673   : > { %8779 = vrot.lane.b32.xlu1 %v13999_v50, %s12428_s14 }
0x1674   : > { %v12316_v52 = vpop.eup %12315 }
0x1675   : > { %v7969_v31 = vpop.xlane.xlu0 %7968  ;;  %v7988_v34 = vmul.f32 %v12316_v52, %v14490_v12 }
0x1676   : > { %12319 = vrcp.f32 %v7969_v31 }
0x1677   : > { %8777 = vrot.lane.b32.xlu1 %v14029_v40, %s12428_s14  ;;  %v7996_v55 = vpack.c.bf16 %v7988_v34, %v7988_v34 }
0x1679   : > { %11756 = vmatmul.mubr.msk.bf16.vlgmr.msra.gmra.mrb[244].mxu1 %vm1810_vm3, %v7996_v55  ;;  %v8292_v27 = vpop.permute.xlu0 %8291 }
0x167a   : > { %11766 = vmatpush3.bf16.msra.mxu1 %v8153_v25  ;;  %11767 = vmatprep.mubr.msk.bf16.mxu1 %vm12425_vm0, %v15141_v18  ;;  %v8297_v6 = vsel %vm1910_vm2, %v8292_v27, 0 }
0x167b   : > { %11777 = vmatprep.subr.bf16.mxu1 %v15141_v18 }
0x167c   : > { %v12318_v50 = vpop.eup %12317 }
0x167d   : > { %v7990_v54 = vmul.f32 %v12318_v50, %v14494_v45  ;;  %v8340_v45 = vpop.permute.xlu1 %8339 }
0x167e   : > { %v8345_v41 = vsel %vm1910_vm2, %v8340_v45, 0 }
0x167f   : > { %v7998_v12 = vpack.c.bf16 %v7990_v54, %v7990_v54 }
0x1680   : > { %v12320_v56 = vpop.eup %12319 }
0x1681   : > { %11768 = vmatmul.mubr.msk.bf16.vlgmr.msra.gmra.mrb[248].mxu1 %vm1810_vm3, %v7998_v12  ;;  %v7991_v40 = vmul.f32 %v12320_v56, %v14498_v15 }
0x1682   : > { %11778 = vmatpush3.bf16.msra.mxu1 %v8249_v33  ;;  %11779 = vmatprep.mubr.msk.bf16.mxu1 %vm12425_vm0, %v15141_v18 }
0x1683   : > { %v7999_v22 = vpack.c.bf16 %v7991_v40, %v7991_v40  ;;  %11789 = vmatprep.subr.bf16.mxu1 %v15141_v18 }
0x1685   : > { %11774 = vmatmul.mubr.msk.bf16.vlgmr.msra.gmra.mrb[236].mxu0 %vm1810_vm3, %v7999_v22 }
0x1686   : > { %11784 = vmatpush3.bf16.msra.mxu0 %v8297_v6  ;;  %11785 = vmatprep.mubr.msk.bf16.mxu0 %vm12425_vm0, %v15141_v18 }
0x1687   : > { %11795 = vmatprep.subr.bf16.mxu0 %v15141_v18 }
0x16a6   : > { %v7972_v15 = vpop.xlane.xlu1 %7971 }
0x16a7   : > { %12321 = vrcp.f32 %v7972_v15 }
0x16aa   : > { %v7975_v24 = vpop.xlane.xlu0 %7974  ;;  %v8480_v38 = vpop.permute.xlu1 %8479 }
0x16ab   : > { %12323 = vrcp.f32 %v7975_v24  ;;  %v8485_v12 = vsel %vm1441_vm1, %v8480_v38, 0 }
0x16ae   : > { %v8430_v61 = vpop.permute.xlu0 %8429 }
0x16af   : > { %v8435_v36 = vsel %vm1441_vm1, %v8430_v61, 0 }
0x16b1   : > { %v12322_v21 = vpop.eup %12321 }
0x16b2   : > { %v7992_v60 = vmul.f32 %v12322_v21, %v14507_v28  ;;  %v8428_v10 = vpop.permute.xlu0 %8427 }
0x16b4   : > { %v8000_v5 = vpack.c.bf16 %v7992_v60, %v7992_v60 }
0x16b5   : > { %v12324_v59 = vpop.eup %12323 }
0x16b6   : > { %11780 = vmatmul.mubr.msk.bf16.vlgmr.msra.gmra.mrb[252].mxu1 %vm1810_vm3, %v8000_v5  ;;  %v7993_v30 = vmul.f32 %v12324_v59, %v14511_v42  ;;  %v8530_v35 = vpop.permute.xlu0 %8529 }
0x16b7   : > { %11790 = vmatpush3.bf16.msra.mxu1 %v8345_v41  ;;  %11791 = vmatprep.mubr.msk.bf16.mxu1 %vm12425_vm0, %v15141_v18  ;;  %v8535_v42 = vsel %vm1441_vm1, %v8530_v35, 0 }
0x16b8   : > { %v8001_v0 = vpack.c.bf16 %v7993_v30, %v7993_v30  ;;  %11801 = vmatprep.subr.bf16.mxu1 %v15141_v18 }
0x16ba   : > { %11786 = vmatmul.mubr.msk.bf16.vlgmr.msra.gmra.mrb[240].mxu0 %vm1810_vm3, %v8001_v0  ;;  %v8528_v28 = vpop.permute.xlu0 %8527 }
0x16bb   : > { %11796 = vmatpush3.bf16.xpose.msra.mxu0 %v8435_v36  ;;  %11797 = vmatprep.mubr.msk.bf16.mxu0 %vm12425_vm0, %v15141_v18 }
0x16bc   : > { %11807 = vmatprep.subr.bf16.mxu0 %v15141_v18 }
0x16be   : > { %v8630_v58 = vpop.permute.xlu0 %8629 }
0x16bf   : > { %v8635_v20 = vsel %vm1441_vm1, %v8630_v58, 0 }
0x16c2   : > { %11798 = vmatmul.mubr.msk.bf16.vlgmr.msra.gmra.mrb[244].mxu0 %vm1441_vm1, %v8428_v10  ;;  %v8628_v44 = vpop.permute.xlu0 %8627 }
0x16c3   : > { %11808 = vmatpush3.bf16.xpose.msra.mxu0 %v8535_v42  ;;  %11809 = vmatprep.mubr.msk.bf16.mxu0 %vm12425_vm0, %v15141_v18 }
0x16c4   : > { %11819 = vmatprep.subr.bf16.mxu0 %v15141_v18 }
0x16c6   : > { %v8730_v57 = vpop.permute.xlu0 %8729 }
0x16c7   : > { %v8735_v53 = vsel %vm1441_vm1, %v8730_v57, 0 }
0x16ca   : > { %11810 = vmatmul.mubr.msk.bf16.vlgmr.msra.gmra.mrb[248].mxu0 %vm1441_vm1, %v8528_v28  ;;  %v8728_v52 = vpop.permute.xlu0 %8727 }
0x16cb   : > { %11820 = vmatpush3.bf16.xpose.msra.mxu0 %v8635_v20  ;;  %11821 = vmatprep.mubr.msk.bf16.mxu0 %vm12425_vm0, %v15141_v18 }
0x16cc   : > { %11831 = vmatprep.subr.bf16.mxu0 %v15141_v18 }
0x16d2   : > { %11822 = vmatmul.mubr.msk.bf16.vlgmr.msra.gmra.mrb[252].mxu0 %vm1441_vm1, %v8628_v44 }
0x16d3   : > { %11832 = vmatpush3.bf16.xpose.msra.mxu0 %v8735_v53  ;;  %11833 = vmatprep.mubr.msk.bf16.mxu0 %vm12425_vm0, %v15141_v18 }
0x16d4   : > { %11843 = vmatprep.subr.bf16.mxu0 %v15141_v18 }
0x16da   : > { %11834 = vmatmul.mubr.msk.bf16.vlgmr.msra.gmra.mrb[0].mxu0 %vm1441_vm1, %v8728_v52 }
0x16db   : > { %v7978_v31 = vpop.xlane.xlu1 %7977  ;;  %11845 = vmatprep.mubr.msk.bf16.mxu0 %vm12425_vm0, %v15141_v18 }
0x16dc   : > { %12325 = vrcp.f32 %v7978_v31 }
0x16df   : > { %v8478_v34 = vpop.permute.xlu1 %8477 }
0x16e3   : > { %v8580_v50 = vpop.permute.xlu1 %8579 }
0x16e4   : > { %v8585_v33 = vsel %vm1441_vm1, %v8580_v50, 0 }
0x16e6   : > { %v12326_v55 = vpop.eup %12325 }
0x16e7   : > { %v7994_v25 = vmul.f32 %v12326_v55, %v14534_v13  ;;  %v8578_v56 = vpop.permute.xlu1 %8577 }
0x16e9   : > { %v8002_v54 = vpack.c.bf16 %v7994_v25, %v7994_v25 }
0x16eb   : > { %11792 = vmatmul.mubr.msk.bf16.vlgmr.msra.gmra.mrb[0].mxu1 %vm1810_vm3, %v8002_v54  ;;  %v8680_v40 = vpop.permute.xlu1 %8679 }
0x16ec   : > { %11802 = vmatpush3.bf16.xpose.msra.mxu1 %v8485_v12  ;;  %11803 = vmatprep.mubr.msk.bf16.mxu1 %vm12425_vm0, %v15141_v18  ;;  %v8685_v27 = vsel %vm1441_vm1, %v8680_v40, 0 }
0x16ed   : > { %11813 = vmatprep.subr.bf16.mxu1 %v15141_v18 }
0x16ef   : > { %v8678_v13 = vpop.permute.xlu1 %8677 }
0x16f3   : > { %11804 = vmatmul.mubr.msk.bf16.vlgmr.msra.gmra.mrb[4].mxu1 %vm1441_vm1, %v8478_v34  ;;  %v8780_v22 = vpop.permute.xlu1 %8779 }
0x16f4   : > { %11814 = vmatpush3.bf16.xpose.msra.mxu1 %v8585_v33  ;;  %11815 = vmatprep.mubr.msk.bf16.mxu1 %vm12425_vm0, %v15141_v18  ;;  %v8785_v6 = vsel %vm1441_vm1, %v8780_v22, 0 }
0x16f5   : > { %11825 = vmatprep.subr.bf16.mxu1 %v15141_v18 }
0x16f7   : > { %v8778_v45 = vpop.permute.xlu1 %8777 }
0x16fb   : > { %11816 = vmatmul.mubr.msk.bf16.vlgmr.msra.gmra.mrb[8].mxu1 %vm1441_vm1, %v8578_v56 }
0x16fc   : > { %11826 = vmatpush3.bf16.xpose.msra.mxu1 %v8685_v27  ;;  %11827 = vmatprep.mubr.msk.bf16.mxu1 %vm12425_vm0, %v15141_v18 }
0x16fd   : > { %11837 = vmatprep.subr.bf16.mxu1 %v15141_v18 }
0x1703   : > { %11828 = vmatmul.mubr.msk.bf16.vlgmr.msra.gmra.mrb[12].mxu1 %vm1441_vm1, %v8678_v13 }
0x1704   : > { %11838 = vmatpush3.bf16.xpose.msra.mxu1 %v8785_v6  ;;  %11839 = vmatprep.mubr.msk.bf16.mxu1 %vm12425_vm0, %v15141_v18 }
0x1705   : > { %11849 = vmatprep.subr.bf16.mxu1 %v15141_v18 }
0x170b   : > { %11840 = vmatmul.mubr.msk.bf16.vlgmr.msra.gmra.mrb[16].mxu1 %vm1441_vm1, %v8778_v45 }
0x170c   : > { %11851 = vmatprep.mubr.msk.bf16.mxu1 %vm12425_vm0, %v15141_v18 }
0x171b   : > { %v14636_v15 = vpop.f32.mrb[228].mxu0 }
0x171c   : > { %v11751_v24 = vpop.f32.mrb[229].mxu0 }
0x171d   : > { %v8048_v61 = vpop.f32.mrb[230].mxu0 }
0x171e   : > { %v11752_v21 = vpop.f32.mrb[231].mxu0 }
0x1723   : > { %v14638_v60 = vpop.f32.mrb[232].mxu0 }
0x1724   : > { %v11763_v10 = vpop.f32.mrb[233].mxu0 }
0x1725   : > { %v8144_v5 = vpop.f32.mrb[234].mxu0 }
0x1726   : > { %v11764_v59 = vpop.f32.mrb[235].mxu0 }
0x174c   : > { %v14640_v41 = vpop.f32.mrb[244].mxu1 }
0x174d   : > { %v11757_v30 = vpop.f32.mrb[245].mxu1 }
0x174e   : > { %v8096_v35 = vpop.f32.mrb[246].mxu1 }
0x174f   : > { %v11758_v0 = vpop.f32.mrb[247].mxu1 }
0x1754   : > { %v14642_v36 = vpop.f32.mrb[248].mxu1 }
0x1755   : > { %v11769_v28 = vpop.f32.mrb[249].mxu1 }
0x1756   : > { %v8192_v42 = vpop.f32.mrb[250].mxu1 }
0x1757   : > { %v11770_v58 = vpop.f32.mrb[251].mxu1 }
0x1758   : > { %v14644_v44 = vpop.f32.mrb[236].mxu0 }
0x1759   : > { %v11775_v20 = vpop.f32.mrb[237].mxu0 }
0x175a   : > { %v8240_v57 = vpop.f32.mrb[238].mxu0 }
0x175b   : > { %v11776_v53 = vpop.f32.mrb[239].mxu0 }
0x1789   : > { %v14646_v38 = vpop.f32.mrb[252].mxu1 }
0x178a   : > { %v11781_v52 = vpop.f32.mrb[253].mxu1 }
0x178b   : > { %v8288_v31 = vpop.f32.mrb[254].mxu1 }
0x178c   : > { %v11782_v34 = vpop.f32.mrb[255].mxu1 }
0x178d   : > { %v14648_v55 = vpop.f32.mrb[240].mxu0 }
0x178e   : > { %v11787_v25 = vpop.f32.mrb[241].mxu0 }
0x178f   : > { %v8336_v50 = vpop.f32.mrb[242].mxu0 }
0x1790   : > { %v11788_v54 = vpop.f32.mrb[243].mxu0 }
0x1795   : > { %v8471_v12 = vpop.f32.mrb[244].mxu0 }
0x1796   : > { %v11799_v56 = vpop.f32.mrb[245].mxu0  ;;  %v8827_v33 = vsel %vm1810_vm3, %v8471_v12, -inf }
0x1797   : > { %8828 = vmax.xlane.f32.xlu0 %v8827_v33  ;;  %v8474_v40 = vpop.f32.mrb[246].mxu0 }
0x1798   : > { %v11800_v13 = vpop.f32.mrb[247].mxu0 }
0x179d   : > { %v8571_v27 = vpop.f32.mrb[248].mxu0 }
0x179e   : > { %v11811_v22 = vpop.f32.mrb[249].mxu0  ;;  %v8833_v6 = vsel %vm1810_vm3, %v8571_v27, -inf }
0x179f   : > { %8834 = vmax.xlane.f32.xlu0 %v8833_v6  ;;  %v8574_v45 = vpop.f32.mrb[250].mxu0 }
0x17a0   : > { %v11812_v24 = vpop.f32.mrb[251].mxu0 }
0x17a5   : > { %v14652_v61 = vpop.f32.mrb[252].mxu0 }
0x17a6   : > { %v11823_v21 = vpop.f32.mrb[253].mxu0  ;;  %v8839_v40 = vsel %vm1810_vm3, %v14652_v61, -inf }
0x17a7   : > { %v8674_v10 = vpop.f32.mrb[254].mxu0 }
0x17a8   : > { %v11824_v5 = vpop.f32.mrb[255].mxu0 }
0x17ad   : > { %v14654_v59 = vpop.f32.mrb[0].mxu0 }
0x17ae   : > { %v11835_v30 = vpop.f32.mrb[1].mxu0  ;;  %v8845_v6 = vsel %vm1810_vm3, %v14654_v59, -inf }
0x17af   : > { %v8774_v35 = vpop.f32.mrb[2].mxu0 }
0x17b0   : > { %v11836_v0 = vpop.f32.mrb[3].mxu0 }
0x17be   : > { %v14656_v28 = vpop.f32.mrb[0].mxu1 }
0x17bf   : > { %v11793_v42 = vpop.f32.mrb[1].mxu1 }
0x17c0   : > { %v8384_v58 = vpop.f32.mrb[2].mxu1 }
0x17c1   : > { %v11794_v20 = vpop.f32.mrb[3].mxu1 }
0x17c6   : > { %v8521_v57 = vpop.f32.mrb[4].mxu1 }
0x17c7   : > { %v11805_v53 = vpop.f32.mrb[5].mxu1  ;;  %v8830_v52 = vsel %vm1810_vm3, %v8521_v57, -inf }
0x17c8   : > { %8831 = vmax.xlane.f32.xlu1 %v8830_v52  ;;  %v8524_v31 = vpop.f32.mrb[6].mxu1 }
0x17c9   : > { %v11806_v34 = vpop.f32.mrb[7].mxu1 }
0x17ce   : > { %v14659_v25 = vpop.f32.mrb[8].mxu1 }
0x17cf   : > { %v11817_v50 = vpop.f32.mrb[9].mxu1  ;;  %v8836_v54 = vsel %vm1810_vm3, %v14659_v25, -inf }
0x17d0   : > { %8837 = vmax.xlane.f32.xlu0 %v8836_v54  ;;  %v8624_v56 = vpop.f32.mrb[10].mxu1 }
0x17d1   : > { %v11818_v33 = vpop.f32.mrb[11].mxu1 }
0x17d4   : > { %8840 = vmax.xlane.f32.xlu0 %v8839_v40 }
0x17d6   : > { %v14665_v13 = vpop.f32.mrb[12].mxu1 }
0x17d7   : > { %v11829_v22 = vpop.f32.mrb[13].mxu1  ;;  %v8842_v45 = vsel %vm1810_vm3, %v14665_v13, -inf }
0x17d8   : > { %8846 = vmax.xlane.f32.xlu0 %v8845_v6  ;;  %8843 = vmax.xlane.f32.xlu1 %v8842_v45  ;;  %v8724_v24 = vpop.f32.mrb[14].mxu1 }
0x17d9   : > { %v11830_v21 = vpop.f32.mrb[15].mxu1 }
0x17de   : > { %v14671_v10 = vpop.f32.mrb[16].mxu1 }
0x17df   : > { %v11841_v5 = vpop.f32.mrb[17].mxu1  ;;  %v8848_v0 = vsel %vm1810_vm3, %v14671_v10, -inf }
0x17e0   : > { %v8824_v30 = vpop.f32.mrb[18].mxu1 }
0x17e1   : > { %v11842_v35 = vpop.f32.mrb[19].mxu1 }
0x17e9   : > { %8971 = vrot.lane.b32.xlu1 %v14025_v62, %s12428_s14 }
0x17ed   : > { %9019 = vrot.lane.b32.xlu1 %v14121_v26, %s12428_s14 }
0x17ee   : > { %8923 = vrot.lane.b32.xlu0 %v14022_v39, %s12428_s14 }
0x1811   : > { %8849 = vmax.xlane.f32.xlu1 %v8848_v0 }
0x1822   : > { %9067 = vrot.lane.b32.xlu1 %v14139_v32, %s12428_s14 }
0x1824   : > { %v8829_v42 = vpop.xlane.xlu0 %8828 }
0x1825   : > { %v8851_v58 = vsub.f32 %v8471_v12, %v8829_v42 }
0x1827   : > { %v8859_v20 = vmul.f32 1.442695, %v8851_v58 }
0x1829   : > { %12327 = vpow2.f32 %v8859_v20 }
0x182c   : > { %v8835_v53 = vpop.xlane.xlu0 %8834 }
0x182d   : > { %v8853_v52 = vsub.f32 %v8571_v27, %v8835_v53 }
0x182f   : > { %v8863_v62 = vmul.f32 1.442695, %v8853_v52 }
0x1831   : > { %12329 = vpow2.f32 %v8863_v62 }
0x1833   : > { %v14683_v31 = vpop.eup %12327 }
0x1834   : > { %v8875_v39 = vsel %vm1810_vm3, %v14683_v31, 0.0 }
0x1835   : > { %8876 = vadd.xlane.f32.xlu0 %v8875_v39 }
0x183b   : > { %v14687_v26 = vpop.eup %12329 }
0x183c   : > { %v8881_v34 = vsel %vm1810_vm3, %v14687_v26, 0.0 }
0x183d   : > { %8882 = vadd.xlane.f32.xlu0 %v8881_v34 }
0x1853   : > { %9115 = vrot.lane.b32.xlu0 %v14141_v3, %s12428_s14 }
0x1855   : > { %v8832_v32 = vpop.xlane.xlu1 %8831 }
0x1856   : > { %v8852_v12 = vsub.f32 %v8521_v57, %v8832_v32 }
0x1858   : > { %v8861_v27 = vmul.f32 1.442695, %v8852_v12 }
0x185a   : > { %12331 = vpow2.f32 %v8861_v27 }
0x185d   : > { %v8838_v50 = vpop.xlane.xlu0 %8837 }
0x185e   : > { %v8854_v42 = vsub.f32 %v14659_v25, %v8838_v50 }
0x1860   : > { %v8865_v58 = vmul.f32 1.442695, %v8854_v42 }
0x1861   : > { %v8841_v54 = vpop.xlane.xlu0 %8840 }
0x1862   : > { %v8855_v56 = vsub.f32 %v14652_v61, %v8841_v54 }
0x1864   : > { %v14694_v33 = vpop.eup %12331  ;;  %v8867_v40 = vmul.f32 1.442695, %v8855_v56 }
0x1865   : > { %v8847_v22 = vpop.xlane.xlu0 %8846  ;;  %v8844_v6 = vpop.xlane.xlu1 %8843  ;;  %v8878_v45 = vsel %vm1810_vm3, %v14694_v33, 0.0 }
0x1866   : > { %12333 = vpow2.f32 %v8867_v40  ;;  %v8857_v24 = vsub.f32 %v14654_v59, %v8847_v22  ;;  %8879 = vadd.xlane.f32.xlu1 %v8878_v45  ;;  %v8856_v20 = vsub.f32 %v14665_v13, %v8844_v6 }
0x1868   : > { %v8871_v3 = vmul.f32 1.442695, %v8857_v24  ;;  %v8869_v53 = vmul.f32 1.442695, %v8856_v20 }
0x1869   : > { %v8924_v57 = vpop.permute.xlu0 %8923  ;;  %v8972_v21 = vpop.permute.xlu1 %8971 }
0x186a   : > { %12335 = vpow2.f32 %v8871_v3  ;;  %v8929_v5 = vsel %vm1910_vm2, %v8924_v57, 0  ;;  %v8977_v61 = vsel %vm1910_vm2, %v8972_v21, 0 }
0x186b   : > { %11844 = vmatpush3.bf16.msra.mxu0 %v8929_v5  ;;  %11850 = vmatpush3.bf16.msra.mxu1 %v8977_v61  ;;  %12337 = vpow2.f32 %v8865_v58 }
0x186c   : > { %11855 = vmatprep.subr.bf16.mxu0 %v15141_v18  ;;  %11861 = vmatprep.subr.bf16.mxu1 %v15141_v18  ;;  %12339 = vpow2.f32 %v8869_v53 }
0x1870   : > { %v14703_v30 = vpop.eup %12333 }
0x1871   : > { %v8887_v59 = vsel %vm1810_vm3, %v14703_v30, 0.0 }
0x1872   : > { %8888 = vadd.xlane.f32.xlu0 %v8887_v59 }
0x1874   : > { %v14707_v35 = vpop.eup %12335 }
0x1875   : > { %v8893_v0 = vsel %vm1810_vm3, %v14707_v35, 0.0  ;;  %v14721_v52 = vpop.eup %12337 }
0x1876   : > { %8894 = vadd.xlane.f32.xlu0 %v8893_v0  ;;  %v8884_v25 = vsel %vm1810_vm3, %v14721_v52, 0.0  ;;  %v14727_v13 = vpop.eup %12339 }
0x1877   : > { %9163 = vrot.lane.b32.xlu1 %v14161_v11, %s12428_s14  ;;  %v9020_v11 = vpop.permute.xlu1 %9019 }
0x188c   : > { %9211 = vrot.lane.b32.xlu0 %v14177_v16, %s12428_s14 }
0x1890   : > { %7475 = vrot.lane.b32.xlu0 %v14445_v4, %s12428_s14  ;;  %v8890_v4 = vsel %vm1810_vm3, %v14727_v13, 0.0 }
0x1894   : > { %7479 = vrot.lane.b32.xlu0 %v14447_v8, %s12428_s14 }
0x1898   : > { %8395 = vrot.lane.b32.xlu0 %v14636_v15, %s12427_s30 }
0x189b   : > { %8885 = vadd.xlane.f32.xlu1 %v8884_v25 }
0x189c   : > { %8399 = vrot.lane.b32.xlu0 %v14638_v60, %s12427_s30 }
0x189e   : > { %v8850_v16 = vpop.xlane.xlu1 %8849 }
0x189f   : > { %v8858_v8 = vsub.f32 %v14671_v10, %v8850_v16  ;;  %8891 = vadd.xlane.f32.xlu1 %v8890_v4 }
0x18a0   : > { %7483 = vrot.lane.b32.xlu0 %v14453_v7, %s12428_s14 }
0x18a1   : > { %v8873_v15 = vmul.f32 1.442695, %v8858_v8 }
0x18a3   : > { %12341 = vpow2.f32 %v8873_v15 }
0x18a4   : > { %7487 = vrot.lane.b32.xlu0 %v14457_v37, %s12428_s14 }
0x18ad   : > { %v14738_v62 = vpop.eup %12341 }
0x18ae   : > { %v8896_v60 = vsel %vm1810_vm3, %v14738_v62, 0.0 }
0x18af   : > { %8897 = vadd.xlane.f32.xlu1 %v8896_v60 }
0x18c0   : > { %9259 = vrot.lane.b32.xlu1 %v14180_v47, %s12428_s14  ;;  %v9025_v47 = vsel %vm1910_vm2, %v9020_v11, 0 }
0x18c2   : > { %v8877_v39 = vpop.xlane.xlu0 %8876 }
0x18c3   : > { %12343 = vrcp.f32 %v8877_v39 }
0x18c4   : > { %7477 = vrot.lane.b32.xlu1 %v14449_v19, %s12428_s14 }
0x18c8   : > { %7481 = vrot.lane.b32.xlu1 %v14451_v29, %s12428_s14 }
0x18ca   : > { %v8883_v7 = vpop.xlane.xlu0 %8882 }
0x18cb   : > { %12345 = vrcp.f32 %v8883_v7 }
0x18cc   : > { %8397 = vrot.lane.b32.xlu1 %v14640_v41, %s12427_s30 }
0x18cd   : > { %v12344_v37 = vpop.eup %12343 }
0x18ce   : > { %v8907_v10 = vmul.f32 %v12344_v37, %v14683_v31  ;;  %v9116_v41 = vpop.permute.xlu0 %9115 }
0x18d0   : > { %v8915_v34 = vpack.c.bf16 %v8907_v10, %v8907_v10  ;;  %8401 = vrot.lane.b32.xlu1 %v14642_v36, %s12427_s30  ;;  %v9121_v36 = vsel %vm1910_vm2, %v9116_v41, 0 }
0x18d2   : > { %11846 = vmatmul.mubr.msk.bf16.vlgmr.msra.gmra.mrb[4].mxu0 %vm1810_vm3, %v8915_v34  ;;  %v15142_v34 = vmov 0  }
0x18d3   : > { %11856 = vmatpush3.bf16.msra.mxu0 %v9025_v47  ;;  %11857 = vmatprep.mubr.msk.bf16.mxu0 %vm12425_vm0, %v15141_v18 }
0x18d4   : > { %7485 = vrot.lane.b32.xlu1 %v14455_v43, %s12428_s14  ;;  %11867 = vmatprep.subr.bf16.mxu0 %v15141_v18  ;;  %v9068_v43 = vpop.permute.xlu1 %9067 }
0x18d5   : > { %v12346_v19 = vpop.eup %12345 }
0x18d6   : > { %v8909_v29 = vmul.f32 %v12346_v19, %v14687_v26 }
0x18d8   : > { %v8917_v31 = vpack.c.bf16 %v8909_v29, %v8909_v29  ;;  %7489 = vrot.lane.b32.xlu1 %v14465_v23, %s12428_s14  ;;  %v9073_v23 = vsel %vm1910_vm2, %v9068_v43, 0  ;;  %s15144_s14 = sld [smem:[#allocation9_spill]] }
0x18da   : > { %11858 = vmatmul.mubr.msk.bf16.vlgmr.msra.gmra.mrb[8].mxu0 %vm1810_vm3, %v8917_v31 }
0x18db   : > { %11868 = vmatpush3.bf16.msra.mxu0 %v9121_v36  ;;  %11869 = vmatprep.mubr.msk.bf16.mxu0 %vm12425_vm0, %v15141_v18 }
0x18dc   : > { %11879 = vmatprep.subr.bf16.mxu0 %v15141_v18 }
0x18f3   : > { %v8880_v32 = vpop.xlane.xlu1 %8879 }
0x18f4   : > { %12347 = vrcp.f32 %v8880_v32 }
0x18f7   : > { %v9164_v0 = vpop.permute.xlu1 %9163 }
0x18f8   : > { %v9169_v25 = vsel %vm1910_vm2, %v9164_v0, 0 }
0x18fe   : > { %v12348_v12 = vpop.eup %12347 }
0x18ff   : > { %v8908_v26 = vmul.f32 %v12348_v12, %v14694_v33  ;;  %v8889_v27 = vpop.xlane.xlu0 %8888 }
0x1900   : > { %12349 = vrcp.f32 %v8889_v27 }
0x1901   : > { %v8916_v50 = vpack.c.bf16 %v8908_v26, %v8908_v26 }
0x1903   : > { %v8895_v54 = vpop.xlane.xlu0 %8894  ;;  %11852 = vmatmul.mubr.msk.bf16.vlgmr.msra.gmra.mrb[20].mxu1 %vm1810_vm3, %v8916_v50 }
0x1904   : > { %12351 = vrcp.f32 %v8895_v54  ;;  %11862 = vmatpush3.bf16.msra.mxu1 %v9073_v23  ;;  %11863 = vmatprep.mubr.msk.bf16.mxu1 %vm12425_vm0, %v15141_v18  ;;  %v12039_v54 = vld [vmem:[%s12614_s6] sm:$0xff]  }
0x1905   : > { %11873 = vmatprep.subr.bf16.mxu1 %v15141_v18 }
0x1907   : > { %v9212_v56 = vpop.permute.xlu0 %9211 }
0x1908   : > { %v9217_v24 = vsel %vm1910_vm2, %v9212_v56, 0  ;;  %v12040_v56 = vld [vmem:[%s12614_s6 + $0x8] sm:$0xff]  }
0x190a   : > { %v12350_v40 = vpop.eup %12349 }
0x190b   : > { %v8911_v22 = vmul.f32 %v12350_v40, %v14703_v30  ;;  %v7476_v33 = vpop.permute.xlu0 %7475 }
0x190c   : > { %7499 = vst.msk [vmem:[#allocation2] sm:$0xff] %vm3220_vm4, %v7476_v33 }
0x190d   : > { %v8919_v6 = vpack.c.bf16 %v8911_v22, %v8911_v22  ;;  %v12041_v22 = vld [vmem:[%s12614_s6 + $0x10] sm:$0xff]  }
0x190e   : > { %v12352_v45 = vpop.eup %12351 }
0x190f   : > { %v7480_v3 = vpop.permute.xlu0 %7479  ;;  %11870 = vmatmul.mubr.msk.bf16.vlgmr.msra.gmra.mrb[12].mxu0 %vm1810_vm3, %v8919_v6  ;;  %v8913_v57 = vmul.f32 %v12352_v45, %v14707_v35  ;;  %v12042_v6 = vld [vmem:[%s12614_s6 + $0x18] sm:$0xff]  }
0x1910   : > { %7501 = vst.msk [vmem:[#allocation2 + $0x10] sm:$0xff] %vm3220_vm4, %v7480_v3  ;;  %11880 = vmatpush3.bf16.msra.mxu0 %v9217_v24  ;;  %11881 = vmatprep.mubr.msk.bf16.mxu0 %vm12425_vm0, %v15141_v18  ;;  %v12043_v24 = vld [vmem:[%s12614_s6 + $0x20] sm:$0xff]  }
0x1911   : > { %v8921_v5 = vpack.c.bf16 %v8913_v57, %v8913_v57  ;;  %11891 = vmatprep.subr.bf16.mxu0 %v12039_v54 }
0x1913   : > { %v8396_v21 = vpop.permute.xlu0 %8395 }
0x1914   : > { %8419 = vst.msk [vmem:[#allocation2] sm:$0xff] %vm4141_vm5, %v8396_v21 }
0x1917   : > { %v8400_v61 = vpop.permute.xlu0 %8399  ;;  %11882 = vmatmul.mubr.msk.bf16.vlgmr.msra.gmra.mrb[16].mxu0 %vm1810_vm3, %v8921_v5  ;;  %v12044_v5 = vld [vmem:[%s12614_s6 + $0x28] sm:$0xff]  }
0x1918   : > { %8421 = vst.msk [vmem:[#allocation2 + $0x10] sm:$0xff] %vm4141_vm5, %v8400_v61  ;;  %11892 = vmatpush3.bf16.msra.mxu0 %v12039_v54  ;;  %v12045_v61 = vld [vmem:[%s12614_s6 + $0x30] sm:$0xff]  }
0x1919   : > { %11893 = vmatprep.subr.bf16.mxu0 %v12040_v56 }
0x191b   : > { %v7484_v30 = vpop.permute.xlu0 %7483 }
0x191c   : > { %7503 = vst.msk [vmem:[#allocation2 + $0x20] sm:$0xff] %vm3220_vm4, %v7484_v30  ;;  %11894 = vmatpush3.bf16.msra.mxu0 %v12040_v56  ;;  %v12046_v30 = vld [vmem:[%s12614_s6 + $0x38] sm:$0xff]  }
0x191d   : > { %11895 = vmatprep.subr.bf16.mxu0 %v12041_v22 }
0x191f   : > { %v7488_v59 = vpop.permute.xlu0 %7487 }
0x1920   : > { %7505 = vst.msk [vmem:[#allocation2 + $0x30] sm:$0xff] %vm3220_vm4, %v7488_v59  ;;  %11896 = vmatpush3.bf16.msra.mxu0 %v12041_v22 }
0x1921   : > { %11897 = vmatprep.subr.bf16.mxu0 %v12042_v6 }
0x1924   : > { %11898 = vmatpush3.bf16.msra.mxu0 %v12042_v6 }
0x1925   : > { %11899 = vmatprep.subr.bf16.mxu0 %v12043_v24 }
0x1928   : > { %v8886_v42 = vpop.xlane.xlu1 %8885  ;;  %11900 = vmatpush3.bf16.msra.mxu0 %v12043_v24 }
0x1929   : > { %12353 = vrcp.f32 %v8886_v42  ;;  %11901 = vmatprep.subr.bf16.mxu0 %v12044_v5 }
0x192c   : > { %v8892_v58 = vpop.xlane.xlu1 %8891  ;;  %11902 = vmatpush3.bf16.msra.mxu0 %v12044_v5 }
0x192d   : > { %12355 = vrcp.f32 %v8892_v58  ;;  %11903 = vmatprep.subr.bf16.mxu0 %v12045_v61 }
0x1930   : > { %11904 = vmatpush3.bf16.msra.mxu0 %v12045_v61 }
0x1931   : > { %11905 = vmatprep.subr.bf16.mxu0 %v12046_v30 }
0x1933   : > { %v12354_v35 = vpop.eup %12353 }
0x1934   : > { %v8910_v20 = vmul.f32 %v12354_v35, %v14721_v52  ;;  %11906 = vmatpush3.bf16.msra.mxu0 %v12046_v30 }
0x1936   : > { %v8918_v53 = vpack.c.bf16 %v8910_v20, %v8910_v20 }
0x1937   : > { %v12356_v11 = vpop.eup %12355 }
0x1938   : > { %11864 = vmatmul.mubr.msk.bf16.vlgmr.msra.gmra.mrb[24].mxu1 %vm1810_vm3, %v8918_v53  ;;  %v8912_v16 = vmul.f32 %v12356_v11, %v14727_v13 }
0x1939   : > { %11874 = vmatpush3.bf16.msra.mxu1 %v9169_v25  ;;  %11875 = vmatprep.mubr.msk.bf16.mxu1 %vm12425_vm0, %v15141_v18 }
0x193a   : > { %11885 = vmatprep.subr.bf16.mxu1 %v15141_v18  ;;  %v8920_v8 = vpack.c.bf16 %v8912_v16, %v8912_v16 }
0x193c   : > { %v8898_v4 = vpop.xlane.xlu1 %8897 }
0x193d   : > { %12357 = vrcp.f32 %v8898_v4 }
0x1940   : > { %11876 = vmatmul.mubr.msk.bf16.vlgmr.msra.gmra.mrb[28].mxu1 %vm1810_vm3, %v8920_v8  ;;  %v9260_v52 = vpop.permute.xlu1 %9259 }
0x1941   : > { %v9265_v15 = vsel %vm1910_vm2, %v9260_v52, 0  ;;  %11887 = vmatprep.mubr.msk.bf16.mxu1 %vm12425_vm0, %v15141_v18 }
0x1942   : > { %11886 = vmatpush3.bf16.msra.mxu1 %v9265_v15 }
0x1944   : > { %v7478_v60 = vpop.permute.xlu1 %7477 }
0x1945   : > { %7500 = vst.msk [vmem:[#allocation2 + $0x8] sm:$0xff] %vm3220_vm4, %v7478_v60 }
0x1947   : > { %v12358_v39 = vpop.eup %12357 }
0x1948   : > { %v8914_v13 = vmul.f32 %v12358_v39, %v14738_v62  ;;  %v7482_v7 = vpop.permute.xlu1 %7481 }
0x1949   : > { %7502 = vst.msk [vmem:[#allocation2 + $0x18] sm:$0xff] %vm3220_vm4, %v7482_v7 }
0x194a   : > { %v8922_v37 = vpack.c.bf16 %v8914_v13, %v8914_v13 }
0x194c   : > { %11888 = vmatmul.mubr.msk.bf16.vlgmr.msra.gmra.mrb[32].mxu1 %vm1810_vm3, %v8922_v37  ;;  %v8398_v10 = vpop.permute.xlu1 %8397 }
0x194d   : > { %8420 = vst.msk [vmem:[#allocation2 + $0x8] sm:$0xff] %vm4141_vm5, %v8398_v10  ;;  %9748 = vmatprep.mubr.bf16.mxu1 %v15142_v34 }
0x1950   : > { %v8402_v47 = vpop.permute.xlu1 %8401 }
0x1951   : > { %8422 = vst.msk [vmem:[#allocation2 + $0x18] sm:$0xff] %vm4141_vm5, %v8402_v47 }
0x1954   : > { %v7486_v18 = vpop.permute.xlu1 %7485 }
0x1955   : > { %7504 = vst.msk [vmem:[#allocation2 + $0x28] sm:$0xff] %vm3220_vm4, %v7486_v18 }
0x1958   : > { %v7490_v19 = vpop.permute.xlu1 %7489 }
0x1959   : > { %7506 = vst.msk [vmem:[#allocation2 + $0x38] sm:$0xff] %vm3220_vm4, %v7490_v19 }
0x19a5   : > { %v8965_v62 = vpop.f32.mrb[4].mxu0 }
0x19a6   : > { %9315 = vrot.lane.b32.xlu0 %v8965_v62, %s12426_s18  ;;  %v11847_v29 = vpop.f32.mrb[5].mxu0 }
0x19a7   : > { %v8968_v41 = vpop.f32.mrb[6].mxu0 }
0x19a8   : > { %v11848_v31 = vpop.f32.mrb[7].mxu0 }
0x19ad   : > { %v9061_v36 = vpop.f32.mrb[8].mxu0 }
0x19ae   : > { %9319 = vrot.lane.b32.xlu0 %v9061_v36, %s12426_s18  ;;  %v11859_v43 = vpop.f32.mrb[9].mxu0 }
0x19af   : > { %v9064_v32 = vpop.f32.mrb[10].mxu0 }
0x19b0   : > { %v11860_v12 = vpop.f32.mrb[11].mxu0 }
0x19b2   : > { %8403 = vrot.lane.b32.xlu0 %v14644_v44, %s12427_s30 }
0x19b6   : > { %8407 = vrot.lane.b32.xlu0 %v14648_v55, %s12427_s30 }
0x19d6   : > { %v9013_v26 = vpop.f32.mrb[20].mxu1 }
0x19d7   : > { %9317 = vrot.lane.b32.xlu1 %v9013_v26, %s12426_s18  ;;  %v11853_v27 = vpop.f32.mrb[21].mxu1 }
0x19d8   : > { %v9016_v50 = vpop.f32.mrb[22].mxu1 }
0x19d9   : > { %v11854_v23 = vpop.f32.mrb[23].mxu1 }
0x19e2   : > { %v9157_v40 = vpop.f32.mrb[12].mxu0 }
0x19e3   : > { %9323 = vrot.lane.b32.xlu0 %v9157_v40, %s12426_s18  ;;  %v11871_v44 = vpop.f32.mrb[13].mxu0 }
0x19e4   : > { %v9160_v55 = vpop.f32.mrb[14].mxu0 }
0x19e5   : > { %v11872_v33 = vpop.f32.mrb[15].mxu0 }
0x19ea   : > { %v9253_v45 = vpop.f32.mrb[16].mxu0 }
0x19eb   : > { %9327 = vrot.lane.b32.xlu0 %v9253_v45, %s12426_s18  ;;  %v11883_v3 = vpop.f32.mrb[17].mxu0 }
0x19ec   : > { %v9256_v57 = vpop.f32.mrb[18].mxu0 }
0x19ed   : > { %v11884_v21 = vpop.f32.mrb[19].mxu0 }
0x1a0b   : > { %v9109_v59 = vpop.f32.mrb[24].mxu1 }
0x1a0c   : > { %9321 = vrot.lane.b32.xlu1 %v9109_v59, %s12426_s18  ;;  %v11865_v0 = vpop.f32.mrb[25].mxu1 }
0x1a0d   : > { %v9112_v42 = vpop.f32.mrb[26].mxu1 }
0x1a0e   : > { %v11866_v58 = vpop.f32.mrb[27].mxu1 }
0x1a10   : > { %8405 = vrot.lane.b32.xlu1 %v14646_v38, %s12427_s30 }
0x1a13   : > { %v9205_v35 = vpop.f32.mrb[28].mxu1 }
0x1a14   : > { %8409 = vrot.lane.b32.xlu1 %v14656_v28, %s12427_s30  ;;  %v11877_v20 = vpop.f32.mrb[29].mxu1  ;;  %s15143_s30 = scalar_lea.vmem %s15060_s11, %s12566_s4 }
0x1a15   : > { %v9208_v53 = vpop.f32.mrb[30].mxu1  ;;  %v10651_v23 = vld [vmem:[%s15143_s30] ss:$0 sm:$0xff]  ;;  %v12049_v20 = vld [vmem:[%s12623_s22 + $0x4] ss:$8 sps:$4 sm:$0xff]  }
0x1a16   : > { %v11878_v11 = vpop.f32.mrb[31].mxu1  ;;  %v12052_v53 = vld [vmem:[%s12623_s22 + $0x14] ss:$8 sps:$4 sm:$0xff]   ;;  %9716 = vmatprep.subr.bf16.mxu1 %v12049_v20 }
0x1a17   : > { %v12050_v11 = vld [vmem:[%s12623_s22 + $0x10] ss:$8 sps:$4 sm:$0xff]  }
0x1a18   : > { %v9316_v25 = vpop.permute.xlu0 %9315  ;;  %9325 = vrot.lane.b32.xlu1 %v9205_v35, %s12426_s18  ;;  %v12047_v35 = vld [vmem:[%s12623_s22] ss:$8 sps:$4 sm:$0xff]  }
0x1a19   : > { %9339 = vst.msk [vmem:[#allocation2] sm:$0xff] %vm5062_vm6, %v9316_v25  ;;  %9717 = vmatpush1.bf16.msra.mxu1 %v12047_v35 }
0x1a1a   : > { %9718 = vmatprep.subr.bf16.mxu1 %v12052_v53 }
0x1a1d   : > { %9719 = vmatpush1.bf16.msra.mxu1 %v12050_v11 }
0x1a1f   : > { %v9301_v16 = vpop.f32.mrb[32].mxu1 }
0x1a20   : > { %v9320_v4 = vpop.permute.xlu0 %9319  ;;  %9329 = vrot.lane.b32.xlu1 %v9301_v16, %s12426_s18  ;;  %v11889_v8 = vpop.f32.mrb[33].mxu1  ;;  %v9347_v39 = vld [vmem:[#allocation2] sm:$0xff] }
0x1a21   : > { %9341 = vst.msk [vmem:[#allocation2 + $0x10] sm:$0xff] %vm5062_vm6, %v9320_v4  ;;  %v9304_v38 = vpop.f32.mrb[34].mxu1 }
0x1a22   : > { %v11890_v52 = vpop.f32.mrb[35].mxu1 }
0x1a24   : > { %v8404_v15 = vpop.permute.xlu0 %8403 }
0x1a25   : > { %8423 = vst.msk [vmem:[#allocation2 + $0x20] sm:$0xff] %vm4141_vm5, %v8404_v15 }
0x1a28   : > { %v8408_v28 = vpop.permute.xlu0 %8407  ;;  %v9349_v62 = vld [vmem:[#allocation2 + $0x10] sm:$0xff] }
0x1a29   : > { %8425 = vst.msk [vmem:[#allocation2 + $0x30] sm:$0xff] %vm4141_vm5, %v8408_v28 }
0x1a49   : > { %v9318_v60 = vpop.permute.xlu1 %9317 }
0x1a4a   : > { %9340 = vst.msk [vmem:[#allocation2 + $0x8] sm:$0xff] %vm5062_vm6, %v9318_v60 }
0x1a51   : > { %v9348_v13 = vld [vmem:[#allocation2 + $0x8] sm:$0xff] }
0x1a52   : > { %v9355_v7 = vpack.c.bf16 %v9348_v13, %v9347_v39 }
0x1a54   : > { %11907 = vmatprep.mubr.bf16.mxu0 %v9355_v7 }
0x1a55   : > { %v9324_v37 = vpop.permute.xlu0 %9323 }
0x1a56   : > { %9343 = vst.msk [vmem:[#allocation2 + $0x20] sm:$0xff] %vm5062_vm6, %v9324_v37 }
0x1a5d   : > { %v9328_v10 = vpop.permute.xlu0 %9327  ;;  %v9351_v43 = vld [vmem:[#allocation2 + $0x20] sm:$0xff] }
0x1a5e   : > { %9345 = vst.msk [vmem:[#allocation2 + $0x30] sm:$0xff] %vm5062_vm6, %v9328_v10 }
0x1a65   : > { %v9353_v26 = vld [vmem:[#allocation2 + $0x30] sm:$0xff] }
0x1a7e   : > { %v9322_v47 = vpop.permute.xlu1 %9321 }
0x1a7f   : > { %9342 = vst.msk [vmem:[#allocation2 + $0x18] sm:$0xff] %vm5062_vm6, %v9322_v47 }
0x1a82   : > { %v8406_v18 = vpop.permute.xlu1 %8405 }
0x1a83   : > { %8424 = vst.msk [vmem:[#allocation2 + $0x28] sm:$0xff] %vm4141_vm5, %v8406_v18  ;;  %v12055_v18 = vld [vmem:[%s12623_s22 + $0x24] ss:$8 sps:$4 sm:$0xff]  }
0x1a84   : > { %9720 = vmatprep.subr.bf16.mxu1 %v12055_v18 }
0x1a86   : > { %v8410_v19 = vpop.permute.xlu1 %8409  ;;  %v9350_v29 = vld [vmem:[#allocation2 + $0x18] sm:$0xff] }
0x1a87   : > { %8426 = vst.msk [vmem:[#allocation2 + $0x38] sm:$0xff] %vm4141_vm5, %v8410_v19  ;;  %v9356_v41 = vpack.c.bf16 %v9350_v29, %v9349_v62  ;;  %v12053_v29 = vld [vmem:[%s12623_s22 + $0x20] ss:$8 sps:$4 sm:$0xff]  }
0x1a88   : > { %9721 = vmatpush1.bf16.msra.mxu1 %v12053_v29 }
0x1a89   : > { %11908 = vmatmul.mubr.bf16.vlgmr.msra.gmra.mrb[20].mxu0 %v9356_v41 }
0x1a8a   : > { %v9326_v31 = vpop.permute.xlu1 %9325 }
0x1a8b   : > { %9344 = vst.msk [vmem:[#allocation2 + $0x28] sm:$0xff] %vm5062_vm6, %v9326_v31 }
0x1a92   : > { %v9330_v36 = vpop.permute.xlu1 %9329  ;;  %v9352_v32 = vld [vmem:[#allocation2 + $0x28] sm:$0xff] }
0x1a93   : > { %9346 = vst.msk [vmem:[#allocation2 + $0x38] sm:$0xff] %vm5062_vm6, %v9330_v36  ;;  %v9357_v12 = vpack.c.bf16 %v9352_v32, %v9351_v43 }
0x1a95   : > { %11911 = vmatprep.mubr.bf16.mxu0 %v9357_v12  ;;  %v12058_v12 = vld [vmem:[%s12623_s22 + $0x34] ss:$8 sps:$4 sm:$0xff]  }
0x1a96   : > { %9722 = vmatprep.subr.bf16.mxu1 %v12058_v12 }
0x1a9a   : > { %v9354_v27 = vld [vmem:[#allocation2 + $0x38] sm:$0xff] }
0x1a9b   : > { %v9358_v50 = vpack.c.bf16 %v9354_v27, %v9353_v26 }
0x1a9d   : > { %11912 = vmatmul.mubr.bf16.gmra.mrb[24].mxu0 %v9358_v50 }
0x1b5c   : > { %v11909_v54 = vpop.f32.mrb[20].mxu0 }
0x1b5d   : > { %v9447_v56 = vpop.f32.mrb[21].mxu0  ;;  %v9456_v55 = vadd.f32 %v11909_v54, %v10651_v23 }
0x1b5e   : > { %v9448_v40 = vadd.f32 %v10651_v23, %v9447_v56  ;;  %v11910_v22 = vpop.f32.mrb[22].mxu0 }
0x1b5f   : > { %v9450_v44 = vpop.f32.mrb[23].mxu0  ;;  %v9480_v24 = vadd.f32 %v9456_v55, %v13879_v2  ;;  %v9459_v3 = vadd.f32 %v11910_v22, %v10651_v23  ;;  %v12064_v55 = vld [vmem:[%s12623_s22 + $0x54] ss:$8 sps:$4 sm:$0xff]  }
0x1b60   : > { %v9478_v33 = vadd.f32 %v9448_v40, %v13872_v49  ;;  %v9451_v6 = vadd.f32 %v10651_v23, %v9450_v44  ;;  %v12061_v40 = vld [vmem:[%s12623_s22 + $0x44] ss:$8 sps:$4 sm:$0xff]   ;;  %v12059_v44 = vld [vmem:[%s12623_s22 + $0x40] ss:$8 sps:$4 sm:$0xff]  }
0x1b61   : > { %v9481_v57 = vadd.f32 %v9459_v3, %v13881_v63  ;;  %v12068_v3 = vld [vmem:[%s12623_s22 + $0x70] ss:$8 sps:$4 sm:$0xff]  }
0x1b62   : > { %v9479_v45 = vadd.f32 %v9451_v6, %v13874_v9  ;;  %9488 = vadd.xlane.f32.xlu0 %v9478_v33  ;;  %v12067_v6 = vld [vmem:[%s12623_s22 + $0x64] ss:$8 sps:$4 sm:$0xff]  }
0x1b64   : > { %9490 = vadd.xlane.f32.xlu1 %v9479_v45 }
0x1b66   : > { %9492 = vadd.xlane.f32.xlu0 %v9480_v24 }
0x1b6a   : > { %9494 = vadd.xlane.f32.xlu0 %v9481_v57 }
0x1b70   : > { %v11913_v21 = vpop.f32.mrb[24].mxu0 }
0x1b71   : > { %v9463_v5 = vpop.f32.mrb[25].mxu0  ;;  %v9472_v59 = vadd.f32 %v11913_v21, %v10651_v23  ;;  %v12072_v21 = vld [vmem:[%s15144_s14] sm:$0xff]  }
0x1b72   : > { %v9464_v61 = vadd.f32 %v10651_v23, %v9463_v5  ;;  %v11914_v30 = vpop.f32.mrb[26].mxu0  ;;  %v12073_v5 = vld [vmem:[%s15144_s14 + $0x48] sm:$0xff]  }
0x1b73   : > { %v9466_v49 = vpop.f32.mrb[27].mxu0  ;;  %v9475_v2 = vadd.f32 %v11914_v30, %v10651_v23  ;;  %v9484_v63 = vadd.f32 %v9472_v59, %v13912_v14  ;;  %v12075_v30 = vld [vmem:[%s15144_s14 + $0x50] sm:$0xff]   ;;  %v12077_v59 = vld [vmem:[%s15144_s14 + $0x58] sm:$0xff]  }
0x1b74   : > { %v9482_v9 = vadd.f32 %v9464_v61, %v13905_v46  ;;  %v9467_v0 = vadd.f32 %v10651_v23, %v9466_v49  ;;  %v12056_v23 = vld [vmem:[%s12623_s22 + $0x30] ss:$8 sps:$4 sm:$0xff]   ;;  %v12074_v61 = vld [vmem:[%s15144_s14 + $0x8] sm:$0xff]  }
0x1b75   : > { %v9485_v58 = vadd.f32 %v9475_v2, %v13914_v17  ;;  %9723 = vmatpush1.bf16.msra.mxu1 %v12056_v23  ;;  %v12076_v49 = vld [vmem:[%s15144_s14 + $0x10] sm:$0xff]   ;;  %v12080_v2 = vld [vmem:[%s15144_s14 + $0x20] sm:$0xff]  }
0x1b76   : > { %v9483_v42 = vadd.f32 %v9467_v0, %v13907_v1  ;;  %9496 = vadd.xlane.f32.xlu0 %v9482_v9  ;;  %9724 = vmatprep.subr.bf16.mxu1 %v12061_v40  ;;  %v12079_v0 = vld [vmem:[%s15144_s14 + $0x60] sm:$0xff]  }
0x1b78   : > { %9498 = vadd.xlane.f32.xlu1 %v9483_v42 }
0x1b79   : > { %9725 = vmatpush1.bf16.msra.mxu1 %v12059_v44 }
0x1b7a   : > { %9500 = vadd.xlane.f32.xlu0 %v9484_v63  ;;  %9726 = vmatprep.subr.bf16.mxu1 %v12064_v55 }
0x1b7c   : > { %9502 = vadd.xlane.f32.xlu1 %v9485_v58 }
0x1bef   : > { %v9489_v46 = vpop.xlane.xlu0 %9488 }
0x1bf0   : > { %v9504_v25 = vmul.f32 0.0078125, %v9489_v46 }
0x1bf1   : > { %v9491_v16 = vpop.xlane.xlu1 %9490 }
0x1bf2   : > { %v14860_v1 = vsub.f32 %v9478_v33, %v9504_v25  ;;  %v9505_v4 = vmul.f32 0.0078125, %v9491_v16  ;;  %v12062_v33 = vld [vmem:[%s12623_s22 + $0x50] ss:$8 sps:$4 sm:$0xff]  }
0x1bf3   : > { %v9493_v14 = vpop.xlane.xlu0 %9492  ;;  %9727 = vmatpush1.bf16.msra.mxu1 %v12062_v33 }
0x1bf4   : > { %v14862_v8 = vsub.f32 %v9479_v45, %v9505_v4  ;;  %v9506_v17 = vmul.f32 0.0078125, %v9493_v14  ;;  %v9520_v38 = vmul.f32 %v14860_v1, %v14860_v1  ;;  %v12065_v45 = vld [vmem:[%s12623_s22 + $0x60] ss:$8 sps:$4 sm:$0xff]   ;;  %9728 = vmatprep.subr.bf16.mxu1 %v12067_v6 }
0x1bf6   : > { %v14866_v52 = vsub.f32 %v9480_v24, %v9506_v17  ;;  %9528 = vadd.xlane.f32.xlu0 %v9520_v38  ;;  %v9521_v15 = vmul.f32 %v14862_v8, %v14862_v8  ;;  %v12070_v24 = vld [vmem:[%s12623_s22 + $0x74] ss:$8 sps:$4 sm:$0xff]  }
0x1bf7   : > { %v9495_v28 = vpop.xlane.xlu0 %9494  ;;  %9729 = vmatpush1.bf16.msra.mxu1 %v12065_v45 }
0x1bf8   : > { %v9507_v60 = vmul.f32 0.0078125, %v9495_v28  ;;  %9530 = vadd.xlane.f32.xlu1 %v9521_v15  ;;  %v9522_v39 = vmul.f32 %v14866_v52, %v14866_v52  ;;  %9730 = vmatprep.subr.bf16.mxu1 %v12070_v24  ;;  %v10660_v15 = vld [vmem:[%s1036_s13] ss:$0 sm:$0xff]  ;;  %s15147_s13 = sld [smem:[#allocation8_spill]] }
0x1bfa   : > { %v14872_v13 = vsub.f32 %v9481_v57, %v9507_v60  ;;  %9532 = vadd.xlane.f32.xlu0 %v9522_v39  ;;  %v12071_v57 = vld [vmem:[%s15144_s14 + $0x40] sm:$0xff]  }
0x1bfb   : > { %9731 = vmatpush1.bf16.msra.mxu1 %v12068_v3  ;;  %11011 = vmatprep.subr.bf16.mxu0 %v12071_v57 }
0x1bfc   : > { %v9523_v7 = vmul.f32 %v14872_v13, %v14872_v13  ;;  %11012 = vmatpush3.bf16.msra.mxu0 %v12072_v21 }
0x1bfd   : > { %11013 = vmatprep.subr.bf16.mxu0 %v12073_v5 }
0x1bfe   : > { %9534 = vadd.xlane.f32.xlu1 %v9523_v7 }
0x1c00   : > { %11014 = vmatpush3.bf16.msra.mxu0 %v12074_v61 }
0x1c01   : > { %11015 = vmatprep.subr.bf16.mxu0 %v12075_v30 }
0x1c03   : > { %v9497_v37 = vpop.xlane.xlu0 %9496 }
0x1c04   : > { %v9508_v10 = vmul.f32 0.0078125, %v9497_v37  ;;  %11016 = vmatpush3.bf16.msra.mxu0 %v12076_v49 }
0x1c05   : > { %v9499_v47 = vpop.xlane.xlu1 %9498  ;;  %11017 = vmatprep.subr.bf16.mxu0 %v12077_v59 }
0x1c06   : > { %v14877_v19 = vsub.f32 %v9482_v9, %v9508_v10  ;;  %v9509_v62 = vmul.f32 0.0078125, %v9499_v47  ;;  %v12078_v9 = vld [vmem:[%s15144_s14 + $0x18] sm:$0xff]   ;;  %v10661_v10 = vld [vmem:[%s1039_s1] ss:$0 sm:$0xff] }
0x1c07   : > { %v9501_v41 = vpop.xlane.xlu0 %9500 }
0x1c08   : > { %v14880_v31 = vsub.f32 %v9483_v42, %v9509_v62  ;;  %v9510_v36 = vmul.f32 0.0078125, %v9501_v41  ;;  %v9524_v43 = vmul.f32 %v14877_v19, %v14877_v19  ;;  %11018 = vmatpush3.bf16.msra.mxu0 %v12078_v9  ;;  %v12081_v42 = vld [vmem:[%s15144_s14 + $0x68] sm:$0xff]  }
0x1c09   : > { %v9503_v32 = vpop.xlane.xlu1 %9502  ;;  %11019 = vmatprep.subr.bf16.mxu0 %v12079_v0 }
0x1c0a   : > { %v14885_v26 = vsub.f32 %v9484_v63, %v9510_v36  ;;  %v9511_v27 = vmul.f32 0.0078125, %v9503_v32  ;;  %9536 = vadd.xlane.f32.xlu0 %v9524_v43  ;;  %v9525_v50 = vmul.f32 %v14880_v31, %v14880_v31 }
0x1c0c   : > { %v14890_v54 = vsub.f32 %v9485_v58, %v9511_v27  ;;  %9538 = vadd.xlane.f32.xlu1 %v9525_v50  ;;  %v9526_v56 = vmul.f32 %v14885_v26, %v14885_v26  ;;  %11020 = vmatpush3.bf16.msra.mxu0 %v12080_v2 }
0x1c0d   : > { %11021 = vmatprep.subr.bf16.mxu0 %v12081_v42 }
0x1c0e   : > { %9540 = vadd.xlane.f32.xlu0 %v9526_v56  ;;  %v9527_v22 = vmul.f32 %v14890_v54, %v14890_v54 }
0x1c10   : > { %9542 = vadd.xlane.f32.xlu1 %v9527_v22 }
0x1c83   : > { %v9529_v63 = vpop.xlane.xlu0 %9528 }
0x1c84   : > { %v9544_v58 = vmul.f32 0.0078125, %v9529_v63 }
0x1c85   : > { %v9531_v35 = vpop.xlane.xlu1 %9530 }
0x1c86   : > { %v9552_v20 = vadd.f32 1e-05, %v9544_v58  ;;  %v9545_v53 = vmul.f32 0.0078125, %v9531_v35  ;;  %v12083_v35 = vld [vmem:[%s15144_s14 + $0x70] sm:$0xff]  }
0x1c87   : > { %v9533_v11 = vpop.xlane.xlu0 %9532 }
0x1c88   : > { %12359 = vrsqrt.f32 %v9552_v20  ;;  %v9553_v46 = vadd.f32 1e-05, %v9545_v53  ;;  %v9546_v25 = vmul.f32 0.0078125, %v9533_v11  ;;  %v12084_v20 = vld [vmem:[%s15144_s14 + $0x30] sm:$0xff]   ;;  %v12085_v53 = vld [vmem:[%s15144_s14 + $0x78] sm:$0xff]  }
0x1c89   : > { %v12086_v11 = vld [vmem:[%s15144_s14 + $0x38] sm:$0xff]  }
0x1c8a   : > { %12361 = vrsqrt.f32 %v9553_v46  ;;  %v9554_v16 = vadd.f32 1e-05, %v9546_v25  ;;  %v9624_v46 = vld [vmem:[%s15147_s13] sm:$0x3] }
0x1c8b   : > { %v9535_v4 = vpop.xlane.xlu1 %9534  ;;  %v9633_v25 = vrot.slane %v9624_v46, %v12777_v48 }
0x1c8c   : > { %12363 = vrsqrt.f32 %v9554_v16  ;;  %v9547_v14 = vmul.f32 0.0078125, %v9535_v4 }
0x1c8e   : > { %v9555_v17 = vadd.f32 1e-05, %v9547_v14 }
0x1c90   : > { %12365 = vrsqrt.f32 %v9555_v17 }
0x1c92   : > { %v12360_v38 = vpop.eup %12359 }
0x1c93   : > { %v9568_v28 = vmul.f32 %v12360_v38, %v14860_v1 }
0x1c94   : > { %v12362_v60 = vpop.eup %12361 }
0x1c95   : > { %v9582_v39 = vmul.f32 %v10660_v15, %v9568_v28  ;;  %v9569_v7 = vmul.f32 %v12362_v60, %v14862_v8 }
0x1c96   : > { %v12364_v37 = vpop.eup %12363 }
0x1c97   : > { %v9583_v47 = vmul.f32 %v10660_v15, %v9569_v7  ;;  %v9537_v18 = vpop.xlane.xlu0 %9536  ;;  %v14927_v29 = vadd.f32 %v10661_v10, %v9582_v39  ;;  %v9570_v36 = vmul.f32 %v12364_v37, %v14866_v52 }
0x1c98   : > { %v9548_v62 = vmul.f32 0.0078125, %v9537_v18 }
0x1c99   : > { %v14929_v41 = vadd.f32 %v10661_v10, %v9583_v47  ;;  %v9539_v1 = vpop.xlane.xlu1 %9538  ;;  %v9584_v40 = vmul.f32 %v10660_v15, %v9570_v36 }
0x1c9a   : > { %v12366_v43 = vpop.eup %12365  ;;  %v9556_v32 = vadd.f32 1e-05, %v9548_v62  ;;  %v9549_v12 = vmul.f32 0.0078125, %v9539_v1 }
0x1c9b   : > { %v9604_v8 = vpack.c.bf16 %v14929_v41, %v14927_v29  ;;  %v9571_v27 = vmul.f32 %v12366_v43, %v14872_v13  ;;  %v9541_v50 = vpop.xlane.xlu0 %9540  ;;  %v14938_v45 = vadd.f32 %v10661_v10, %v9584_v40 }
0x1c9c   : > { %12367 = vrsqrt.f32 %v9556_v32  ;;  %v9557_v23 = vadd.f32 1e-05, %v9549_v12  ;;  %v9550_v56 = vmul.f32 0.0078125, %v9541_v50 }
0x1c9d   : > { %v9585_v22 = vmul.f32 %v10660_v15, %v9571_v27  ;;  %9749 = vmatmul.mubr.bf16.vlgmr.msra.gmra.mrb[36].mxu1 %v9604_v8  ;;  %v9543_v44 = vpop.xlane.xlu1 %9542 }
0x1c9e   : > { %12369 = vrsqrt.f32 %v9557_v23  ;;  %v9558_v55 = vadd.f32 1e-05, %v9550_v56  ;;  %v9551_v52 = vmul.f32 0.0078125, %v9543_v44  ;;  %9758 = vmatprep.mubr.bf16.mxu1 %v15142_v34 }
0x1c9f   : > { %v14936_v33 = vadd.f32 %v10661_v10, %v9585_v22 }
0x1ca0   : > { %12371 = vrsqrt.f32 %v9558_v55  ;;  %v9559_v6 = vadd.f32 1e-05, %v9551_v52 }
0x1ca1   : > { %v9605_v13 = vpack.c.bf16 %v14936_v33, %v14938_v45 }
0x1ca2   : > { %12373 = vrsqrt.f32 %v9559_v6 }
0x1ca5   : > { %9759 = vmatmul.mubr.bf16.gmra.mrb[40].mxu1 %v9605_v13 }
0x1ca6   : > { %v12368_v24 = vpop.eup %12367  ;;  %9768 = vmatprep.mubr.bf16.mxu1 %v15142_v34 }
0x1ca7   : > { %v9572_v3 = vmul.f32 %v12368_v24, %v14877_v19 }
0x1ca8   : > { %v12370_v57 = vpop.eup %12369 }
0x1ca9   : > { %v9586_v21 = vmul.f32 %v10660_v15, %v9572_v3  ;;  %v9573_v5 = vmul.f32 %v12370_v57, %v14880_v31 }
0x1caa   : > { %v12372_v61 = vpop.eup %12371 }
0x1cab   : > { %v9587_v30 = vmul.f32 %v10660_v15, %v9573_v5  ;;  %v14945_v59 = vadd.f32 %v10661_v10, %v9586_v21  ;;  %v9574_v0 = vmul.f32 %v12372_v61, %v14885_v26 }
0x1cac   : > { %v12374_v49 = vpop.eup %12373 }
0x1cad   : > { %v14947_v9 = vadd.f32 %v10661_v10, %v9587_v30  ;;  %v9575_v2 = vmul.f32 %v12374_v49, %v14890_v54  ;;  %v9588_v42 = vmul.f32 %v10660_v15, %v9574_v0  ;;  %v12082_v54 = vld [vmem:[%s15144_s14 + $0x28] sm:$0xff]  }
0x1cae   : > { %11022 = vmatpush3.bf16.msra.mxu0 %v12082_v54 }
0x1caf   : > { %v9606_v19 = vpack.c.bf16 %v14947_v9, %v14945_v59  ;;  %v9589_v31 = vmul.f32 %v10660_v15, %v9575_v2  ;;  %v14956_v58 = vadd.f32 %v10661_v10, %v9588_v42  ;;  %11023 = vmatprep.subr.bf16.mxu0 %v12083_v35 }
0x1cb1   : > { %9769 = vmatmul.mubr.bf16.gmra.mrb[44].mxu1 %v9606_v19  ;;  %v14954_v63 = vadd.f32 %v10661_v10, %v9589_v31 }
0x1cb2   : > { %9778 = vmatprep.mubr.bf16.mxu1 %v15142_v34  ;;  %11024 = vmatpush3.bf16.msra.mxu0 %v12084_v20  ;;  %v9629_v34 = vrot.slane %v9624_v46, %v12787_v51 }
0x1cb3   : > { %v9607_v26 = vpack.c.bf16 %v14954_v63, %v14956_v58  ;;  %11025 = vmatprep.subr.bf16.mxu0 %v12085_v53 }
0x1cb6   : > { %11026 = vmatpush3.bf16.msra.mxu0 %v12086_v11 }
0x1cb9   : > { %9779 = vmatmul.mubr.bf16.gmra.mrb[48].mxu1 %v9607_v26 }
0x1d70   : > { %v9750_v16 = vpop.f32.mrb[36].mxu1 }
0x1d71   : > { %v9751_v4 = vadd.f32 %v9750_v16, %v9629_v34  ;;  %v9752_v14 = vpop.f32.mrb[37].mxu1 }
0x1d72   : > { %v9753_v17 = vadd.f32 %v9752_v14, %v9633_v25  ;;  %v9754_v38 = vpop.f32.mrb[38].mxu1 }
0x1d73   : > { %v9755_v15 = vadd.f32 %v9754_v38, %v9629_v34  ;;  %v9756_v28 = vpop.f32.mrb[39].mxu1  ;;  %v9789_v39 = vmax.f32 %v9751_v4, 0.0 }
0x1d74   : > { %v9757_v60 = vadd.f32 %v9756_v28, %v9633_v25  ;;  %v9790_v37 = vmax.f32 %v9753_v17, 0.0  ;;  %v10678_v17 = vld [vmem:[%s15149_s28] ss:$0 sm:$0xff] }
0x1d75   : > { %v9791_v7 = vmax.f32 %v9755_v15, 0.0 }
0x1d76   : > { %v9792_v10 = vmax.f32 %v9757_v60, 0.0 }
0x1d77   : > { %v9805_v47 = vpack.c.bf16 %v9791_v7, %v9789_v39 }
0x1d78   : > { %v9806_v18 = vpack.c.bf16 %v9792_v10, %v9790_v37  ;;  %v9760_v62 = vpop.f32.mrb[40].mxu1 }
0x1d79   : > { %v9761_v36 = vadd.f32 %v9760_v62, %v9629_v34  ;;  %v9762_v1 = vpop.f32.mrb[41].mxu1 }
0x1d7a   : > { %v9763_v51 = vadd.f32 %v9762_v1, %v9633_v25  ;;  %v9764_v43 = vpop.f32.mrb[42].mxu1  ;;  %9980 = vmatprep.mubr.bf16.mxu0 %v9806_v18 }
0x1d7b   : > { %v9765_v48 = vadd.f32 %v9764_v43, %v9629_v34  ;;  %v9766_v32 = vpop.f32.mrb[43].mxu1  ;;  %9981 = vmatmul.mubr.bf16.vlgmr.msra.gmra.mrb[28].mxu0 %v9805_v47  ;;  %v9793_v8 = vmax.f32 %v9761_v36, 0.0 }
0x1d7c   : > { %v9767_v12 = vadd.f32 %v9766_v32, %v9633_v25  ;;  %v9794_v50 = vmax.f32 %v9763_v51, 0.0 }
0x1d7d   : > { %v9795_v27 = vmax.f32 %v9765_v48, 0.0 }
0x1d7e   : > { %v9796_v23 = vmax.f32 %v9767_v12, 0.0 }
0x1d7f   : > { %v9807_v56 = vpack.c.bf16 %v9795_v27, %v9793_v8 }
0x1d80   : > { %v9808_v40 = vpack.c.bf16 %v9796_v23, %v9794_v50 }
0x1d82   : > { %9988 = vmatprep.mubr.bf16.mxu0 %v9808_v40 }
0x1d83   : > { %9989 = vmatmul.mubr.bf16.gmra.mrb[32].mxu0 %v9807_v56 }
0x1d84   : > { %v9770_v22 = vpop.f32.mrb[44].mxu1 }
0x1d85   : > { %v9771_v44 = vadd.f32 %v9770_v22, %v9629_v34  ;;  %v9772_v55 = vpop.f32.mrb[45].mxu1 }
0x1d86   : > { %v9773_v52 = vadd.f32 %v9772_v55, %v9633_v25  ;;  %v9774_v6 = vpop.f32.mrb[46].mxu1 }
0x1d87   : > { %v9775_v13 = vadd.f32 %v9774_v6, %v9629_v34  ;;  %v9776_v24 = vpop.f32.mrb[47].mxu1  ;;  %v9797_v57 = vmax.f32 %v9771_v44, 0.0 }
0x1d88   : > { %v9777_v3 = vadd.f32 %v9776_v24, %v9633_v25  ;;  %v9798_v5 = vmax.f32 %v9773_v52, 0.0 }
0x1d89   : > { %v9799_v21 = vmax.f32 %v9775_v13, 0.0 }
0x1d8a   : > { %v9800_v61 = vmax.f32 %v9777_v3, 0.0 }
0x1d8b   : > { %v9809_v30 = vpack.c.bf16 %v9799_v21, %v9797_v57 }
0x1d8c   : > { %v9810_v49 = vpack.c.bf16 %v9800_v61, %v9798_v5  ;;  %v9780_v0 = vpop.f32.mrb[48].mxu1 }
0x1d8d   : > { %v9781_v2 = vadd.f32 %v9780_v0, %v9629_v34  ;;  %v9782_v19 = vpop.f32.mrb[49].mxu1 }
0x1d8e   : > { %v9783_v31 = vadd.f32 %v9782_v19, %v9633_v25  ;;  %v9784_v42 = vpop.f32.mrb[50].mxu1  ;;  %9996 = vmatprep.mubr.bf16.mxu0 %v9810_v49 }
0x1d8f   : > { %v9785_v26 = vadd.f32 %v9784_v42, %v9629_v34  ;;  %v9786_v54 = vpop.f32.mrb[51].mxu1  ;;  %9997 = vmatmul.mubr.bf16.gmra.mrb[36].mxu0 %v9809_v30  ;;  %v9801_v20 = vmax.f32 %v9781_v2, 0.0 }
0x1d90   : > { %v9787_v35 = vadd.f32 %v9786_v54, %v9633_v25  ;;  %v9802_v11 = vmax.f32 %v9783_v31, 0.0 }
0x1d91   : > { %v9803_v53 = vmax.f32 %v9785_v26, 0.0 }
0x1d92   : > { %v9804_v46 = vmax.f32 %v9787_v35, 0.0 }
0x1d93   : > { %v9811_v16 = vpack.c.bf16 %v9803_v53, %v9801_v20 }
0x1d94   : > { %v9812_v4 = vpack.c.bf16 %v9804_v46, %v9802_v11 }
0x1d96   : > { %10004 = vmatprep.mubr.bf16.mxu0 %v9812_v4 }
0x1d97   : > { %10005 = vmatmul.mubr.bf16.gmra.mrb[40].mxu0 %v9811_v16 }
0x1e4e   : > { %v11027_v14 = vpop.f32.mrb[28].mxu0 }
0x1e4f   : > { %v11028_v38 = vpop.f32.mrb[29].mxu0 }
0x1e50   : > { %v11029_v15 = vadd.f32 %v11028_v38, %v11027_v14  ;;  %v11030_v34 = vpop.f32.mrb[30].mxu0 }
0x1e51   : > { %v11031_v28 = vpop.f32.mrb[31].mxu0 }
0x1e52   : > { %v9983_v60 = vadd.f32 %v11029_v15, %v10678_v17  ;;  %v11032_v25 = vadd.f32 %v11031_v28, %v11030_v34 }
0x1e54   : > { %v9986_v39 = vadd.f32 %v11032_v25, %v10678_v17  ;;  %v10013_v7 = vadd.f32 %v9983_v60, %v14927_v29 }
0x1e56   : > { %v11033_v37 = vpop.f32.mrb[32].mxu0  ;;  %10023 = vadd.xlane.f32.xlu0 %v10013_v7  ;;  %v10014_v10 = vadd.f32 %v9986_v39, %v14929_v41 }
0x1e57   : > { %v11034_v47 = vpop.f32.mrb[33].mxu0 }
0x1e58   : > { %v11035_v18 = vadd.f32 %v11034_v47, %v11033_v37  ;;  %v11036_v62 = vpop.f32.mrb[34].mxu0  ;;  %10025 = vadd.xlane.f32.xlu1 %v10014_v10 }
0x1e59   : > { %v11037_v36 = vpop.f32.mrb[35].mxu0 }
0x1e5a   : > { %v9991_v1 = vadd.f32 %v11035_v18, %v10678_v17  ;;  %v11038_v51 = vadd.f32 %v11037_v36, %v11036_v62 }
0x1e5c   : > { %v9994_v43 = vadd.f32 %v11038_v51, %v10678_v17  ;;  %v10015_v48 = vadd.f32 %v9991_v1, %v14938_v45 }
0x1e5e   : > { %10027 = vadd.xlane.f32.xlu0 %v10015_v48  ;;  %v10016_v32 = vadd.f32 %v9994_v43, %v14936_v33 }
0x1e60   : > { %10029 = vadd.xlane.f32.xlu1 %v10016_v32 }
0x1e62   : > { %v11039_v12 = vpop.f32.mrb[36].mxu0 }
0x1e63   : > { %v11040_v29 = vpop.f32.mrb[37].mxu0 }
0x1e64   : > { %v11041_v8 = vadd.f32 %v11040_v29, %v11039_v12  ;;  %v11042_v27 = vpop.f32.mrb[38].mxu0  ;;  %v10695_v29 = vld [vmem:[%s1042_s24] ss:$0 sm:$0xff] }
0x1e65   : > { %v11043_v50 = vpop.f32.mrb[39].mxu0 }
0x1e66   : > { %v9999_v41 = vadd.f32 %v11041_v8, %v10678_v17  ;;  %v11044_v23 = vadd.f32 %v11043_v50, %v11042_v27  ;;  %v10696_v50 = vld [vmem:[%s1045_s0] ss:$0 sm:$0xff] }
0x1e68   : > { %v10002_v56 = vadd.f32 %v11044_v23, %v10678_v17  ;;  %v10017_v40 = vadd.f32 %v9999_v41, %v14945_v59 }
0x1e6a   : > { %v11045_v22 = vpop.f32.mrb[40].mxu0  ;;  %10031 = vadd.xlane.f32.xlu0 %v10017_v40  ;;  %v10018_v44 = vadd.f32 %v10002_v56, %v14947_v9 }
0x1e6b   : > { %v11046_v55 = vpop.f32.mrb[41].mxu0 }
0x1e6c   : > { %v11047_v45 = vadd.f32 %v11046_v55, %v11045_v22  ;;  %v11048_v52 = vpop.f32.mrb[42].mxu0  ;;  %10033 = vadd.xlane.f32.xlu1 %v10018_v44 }
0x1e6d   : > { %v11049_v33 = vpop.f32.mrb[43].mxu0 }
0x1e6e   : > { %v10007_v6 = vadd.f32 %v11047_v45, %v10678_v17  ;;  %v11050_v13 = vadd.f32 %v11049_v33, %v11048_v52 }
0x1e70   : > { %v10010_v24 = vadd.f32 %v11050_v13, %v10678_v17  ;;  %v10019_v3 = vadd.f32 %v10007_v6, %v14956_v58 }
0x1e72   : > { %10035 = vadd.xlane.f32.xlu0 %v10019_v3  ;;  %v10020_v57 = vadd.f32 %v10010_v24, %v14954_v63 }
0x1e74   : > { %10037 = vadd.xlane.f32.xlu1 %v10020_v57 }
0x1ee3   : > { %v10024_v21 = vpop.xlane.xlu0 %10023 }
0x1ee4   : > { %v10039_v59 = vmul.f32 0.0078125, %v10024_v21 }
0x1ee5   : > { %v10026_v5 = vpop.xlane.xlu1 %10025 }
0x1ee6   : > { %v10047_v61 = vsub.f32 %v10013_v7, %v10039_v59  ;;  %v10040_v30 = vmul.f32 0.0078125, %v10026_v5 }
0x1ee8   : > { %v10048_v9 = vsub.f32 %v10014_v10, %v10040_v30  ;;  %v10055_v49 = vmul.f32 %v10047_v61, %v10047_v61 }
0x1eea   : > { %10063 = vadd.xlane.f32.xlu0 %v10055_v49  ;;  %v10056_v0 = vmul.f32 %v10048_v9, %v10048_v9 }
0x1eeb   : > { %v10028_v2 = vpop.xlane.xlu0 %10027 }
0x1eec   : > { %v10041_v19 = vmul.f32 0.0078125, %v10028_v2  ;;  %10065 = vadd.xlane.f32.xlu1 %v10056_v0 }
0x1eed   : > { %v10030_v31 = vpop.xlane.xlu1 %10029 }
0x1eee   : > { %v10049_v42 = vsub.f32 %v10015_v48, %v10041_v19  ;;  %v10042_v26 = vmul.f32 0.0078125, %v10030_v31 }
0x1ef0   : > { %v14981_v58 = vsub.f32 %v10016_v32, %v10042_v26  ;;  %v10057_v54 = vmul.f32 %v10049_v42, %v10049_v42 }
0x1ef2   : > { %10067 = vadd.xlane.f32.xlu0 %v10057_v54  ;;  %v10058_v63 = vmul.f32 %v14981_v58, %v14981_v58 }
0x1ef4   : > { %10069 = vadd.xlane.f32.xlu1 %v10058_v63 }
0x1ef7   : > { %v10032_v35 = vpop.xlane.xlu0 %10031 }
0x1ef8   : > { %v10043_v20 = vmul.f32 0.0078125, %v10032_v35 }
0x1ef9   : > { %v10034_v53 = vpop.xlane.xlu1 %10033 }
0x1efa   : > { %v14985_v11 = vsub.f32 %v10017_v40, %v10043_v20  ;;  %v10044_v46 = vmul.f32 0.0078125, %v10034_v53 }
0x1efc   : > { %v14987_v16 = vsub.f32 %v10018_v44, %v10044_v46  ;;  %v10059_v4 = vmul.f32 %v14985_v11, %v14985_v11 }
0x1efe   : > { %10071 = vadd.xlane.f32.xlu0 %v10059_v4  ;;  %v10060_v14 = vmul.f32 %v14987_v16, %v14987_v16 }
0x1eff   : > { %v10036_v17 = vpop.xlane.xlu0 %10035 }
0x1f00   : > { %v10045_v38 = vmul.f32 0.0078125, %v10036_v17  ;;  %10073 = vadd.xlane.f32.xlu1 %v10060_v14 }
0x1f01   : > { %v10038_v15 = vpop.xlane.xlu1 %10037 }
0x1f02   : > { %v14993_v34 = vsub.f32 %v10019_v3, %v10045_v38  ;;  %v10046_v28 = vmul.f32 0.0078125, %v10038_v15 }
0x1f04   : > { %v14995_v60 = vsub.f32 %v10020_v57, %v10046_v28  ;;  %v10061_v25 = vmul.f32 %v14993_v34, %v14993_v34 }
0x1f06   : > { %10075 = vadd.xlane.f32.xlu0 %v10061_v25  ;;  %v10062_v39 = vmul.f32 %v14995_v60, %v14995_v60 }
0x1f08   : > { %10077 = vadd.xlane.f32.xlu1 %v10062_v39 }
0x1f77   : > { %v10064_v7 = vpop.xlane.xlu0 %10063 }
0x1f78   : > { %v10079_v37 = vmul.f32 0.0078125, %v10064_v7 }
0x1f79   : > { %v10066_v10 = vpop.xlane.xlu1 %10065 }
0x1f7a   : > { %v10087_v47 = vadd.f32 1e-05, %v10079_v37  ;;  %v10080_v18 = vmul.f32 0.0078125, %v10066_v10 }
0x1f7c   : > { %12375 = vrsqrt.f32 %v10087_v47  ;;  %v10088_v62 = vadd.f32 1e-05, %v10080_v18 }
0x1f7e   : > { %12377 = vrsqrt.f32 %v10088_v62 }
0x1f7f   : > { %v10068_v36 = vpop.xlane.xlu0 %10067 }
0x1f80   : > { %v10081_v1 = vmul.f32 0.0078125, %v10068_v36 }
0x1f81   : > { %v10070_v51 = vpop.xlane.xlu1 %10069 }
0x1f82   : > { %v10089_v43 = vadd.f32 1e-05, %v10081_v1  ;;  %v10082_v48 = vmul.f32 0.0078125, %v10070_v51 }
0x1f84   : > { %12379 = vrsqrt.f32 %v10089_v43  ;;  %v10090_v32 = vadd.f32 1e-05, %v10082_v48 }
0x1f86   : > { %v12376_v12 = vpop.eup %12375  ;;  %12381 = vrsqrt.f32 %v10090_v32 }
0x1f87   : > { %v10103_v8 = vmul.f32 %v12376_v12, %v10047_v61 }
0x1f88   : > { %v12378_v27 = vpop.eup %12377 }
0x1f89   : > { %v10117_v41 = vmul.f32 %v10695_v29, %v10103_v8  ;;  %v10104_v23 = vmul.f32 %v12378_v27, %v10048_v9 }
0x1f8b   : > { %v10131_v56 = vadd.f32 %v10696_v50, %v10117_v41  ;;  %v10118_v40 = vmul.f32 %v10695_v29, %v10104_v23  ;;  %v10072_v22 = vpop.xlane.xlu0 %10071 }
0x1f8c   : > { %v10083_v44 = vmul.f32 0.0078125, %v10072_v22 }
0x1f8d   : > { %10139 = vst [vmem:[%s15132_s29] sm:$0xff] %v10131_v56  ;;  %v10132_v55 = vadd.f32 %v10696_v50, %v10118_v40  ;;  %v10074_v45 = vpop.xlane.xlu1 %10073 }
0x1f8e   : > { %v12380_v52 = vpop.eup %12379  ;;  %v10091_v33 = vadd.f32 1e-05, %v10083_v44  ;;  %v10084_v6 = vmul.f32 0.0078125, %v10074_v45 }
0x1f8f   : > { %10140 = vst [vmem:[%s15132_s29 + $0x8] sm:$0xff] %v10132_v55  ;;  %v10105_v13 = vmul.f32 %v12380_v52, %v10049_v42 }
0x1f90   : > { %v12382_v24 = vpop.eup %12381  ;;  %12383 = vrsqrt.f32 %v10091_v33  ;;  %v10092_v3 = vadd.f32 1e-05, %v10084_v6 }
0x1f91   : > { %v10119_v57 = vmul.f32 %v10695_v29, %v10105_v13  ;;  %v10106_v21 = vmul.f32 %v12382_v24, %v14981_v58 }
0x1f92   : > { %12385 = vrsqrt.f32 %v10092_v3 }
0x1f93   : > { %v10133_v59 = vadd.f32 %v10696_v50, %v10119_v57  ;;  %v10120_v5 = vmul.f32 %v10695_v29, %v10106_v21  ;;  %v10076_v61 = vpop.xlane.xlu0 %10075 }
0x1f94   : > { %v10085_v30 = vmul.f32 0.0078125, %v10076_v61 }
0x1f95   : > { %10141 = vst [vmem:[%s15132_s29 + $0x10] sm:$0xff] %v10133_v59  ;;  %v10134_v9 = vadd.f32 %v10696_v50, %v10120_v5  ;;  %v10078_v49 = vpop.xlane.xlu1 %10077 }
0x1f96   : > { %v10093_v0 = vadd.f32 1e-05, %v10085_v30  ;;  %v10086_v2 = vmul.f32 0.0078125, %v10078_v49 }
0x1f97   : > { %10142 = vst [vmem:[%s15132_s29 + $0x18] sm:$0xff] %v10134_v9 }
0x1f98   : > { %12387 = vrsqrt.f32 %v10093_v0  ;;  %v10094_v19 = vadd.f32 1e-05, %v10086_v2 }
0x1f9a   : > { %v12384_v31 = vpop.eup %12383  ;;  %12389 = vrsqrt.f32 %v10094_v19 }
0x1f9b   : > { %v10107_v42 = vmul.f32 %v12384_v31, %v14985_v11 }
0x1f9c   : > { %v12386_v26 = vpop.eup %12385 }
0x1f9d   : > { %v10121_v58 = vmul.f32 %v10695_v29, %v10107_v42  ;;  %v10108_v54 = vmul.f32 %v12386_v26, %v14987_v16 }
0x1f9f   : > { %v10135_v63 = vadd.f32 %v10696_v50, %v10121_v58  ;;  %v10122_v35 = vmul.f32 %v10695_v29, %v10108_v54 }
0x1fa1   : > { %10143 = vst [vmem:[%s15132_s29 + $0x20] sm:$0xff] %v10135_v63  ;;  %v10136_v20 = vadd.f32 %v10696_v50, %v10122_v35 }
0x1fa2   : > { %v12388_v53 = vpop.eup %12387 }
0x1fa3   : > { %10144 = vst [vmem:[%s15132_s29 + $0x28] sm:$0xff] %v10136_v20  ;;  %v10109_v46 = vmul.f32 %v12388_v53, %v14993_v34 }
0x1fa4   : > { %v12390_v4 = vpop.eup %12389 }
0x1fa5   : > { %v10123_v11 = vmul.f32 %v10695_v29, %v10109_v46  ;;  %v10110_v14 = vmul.f32 %v12390_v4, %v14995_v60 }
0x1fa7   : > { %v10137_v17 = vadd.f32 %v10696_v50, %v10123_v11  ;;  %v10124_v16 = vmul.f32 %v10695_v29, %v10110_v14 }
0x1fa9   : > { %10145 = vst [vmem:[%s15132_s29 + $0x30] sm:$0xff] %v10137_v17  ;;  %v10138_v38 = vadd.f32 %v10696_v50, %v10124_v16 }
0x1fab   : > { %10146 = vst [vmem:[%s15132_s29 + $0x38] sm:$0xff] %v10138_v38 }
0x1fac PF: > { %s15152_s25 = sld [smem:[#allocation5_spill]]  ;;  %s15153_s3 = sld [smem:[#allocation4_spill]] }
0x1fad   : > { %s15154_s28 = sld [smem:[#allocation6_spill]] }
0x1fb2   : > { %s32_s29 = sadd.s32 1, %s15152_s25  }
0x1fb3   : > { %p29_p6 = scmp.ge.s32.totalorder %s32_s29, 4  }
0x1fb5   :  { %31 = sbr.rel (!%p29_p6) target bundleno = 21 (0x15), region = 205 }

</bundles_post_ra>
